<compile_context>
chip_gen: v5e
topology: v5e:2x2
jax: 0.10.0
libtpu: 0.0.40
codegen_flags: <defaults>
</compile_context>

<pallas_src>
import jax
import jax.numpy as jnp
from jax import lax
from jax.experimental import pallas as pl
from jax.experimental.pallas import tpu as pltpu

G = 4            # grid_points == groups
P = 16           # point_feat_channels (per-group channels)
C = G * P        # conv_out_channels = 64
K = 4            # deconv kernel size
EPS = 1e-5       # GroupNorm eps

# ConvTranspose2d(k=4, s=2, p=1): output index oy = 2*iy - 1 + ky.
# stage-1 sub-pixel taps:  oy = 2*m + py  reads input row  m + dm  with tap ky
_TAPS1 = (
    ((1, 0), (3, -1)),        # py = 0: (ky, dm)
    ((0, 1), (2, 0)),         # py = 1
)
# stage-2 sub-pixel taps:  OY = 4*m + ry  reads stage-1 phase slab py' at row
# m + dm with tap KY  (entries are (KY, py', dm))
_TAPS2 = (
    ((1, 0, 0), (3, 1, -1)),  # ry = 0
    ((0, 1, 0), (2, 0, 0)),   # ry = 1
    ((1, 1, 0), (3, 0, 0)),   # ry = 2
    ((0, 0, 1), (2, 1, 0)),   # ry = 3
)


# ----------------------------------------------------------------------------
# Pallas kernel: whole branch for one (branch, sample) per grid step
# ----------------------------------------------------------------------------
def _grid_branch_kernel(z_ref, s_ref, w1_ref, w2_ref, aff_ref, b2_ref,
                        o_ref, y1_scr):
    """Fused deconv_1 + GroupNorm + ReLU + deconv_2.

    z_ref   : (C, T)        input activation, spatial flattened on lanes
    s_ref   : (9, T, T)     shift matrices for (dm, dl) in {-1,0,1}^2
    w1_ref  : (K, K, C, C)  deconv_1 weight [ky, kx, c_out, c_in] (block-diag)
    w2_ref  : (K, K, G, C)  deconv_2 weight [ky, kx, g,     c_in] (block-diag)
    aff_ref : (C, 3)        columns = (deconv_1 bias, GN gamma, GN beta)
    b2_ref  : (G, 1)        deconv_2 bias
    o_ref   : (G, 16*T)     heatmap, 16 sub-pixel phases x T (lane-dense)
    y1_scr  : (4, C, T)     stage-1 activation, phase-separated (VMEM scratch)
    """
    t = z_ref.shape[1]
    x = z_ref[...]
    b1 = aff_ref[:, 0:1]
    gamma = aff_ref[:, 1:2]
    beta = aff_ref[:, 2:3]

    def shifted(v, dm, dl):
        # (v @ S)[:, m*W+l] = v[:, (m+dm)*W + (l+dl)]  (0 outside the border)
        if dm == 0 and dl == 0:
            return v
        return jnp.dot(v, s_ref[(dm + 1) * 3 + (dl + 1)],
                       preferred_element_type=jnp.float32)

    # ---- stage 1: deconv_1 via 4 sub-pixel output phases --------------------
    y1_pre = []
    for py in range(2):
        for px in range(2):
            acc = None
            for ky, dm in _TAPS1[py]:
                for kx, dl in _TAPS1[px]:
                    term = jnp.dot(w1_ref[ky, kx], shifted(x, dm, dl),
                                   preferred_element_type=jnp.float32)
                    acc = term if acc is None else acc + term
            y1_pre.append(acc + b1)

    # ---- GroupNorm (num_groups == grid points) + ReLU ------------------------
    # Stats per (sample, group): P channels x all 4*T spatial positions (the
    # four phase slabs tile the 2h x 2w plane exactly once).
    npix = 4.0 * P * t
    scale_cols, shift_cols = [], []
    for g in range(G):
        c0, c1 = g * P, (g + 1) * P
        tot = None
        for v in y1_pre:
            s = jnp.sum(v[c0:c1, :])
            tot = s if tot is None else tot + s
        mu = tot / npix
        var = None
        for v in y1_pre:
            s = jnp.sum(jnp.square(v[c0:c1, :] - mu))
            var = s if var is None else var + s
        inv = lax.rsqrt(var / npix + EPS)
        sc = inv * gamma[c0:c1, :]               # (P, 1)
        sh = beta[c0:c1, :] - mu * sc            # (P, 1)
        scale_cols.append(sc)
        shift_cols.append(sh)
    scale = jnp.concatenate(scale_cols, axis=0)  # (C, 1)
    shift = jnp.concatenate(shift_cols, axis=0)  # (C, 1)
    for ph in range(4):
        y1_scr[ph] = jnp.maximum(y1_pre[ph] * scale + shift, 0.0)

    # ---- stage 2: deconv_2 via 16 final sub-pixel phases ---------------------
    b2 = b2_ref[...]
    for ry in range(4):
        for rx in range(4):
            acc = None
            for ky, pyp, dm in _TAPS2[ry]:
                for kx, pxp, dl in _TAPS2[rx]:
                    u = jnp.dot(w2_ref[ky, kx], y1_scr[pyp * 2 + pxp],
                                preferred_element_type=jnp.float32)
                    u = shifted(u, dm, dl)
                    acc = u if acc is None else acc + u
            c0 = (ry * 4 + rx) * t
            o_ref[:, c0:c0 + t] = acc + b2


# ----------------------------------------------------------------------------
# Wrapper-side constant packing (tiny, traced/constant-folded under jit)
# ----------------------------------------------------------------------------
def _shift_matrices(h, w):
    """S[k] is (T, T), k = (dm+1)*3 + (dl+1); right-multiplying by S[k] shifts
    the flattened (h, w) spatial axis by (dm, dl) with zero fill at borders."""
    t = h * w
    mm, ll = jnp.meshgrid(jnp.arange(h), jnp.arange(w), indexing="ij")
    u = jnp.arange(t)[:, None]
    mats = []
    for dm in (-1, 0, 1):
        for dl in (-1, 0, 1):
            sm = mm + dm
            sl = ll + dl
            valid = (sm >= 0) & (sm < h) & (sl >= 0) & (sl < w)
            src = (sm * w + sl).reshape(-1)
            mat = (u == src[None, :]) & valid.reshape(-1)[None, :]
            mats.append(mat.astype(jnp.float32))
    return jnp.stack(mats)                          # (9, T, T)


def _repack_w1(w1):
    # PyTorch ConvTranspose2d weight (C_in, C_out//G, K, K), grouped.
    # -> (K, K, C_out, C_in) block-diagonal over groups (no spatial flip: the
    #    sub-pixel decomposition uses the native transposed-conv tap indices).
    full = jnp.zeros((K, K, C, C), jnp.float32)
    for g in range(G):
        blk = w1[g * P:(g + 1) * P]                 # (ci_local, co_local, K, K)
        blk = jnp.transpose(blk, (2, 3, 1, 0))      # (K, K, co_local, ci_local)
        full = full.at[:, :, g * P:(g + 1) * P, g * P:(g + 1) * P].set(blk)
    return full


def _repack_w2(w2):
    # PyTorch ConvTranspose2d weight (C_in, 1, K, K), grouped -> (K, K, G, C_in)
    full = jnp.zeros((K, K, G, C), jnp.float32)
    for g in range(G):
        blk = w2[g * P:(g + 1) * P, 0]              # (ci_local, K, K)
        blk = jnp.transpose(blk, (1, 2, 0))         # (K, K, ci_local)
        full = full.at[:, :, g, g * P:(g + 1) * P].set(blk)
    return full


def pallas_grid_branch(z, params):
    """branch(z) = deconv_2(relu(GroupNorm(deconv_1(z)))) for stacked samples."""
    nb, c, h, w = z.shape
    assert c == C
    t = h * w

    zf = z.reshape(nb, C, t)
    smat = _shift_matrices(h, w)
    w1t = _repack_w1(params["W1"])
    w2t = _repack_w2(params["W2"])
    aff = jnp.stack([params["b1"], params["gamma"], params["beta"]], axis=1)
    b2c = params["b2"].reshape(G, 1)

    out = pl.pallas_call(
        _grid_branch_kernel,
        out_shape=jax.ShapeDtypeStruct((nb, G, 16 * t), jnp.float32),
        grid=(nb,),
        in_specs=[
            pl.BlockSpec((None, C, t), lambda i: (i, 0, 0)),      # activation
            pl.BlockSpec((9, t, t), lambda i: (0, 0, 0)),         # shift mats
            pl.BlockSpec((K, K, C, C), lambda i: (0, 0, 0, 0)),   # deconv_1 W
            pl.BlockSpec((K, K, G, C), lambda i: (0, 0, 0, 0)),   # deconv_2 W
            pl.BlockSpec((C, 3), lambda i: (0, 0)),               # b1/gamma/beta
            pl.BlockSpec((G, 1), lambda i: (0, 0)),               # b2
        ],
        out_specs=pl.BlockSpec((None, G, 16 * t), lambda i: (i, 0, 0)),
        scratch_shapes=[pltpu.VMEM((4, C, t), jnp.float32)],
        compiler_params=pltpu.CompilerParams(
            dimension_semantics=("parallel",)),
    )(zf, smat, w1t, w2t, aff, b2c)

    # (nb, G, ry, rx, m, l)  ->  NCHW with OY = 4*m + ry, OX = 4*l + rx
    out = out.reshape(nb, G, 4, 4, h, w)
    out = jnp.transpose(out, (0, 1, 4, 2, 5, 3)).reshape(nb, G, 4 * h, 4 * w)
    return out


@jax.jit
def grid_output_forward(x, x_so, params):
    """Grid_output.forward with OFFSET_ON=True, FUSED_ON/SE_ON/IOU_HELPER=False."""
    n = x.shape[0]
    # Both branches use identical weights -> stack them on the batch axis so a
    # single pallas_call (one weight DMA, 2N parallel grid steps) covers both.
    z = jnp.concatenate([x + x_so, x], axis=0)
    heat = pallas_grid_branch(z, params)
    iou_logits = None  # TODO(synk): IOU_HELPER fc head disabled in this config.
    return dict(fused=heat[:n], unfused=heat[n:]), iou_logits


# ----------------------------------------------------------------------------
# Pure-JAX reference (mirrors the PyTorch ops) for validation
# ----------------------------------------------------------------------------
def _ref_conv_transpose(x, w_torch, bias, groups):
    cin = w_torch.shape[0]
    coutpg = w_torch.shape[1]
    cout = coutpg * groups
    rhs = w_torch.reshape(groups, cin // groups, coutpg, K, K)
    rhs = jnp.transpose(rhs, (0, 2, 1, 3, 4)).reshape(cout, cin // groups, K, K)
    rhs = rhs[:, :, ::-1, ::-1]
    out = lax.conv_general_dilated(
        x, rhs, window_strides=(1, 1), padding=((2, 2), (2, 2)),
        lhs_dilation=(2, 2), rhs_dilation=(1, 1),
        dimension_numbers=("NCHW", "OIHW", "NCHW"),
        feature_group_count=groups,
        precision=lax.Precision.HIGHEST)
    return out + bias.reshape(1, -1, 1, 1)


def _ref_groupnorm_relu(y, gamma, beta):
    n, c, h, w = y.shape
    yg = y.reshape(n, G, c // G, h, w)
    mean = yg.mean(axis=(2, 3, 4), keepdims=True)
    var = ((yg - mean) ** 2).mean(axis=(2, 3, 4), keepdims=True)
    yn = ((yg - mean) / jnp.sqrt(var + EPS)).reshape(n, c, h, w)
    yn = yn * gamma.reshape(1, -1, 1, 1) + beta.reshape(1, -1, 1, 1)
    return jnp.maximum(yn, 0.0)


def _ref_branch(z, params):
    y1 = _ref_conv_transpose(z, params["W1"], params["b1"], G)
    y1 = _ref_groupnorm_relu(y1, params["gamma"], params["beta"])
    return _ref_conv_transpose(y1, params["W2"], params["b2"], G)


# ----------------------------------------------------------------------------
if __name__ == "__main__":
    N, H, W = 2, 8, 8
    key = jax.random.PRNGKey(0)
    keys = jax.random.split(key, 8)

    x = jax.random.normal(keys[0], (N, C, H, W), jnp.float32)
    x_so = jax.random.normal(keys[1], (N, C, H, W), jnp.float32)

    # Deterministic parameter init (shapes follow the PyTorch module).
    params = dict(
        W1=0.05 * jax.random.normal(keys[2], (C, P, K, K), jnp.float32),  # deconv_1
        b1=0.05 * jax.random.normal(keys[3], (C,), jnp.float32),
        W2=0.05 * jax.random.normal(keys[4], (C, 1, K, K), jnp.float32),  # deconv_2
        b2=0.05 * jax.random.normal(keys[5], (G,), jnp.float32),
        gamma=1.0 + 0.1 * jax.random.normal(keys[6], (C,), jnp.float32),  # norm1
        beta=0.1 * jax.random.normal(keys[7], (C,), jnp.float32),
    )

    heatmaps, iou_logits = grid_output_forward(x, x_so, params)
    heatmap = jax.block_until_ready(heatmaps["fused"])
    heatmap_unfused = jax.block_until_ready(heatmaps["unfused"])

    assert heatmap.shape == (N, G, 4 * H, 4 * W)
    assert heatmap_unfused.shape == (N, G, 4 * H, 4 * W)
    assert iou_logits is None

    # Tight tolerance (review request): both sides are f32-accurate, so any
    # weight-repacking / tap-ordering bug would blow far past this.
    ref_fused = _ref_branch(x + x_so, params)
    ref_unfused = _ref_branch(x, params)
    assert jnp.allclose(heatmap, ref_fused, atol=2e-4, rtol=2e-4), \
        float(jnp.max(jnp.abs(heatmap - ref_fused)))
    assert jnp.allclose(heatmap_unfused, ref_unfused, atol=2e-4, rtol=2e-4), \
        float(jnp.max(jnp.abs(heatmap_unfused - ref_unfused)))

    print("KERNEL_OK")
</pallas_src>

<mosaic_0001>
module attributes {stable_mosaic.version = 11 : i64} {
  func.func @_grid_branch_kernel(%arg0: i32, %arg1: memref<1x64x64xf32, #tpu.memory_space<vmem>>, %arg2: memref<9x64x64xf32, #tpu.memory_space<vmem>>, %arg3: memref<4x4x64x64xf32, #tpu.memory_space<vmem>>, %arg4: memref<4x4x4x64xf32, #tpu.memory_space<vmem>>, %arg5: memref<64x3xf32, #tpu.memory_space<vmem>>, %arg6: memref<4x1xf32, #tpu.memory_space<vmem>>, %arg7: memref<1x4x1024xf32, #tpu.memory_space<vmem>>, %arg8: memref<4x64x64xf32, #tpu.memory_space<vmem>>) attributes {dimension_semantics = [#tpu.dimension_semantics<parallel>], iteration_bounds = array<i64: 4>, scalar_prefetch = 0 : i64, scratch_operands = 1 : i64, tpu.core_type = #tpu.core_type<tc>, window_params = [{transform_indices = @transform_0, window_bounds = array<i64: 1, 64, 64>}, {pipeline_mode = #tpu.pipeline_mode<synchronous>, transform_indices = @transform_1, window_bounds = array<i64: 9, 64, 64>}, {pipeline_mode = #tpu.pipeline_mode<synchronous>, transform_indices = @transform_2, window_bounds = array<i64: 4, 4, 64, 64>}, {pipeline_mode = #tpu.pipeline_mode<synchronous>, transform_indices = @transform_3, window_bounds = array<i64: 4, 4, 4, 64>}, {pipeline_mode = #tpu.pipeline_mode<synchronous>, transform_indices = @transform_4, window_bounds = array<i64: 64, 3>}, {pipeline_mode = #tpu.pipeline_mode<synchronous>, transform_indices = @transform_5, window_bounds = array<i64: 4, 1>}, {transform_indices = @transform_6, window_bounds = array<i64: 1, 4, 1024>}]} {
    %c0 = arith.constant 0 : index
    %c0_0 = arith.constant 0 : index
    %c0_1 = arith.constant 0 : index
    %0 = vector.load %arg1[%c0, %c0_0, %c0_1] : memref<1x64x64xf32, #tpu.memory_space<vmem>>, vector<1x64x64xf32>
    %1 = vector.shape_cast %0 : vector<1x64x64xf32> to vector<64x64xf32>
    %c0_2 = arith.constant 0 : index
    %c0_3 = arith.constant 0 : index
    %2 = vector.load %arg5[%c0_2, %c0_3] : memref<64x3xf32, #tpu.memory_space<vmem>>, vector<64x1xf32>
    %c0_4 = arith.constant 0 : index
    %c1 = arith.constant 1 : index
    %3 = vector.load %arg5[%c0_4, %c1] : memref<64x3xf32, #tpu.memory_space<vmem>>, vector<64x1xf32>
    %c0_5 = arith.constant 0 : index
    %c2 = arith.constant 2 : index
    %4 = vector.load %arg5[%c0_5, %c2] : memref<64x3xf32, #tpu.memory_space<vmem>>, vector<64x1xf32>
    %c1_6 = arith.constant 1 : index
    %c1_7 = arith.constant 1 : index
    %c0_8 = arith.constant 0 : index
    %c0_9 = arith.constant 0 : index
    %5 = vector.load %arg3[%c1_6, %c1_7, %c0_8, %c0_9] : memref<4x4x64x64xf32, #tpu.memory_space<vmem>>, vector<1x1x64x64xf32>
    %6 = vector.shape_cast %5 : vector<1x1x64x64xf32> to vector<64x64xf32>
    %cst = arith.constant dense<0.000000e+00> : vector<64x64xf32>
    %7 = tpu.matmul %6, %1, %cst {dimension_numbers = #tpu.dot_dimension_numbers<[1], [0], [0], [1], [0, 0, 1, 1], [], []>} : vector<64x64xf32>, vector<64x64xf32>, vector<64x64xf32> -> vector<64x64xf32>
    %c1_10 = arith.constant 1 : index
    %c3 = arith.constant 3 : index
    %c0_11 = arith.constant 0 : index
    %c0_12 = arith.constant 0 : index
    %8 = vector.load %arg3[%c1_10, %c3, %c0_11, %c0_12] : memref<4x4x64x64xf32, #tpu.memory_space<vmem>>, vector<1x1x64x64xf32>
    %9 = vector.shape_cast %8 : vector<1x1x64x64xf32> to vector<64x64xf32>
    %c3_13 = arith.constant 3 : index
    %c0_14 = arith.constant 0 : index
    %c0_15 = arith.constant 0 : index
    %10 = vector.load %arg2[%c3_13, %c0_14, %c0_15] : memref<9x64x64xf32, #tpu.memory_space<vmem>>, vector<1x64x64xf32>
    %11 = vector.shape_cast %10 : vector<1x64x64xf32> to vector<64x64xf32>
    %cst_16 = arith.constant dense<0.000000e+00> : vector<64x64xf32>
    %12 = tpu.matmul %1, %11, %cst_16 {dimension_numbers = #tpu.dot_dimension_numbers<[1], [0], [0], [1], [0, 0, 1, 1], [], []>} : vector<64x64xf32>, vector<64x64xf32>, vector<64x64xf32> -> vector<64x64xf32>
    %cst_17 = arith.constant dense<0.000000e+00> : vector<64x64xf32>
    %13 = tpu.matmul %9, %12, %cst_17 {dimension_numbers = #tpu.dot_dimension_numbers<[1], [0], [0], [1], [0, 0, 1, 1], [], []>} : vector<64x64xf32>, vector<64x64xf32>, vector<64x64xf32> -> vector<64x64xf32>
    %14 = arith.addf %7, %13 : vector<64x64xf32>
    %c3_18 = arith.constant 3 : index
    %c1_19 = arith.constant 1 : index
    %c0_20 = arith.constant 0 : index
    %c0_21 = arith.constant 0 : index
    %15 = vector.load %arg3[%c3_18, %c1_19, %c0_20, %c0_21] : memref<4x4x64x64xf32, #tpu.memory_space<vmem>>, vector<1x1x64x64xf32>
    %16 = vector.shape_cast %15 : vector<1x1x64x64xf32> to vector<64x64xf32>
    %c1_22 = arith.constant 1 : index
    %c0_23 = arith.constant 0 : index
    %c0_24 = arith.constant 0 : index
    %17 = vector.load %arg2[%c1_22, %c0_23, %c0_24] : memref<9x64x64xf32, #tpu.memory_space<vmem>>, vector<1x64x64xf32>
    %18 = vector.shape_cast %17 : vector<1x64x64xf32> to vector<64x64xf32>
    %cst_25 = arith.constant dense<0.000000e+00> : vector<64x64xf32>
    %19 = tpu.matmul %1, %18, %cst_25 {dimension_numbers = #tpu.dot_dimension_numbers<[1], [0], [0], [1], [0, 0, 1, 1], [], []>} : vector<64x64xf32>, vector<64x64xf32>, vector<64x64xf32> -> vector<64x64xf32>
    %cst_26 = arith.constant dense<0.000000e+00> : vector<64x64xf32>
    %20 = tpu.matmul %16, %19, %cst_26 {dimension_numbers = #tpu.dot_dimension_numbers<[1], [0], [0], [1], [0, 0, 1, 1], [], []>} : vector<64x64xf32>, vector<64x64xf32>, vector<64x64xf32> -> vector<64x64xf32>
    %21 = arith.addf %14, %20 : vector<64x64xf32>
    %c3_27 = arith.constant 3 : index
    %c3_28 = arith.constant 3 : index
    %c0_29 = arith.constant 0 : index
    %c0_30 = arith.constant 0 : index
    %22 = vector.load %arg3[%c3_27, %c3_28, %c0_29, %c0_30] : memref<4x4x64x64xf32, #tpu.memory_space<vmem>>, vector<1x1x64x64xf32>
    %23 = vector.shape_cast %22 : vector<1x1x64x64xf32> to vector<64x64xf32>
    %c0_31 = arith.constant 0 : index
    %c0_32 = arith.constant 0 : index
    %c0_33 = arith.constant 0 : index
    %24 = vector.load %arg2[%c0_31, %c0_32, %c0_33] : memref<9x64x64xf32, #tpu.memory_space<vmem>>, vector<1x64x64xf32>
    %25 = vector.shape_cast %24 : vector<1x64x64xf32> to vector<64x64xf32>
    %cst_34 = arith.constant dense<0.000000e+00> : vector<64x64xf32>
    %26 = tpu.matmul %1, %25, %cst_34 {dimension_numbers = #tpu.dot_dimension_numbers<[1], [0], [0], [1], [0, 0, 1, 1], [], []>} : vector<64x64xf32>, vector<64x64xf32>, vector<64x64xf32> -> vector<64x64xf32>
    %cst_35 = arith.constant dense<0.000000e+00> : vector<64x64xf32>
    %27 = tpu.matmul %23, %26, %cst_35 {dimension_numbers = #tpu.dot_dimension_numbers<[1], [0], [0], [1], [0, 0, 1, 1], [], []>} : vector<64x64xf32>, vector<64x64xf32>, vector<64x64xf32> -> vector<64x64xf32>
    %28 = arith.addf %21, %27 : vector<64x64xf32>
    %29 = vector.broadcast %2 : vector<64x1xf32> to vector<64x64xf32>
    %30 = arith.addf %28, %29 : vector<64x64xf32>
    %c1_36 = arith.constant 1 : index
    %c0_37 = arith.constant 0 : index
    %c0_38 = arith.constant 0 : index
    %c0_39 = arith.constant 0 : index
    %31 = vector.load %arg3[%c1_36, %c0_37, %c0_38, %c0_39] : memref<4x4x64x64xf32, #tpu.memory_space<vmem>>, vector<1x1x64x64xf32>
    %32 = vector.shape_cast %31 : vector<1x1x64x64xf32> to vector<64x64xf32>
    %c5 = arith.constant 5 : index
    %c0_40 = arith.constant 0 : index
    %c0_41 = arith.constant 0 : index
    %33 = vector.load %arg2[%c5, %c0_40, %c0_41] : memref<9x64x64xf32, #tpu.memory_space<vmem>>, vector<1x64x64xf32>
    %34 = vector.shape_cast %33 : vector<1x64x64xf32> to vector<64x64xf32>
    %cst_42 = arith.constant dense<0.000000e+00> : vector<64x64xf32>
    %35 = tpu.matmul %1, %34, %cst_42 {dimension_numbers = #tpu.dot_dimension_numbers<[1], [0], [0], [1], [0, 0, 1, 1], [], []>} : vector<64x64xf32>, vector<64x64xf32>, vector<64x64xf32> -> vector<64x64xf32>
    %cst_43 = arith.constant dense<0.000000e+00> : vector<64x64xf32>
    %36 = tpu.matmul %32, %35, %cst_43 {dimension_numbers = #tpu.dot_dimension_numbers<[1], [0], [0], [1], [0, 0, 1, 1], [], []>} : vector<64x64xf32>, vector<64x64xf32>, vector<64x64xf32> -> vector<64x64xf32>
    %c1_44 = arith.constant 1 : index
    %c2_45 = arith.constant 2 : index
    %c0_46 = arith.constant 0 : index
    %c0_47 = arith.constant 0 : index
    %37 = vector.load %arg3[%c1_44, %c2_45, %c0_46, %c0_47] : memref<4x4x64x64xf32, #tpu.memory_space<vmem>>, vector<1x1x64x64xf32>
    %38 = vector.shape_cast %37 : vector<1x1x64x64xf32> to vector<64x64xf32>
    %cst_48 = arith.constant dense<0.000000e+00> : vector<64x64xf32>
    %39 = tpu.matmul %38, %1, %cst_48 {dimension_numbers = #tpu.dot_dimension_numbers<[1], [0], [0], [1], [0, 0, 1, 1], [], []>} : vector<64x64xf32>, vector<64x64xf32>, vector<64x64xf32> -> vector<64x64xf32>
    %40 = arith.addf %36, %39 : vector<64x64xf32>
    %c3_49 = arith.constant 3 : index
    %c0_50 = arith.constant 0 : index
    %c0_51 = arith.constant 0 : index
    %c0_52 = arith.constant 0 : index
    %41 = vector.load %arg3[%c3_49, %c0_50, %c0_51, %c0_52] : memref<4x4x64x64xf32, #tpu.memory_space<vmem>>, vector<1x1x64x64xf32>
    %42 = vector.shape_cast %41 : vector<1x1x64x64xf32> to vector<64x64xf32>
    %c2_53 = arith.constant 2 : index
    %c0_54 = arith.constant 0 : index
    %c0_55 = arith.constant 0 : index
    %43 = vector.load %arg2[%c2_53, %c0_54, %c0_55] : memref<9x64x64xf32, #tpu.memory_space<vmem>>, vector<1x64x64xf32>
    %44 = vector.shape_cast %43 : vector<1x64x64xf32> to vector<64x64xf32>
    %cst_56 = arith.constant dense<0.000000e+00> : vector<64x64xf32>
    %45 = tpu.matmul %1, %44, %cst_56 {dimension_numbers = #tpu.dot_dimension_numbers<[1], [0], [0], [1], [0, 0, 1, 1], [], []>} : vector<64x64xf32>, vector<64x64xf32>, vector<64x64xf32> -> vector<64x64xf32>
    %cst_57 = arith.constant dense<0.000000e+00> : vector<64x64xf32>
    %46 = tpu.matmul %42, %45, %cst_57 {dimension_numbers = #tpu.dot_dimension_numbers<[1], [0], [0], [1], [0, 0, 1, 1], [], []>} : vector<64x64xf32>, vector<64x64xf32>, vector<64x64xf32> -> vector<64x64xf32>
    %47 = arith.addf %40, %46 : vector<64x64xf32>
    %c3_58 = arith.constant 3 : index
    %c2_59 = arith.constant 2 : index
    %c0_60 = arith.constant 0 : index
    %c0_61 = arith.constant 0 : index
    %48 = vector.load %arg3[%c3_58, %c2_59, %c0_60, %c0_61] : memref<4x4x64x64xf32, #tpu.memory_space<vmem>>, vector<1x1x64x64xf32>
    %49 = vector.shape_cast %48 : vector<1x1x64x64xf32> to vector<64x64xf32>
    %c1_62 = arith.constant 1 : index
    %c0_63 = arith.constant 0 : index
    %c0_64 = arith.constant 0 : index
    %50 = vector.load %arg2[%c1_62, %c0_63, %c0_64] : memref<9x64x64xf32, #tpu.memory_space<vmem>>, vector<1x64x64xf32>
    %51 = vector.shape_cast %50 : vector<1x64x64xf32> to vector<64x64xf32>
    %cst_65 = arith.constant dense<0.000000e+00> : vector<64x64xf32>
    %52 = tpu.matmul %1, %51, %cst_65 {dimension_numbers = #tpu.dot_dimension_numbers<[1], [0], [0], [1], [0, 0, 1, 1], [], []>} : vector<64x64xf32>, vector<64x64xf32>, vector<64x64xf32> -> vector<64x64xf32>
    %cst_66 = arith.constant dense<0.000000e+00> : vector<64x64xf32>
    %53 = tpu.matmul %49, %52, %cst_66 {dimension_numbers = #tpu.dot_dimension_numbers<[1], [0], [0], [1], [0, 0, 1, 1], [], []>} : vector<64x64xf32>, vector<64x64xf32>, vector<64x64xf32> -> vector<64x64xf32>
    %54 = arith.addf %47, %53 : vector<64x64xf32>
    %55 = vector.broadcast %2 : vector<64x1xf32> to vector<64x64xf32>
    %56 = arith.addf %54, %55 : vector<64x64xf32>
    %c0_67 = arith.constant 0 : index
    %c1_68 = arith.constant 1 : index
    %c0_69 = arith.constant 0 : index
    %c0_70 = arith.constant 0 : index
    %57 = vector.load %arg3[%c0_67, %c1_68, %c0_69, %c0_70] : memref<4x4x64x64xf32, #tpu.memory_space<vmem>>, vector<1x1x64x64xf32>
    %58 = vector.shape_cast %57 : vector<1x1x64x64xf32> to vector<64x64xf32>
    %c7 = arith.constant 7 : index
    %c0_71 = arith.constant 0 : index
    %c0_72 = arith.constant 0 : index
    %59 = vector.load %arg2[%c7, %c0_71, %c0_72] : memref<9x64x64xf32, #tpu.memory_space<vmem>>, vector<1x64x64xf32>
    %60 = vector.shape_cast %59 : vector<1x64x64xf32> to vector<64x64xf32>
    %cst_73 = arith.constant dense<0.000000e+00> : vector<64x64xf32>
    %61 = tpu.matmul %1, %60, %cst_73 {dimension_numbers = #tpu.dot_dimension_numbers<[1], [0], [0], [1], [0, 0, 1, 1], [], []>} : vector<64x64xf32>, vector<64x64xf32>, vector<64x64xf32> -> vector<64x64xf32>
    %cst_74 = arith.constant dense<0.000000e+00> : vector<64x64xf32>
    %62 = tpu.matmul %58, %61, %cst_74 {dimension_numbers = #tpu.dot_dimension_numbers<[1], [0], [0], [1], [0, 0, 1, 1], [], []>} : vector<64x64xf32>, vector<64x64xf32>, vector<64x64xf32> -> vector<64x64xf32>
    %c0_75 = arith.constant 0 : index
    %c3_76 = arith.constant 3 : index
    %c0_77 = arith.constant 0 : index
    %c0_78 = arith.constant 0 : index
    %63 = vector.load %arg3[%c0_75, %c3_76, %c0_77, %c0_78] : memref<4x4x64x64xf32, #tpu.memory_space<vmem>>, vector<1x1x64x64xf32>
    %64 = vector.shape_cast %63 : vector<1x1x64x64xf32> to vector<64x64xf32>
    %c6 = arith.constant 6 : index
    %c0_79 = arith.constant 0 : index
    %c0_80 = arith.constant 0 : index
    %65 = vector.load %arg2[%c6, %c0_79, %c0_80] : memref<9x64x64xf32, #tpu.memory_space<vmem>>, vector<1x64x64xf32>
    %66 = vector.shape_cast %65 : vector<1x64x64xf32> to vector<64x64xf32>
    %cst_81 = arith.constant dense<0.000000e+00> : vector<64x64xf32>
    %67 = tpu.matmul %1, %66, %cst_81 {dimension_numbers = #tpu.dot_dimension_numbers<[1], [0], [0], [1], [0, 0, 1, 1], [], []>} : vector<64x64xf32>, vector<64x64xf32>, vector<64x64xf32> -> vector<64x64xf32>
    %cst_82 = arith.constant dense<0.000000e+00> : vector<64x64xf32>
    %68 = tpu.matmul %64, %67, %cst_82 {dimension_numbers = #tpu.dot_dimension_numbers<[1], [0], [0], [1], [0, 0, 1, 1], [], []>} : vector<64x64xf32>, vector<64x64xf32>, vector<64x64xf32> -> vector<64x64xf32>
    %69 = arith.addf %62, %68 : vector<64x64xf32>
    %c2_83 = arith.constant 2 : index
    %c1_84 = arith.constant 1 : index
    %c0_85 = arith.constant 0 : index
    %c0_86 = arith.constant 0 : index
    %70 = vector.load %arg3[%c2_83, %c1_84, %c0_85, %c0_86] : memref<4x4x64x64xf32, #tpu.memory_space<vmem>>, vector<1x1x64x64xf32>
    %71 = vector.shape_cast %70 : vector<1x1x64x64xf32> to vector<64x64xf32>
    %cst_87 = arith.constant dense<0.000000e+00> : vector<64x64xf32>
    %72 = tpu.matmul %71, %1, %cst_87 {dimension_numbers = #tpu.dot_dimension_numbers<[1], [0], [0], [1], [0, 0, 1, 1], [], []>} : vector<64x64xf32>, vector<64x64xf32>, vector<64x64xf32> -> vector<64x64xf32>
    %73 = arith.addf %69, %72 : vector<64x64xf32>
    %c2_88 = arith.constant 2 : index
    %c3_89 = arith.constant 3 : index
    %c0_90 = arith.constant 0 : index
    %c0_91 = arith.constant 0 : index
    %74 = vector.load %arg3[%c2_88, %c3_89, %c0_90, %c0_91] : memref<4x4x64x64xf32, #tpu.memory_space<vmem>>, vector<1x1x64x64xf32>
    %75 = vector.shape_cast %74 : vector<1x1x64x64xf32> to vector<64x64xf32>
    %c3_92 = arith.constant 3 : index
    %c0_93 = arith.constant 0 : index
    %c0_94 = arith.constant 0 : index
    %76 = vector.load %arg2[%c3_92, %c0_93, %c0_94] : memref<9x64x64xf32, #tpu.memory_space<vmem>>, vector<1x64x64xf32>
    %77 = vector.shape_cast %76 : vector<1x64x64xf32> to vector<64x64xf32>
    %cst_95 = arith.constant dense<0.000000e+00> : vector<64x64xf32>
    %78 = tpu.matmul %1, %77, %cst_95 {dimension_numbers = #tpu.dot_dimension_numbers<[1], [0], [0], [1], [0, 0, 1, 1], [], []>} : vector<64x64xf32>, vector<64x64xf32>, vector<64x64xf32> -> vector<64x64xf32>
    %cst_96 = arith.constant dense<0.000000e+00> : vector<64x64xf32>
    %79 = tpu.matmul %75, %78, %cst_96 {dimension_numbers = #tpu.dot_dimension_numbers<[1], [0], [0], [1], [0, 0, 1, 1], [], []>} : vector<64x64xf32>, vector<64x64xf32>, vector<64x64xf32> -> vector<64x64xf32>
    %80 = arith.addf %73, %79 : vector<64x64xf32>
    %81 = vector.broadcast %2 : vector<64x1xf32> to vector<64x64xf32>
    %82 = arith.addf %80, %81 : vector<64x64xf32>
    %c0_97 = arith.constant 0 : index
    %c0_98 = arith.constant 0 : index
    %c0_99 = arith.constant 0 : index
    %c0_100 = arith.constant 0 : index
    %83 = vector.load %arg3[%c0_97, %c0_98, %c0_99, %c0_100] : memref<4x4x64x64xf32, #tpu.memory_space<vmem>>, vector<1x1x64x64xf32>
    %84 = vector.shape_cast %83 : vector<1x1x64x64xf32> to vector<64x64xf32>
    %c8 = arith.constant 8 : index
    %c0_101 = arith.constant 0 : index
    %c0_102 = arith.constant 0 : index
    %85 = vector.load %arg2[%c8, %c0_101, %c0_102] : memref<9x64x64xf32, #tpu.memory_space<vmem>>, vector<1x64x64xf32>
    %86 = vector.shape_cast %85 : vector<1x64x64xf32> to vector<64x64xf32>
    %cst_103 = arith.constant dense<0.000000e+00> : vector<64x64xf32>
    %87 = tpu.matmul %1, %86, %cst_103 {dimension_numbers = #tpu.dot_dimension_numbers<[1], [0], [0], [1], [0, 0, 1, 1], [], []>} : vector<64x64xf32>, vector<64x64xf32>, vector<64x64xf32> -> vector<64x64xf32>
    %cst_104 = arith.constant dense<0.000000e+00> : vector<64x64xf32>
    %88 = tpu.matmul %84, %87, %cst_104 {dimension_numbers = #tpu.dot_dimension_numbers<[1], [0], [0], [1], [0, 0, 1, 1], [], []>} : vector<64x64xf32>, vector<64x64xf32>, vector<64x64xf32> -> vector<64x64xf32>
    %c0_105 = arith.constant 0 : index
    %c2_106 = arith.constant 2 : index
    %c0_107 = arith.constant 0 : index
    %c0_108 = arith.constant 0 : index
    %89 = vector.load %arg3[%c0_105, %c2_106, %c0_107, %c0_108] : memref<4x4x64x64xf32, #tpu.memory_space<vmem>>, vector<1x1x64x64xf32>
    %90 = vector.shape_cast %89 : vector<1x1x64x64xf32> to vector<64x64xf32>
    %c7_109 = arith.constant 7 : index
    %c0_110 = arith.constant 0 : index
    %c0_111 = arith.constant 0 : index
    %91 = vector.load %arg2[%c7_109, %c0_110, %c0_111] : memref<9x64x64xf32, #tpu.memory_space<vmem>>, vector<1x64x64xf32>
    %92 = vector.shape_cast %91 : vector<1x64x64xf32> to vector<64x64xf32>
    %cst_112 = arith.constant dense<0.000000e+00> : vector<64x64xf32>
    %93 = tpu.matmul %1, %92, %cst_112 {dimension_numbers = #tpu.dot_dimension_numbers<[1], [0], [0], [1], [0, 0, 1, 1], [], []>} : vector<64x64xf32>, vector<64x64xf32>, vector<64x64xf32> -> vector<64x64xf32>
    %cst_113 = arith.constant dense<0.000000e+00> : vector<64x64xf32>
    %94 = tpu.matmul %90, %93, %cst_113 {dimension_numbers = #tpu.dot_dimension_numbers<[1], [0], [0], [1], [0, 0, 1, 1], [], []>} : vector<64x64xf32>, vector<64x64xf32>, vector<64x64xf32> -> vector<64x64xf32>
    %95 = arith.addf %88, %94 : vector<64x64xf32>
    %c2_114 = arith.constant 2 : index
    %c0_115 = arith.constant 0 : index
    %c0_116 = arith.constant 0 : index
    %c0_117 = arith.constant 0 : index
    %96 = vector.load %arg3[%c2_114, %c0_115, %c0_116, %c0_117] : memref<4x4x64x64xf32, #tpu.memory_space<vmem>>, vector<1x1x64x64xf32>
    %97 = vector.shape_cast %96 : vector<1x1x64x64xf32> to vector<64x64xf32>
    %c5_118 = arith.constant 5 : index
    %c0_119 = arith.constant 0 : index
    %c0_120 = arith.constant 0 : index
    %98 = vector.load %arg2[%c5_118, %c0_119, %c0_120] : memref<9x64x64xf32, #tpu.memory_space<vmem>>, vector<1x64x64xf32>
    %99 = vector.shape_cast %98 : vector<1x64x64xf32> to vector<64x64xf32>
    %cst_121 = arith.constant dense<0.000000e+00> : vector<64x64xf32>
    %100 = tpu.matmul %1, %99, %cst_121 {dimension_numbers = #tpu.dot_dimension_numbers<[1], [0], [0], [1], [0, 0, 1, 1], [], []>} : vector<64x64xf32>, vector<64x64xf32>, vector<64x64xf32> -> vector<64x64xf32>
    %cst_122 = arith.constant dense<0.000000e+00> : vector<64x64xf32>
    %101 = tpu.matmul %97, %100, %cst_122 {dimension_numbers = #tpu.dot_dimension_numbers<[1], [0], [0], [1], [0, 0, 1, 1], [], []>} : vector<64x64xf32>, vector<64x64xf32>, vector<64x64xf32> -> vector<64x64xf32>
    %102 = arith.addf %95, %101 : vector<64x64xf32>
    %c2_123 = arith.constant 2 : index
    %c2_124 = arith.constant 2 : index
    %c0_125 = arith.constant 0 : index
    %c0_126 = arith.constant 0 : index
    %103 = vector.load %arg3[%c2_123, %c2_124, %c0_125, %c0_126] : memref<4x4x64x64xf32, #tpu.memory_space<vmem>>, vector<1x1x64x64xf32>
    %104 = vector.shape_cast %103 : vector<1x1x64x64xf32> to vector<64x64xf32>
    %cst_127 = arith.constant dense<0.000000e+00> : vector<64x64xf32>
    %105 = tpu.matmul %104, %1, %cst_127 {dimension_numbers = #tpu.dot_dimension_numbers<[1], [0], [0], [1], [0, 0, 1, 1], [], []>} : vector<64x64xf32>, vector<64x64xf32>, vector<64x64xf32> -> vector<64x64xf32>
    %106 = arith.addf %102, %105 : vector<64x64xf32>
    %107 = vector.broadcast %2 : vector<64x1xf32> to vector<64x64xf32>
    %108 = arith.addf %106, %107 : vector<64x64xf32>
    %109 = vector.extract_strided_slice %30 {offsets = [0, 0], sizes = [16, 64], strides = [1, 1]} : vector<64x64xf32> to vector<16x64xf32>
    %110 = vector.shape_cast %109 : vector<16x64xf32> to vector<1x16x64xf32>
    %cst_128 = arith.constant dense<0.000000e+00> : vector<1xf32>
    %111 = vector.multi_reduction <add>, %110, %cst_128 [1, 2] : vector<1x16x64xf32> to vector<1xf32>
    %112 = vector.shape_cast %111 : vector<1xf32> to vector<1x1x1xf32>
    %113 = vector.extract %112[0, 0, 0] : f32 from vector<1x1x1xf32>
    %114 = vector.extract_strided_slice %56 {offsets = [0, 0], sizes = [16, 64], strides = [1, 1]} : vector<64x64xf32> to vector<16x64xf32>
    %115 = vector.shape_cast %114 : vector<16x64xf32> to vector<1x16x64xf32>
    %cst_129 = arith.constant dense<0.000000e+00> : vector<1xf32>
    %116 = vector.multi_reduction <add>, %115, %cst_129 [1, 2] : vector<1x16x64xf32> to vector<1xf32>
    %117 = vector.shape_cast %116 : vector<1xf32> to vector<1x1x1xf32>
    %118 = vector.extract %117[0, 0, 0] : f32 from vector<1x1x1xf32>
    %119 = arith.addf %113, %118 : f32
    %120 = vector.extract_strided_slice %82 {offsets = [0, 0], sizes = [16, 64], strides = [1, 1]} : vector<64x64xf32> to vector<16x64xf32>
    %121 = vector.shape_cast %120 : vector<16x64xf32> to vector<1x16x64xf32>
    %cst_130 = arith.constant dense<0.000000e+00> : vector<1xf32>
    %122 = vector.multi_reduction <add>, %121, %cst_130 [1, 2] : vector<1x16x64xf32> to vector<1xf32>
    %123 = vector.shape_cast %122 : vector<1xf32> to vector<1x1x1xf32>
    %124 = vector.extract %123[0, 0, 0] : f32 from vector<1x1x1xf32>
    %125 = arith.addf %119, %124 : f32
    %126 = vector.extract_strided_slice %108 {offsets = [0, 0], sizes = [16, 64], strides = [1, 1]} : vector<64x64xf32> to vector<16x64xf32>
    %127 = vector.shape_cast %126 : vector<16x64xf32> to vector<1x16x64xf32>
    %cst_131 = arith.constant dense<0.000000e+00> : vector<1xf32>
    %128 = vector.multi_reduction <add>, %127, %cst_131 [1, 2] : vector<1x16x64xf32> to vector<1xf32>
    %129 = vector.shape_cast %128 : vector<1xf32> to vector<1x1x1xf32>
    %130 = vector.extract %129[0, 0, 0] : f32 from vector<1x1x1xf32>
    %131 = arith.addf %125, %130 : f32
    %cst_132 = arith.constant 4.096000e+03 : f32
    %132 = arith.divf %131, %cst_132 : f32
    %133 = vector.extract_strided_slice %30 {offsets = [0, 0], sizes = [16, 64], strides = [1, 1]} : vector<64x64xf32> to vector<16x64xf32>
    %134 = vector.broadcast %132 : f32 to vector<16x64xf32>
    %135 = arith.subf %133, %134 : vector<16x64xf32>
    %136 = arith.mulf %135, %135 : vector<16x64xf32>
    %137 = vector.shape_cast %136 : vector<16x64xf32> to vector<1x16x64xf32>
    %cst_133 = arith.constant dense<0.000000e+00> : vector<1xf32>
    %138 = vector.multi_reduction <add>, %137, %cst_133 [1, 2] : vector<1x16x64xf32> to vector<1xf32>
    %139 = vector.shape_cast %138 : vector<1xf32> to vector<1x1x1xf32>
    %140 = vector.extract %139[0, 0, 0] : f32 from vector<1x1x1xf32>
    %141 = vector.extract_strided_slice %56 {offsets = [0, 0], sizes = [16, 64], strides = [1, 1]} : vector<64x64xf32> to vector<16x64xf32>
    %142 = vector.broadcast %132 : f32 to vector<16x64xf32>
    %143 = arith.subf %141, %142 : vector<16x64xf32>
    %144 = arith.mulf %143, %143 : vector<16x64xf32>
    %145 = vector.shape_cast %144 : vector<16x64xf32> to vector<1x16x64xf32>
    %cst_134 = arith.constant dense<0.000000e+00> : vector<1xf32>
    %146 = vector.multi_reduction <add>, %145, %cst_134 [1, 2] : vector<1x16x64xf32> to vector<1xf32>
    %147 = vector.shape_cast %146 : vector<1xf32> to vector<1x1x1xf32>
    %148 = vector.extract %147[0, 0, 0] : f32 from vector<1x1x1xf32>
    %149 = arith.addf %140, %148 : f32
    %150 = vector.extract_strided_slice %82 {offsets = [0, 0], sizes = [16, 64], strides = [1, 1]} : vector<64x64xf32> to vector<16x64xf32>
    %151 = vector.broadcast %132 : f32 to vector<16x64xf32>
    %152 = arith.subf %150, %151 : vector<16x64xf32>
    %153 = arith.mulf %152, %152 : vector<16x64xf32>
    %154 = vector.shape_cast %153 : vector<16x64xf32> to vector<1x16x64xf32>
    %cst_135 = arith.constant dense<0.000000e+00> : vector<1xf32>
    %155 = vector.multi_reduction <add>, %154, %cst_135 [1, 2] : vector<1x16x64xf32> to vector<1xf32>
    %156 = vector.shape_cast %155 : vector<1xf32> to vector<1x1x1xf32>
    %157 = vector.extract %156[0, 0, 0] : f32 from vector<1x1x1xf32>
    %158 = arith.addf %149, %157 : f32
    %159 = vector.extract_strided_slice %108 {offsets = [0, 0], sizes = [16, 64], strides = [1, 1]} : vector<64x64xf32> to vector<16x64xf32>
    %160 = vector.broadcast %132 : f32 to vector<16x64xf32>
    %161 = arith.subf %159, %160 : vector<16x64xf32>
    %162 = arith.mulf %161, %161 : vector<16x64xf32>
    %163 = vector.shape_cast %162 : vector<16x64xf32> to vector<1x16x64xf32>
    %cst_136 = arith.constant dense<0.000000e+00> : vector<1xf32>
    %164 = vector.multi_reduction <add>, %163, %cst_136 [1, 2] : vector<1x16x64xf32> to vector<1xf32>
    %165 = vector.shape_cast %164 : vector<1xf32> to vector<1x1x1xf32>
    %166 = vector.extract %165[0, 0, 0] : f32 from vector<1x1x1xf32>
    %167 = arith.addf %158, %166 : f32
    %cst_137 = arith.constant 4.096000e+03 : f32
    %168 = arith.divf %167, %cst_137 : f32
    %cst_138 = arith.constant 9.99999974E-6 : f32
    %169 = arith.addf %168, %cst_138 : f32
    %170 = math.rsqrt %169 : f32
    %171 = vector.extract_strided_slice %3 {offsets = [0, 0], sizes = [16, 1], strides = [1, 1]} : vector<64x1xf32> to vector<16x1xf32>
    %172 = vector.broadcast %170 : f32 to vector<16x1xf32>
    %173 = arith.mulf %172, %171 : vector<16x1xf32>
    %174 = vector.extract_strided_slice %4 {offsets = [0, 0], sizes = [16, 1], strides = [1, 1]} : vector<64x1xf32> to vector<16x1xf32>
    %175 = vector.broadcast %132 : f32 to vector<16x1xf32>
    %176 = arith.mulf %175, %173 : vector<16x1xf32>
    %177 = arith.subf %174, %176 : vector<16x1xf32>
    %178 = vector.extract_strided_slice %30 {offsets = [16, 0], sizes = [16, 64], strides = [1, 1]} : vector<64x64xf32> to vector<16x64xf32>
    %179 = vector.shape_cast %178 : vector<16x64xf32> to vector<1x16x64xf32>
    %cst_139 = arith.constant dense<0.000000e+00> : vector<1xf32>
    %180 = vector.multi_reduction <add>, %179, %cst_139 [1, 2] : vector<1x16x64xf32> to vector<1xf32>
    %181 = vector.shape_cast %180 : vector<1xf32> to vector<1x1x1xf32>
    %182 = vector.extract %181[0, 0, 0] : f32 from vector<1x1x1xf32>
    %183 = vector.extract_strided_slice %56 {offsets = [16, 0], sizes = [16, 64], strides = [1, 1]} : vector<64x64xf32> to vector<16x64xf32>
    %184 = vector.shape_cast %183 : vector<16x64xf32> to vector<1x16x64xf32>
    %cst_140 = arith.constant dense<0.000000e+00> : vector<1xf32>
    %185 = vector.multi_reduction <add>, %184, %cst_140 [1, 2] : vector<1x16x64xf32> to vector<1xf32>
    %186 = vector.shape_cast %185 : vector<1xf32> to vector<1x1x1xf32>
    %187 = vector.extract %186[0, 0, 0] : f32 from vector<1x1x1xf32>
    %188 = arith.addf %182, %187 : f32
    %189 = vector.extract_strided_slice %82 {offsets = [16, 0], sizes = [16, 64], strides = [1, 1]} : vector<64x64xf32> to vector<16x64xf32>
    %190 = vector.shape_cast %189 : vector<16x64xf32> to vector<1x16x64xf32>
    %cst_141 = arith.constant dense<0.000000e+00> : vector<1xf32>
    %191 = vector.multi_reduction <add>, %190, %cst_141 [1, 2] : vector<1x16x64xf32> to vector<1xf32>
    %192 = vector.shape_cast %191 : vector<1xf32> to vector<1x1x1xf32>
    %193 = vector.extract %192[0, 0, 0] : f32 from vector<1x1x1xf32>
    %194 = arith.addf %188, %193 : f32
    %195 = vector.extract_strided_slice %108 {offsets = [16, 0], sizes = [16, 64], strides = [1, 1]} : vector<64x64xf32> to vector<16x64xf32>
    %196 = vector.shape_cast %195 : vector<16x64xf32> to vector<1x16x64xf32>
    %cst_142 = arith.constant dense<0.000000e+00> : vector<1xf32>
    %197 = vector.multi_reduction <add>, %196, %cst_142 [1, 2] : vector<1x16x64xf32> to vector<1xf32>
    %198 = vector.shape_cast %197 : vector<1xf32> to vector<1x1x1xf32>
    %199 = vector.extract %198[0, 0, 0] : f32 from vector<1x1x1xf32>
    %200 = arith.addf %194, %199 : f32
    %cst_143 = arith.constant 4.096000e+03 : f32
    %201 = arith.divf %200, %cst_143 : f32
    %202 = vector.extract_strided_slice %30 {offsets = [16, 0], sizes = [16, 64], strides = [1, 1]} : vector<64x64xf32> to vector<16x64xf32>
    %203 = vector.broadcast %201 : f32 to vector<16x64xf32>
    %204 = arith.subf %202, %203 : vector<16x64xf32>
    %205 = arith.mulf %204, %204 : vector<16x64xf32>
    %206 = vector.shape_cast %205 : vector<16x64xf32> to vector<1x16x64xf32>
    %cst_144 = arith.constant dense<0.000000e+00> : vector<1xf32>
    %207 = vector.multi_reduction <add>, %206, %cst_144 [1, 2] : vector<1x16x64xf32> to vector<1xf32>
    %208 = vector.shape_cast %207 : vector<1xf32> to vector<1x1x1xf32>
    %209 = vector.extract %208[0, 0, 0] : f32 from vector<1x1x1xf32>
    %210 = vector.extract_strided_slice %56 {offsets = [16, 0], sizes = [16, 64], strides = [1, 1]} : vector<64x64xf32> to vector<16x64xf32>
    %211 = vector.broadcast %201 : f32 to vector<16x64xf32>
    %212 = arith.subf %210, %211 : vector<16x64xf32>
    %213 = arith.mulf %212, %212 : vector<16x64xf32>
    %214 = vector.shape_cast %213 : vector<16x64xf32> to vector<1x16x64xf32>
    %cst_145 = arith.constant dense<0.000000e+00> : vector<1xf32>
    %215 = vector.multi_reduction <add>, %214, %cst_145 [1, 2] : vector<1x16x64xf32> to vector<1xf32>
    %216 = vector.shape_cast %215 : vector<1xf32> to vector<1x1x1xf32>
    %217 = vector.extract %216[0, 0, 0] : f32 from vector<1x1x1xf32>
    %218 = arith.addf %209, %217 : f32
    %219 = vector.extract_strided_slice %82 {offsets = [16, 0], sizes = [16, 64], strides = [1, 1]} : vector<64x64xf32> to vector<16x64xf32>
    %220 = vector.broadcast %201 : f32 to vector<16x64xf32>
    %221 = arith.subf %219, %220 : vector<16x64xf32>
    %222 = arith.mulf %221, %221 : vector<16x64xf32>
    %223 = vector.shape_cast %222 : vector<16x64xf32> to vector<1x16x64xf32>
    %cst_146 = arith.constant dense<0.000000e+00> : vector<1xf32>
    %224 = vector.multi_reduction <add>, %223, %cst_146 [1, 2] : vector<1x16x64xf32> to vector<1xf32>
    %225 = vector.shape_cast %224 : vector<1xf32> to vector<1x1x1xf32>
    %226 = vector.extract %225[0, 0, 0] : f32 from vector<1x1x1xf32>
    %227 = arith.addf %218, %226 : f32
    %228 = vector.extract_strided_slice %108 {offsets = [16, 0], sizes = [16, 64], strides = [1, 1]} : vector<64x64xf32> to vector<16x64xf32>
    %229 = vector.broadcast %201 : f32 to vector<16x64xf32>
    %230 = arith.subf %228, %229 : vector<16x64xf32>
    %231 = arith.mulf %230, %230 : vector<16x64xf32>
    %232 = vector.shape_cast %231 : vector<16x64xf32> to vector<1x16x64xf32>
    %cst_147 = arith.constant dense<0.000000e+00> : vector<1xf32>
    %233 = vector.multi_reduction <add>, %232, %cst_147 [1, 2] : vector<1x16x64xf32> to vector<1xf32>
    %234 = vector.shape_cast %233 : vector<1xf32> to vector<1x1x1xf32>
    %235 = vector.extract %234[0, 0, 0] : f32 from vector<1x1x1xf32>
    %236 = arith.addf %227, %235 : f32
    %cst_148 = arith.constant 4.096000e+03 : f32
    %237 = arith.divf %236, %cst_148 : f32
    %cst_149 = arith.constant 9.99999974E-6 : f32
    %238 = arith.addf %237, %cst_149 : f32
    %239 = math.rsqrt %238 : f32
    %240 = vector.extract_strided_slice %3 {offsets = [16, 0], sizes = [16, 1], strides = [1, 1]} : vector<64x1xf32> to vector<16x1xf32>
    %241 = vector.broadcast %239 : f32 to vector<16x1xf32>
    %242 = arith.mulf %241, %240 : vector<16x1xf32>
    %243 = vector.extract_strided_slice %4 {offsets = [16, 0], sizes = [16, 1], strides = [1, 1]} : vector<64x1xf32> to vector<16x1xf32>
    %244 = vector.broadcast %201 : f32 to vector<16x1xf32>
    %245 = arith.mulf %244, %242 : vector<16x1xf32>
    %246 = arith.subf %243, %245 : vector<16x1xf32>
    %247 = vector.extract_strided_slice %30 {offsets = [32, 0], sizes = [16, 64], strides = [1, 1]} : vector<64x64xf32> to vector<16x64xf32>
    %248 = vector.shape_cast %247 : vector<16x64xf32> to vector<1x16x64xf32>
    %cst_150 = arith.constant dense<0.000000e+00> : vector<1xf32>
    %249 = vector.multi_reduction <add>, %248, %cst_150 [1, 2] : vector<1x16x64xf32> to vector<1xf32>
    %250 = vector.shape_cast %249 : vector<1xf32> to vector<1x1x1xf32>
    %251 = vector.extract %250[0, 0, 0] : f32 from vector<1x1x1xf32>
    %252 = vector.extract_strided_slice %56 {offsets = [32, 0], sizes = [16, 64], strides = [1, 1]} : vector<64x64xf32> to vector<16x64xf32>
    %253 = vector.shape_cast %252 : vector<16x64xf32> to vector<1x16x64xf32>
    %cst_151 = arith.constant dense<0.000000e+00> : vector<1xf32>
    %254 = vector.multi_reduction <add>, %253, %cst_151 [1, 2] : vector<1x16x64xf32> to vector<1xf32>
    %255 = vector.shape_cast %254 : vector<1xf32> to vector<1x1x1xf32>
    %256 = vector.extract %255[0, 0, 0] : f32 from vector<1x1x1xf32>
    %257 = arith.addf %251, %256 : f32
    %258 = vector.extract_strided_slice %82 {offsets = [32, 0], sizes = [16, 64], strides = [1, 1]} : vector<64x64xf32> to vector<16x64xf32>
    %259 = vector.shape_cast %258 : vector<16x64xf32> to vector<1x16x64xf32>
    %cst_152 = arith.constant dense<0.000000e+00> : vector<1xf32>
    %260 = vector.multi_reduction <add>, %259, %cst_152 [1, 2] : vector<1x16x64xf32> to vector<1xf32>
    %261 = vector.shape_cast %260 : vector<1xf32> to vector<1x1x1xf32>
    %262 = vector.extract %261[0, 0, 0] : f32 from vector<1x1x1xf32>
    %263 = arith.addf %257, %262 : f32
    %264 = vector.extract_strided_slice %108 {offsets = [32, 0], sizes = [16, 64], strides = [1, 1]} : vector<64x64xf32> to vector<16x64xf32>
    %265 = vector.shape_cast %264 : vector<16x64xf32> to vector<1x16x64xf32>
    %cst_153 = arith.constant dense<0.000000e+00> : vector<1xf32>
    %266 = vector.multi_reduction <add>, %265, %cst_153 [1, 2] : vector<1x16x64xf32> to vector<1xf32>
    %267 = vector.shape_cast %266 : vector<1xf32> to vector<1x1x1xf32>
    %268 = vector.extract %267[0, 0, 0] : f32 from vector<1x1x1xf32>
    %269 = arith.addf %263, %268 : f32
    %cst_154 = arith.constant 4.096000e+03 : f32
    %270 = arith.divf %269, %cst_154 : f32
    %271 = vector.extract_strided_slice %30 {offsets = [32, 0], sizes = [16, 64], strides = [1, 1]} : vector<64x64xf32> to vector<16x64xf32>
    %272 = vector.broadcast %270 : f32 to vector<16x64xf32>
    %273 = arith.subf %271, %272 : vector<16x64xf32>
    %274 = arith.mulf %273, %273 : vector<16x64xf32>
    %275 = vector.shape_cast %274 : vector<16x64xf32> to vector<1x16x64xf32>
    %cst_155 = arith.constant dense<0.000000e+00> : vector<1xf32>
    %276 = vector.multi_reduction <add>, %275, %cst_155 [1, 2] : vector<1x16x64xf32> to vector<1xf32>
    %277 = vector.shape_cast %276 : vector<1xf32> to vector<1x1x1xf32>
    %278 = vector.extract %277[0, 0, 0] : f32 from vector<1x1x1xf32>
    %279 = vector.extract_strided_slice %56 {offsets = [32, 0], sizes = [16, 64], strides = [1, 1]} : vector<64x64xf32> to vector<16x64xf32>
    %280 = vector.broadcast %270 : f32 to vector<16x64xf32>
    %281 = arith.subf %279, %280 : vector<16x64xf32>
    %282 = arith.mulf %281, %281 : vector<16x64xf32>
    %283 = vector.shape_cast %282 : vector<16x64xf32> to vector<1x16x64xf32>
    %cst_156 = arith.constant dense<0.000000e+00> : vector<1xf32>
    %284 = vector.multi_reduction <add>, %283, %cst_156 [1, 2] : vector<1x16x64xf32> to vector<1xf32>
    %285 = vector.shape_cast %284 : vector<1xf32> to vector<1x1x1xf32>
    %286 = vector.extract %285[0, 0, 0] : f32 from vector<1x1x1xf32>
    %287 = arith.addf %278, %286 : f32
    %288 = vector.extract_strided_slice %82 {offsets = [32, 0], sizes = [16, 64], strides = [1, 1]} : vector<64x64xf32> to vector<16x64xf32>
    %289 = vector.broadcast %270 : f32 to vector<16x64xf32>
    %290 = arith.subf %288, %289 : vector<16x64xf32>
    %291 = arith.mulf %290, %290 : vector<16x64xf32>
    %292 = vector.shape_cast %291 : vector<16x64xf32> to vector<1x16x64xf32>
    %cst_157 = arith.constant dense<0.000000e+00> : vector<1xf32>
    %293 = vector.multi_reduction <add>, %292, %cst_157 [1, 2] : vector<1x16x64xf32> to vector<1xf32>
    %294 = vector.shape_cast %293 : vector<1xf32> to vector<1x1x1xf32>
    %295 = vector.extract %294[0, 0, 0] : f32 from vector<1x1x1xf32>
    %296 = arith.addf %287, %295 : f32
    %297 = vector.extract_strided_slice %108 {offsets = [32, 0], sizes = [16, 64], strides = [1, 1]} : vector<64x64xf32> to vector<16x64xf32>
    %298 = vector.broadcast %270 : f32 to vector<16x64xf32>
    %299 = arith.subf %297, %298 : vector<16x64xf32>
    %300 = arith.mulf %299, %299 : vector<16x64xf32>
    %301 = vector.shape_cast %300 : vector<16x64xf32> to vector<1x16x64xf32>
    %cst_158 = arith.constant dense<0.000000e+00> : vector<1xf32>
    %302 = vector.multi_reduction <add>, %301, %cst_158 [1, 2] : vector<1x16x64xf32> to vector<1xf32>
    %303 = vector.shape_cast %302 : vector<1xf32> to vector<1x1x1xf32>
    %304 = vector.extract %303[0, 0, 0] : f32 from vector<1x1x1xf32>
    %305 = arith.addf %296, %304 : f32
    %cst_159 = arith.constant 4.096000e+03 : f32
    %306 = arith.divf %305, %cst_159 : f32
    %cst_160 = arith.constant 9.99999974E-6 : f32
    %307 = arith.addf %306, %cst_160 : f32
    %308 = math.rsqrt %307 : f32
    %309 = vector.extract_strided_slice %3 {offsets = [32, 0], sizes = [16, 1], strides = [1, 1]} : vector<64x1xf32> to vector<16x1xf32>
    %310 = vector.broadcast %308 : f32 to vector<16x1xf32>
    %311 = arith.mulf %310, %309 : vector<16x1xf32>
    %312 = vector.extract_strided_slice %4 {offsets = [32, 0], sizes = [16, 1], strides = [1, 1]} : vector<64x1xf32> to vector<16x1xf32>
    %313 = vector.broadcast %270 : f32 to vector<16x1xf32>
    %314 = arith.mulf %313, %311 : vector<16x1xf32>
    %315 = arith.subf %312, %314 : vector<16x1xf32>
    %316 = vector.extract_strided_slice %30 {offsets = [48, 0], sizes = [16, 64], strides = [1, 1]} : vector<64x64xf32> to vector<16x64xf32>
    %317 = vector.shape_cast %316 : vector<16x64xf32> to vector<1x16x64xf32>
    %cst_161 = arith.constant dense<0.000000e+00> : vector<1xf32>
    %318 = vector.multi_reduction <add>, %317, %cst_161 [1, 2] : vector<1x16x64xf32> to vector<1xf32>
    %319 = vector.shape_cast %318 : vector<1xf32> to vector<1x1x1xf32>
    %320 = vector.extract %319[0, 0, 0] : f32 from vector<1x1x1xf32>
    %321 = vector.extract_strided_slice %56 {offsets = [48, 0], sizes = [16, 64], strides = [1, 1]} : vector<64x64xf32> to vector<16x64xf32>
    %322 = vector.shape_cast %321 : vector<16x64xf32> to vector<1x16x64xf32>
    %cst_162 = arith.constant dense<0.000000e+00> : vector<1xf32>
    %323 = vector.multi_reduction <add>, %322, %cst_162 [1, 2] : vector<1x16x64xf32> to vector<1xf32>
    %324 = vector.shape_cast %323 : vector<1xf32> to vector<1x1x1xf32>
    %325 = vector.extract %324[0, 0, 0] : f32 from vector<1x1x1xf32>
    %326 = arith.addf %320, %325 : f32
    %327 = vector.extract_strided_slice %82 {offsets = [48, 0], sizes = [16, 64], strides = [1, 1]} : vector<64x64xf32> to vector<16x64xf32>
    %328 = vector.shape_cast %327 : vector<16x64xf32> to vector<1x16x64xf32>
    %cst_163 = arith.constant dense<0.000000e+00> : vector<1xf32>
    %329 = vector.multi_reduction <add>, %328, %cst_163 [1, 2] : vector<1x16x64xf32> to vector<1xf32>
    %330 = vector.shape_cast %329 : vector<1xf32> to vector<1x1x1xf32>
    %331 = vector.extract %330[0, 0, 0] : f32 from vector<1x1x1xf32>
    %332 = arith.addf %326, %331 : f32
    %333 = vector.extract_strided_slice %108 {offsets = [48, 0], sizes = [16, 64], strides = [1, 1]} : vector<64x64xf32> to vector<16x64xf32>
    %334 = vector.shape_cast %333 : vector<16x64xf32> to vector<1x16x64xf32>
    %cst_164 = arith.constant dense<0.000000e+00> : vector<1xf32>
    %335 = vector.multi_reduction <add>, %334, %cst_164 [1, 2] : vector<1x16x64xf32> to vector<1xf32>
    %336 = vector.shape_cast %335 : vector<1xf32> to vector<1x1x1xf32>
    %337 = vector.extract %336[0, 0, 0] : f32 from vector<1x1x1xf32>
    %338 = arith.addf %332, %337 : f32
    %cst_165 = arith.constant 4.096000e+03 : f32
    %339 = arith.divf %338, %cst_165 : f32
    %340 = vector.extract_strided_slice %30 {offsets = [48, 0], sizes = [16, 64], strides = [1, 1]} : vector<64x64xf32> to vector<16x64xf32>
    %341 = vector.broadcast %339 : f32 to vector<16x64xf32>
    %342 = arith.subf %340, %341 : vector<16x64xf32>
    %343 = arith.mulf %342, %342 : vector<16x64xf32>
    %344 = vector.shape_cast %343 : vector<16x64xf32> to vector<1x16x64xf32>
    %cst_166 = arith.constant dense<0.000000e+00> : vector<1xf32>
    %345 = vector.multi_reduction <add>, %344, %cst_166 [1, 2] : vector<1x16x64xf32> to vector<1xf32>
    %346 = vector.shape_cast %345 : vector<1xf32> to vector<1x1x1xf32>
    %347 = vector.extract %346[0, 0, 0] : f32 from vector<1x1x1xf32>
    %348 = vector.extract_strided_slice %56 {offsets = [48, 0], sizes = [16, 64], strides = [1, 1]} : vector<64x64xf32> to vector<16x64xf32>
    %349 = vector.broadcast %339 : f32 to vector<16x64xf32>
    %350 = arith.subf %348, %349 : vector<16x64xf32>
    %351 = arith.mulf %350, %350 : vector<16x64xf32>
    %352 = vector.shape_cast %351 : vector<16x64xf32> to vector<1x16x64xf32>
    %cst_167 = arith.constant dense<0.000000e+00> : vector<1xf32>
    %353 = vector.multi_reduction <add>, %352, %cst_167 [1, 2] : vector<1x16x64xf32> to vector<1xf32>
    %354 = vector.shape_cast %353 : vector<1xf32> to vector<1x1x1xf32>
    %355 = vector.extract %354[0, 0, 0] : f32 from vector<1x1x1xf32>
    %356 = arith.addf %347, %355 : f32
    %357 = vector.extract_strided_slice %82 {offsets = [48, 0], sizes = [16, 64], strides = [1, 1]} : vector<64x64xf32> to vector<16x64xf32>
    %358 = vector.broadcast %339 : f32 to vector<16x64xf32>
    %359 = arith.subf %357, %358 : vector<16x64xf32>
    %360 = arith.mulf %359, %359 : vector<16x64xf32>
    %361 = vector.shape_cast %360 : vector<16x64xf32> to vector<1x16x64xf32>
    %cst_168 = arith.constant dense<0.000000e+00> : vector<1xf32>
    %362 = vector.multi_reduction <add>, %361, %cst_168 [1, 2] : vector<1x16x64xf32> to vector<1xf32>
    %363 = vector.shape_cast %362 : vector<1xf32> to vector<1x1x1xf32>
    %364 = vector.extract %363[0, 0, 0] : f32 from vector<1x1x1xf32>
    %365 = arith.addf %356, %364 : f32
    %366 = vector.extract_strided_slice %108 {offsets = [48, 0], sizes = [16, 64], strides = [1, 1]} : vector<64x64xf32> to vector<16x64xf32>
    %367 = vector.broadcast %339 : f32 to vector<16x64xf32>
    %368 = arith.subf %366, %367 : vector<16x64xf32>
    %369 = arith.mulf %368, %368 : vector<16x64xf32>
    %370 = vector.shape_cast %369 : vector<16x64xf32> to vector<1x16x64xf32>
    %cst_169 = arith.constant dense<0.000000e+00> : vector<1xf32>
    %371 = vector.multi_reduction <add>, %370, %cst_169 [1, 2] : vector<1x16x64xf32> to vector<1xf32>
    %372 = vector.shape_cast %371 : vector<1xf32> to vector<1x1x1xf32>
    %373 = vector.extract %372[0, 0, 0] : f32 from vector<1x1x1xf32>
    %374 = arith.addf %365, %373 : f32
    %cst_170 = arith.constant 4.096000e+03 : f32
    %375 = arith.divf %374, %cst_170 : f32
    %cst_171 = arith.constant 9.99999974E-6 : f32
    %376 = arith.addf %375, %cst_171 : f32
    %377 = math.rsqrt %376 : f32
    %378 = vector.extract_strided_slice %3 {offsets = [48, 0], sizes = [16, 1], strides = [1, 1]} : vector<64x1xf32> to vector<16x1xf32>
    %379 = vector.broadcast %377 : f32 to vector<16x1xf32>
    %380 = arith.mulf %379, %378 : vector<16x1xf32>
    %381 = vector.extract_strided_slice %4 {offsets = [48, 0], sizes = [16, 1], strides = [1, 1]} : vector<64x1xf32> to vector<16x1xf32>
    %382 = vector.broadcast %339 : f32 to vector<16x1xf32>
    %383 = arith.mulf %382, %380 : vector<16x1xf32>
    %384 = arith.subf %381, %383 : vector<16x1xf32>
    %385 = tpu.concatenate %173, %242, %311, %380 in 0 : vector<16x1xf32>, vector<16x1xf32>, vector<16x1xf32>, vector<16x1xf32> -> vector<64x1xf32>
    %386 = tpu.concatenate %177, %246, %315, %384 in 0 : vector<16x1xf32>, vector<16x1xf32>, vector<16x1xf32>, vector<16x1xf32> -> vector<64x1xf32>
    %387 = vector.broadcast %385 : vector<64x1xf32> to vector<64x64xf32>
    %388 = arith.mulf %30, %387 : vector<64x64xf32>
    %389 = vector.broadcast %386 : vector<64x1xf32> to vector<64x64xf32>
    %390 = arith.addf %388, %389 : vector<64x64xf32>
    %cst_172 = arith.constant 0.000000e+00 : f32
    %391 = vector.broadcast %cst_172 : f32 to vector<64x64xf32>
    %392 = arith.maximumf %390, %391 : vector<64x64xf32>
    %c0_173 = arith.constant 0 : index
    %c0_174 = arith.constant 0 : index
    %c0_175 = arith.constant 0 : index
    %393 = vector.load %arg8[%c0_173, %c0_174, %c0_175] : memref<4x64x64xf32, #tpu.memory_space<vmem>>, vector<1x64x64xf32>
    %394 = vector.shape_cast %393 : vector<1x64x64xf32> to vector<64x64xf32>
    %395 = vector.shape_cast %392 : vector<64x64xf32> to vector<1x64x64xf32>
    tpu.vector_store %arg8[%c0_173, %c0_174, %c0_175], %395 {strides = array<i32>} : memref<4x64x64xf32, #tpu.memory_space<vmem>>, vector<1x64x64xf32>,
    %396 = vector.broadcast %385 : vector<64x1xf32> to vector<64x64xf32>
    %397 = arith.mulf %56, %396 : vector<64x64xf32>
    %398 = vector.broadcast %386 : vector<64x1xf32> to vector<64x64xf32>
    %399 = arith.addf %397, %398 : vector<64x64xf32>
    %cst_176 = arith.constant 0.000000e+00 : f32
    %400 = vector.broadcast %cst_176 : f32 to vector<64x64xf32>
    %401 = arith.maximumf %399, %400 : vector<64x64xf32>
    %c1_177 = arith.constant 1 : index
    %c0_178 = arith.constant 0 : index
    %c0_179 = arith.constant 0 : index
    %402 = vector.load %arg8[%c1_177, %c0_178, %c0_179] : memref<4x64x64xf32, #tpu.memory_space<vmem>>, vector<1x64x64xf32>
    %403 = vector.shape_cast %402 : vector<1x64x64xf32> to vector<64x64xf32>
    %404 = vector.shape_cast %401 : vector<64x64xf32> to vector<1x64x64xf32>
    tpu.vector_store %arg8[%c1_177, %c0_178, %c0_179], %404 {strides = array<i32>} : memref<4x64x64xf32, #tpu.memory_space<vmem>>, vector<1x64x64xf32>,
    %405 = vector.broadcast %385 : vector<64x1xf32> to vector<64x64xf32>
    %406 = arith.mulf %82, %405 : vector<64x64xf32>
    %407 = vector.broadcast %386 : vector<64x1xf32> to vector<64x64xf32>
    %408 = arith.addf %406, %407 : vector<64x64xf32>
    %cst_180 = arith.constant 0.000000e+00 : f32
    %409 = vector.broadcast %cst_180 : f32 to vector<64x64xf32>
    %410 = arith.maximumf %408, %409 : vector<64x64xf32>
    %c2_181 = arith.constant 2 : index
    %c0_182 = arith.constant 0 : index
    %c0_183 = arith.constant 0 : index
    %411 = vector.load %arg8[%c2_181, %c0_182, %c0_183] : memref<4x64x64xf32, #tpu.memory_space<vmem>>, vector<1x64x64xf32>
    %412 = vector.shape_cast %411 : vector<1x64x64xf32> to vector<64x64xf32>
    %413 = vector.shape_cast %410 : vector<64x64xf32> to vector<1x64x64xf32>
    tpu.vector_store %arg8[%c2_181, %c0_182, %c0_183], %413 {strides = array<i32>} : memref<4x64x64xf32, #tpu.memory_space<vmem>>, vector<1x64x64xf32>,
    %414 = vector.broadcast %385 : vector<64x1xf32> to vector<64x64xf32>
    %415 = arith.mulf %108, %414 : vector<64x64xf32>
    %416 = vector.broadcast %386 : vector<64x1xf32> to vector<64x64xf32>
    %417 = arith.addf %415, %416 : vector<64x64xf32>
    %cst_184 = arith.constant 0.000000e+00 : f32
    %418 = vector.broadcast %cst_184 : f32 to vector<64x64xf32>
    %419 = arith.maximumf %417, %418 : vector<64x64xf32>
    %c3_185 = arith.constant 3 : index
    %c0_186 = arith.constant 0 : index
    %c0_187 = arith.constant 0 : index
    %420 = vector.load %arg8[%c3_185, %c0_186, %c0_187] : memref<4x64x64xf32, #tpu.memory_space<vmem>>, vector<1x64x64xf32>
    %421 = vector.shape_cast %420 : vector<1x64x64xf32> to vector<64x64xf32>
    %422 = vector.shape_cast %419 : vector<64x64xf32> to vector<1x64x64xf32>
    tpu.vector_store %arg8[%c3_185, %c0_186, %c0_187], %422 {strides = array<i32>} : memref<4x64x64xf32, #tpu.memory_space<vmem>>, vector<1x64x64xf32>,
    %c0_188 = arith.constant 0 : index
    %c0_189 = arith.constant 0 : index
    %423 = vector.load %arg6[%c0_188, %c0_189] : memref<4x1xf32, #tpu.memory_space<vmem>>, vector<4x1xf32>
    %c1_190 = arith.constant 1 : index
    %c1_191 = arith.constant 1 : index
    %c0_192 = arith.constant 0 : index
    %c0_193 = arith.constant 0 : index
    %424 = vector.load %arg4[%c1_190, %c1_191, %c0_192, %c0_193] : memref<4x4x4x64xf32, #tpu.memory_space<vmem>>, vector<1x1x4x64xf32>
    %425 = vector.shape_cast %424 : vector<1x1x4x64xf32> to vector<4x64xf32>
    %c0_194 = arith.constant 0 : index
    %c0_195 = arith.constant 0 : index
    %c0_196 = arith.constant 0 : index
    %426 = vector.load %arg8[%c0_194, %c0_195, %c0_196] : memref<4x64x64xf32, #tpu.memory_space<vmem>>, vector<1x64x64xf32>
    %427 = vector.shape_cast %426 : vector<1x64x64xf32> to vector<64x64xf32>
    %cst_197 = arith.constant dense<0.000000e+00> : vector<4x64xf32>
    %428 = tpu.matmul %425, %427, %cst_197 {dimension_numbers = #tpu.dot_dimension_numbers<[1], [0], [0], [1], [0, 0, 1, 1], [], []>} : vector<4x64xf32>, vector<64x64xf32>, vector<4x64xf32> -> vector<4x64xf32>
    %c1_198 = arith.constant 1 : index
    %c3_199 = arith.constant 3 : index
    %c0_200 = arith.constant 0 : index
    %c0_201 = arith.constant 0 : index
    %429 = vector.load %arg4[%c1_198, %c3_199, %c0_200, %c0_201] : memref<4x4x4x64xf32, #tpu.memory_space<vmem>>, vector<1x1x4x64xf32>
    %430 = vector.shape_cast %429 : vector<1x1x4x64xf32> to vector<4x64xf32>
    %c1_202 = arith.constant 1 : index
    %c0_203 = arith.constant 0 : index
    %c0_204 = arith.constant 0 : index
    %431 = vector.load %arg8[%c1_202, %c0_203, %c0_204] : memref<4x64x64xf32, #tpu.memory_space<vmem>>, vector<1x64x64xf32>
    %432 = vector.shape_cast %431 : vector<1x64x64xf32> to vector<64x64xf32>
    %cst_205 = arith.constant dense<0.000000e+00> : vector<4x64xf32>
    %433 = tpu.matmul %430, %432, %cst_205 {dimension_numbers = #tpu.dot_dimension_numbers<[1], [0], [0], [1], [0, 0, 1, 1], [], []>} : vector<4x64xf32>, vector<64x64xf32>, vector<4x64xf32> -> vector<4x64xf32>
    %c3_206 = arith.constant 3 : index
    %c0_207 = arith.constant 0 : index
    %c0_208 = arith.constant 0 : index
    %434 = vector.load %arg2[%c3_206, %c0_207, %c0_208] : memref<9x64x64xf32, #tpu.memory_space<vmem>>, vector<1x64x64xf32>
    %435 = vector.shape_cast %434 : vector<1x64x64xf32> to vector<64x64xf32>
    %cst_209 = arith.constant dense<0.000000e+00> : vector<4x64xf32>
    %436 = tpu.matmul %433, %435, %cst_209 {dimension_numbers = #tpu.dot_dimension_numbers<[1], [0], [0], [1], [0, 0, 1, 1], [], []>} : vector<4x64xf32>, vector<64x64xf32>, vector<4x64xf32> -> vector<4x64xf32>
    %437 = arith.addf %428, %436 : vector<4x64xf32>
    %c3_210 = arith.constant 3 : index
    %c1_211 = arith.constant 1 : index
    %c0_212 = arith.constant 0 : index
    %c0_213 = arith.constant 0 : index
    %438 = vector.load %arg4[%c3_210, %c1_211, %c0_212, %c0_213] : memref<4x4x4x64xf32, #tpu.memory_space<vmem>>, vector<1x1x4x64xf32>
    %439 = vector.shape_cast %438 : vector<1x1x4x64xf32> to vector<4x64xf32>
    %c2_214 = arith.constant 2 : index
    %c0_215 = arith.constant 0 : index
    %c0_216 = arith.constant 0 : index
    %440 = vector.load %arg8[%c2_214, %c0_215, %c0_216] : memref<4x64x64xf32, #tpu.memory_space<vmem>>, vector<1x64x64xf32>
    %441 = vector.shape_cast %440 : vector<1x64x64xf32> to vector<64x64xf32>
    %cst_217 = arith.constant dense<0.000000e+00> : vector<4x64xf32>
    %442 = tpu.matmul %439, %441, %cst_217 {dimension_numbers = #tpu.dot_dimension_numbers<[1], [0], [0], [1], [0, 0, 1, 1], [], []>} : vector<4x64xf32>, vector<64x64xf32>, vector<4x64xf32> -> vector<4x64xf32>
    %c1_218 = arith.constant 1 : index
    %c0_219 = arith.constant 0 : index
    %c0_220 = arith.constant 0 : index
    %443 = vector.load %arg2[%c1_218, %c0_219, %c0_220] : memref<9x64x64xf32, #tpu.memory_space<vmem>>, vector<1x64x64xf32>
    %444 = vector.shape_cast %443 : vector<1x64x64xf32> to vector<64x64xf32>
    %cst_221 = arith.constant dense<0.000000e+00> : vector<4x64xf32>
    %445 = tpu.matmul %442, %444, %cst_221 {dimension_numbers = #tpu.dot_dimension_numbers<[1], [0], [0], [1], [0, 0, 1, 1], [], []>} : vector<4x64xf32>, vector<64x64xf32>, vector<4x64xf32> -> vector<4x64xf32>
    %446 = arith.addf %437, %445 : vector<4x64xf32>
    %c3_222 = arith.constant 3 : index
    %c3_223 = arith.constant 3 : index
    %c0_224 = arith.constant 0 : index
    %c0_225 = arith.constant 0 : index
    %447 = vector.load %arg4[%c3_222, %c3_223, %c0_224, %c0_225] : memref<4x4x4x64xf32, #tpu.memory_space<vmem>>, vector<1x1x4x64xf32>
    %448 = vector.shape_cast %447 : vector<1x1x4x64xf32> to vector<4x64xf32>
    %c3_226 = arith.constant 3 : index
    %c0_227 = arith.constant 0 : index
    %c0_228 = arith.constant 0 : index
    %449 = vector.load %arg8[%c3_226, %c0_227, %c0_228] : memref<4x64x64xf32, #tpu.memory_space<vmem>>, vector<1x64x64xf32>
    %450 = vector.shape_cast %449 : vector<1x64x64xf32> to vector<64x64xf32>
    %cst_229 = arith.constant dense<0.000000e+00> : vector<4x64xf32>
    %451 = tpu.matmul %448, %450, %cst_229 {dimension_numbers = #tpu.dot_dimension_numbers<[1], [0], [0], [1], [0, 0, 1, 1], [], []>} : vector<4x64xf32>, vector<64x64xf32>, vector<4x64xf32> -> vector<4x64xf32>
    %c0_230 = arith.constant 0 : index
    %c0_231 = arith.constant 0 : index
    %c0_232 = arith.constant 0 : index
    %452 = vector.load %arg2[%c0_230, %c0_231, %c0_232] : memref<9x64x64xf32, #tpu.memory_space<vmem>>, vector<1x64x64xf32>
    %453 = vector.shape_cast %452 : vector<1x64x64xf32> to vector<64x64xf32>
    %cst_233 = arith.constant dense<0.000000e+00> : vector<4x64xf32>
    %454 = tpu.matmul %451, %453, %cst_233 {dimension_numbers = #tpu.dot_dimension_numbers<[1], [0], [0], [1], [0, 0, 1, 1], [], []>} : vector<4x64xf32>, vector<64x64xf32>, vector<4x64xf32> -> vector<4x64xf32>
    %455 = arith.addf %446, %454 : vector<4x64xf32>
    %456 = vector.broadcast %423 : vector<4x1xf32> to vector<4x64xf32>
    %457 = arith.addf %455, %456 : vector<4x64xf32>
    %c0_234 = arith.constant 0 : index
    %c0_235 = arith.constant 0 : index
    %c0_236 = arith.constant 0 : index
    %458 = vector.load %arg7[%c0_234, %c0_235, %c0_236] : memref<1x4x1024xf32, #tpu.memory_space<vmem>>, vector<1x4x64xf32>
    %459 = vector.shape_cast %458 : vector<1x4x64xf32> to vector<4x64xf32>
    %460 = vector.shape_cast %457 : vector<4x64xf32> to vector<1x4x64xf32>
    tpu.vector_store %arg7[%c0_234, %c0_235, %c0_236], %460 {strides = array<i32>} : memref<1x4x1024xf32, #tpu.memory_space<vmem>>, vector<1x4x64xf32>,
    %c1_237 = arith.constant 1 : index
    %c0_238 = arith.constant 0 : index
    %c0_239 = arith.constant 0 : index
    %c0_240 = arith.constant 0 : index
    %461 = vector.load %arg4[%c1_237, %c0_238, %c0_239, %c0_240] : memref<4x4x4x64xf32, #tpu.memory_space<vmem>>, vector<1x1x4x64xf32>
    %462 = vector.shape_cast %461 : vector<1x1x4x64xf32> to vector<4x64xf32>
    %c1_241 = arith.constant 1 : index
    %c0_242 = arith.constant 0 : index
    %c0_243 = arith.constant 0 : index
    %463 = vector.load %arg8[%c1_241, %c0_242, %c0_243] : memref<4x64x64xf32, #tpu.memory_space<vmem>>, vector<1x64x64xf32>
    %464 = vector.shape_cast %463 : vector<1x64x64xf32> to vector<64x64xf32>
    %cst_244 = arith.constant dense<0.000000e+00> : vector<4x64xf32>
    %465 = tpu.matmul %462, %464, %cst_244 {dimension_numbers = #tpu.dot_dimension_numbers<[1], [0], [0], [1], [0, 0, 1, 1], [], []>} : vector<4x64xf32>, vector<64x64xf32>, vector<4x64xf32> -> vector<4x64xf32>
    %c1_245 = arith.constant 1 : index
    %c2_246 = arith.constant 2 : index
    %c0_247 = arith.constant 0 : index
    %c0_248 = arith.constant 0 : index
    %466 = vector.load %arg4[%c1_245, %c2_246, %c0_247, %c0_248] : memref<4x4x4x64xf32, #tpu.memory_space<vmem>>, vector<1x1x4x64xf32>
    %467 = vector.shape_cast %466 : vector<1x1x4x64xf32> to vector<4x64xf32>
    %c0_249 = arith.constant 0 : index
    %c0_250 = arith.constant 0 : index
    %c0_251 = arith.constant 0 : index
    %468 = vector.load %arg8[%c0_249, %c0_250, %c0_251] : memref<4x64x64xf32, #tpu.memory_space<vmem>>, vector<1x64x64xf32>
    %469 = vector.shape_cast %468 : vector<1x64x64xf32> to vector<64x64xf32>
    %cst_252 = arith.constant dense<0.000000e+00> : vector<4x64xf32>
    %470 = tpu.matmul %467, %469, %cst_252 {dimension_numbers = #tpu.dot_dimension_numbers<[1], [0], [0], [1], [0, 0, 1, 1], [], []>} : vector<4x64xf32>, vector<64x64xf32>, vector<4x64xf32> -> vector<4x64xf32>
    %471 = arith.addf %465, %470 : vector<4x64xf32>
    %c3_253 = arith.constant 3 : index
    %c0_254 = arith.constant 0 : index
    %c0_255 = arith.constant 0 : index
    %c0_256 = arith.constant 0 : index
    %472 = vector.load %arg4[%c3_253, %c0_254, %c0_255, %c0_256] : memref<4x4x4x64xf32, #tpu.memory_space<vmem>>, vector<1x1x4x64xf32>
    %473 = vector.shape_cast %472 : vector<1x1x4x64xf32> to vector<4x64xf32>
    %c3_257 = arith.constant 3 : index
    %c0_258 = arith.constant 0 : index
    %c0_259 = arith.constant 0 : index
    %474 = vector.load %arg8[%c3_257, %c0_258, %c0_259] : memref<4x64x64xf32, #tpu.memory_space<vmem>>, vector<1x64x64xf32>
    %475 = vector.shape_cast %474 : vector<1x64x64xf32> to vector<64x64xf32>
    %cst_260 = arith.constant dense<0.000000e+00> : vector<4x64xf32>
    %476 = tpu.matmul %473, %475, %cst_260 {dimension_numbers = #tpu.dot_dimension_numbers<[1], [0], [0], [1], [0, 0, 1, 1], [], []>} : vector<4x64xf32>, vector<64x64xf32>, vector<4x64xf32> -> vector<4x64xf32>
    %c1_261 = arith.constant 1 : index
    %c0_262 = arith.constant 0 : index
    %c0_263 = arith.constant 0 : index
    %477 = vector.load %arg2[%c1_261, %c0_262, %c0_263] : memref<9x64x64xf32, #tpu.memory_space<vmem>>, vector<1x64x64xf32>
    %478 = vector.shape_cast %477 : vector<1x64x64xf32> to vector<64x64xf32>
    %cst_264 = arith.constant dense<0.000000e+00> : vector<4x64xf32>
    %479 = tpu.matmul %476, %478, %cst_264 {dimension_numbers = #tpu.dot_dimension_numbers<[1], [0], [0], [1], [0, 0, 1, 1], [], []>} : vector<4x64xf32>, vector<64x64xf32>, vector<4x64xf32> -> vector<4x64xf32>
    %480 = arith.addf %471, %479 : vector<4x64xf32>
    %c3_265 = arith.constant 3 : index
    %c2_266 = arith.constant 2 : index
    %c0_267 = arith.constant 0 : index
    %c0_268 = arith.constant 0 : index
    %481 = vector.load %arg4[%c3_265, %c2_266, %c0_267, %c0_268] : memref<4x4x4x64xf32, #tpu.memory_space<vmem>>, vector<1x1x4x64xf32>
    %482 = vector.shape_cast %481 : vector<1x1x4x64xf32> to vector<4x64xf32>
    %c2_269 = arith.constant 2 : index
    %c0_270 = arith.constant 0 : index
    %c0_271 = arith.constant 0 : index
    %483 = vector.load %arg8[%c2_269, %c0_270, %c0_271] : memref<4x64x64xf32, #tpu.memory_space<vmem>>, vector<1x64x64xf32>
    %484 = vector.shape_cast %483 : vector<1x64x64xf32> to vector<64x64xf32>
    %cst_272 = arith.constant dense<0.000000e+00> : vector<4x64xf32>
    %485 = tpu.matmul %482, %484, %cst_272 {dimension_numbers = #tpu.dot_dimension_numbers<[1], [0], [0], [1], [0, 0, 1, 1], [], []>} : vector<4x64xf32>, vector<64x64xf32>, vector<4x64xf32> -> vector<4x64xf32>
    %c1_273 = arith.constant 1 : index
    %c0_274 = arith.constant 0 : index
    %c0_275 = arith.constant 0 : index
    %486 = vector.load %arg2[%c1_273, %c0_274, %c0_275] : memref<9x64x64xf32, #tpu.memory_space<vmem>>, vector<1x64x64xf32>
    %487 = vector.shape_cast %486 : vector<1x64x64xf32> to vector<64x64xf32>
    %cst_276 = arith.constant dense<0.000000e+00> : vector<4x64xf32>
    %488 = tpu.matmul %485, %487, %cst_276 {dimension_numbers = #tpu.dot_dimension_numbers<[1], [0], [0], [1], [0, 0, 1, 1], [], []>} : vector<4x64xf32>, vector<64x64xf32>, vector<4x64xf32> -> vector<4x64xf32>
    %489 = arith.addf %480, %488 : vector<4x64xf32>
    %490 = vector.broadcast %423 : vector<4x1xf32> to vector<4x64xf32>
    %491 = arith.addf %489, %490 : vector<4x64xf32>
    %c0_277 = arith.constant 0 : index
    %c0_278 = arith.constant 0 : index
    %c64 = arith.constant 64 : index
    %492 = vector.load %arg7[%c0_277, %c0_278, %c64] : memref<1x4x1024xf32, #tpu.memory_space<vmem>>, vector<1x4x64xf32>
    %493 = vector.shape_cast %492 : vector<1x4x64xf32> to vector<4x64xf32>
    %494 = vector.shape_cast %491 : vector<4x64xf32> to vector<1x4x64xf32>
    tpu.vector_store %arg7[%c0_277, %c0_278, %c64], %494 {strides = array<i32>} : memref<1x4x1024xf32, #tpu.memory_space<vmem>>, vector<1x4x64xf32>,
    %c1_279 = arith.constant 1 : index
    %c1_280 = arith.constant 1 : index
    %c0_281 = arith.constant 0 : index
    %c0_282 = arith.constant 0 : index
    %495 = vector.load %arg4[%c1_279, %c1_280, %c0_281, %c0_282] : memref<4x4x4x64xf32, #tpu.memory_space<vmem>>, vector<1x1x4x64xf32>
    %496 = vector.shape_cast %495 : vector<1x1x4x64xf32> to vector<4x64xf32>
    %c1_283 = arith.constant 1 : index
    %c0_284 = arith.constant 0 : index
    %c0_285 = arith.constant 0 : index
    %497 = vector.load %arg8[%c1_283, %c0_284, %c0_285] : memref<4x64x64xf32, #tpu.memory_space<vmem>>, vector<1x64x64xf32>
    %498 = vector.shape_cast %497 : vector<1x64x64xf32> to vector<64x64xf32>
    %cst_286 = arith.constant dense<0.000000e+00> : vector<4x64xf32>
    %499 = tpu.matmul %496, %498, %cst_286 {dimension_numbers = #tpu.dot_dimension_numbers<[1], [0], [0], [1], [0, 0, 1, 1], [], []>} : vector<4x64xf32>, vector<64x64xf32>, vector<4x64xf32> -> vector<4x64xf32>
    %c1_287 = arith.constant 1 : index
    %c3_288 = arith.constant 3 : index
    %c0_289 = arith.constant 0 : index
    %c0_290 = arith.constant 0 : index
    %500 = vector.load %arg4[%c1_287, %c3_288, %c0_289, %c0_290] : memref<4x4x4x64xf32, #tpu.memory_space<vmem>>, vector<1x1x4x64xf32>
    %501 = vector.shape_cast %500 : vector<1x1x4x64xf32> to vector<4x64xf32>
    %c0_291 = arith.constant 0 : index
    %c0_292 = arith.constant 0 : index
    %c0_293 = arith.constant 0 : index
    %502 = vector.load %arg8[%c0_291, %c0_292, %c0_293] : memref<4x64x64xf32, #tpu.memory_space<vmem>>, vector<1x64x64xf32>
    %503 = vector.shape_cast %502 : vector<1x64x64xf32> to vector<64x64xf32>
    %cst_294 = arith.constant dense<0.000000e+00> : vector<4x64xf32>
    %504 = tpu.matmul %501, %503, %cst_294 {dimension_numbers = #tpu.dot_dimension_numbers<[1], [0], [0], [1], [0, 0, 1, 1], [], []>} : vector<4x64xf32>, vector<64x64xf32>, vector<4x64xf32> -> vector<4x64xf32>
    %505 = arith.addf %499, %504 : vector<4x64xf32>
    %c3_295 = arith.constant 3 : index
    %c1_296 = arith.constant 1 : index
    %c0_297 = arith.constant 0 : index
    %c0_298 = arith.constant 0 : index
    %506 = vector.load %arg4[%c3_295, %c1_296, %c0_297, %c0_298] : memref<4x4x4x64xf32, #tpu.memory_space<vmem>>, vector<1x1x4x64xf32>
    %507 = vector.shape_cast %506 : vector<1x1x4x64xf32> to vector<4x64xf32>
    %c3_299 = arith.constant 3 : index
    %c0_300 = arith.constant 0 : index
    %c0_301 = arith.constant 0 : index
    %508 = vector.load %arg8[%c3_299, %c0_300, %c0_301] : memref<4x64x64xf32, #tpu.memory_space<vmem>>, vector<1x64x64xf32>
    %509 = vector.shape_cast %508 : vector<1x64x64xf32> to vector<64x64xf32>
    %cst_302 = arith.constant dense<0.000000e+00> : vector<4x64xf32>
    %510 = tpu.matmul %507, %509, %cst_302 {dimension_numbers = #tpu.dot_dimension_numbers<[1], [0], [0], [1], [0, 0, 1, 1], [], []>} : vector<4x64xf32>, vector<64x64xf32>, vector<4x64xf32> -> vector<4x64xf32>
    %c1_303 = arith.constant 1 : index
    %c0_304 = arith.constant 0 : index
    %c0_305 = arith.constant 0 : index
    %511 = vector.load %arg2[%c1_303, %c0_304, %c0_305] : memref<9x64x64xf32, #tpu.memory_space<vmem>>, vector<1x64x64xf32>
    %512 = vector.shape_cast %511 : vector<1x64x64xf32> to vector<64x64xf32>
    %cst_306 = arith.constant dense<0.000000e+00> : vector<4x64xf32>
    %513 = tpu.matmul %510, %512, %cst_306 {dimension_numbers = #tpu.dot_dimension_numbers<[1], [0], [0], [1], [0, 0, 1, 1], [], []>} : vector<4x64xf32>, vector<64x64xf32>, vector<4x64xf32> -> vector<4x64xf32>
    %514 = arith.addf %505, %513 : vector<4x64xf32>
    %c3_307 = arith.constant 3 : index
    %c3_308 = arith.constant 3 : index
    %c0_309 = arith.constant 0 : index
    %c0_310 = arith.constant 0 : index
    %515 = vector.load %arg4[%c3_307, %c3_308, %c0_309, %c0_310] : memref<4x4x4x64xf32, #tpu.memory_space<vmem>>, vector<1x1x4x64xf32>
    %516 = vector.shape_cast %515 : vector<1x1x4x64xf32> to vector<4x64xf32>
    %c2_311 = arith.constant 2 : index
    %c0_312 = arith.constant 0 : index
    %c0_313 = arith.constant 0 : index
    %517 = vector.load %arg8[%c2_311, %c0_312, %c0_313] : memref<4x64x64xf32, #tpu.memory_space<vmem>>, vector<1x64x64xf32>
    %518 = vector.shape_cast %517 : vector<1x64x64xf32> to vector<64x64xf32>
    %cst_314 = arith.constant dense<0.000000e+00> : vector<4x64xf32>
    %519 = tpu.matmul %516, %518, %cst_314 {dimension_numbers = #tpu.dot_dimension_numbers<[1], [0], [0], [1], [0, 0, 1, 1], [], []>} : vector<4x64xf32>, vector<64x64xf32>, vector<4x64xf32> -> vector<4x64xf32>
    %c1_315 = arith.constant 1 : index
    %c0_316 = arith.constant 0 : index
    %c0_317 = arith.constant 0 : index
    %520 = vector.load %arg2[%c1_315, %c0_316, %c0_317] : memref<9x64x64xf32, #tpu.memory_space<vmem>>, vector<1x64x64xf32>
    %521 = vector.shape_cast %520 : vector<1x64x64xf32> to vector<64x64xf32>
    %cst_318 = arith.constant dense<0.000000e+00> : vector<4x64xf32>
    %522 = tpu.matmul %519, %521, %cst_318 {dimension_numbers = #tpu.dot_dimension_numbers<[1], [0], [0], [1], [0, 0, 1, 1], [], []>} : vector<4x64xf32>, vector<64x64xf32>, vector<4x64xf32> -> vector<4x64xf32>
    %523 = arith.addf %514, %522 : vector<4x64xf32>
    %524 = vector.broadcast %423 : vector<4x1xf32> to vector<4x64xf32>
    %525 = arith.addf %523, %524 : vector<4x64xf32>
    %c0_319 = arith.constant 0 : index
    %c0_320 = arith.constant 0 : index
    %c128 = arith.constant 128 : index
    %526 = vector.load %arg7[%c0_319, %c0_320, %c128] : memref<1x4x1024xf32, #tpu.memory_space<vmem>>, vector<1x4x64xf32>
    %527 = vector.shape_cast %526 : vector<1x4x64xf32> to vector<4x64xf32>
    %528 = vector.shape_cast %525 : vector<4x64xf32> to vector<1x4x64xf32>
    tpu.vector_store %arg7[%c0_319, %c0_320, %c128], %528 {strides = array<i32>} : memref<1x4x1024xf32, #tpu.memory_space<vmem>>, vector<1x4x64xf32>,
    %c1_321 = arith.constant 1 : index
    %c0_322 = arith.constant 0 : index
    %c0_323 = arith.constant 0 : index
    %c0_324 = arith.constant 0 : index
    %529 = vector.load %arg4[%c1_321, %c0_322, %c0_323, %c0_324] : memref<4x4x4x64xf32, #tpu.memory_space<vmem>>, vector<1x1x4x64xf32>
    %530 = vector.shape_cast %529 : vector<1x1x4x64xf32> to vector<4x64xf32>
    %c0_325 = arith.constant 0 : index
    %c0_326 = arith.constant 0 : index
    %c0_327 = arith.constant 0 : index
    %531 = vector.load %arg8[%c0_325, %c0_326, %c0_327] : memref<4x64x64xf32, #tpu.memory_space<vmem>>, vector<1x64x64xf32>
    %532 = vector.shape_cast %531 : vector<1x64x64xf32> to vector<64x64xf32>
    %cst_328 = arith.constant dense<0.000000e+00> : vector<4x64xf32>
    %533 = tpu.matmul %530, %532, %cst_328 {dimension_numbers = #tpu.dot_dimension_numbers<[1], [0], [0], [1], [0, 0, 1, 1], [], []>} : vector<4x64xf32>, vector<64x64xf32>, vector<4x64xf32> -> vector<4x64xf32>
    %c5_329 = arith.constant 5 : index
    %c0_330 = arith.constant 0 : index
    %c0_331 = arith.constant 0 : index
    %534 = vector.load %arg2[%c5_329, %c0_330, %c0_331] : memref<9x64x64xf32, #tpu.memory_space<vmem>>, vector<1x64x64xf32>
    %535 = vector.shape_cast %534 : vector<1x64x64xf32> to vector<64x64xf32>
    %cst_332 = arith.constant dense<0.000000e+00> : vector<4x64xf32>
    %536 = tpu.matmul %533, %535, %cst_332 {dimension_numbers = #tpu.dot_dimension_numbers<[1], [0], [0], [1], [0, 0, 1, 1], [], []>} : vector<4x64xf32>, vector<64x64xf32>, vector<4x64xf32> -> vector<4x64xf32>
    %c1_333 = arith.constant 1 : index
    %c2_334 = arith.constant 2 : index
    %c0_335 = arith.constant 0 : index
    %c0_336 = arith.constant 0 : index
    %537 = vector.load %arg4[%c1_333, %c2_334, %c0_335, %c0_336] : memref<4x4x4x64xf32, #tpu.memory_space<vmem>>, vector<1x1x4x64xf32>
    %538 = vector.shape_cast %537 : vector<1x1x4x64xf32> to vector<4x64xf32>
    %c1_337 = arith.constant 1 : index
    %c0_338 = arith.constant 0 : index
    %c0_339 = arith.constant 0 : index
    %539 = vector.load %arg8[%c1_337, %c0_338, %c0_339] : memref<4x64x64xf32, #tpu.memory_space<vmem>>, vector<1x64x64xf32>
    %540 = vector.shape_cast %539 : vector<1x64x64xf32> to vector<64x64xf32>
    %cst_340 = arith.constant dense<0.000000e+00> : vector<4x64xf32>
    %541 = tpu.matmul %538, %540, %cst_340 {dimension_numbers = #tpu.dot_dimension_numbers<[1], [0], [0], [1], [0, 0, 1, 1], [], []>} : vector<4x64xf32>, vector<64x64xf32>, vector<4x64xf32> -> vector<4x64xf32>
    %542 = arith.addf %536, %541 : vector<4x64xf32>
    %c3_341 = arith.constant 3 : index
    %c0_342 = arith.constant 0 : index
    %c0_343 = arith.constant 0 : index
    %c0_344 = arith.constant 0 : index
    %543 = vector.load %arg4[%c3_341, %c0_342, %c0_343, %c0_344] : memref<4x4x4x64xf32, #tpu.memory_space<vmem>>, vector<1x1x4x64xf32>
    %544 = vector.shape_cast %543 : vector<1x1x4x64xf32> to vector<4x64xf32>
    %c2_345 = arith.constant 2 : index
    %c0_346 = arith.constant 0 : index
    %c0_347 = arith.constant 0 : index
    %545 = vector.load %arg8[%c2_345, %c0_346, %c0_347] : memref<4x64x64xf32, #tpu.memory_space<vmem>>, vector<1x64x64xf32>
    %546 = vector.shape_cast %545 : vector<1x64x64xf32> to vector<64x64xf32>
    %cst_348 = arith.constant dense<0.000000e+00> : vector<4x64xf32>
    %547 = tpu.matmul %544, %546, %cst_348 {dimension_numbers = #tpu.dot_dimension_numbers<[1], [0], [0], [1], [0, 0, 1, 1], [], []>} : vector<4x64xf32>, vector<64x64xf32>, vector<4x64xf32> -> vector<4x64xf32>
    %c2_349 = arith.constant 2 : index
    %c0_350 = arith.constant 0 : index
    %c0_351 = arith.constant 0 : index
    %548 = vector.load %arg2[%c2_349, %c0_350, %c0_351] : memref<9x64x64xf32, #tpu.memory_space<vmem>>, vector<1x64x64xf32>
    %549 = vector.shape_cast %548 : vector<1x64x64xf32> to vector<64x64xf32>
    %cst_352 = arith.constant dense<0.000000e+00> : vector<4x64xf32>
    %550 = tpu.matmul %547, %549, %cst_352 {dimension_numbers = #tpu.dot_dimension_numbers<[1], [0], [0], [1], [0, 0, 1, 1], [], []>} : vector<4x64xf32>, vector<64x64xf32>, vector<4x64xf32> -> vector<4x64xf32>
    %551 = arith.addf %542, %550 : vector<4x64xf32>
    %c3_353 = arith.constant 3 : index
    %c2_354 = arith.constant 2 : index
    %c0_355 = arith.constant 0 : index
    %c0_356 = arith.constant 0 : index
    %552 = vector.load %arg4[%c3_353, %c2_354, %c0_355, %c0_356] : memref<4x4x4x64xf32, #tpu.memory_space<vmem>>, vector<1x1x4x64xf32>
    %553 = vector.shape_cast %552 : vector<1x1x4x64xf32> to vector<4x64xf32>
    %c3_357 = arith.constant 3 : index
    %c0_358 = arith.constant 0 : index
    %c0_359 = arith.constant 0 : index
    %554 = vector.load %arg8[%c3_357, %c0_358, %c0_359] : memref<4x64x64xf32, #tpu.memory_space<vmem>>, vector<1x64x64xf32>
    %555 = vector.shape_cast %554 : vector<1x64x64xf32> to vector<64x64xf32>
    %cst_360 = arith.constant dense<0.000000e+00> : vector<4x64xf32>
    %556 = tpu.matmul %553, %555, %cst_360 {dimension_numbers = #tpu.dot_dimension_numbers<[1], [0], [0], [1], [0, 0, 1, 1], [], []>} : vector<4x64xf32>, vector<64x64xf32>, vector<4x64xf32> -> vector<4x64xf32>
    %c1_361 = arith.constant 1 : index
    %c0_362 = arith.constant 0 : index
    %c0_363 = arith.constant 0 : index
    %557 = vector.load %arg2[%c1_361, %c0_362, %c0_363] : memref<9x64x64xf32, #tpu.memory_space<vmem>>, vector<1x64x64xf32>
    %558 = vector.shape_cast %557 : vector<1x64x64xf32> to vector<64x64xf32>
    %cst_364 = arith.constant dense<0.000000e+00> : vector<4x64xf32>
    %559 = tpu.matmul %556, %558, %cst_364 {dimension_numbers = #tpu.dot_dimension_numbers<[1], [0], [0], [1], [0, 0, 1, 1], [], []>} : vector<4x64xf32>, vector<64x64xf32>, vector<4x64xf32> -> vector<4x64xf32>
    %560 = arith.addf %551, %559 : vector<4x64xf32>
    %561 = vector.broadcast %423 : vector<4x1xf32> to vector<4x64xf32>
    %562 = arith.addf %560, %561 : vector<4x64xf32>
    %c0_365 = arith.constant 0 : index
    %c0_366 = arith.constant 0 : index
    %c192 = arith.constant 192 : index
    %563 = vector.load %arg7[%c0_365, %c0_366, %c192] : memref<1x4x1024xf32, #tpu.memory_space<vmem>>, vector<1x4x64xf32>
    %564 = vector.shape_cast %563 : vector<1x4x64xf32> to vector<4x64xf32>
    %565 = vector.shape_cast %562 : vector<4x64xf32> to vector<1x4x64xf32>
    tpu.vector_store %arg7[%c0_365, %c0_366, %c192], %565 {strides = array<i32>} : memref<1x4x1024xf32, #tpu.memory_space<vmem>>, vector<1x4x64xf32>,
    %c0_367 = arith.constant 0 : index
    %c1_368 = arith.constant 1 : index
    %c0_369 = arith.constant 0 : index
    %c0_370 = arith.constant 0 : index
    %566 = vector.load %arg4[%c0_367, %c1_368, %c0_369, %c0_370] : memref<4x4x4x64xf32, #tpu.memory_space<vmem>>, vector<1x1x4x64xf32>
    %567 = vector.shape_cast %566 : vector<1x1x4x64xf32> to vector<4x64xf32>
    %c2_371 = arith.constant 2 : index
    %c0_372 = arith.constant 0 : index
    %c0_373 = arith.constant 0 : index
    %568 = vector.load %arg8[%c2_371, %c0_372, %c0_373] : memref<4x64x64xf32, #tpu.memory_space<vmem>>, vector<1x64x64xf32>
    %569 = vector.shape_cast %568 : vector<1x64x64xf32> to vector<64x64xf32>
    %cst_374 = arith.constant dense<0.000000e+00> : vector<4x64xf32>
    %570 = tpu.matmul %567, %569, %cst_374 {dimension_numbers = #tpu.dot_dimension_numbers<[1], [0], [0], [1], [0, 0, 1, 1], [], []>} : vector<4x64xf32>, vector<64x64xf32>, vector<4x64xf32> -> vector<4x64xf32>
    %c0_375 = arith.constant 0 : index
    %c3_376 = arith.constant 3 : index
    %c0_377 = arith.constant 0 : index
    %c0_378 = arith.constant 0 : index
    %571 = vector.load %arg4[%c0_375, %c3_376, %c0_377, %c0_378] : memref<4x4x4x64xf32, #tpu.memory_space<vmem>>, vector<1x1x4x64xf32>
    %572 = vector.shape_cast %571 : vector<1x1x4x64xf32> to vector<4x64xf32>
    %c3_379 = arith.constant 3 : index
    %c0_380 = arith.constant 0 : index
    %c0_381 = arith.constant 0 : index
    %573 = vector.load %arg8[%c3_379, %c0_380, %c0_381] : memref<4x64x64xf32, #tpu.memory_space<vmem>>, vector<1x64x64xf32>
    %574 = vector.shape_cast %573 : vector<1x64x64xf32> to vector<64x64xf32>
    %cst_382 = arith.constant dense<0.000000e+00> : vector<4x64xf32>
    %575 = tpu.matmul %572, %574, %cst_382 {dimension_numbers = #tpu.dot_dimension_numbers<[1], [0], [0], [1], [0, 0, 1, 1], [], []>} : vector<4x64xf32>, vector<64x64xf32>, vector<4x64xf32> -> vector<4x64xf32>
    %c3_383 = arith.constant 3 : index
    %c0_384 = arith.constant 0 : index
    %c0_385 = arith.constant 0 : index
    %576 = vector.load %arg2[%c3_383, %c0_384, %c0_385] : memref<9x64x64xf32, #tpu.memory_space<vmem>>, vector<1x64x64xf32>
    %577 = vector.shape_cast %576 : vector<1x64x64xf32> to vector<64x64xf32>
    %cst_386 = arith.constant dense<0.000000e+00> : vector<4x64xf32>
    %578 = tpu.matmul %575, %577, %cst_386 {dimension_numbers = #tpu.dot_dimension_numbers<[1], [0], [0], [1], [0, 0, 1, 1], [], []>} : vector<4x64xf32>, vector<64x64xf32>, vector<4x64xf32> -> vector<4x64xf32>
    %579 = arith.addf %570, %578 : vector<4x64xf32>
    %c2_387 = arith.constant 2 : index
    %c1_388 = arith.constant 1 : index
    %c0_389 = arith.constant 0 : index
    %c0_390 = arith.constant 0 : index
    %580 = vector.load %arg4[%c2_387, %c1_388, %c0_389, %c0_390] : memref<4x4x4x64xf32, #tpu.memory_space<vmem>>, vector<1x1x4x64xf32>
    %581 = vector.shape_cast %580 : vector<1x1x4x64xf32> to vector<4x64xf32>
    %c0_391 = arith.constant 0 : index
    %c0_392 = arith.constant 0 : index
    %c0_393 = arith.constant 0 : index
    %582 = vector.load %arg8[%c0_391, %c0_392, %c0_393] : memref<4x64x64xf32, #tpu.memory_space<vmem>>, vector<1x64x64xf32>
    %583 = vector.shape_cast %582 : vector<1x64x64xf32> to vector<64x64xf32>
    %cst_394 = arith.constant dense<0.000000e+00> : vector<4x64xf32>
    %584 = tpu.matmul %581, %583, %cst_394 {dimension_numbers = #tpu.dot_dimension_numbers<[1], [0], [0], [1], [0, 0, 1, 1], [], []>} : vector<4x64xf32>, vector<64x64xf32>, vector<4x64xf32> -> vector<4x64xf32>
    %585 = arith.addf %579, %584 : vector<4x64xf32>
    %c2_395 = arith.constant 2 : index
    %c3_396 = arith.constant 3 : index
    %c0_397 = arith.constant 0 : index
    %c0_398 = arith.constant 0 : index
    %586 = vector.load %arg4[%c2_395, %c3_396, %c0_397, %c0_398] : memref<4x4x4x64xf32, #tpu.memory_space<vmem>>, vector<1x1x4x64xf32>
    %587 = vector.shape_cast %586 : vector<1x1x4x64xf32> to vector<4x64xf32>
    %c1_399 = arith.constant 1 : index
    %c0_400 = arith.constant 0 : index
    %c0_401 = arith.constant 0 : index
    %588 = vector.load %arg8[%c1_399, %c0_400, %c0_401] : memref<4x64x64xf32, #tpu.memory_space<vmem>>, vector<1x64x64xf32>
    %589 = vector.shape_cast %588 : vector<1x64x64xf32> to vector<64x64xf32>
    %cst_402 = arith.constant dense<0.000000e+00> : vector<4x64xf32>
    %590 = tpu.matmul %587, %589, %cst_402 {dimension_numbers = #tpu.dot_dimension_numbers<[1], [0], [0], [1], [0, 0, 1, 1], [], []>} : vector<4x64xf32>, vector<64x64xf32>, vector<4x64xf32> -> vector<4x64xf32>
    %c3_403 = arith.constant 3 : index
    %c0_404 = arith.constant 0 : index
    %c0_405 = arith.constant 0 : index
    %591 = vector.load %arg2[%c3_403, %c0_404, %c0_405] : memref<9x64x64xf32, #tpu.memory_space<vmem>>, vector<1x64x64xf32>
    %592 = vector.shape_cast %591 : vector<1x64x64xf32> to vector<64x64xf32>
    %cst_406 = arith.constant dense<0.000000e+00> : vector<4x64xf32>
    %593 = tpu.matmul %590, %592, %cst_406 {dimension_numbers = #tpu.dot_dimension_numbers<[1], [0], [0], [1], [0, 0, 1, 1], [], []>} : vector<4x64xf32>, vector<64x64xf32>, vector<4x64xf32> -> vector<4x64xf32>
    %594 = arith.addf %585, %593 : vector<4x64xf32>
    %595 = vector.broadcast %423 : vector<4x1xf32> to vector<4x64xf32>
    %596 = arith.addf %594, %595 : vector<4x64xf32>
    %c0_407 = arith.constant 0 : index
    %c0_408 = arith.constant 0 : index
    %c256 = arith.constant 256 : index
    %597 = vector.load %arg7[%c0_407, %c0_408, %c256] : memref<1x4x1024xf32, #tpu.memory_space<vmem>>, vector<1x4x64xf32>
    %598 = vector.shape_cast %597 : vector<1x4x64xf32> to vector<4x64xf32>
    %599 = vector.shape_cast %596 : vector<4x64xf32> to vector<1x4x64xf32>
    tpu.vector_store %arg7[%c0_407, %c0_408, %c256], %599 {strides = array<i32>} : memref<1x4x1024xf32, #tpu.memory_space<vmem>>, vector<1x4x64xf32>,
    %c0_409 = arith.constant 0 : index
    %c0_410 = arith.constant 0 : index
    %c0_411 = arith.constant 0 : index
    %c0_412 = arith.constant 0 : index
    %600 = vector.load %arg4[%c0_409, %c0_410, %c0_411, %c0_412] : memref<4x4x4x64xf32, #tpu.memory_space<vmem>>, vector<1x1x4x64xf32>
    %601 = vector.shape_cast %600 : vector<1x1x4x64xf32> to vector<4x64xf32>
    %c3_413 = arith.constant 3 : index
    %c0_414 = arith.constant 0 : index
    %c0_415 = arith.constant 0 : index
    %602 = vector.load %arg8[%c3_413, %c0_414, %c0_415] : memref<4x64x64xf32, #tpu.memory_space<vmem>>, vector<1x64x64xf32>
    %603 = vector.shape_cast %602 : vector<1x64x64xf32> to vector<64x64xf32>
    %cst_416 = arith.constant dense<0.000000e+00> : vector<4x64xf32>
    %604 = tpu.matmul %601, %603, %cst_416 {dimension_numbers = #tpu.dot_dimension_numbers<[1], [0], [0], [1], [0, 0, 1, 1], [], []>} : vector<4x64xf32>, vector<64x64xf32>, vector<4x64xf32> -> vector<4x64xf32>
    %c0_417 = arith.constant 0 : index
    %c2_418 = arith.constant 2 : index
    %c0_419 = arith.constant 0 : index
    %c0_420 = arith.constant 0 : index
    %605 = vector.load %arg4[%c0_417, %c2_418, %c0_419, %c0_420] : memref<4x4x4x64xf32, #tpu.memory_space<vmem>>, vector<1x1x4x64xf32>
    %606 = vector.shape_cast %605 : vector<1x1x4x64xf32> to vector<4x64xf32>
    %c2_421 = arith.constant 2 : index
    %c0_422 = arith.constant 0 : index
    %c0_423 = arith.constant 0 : index
    %607 = vector.load %arg8[%c2_421, %c0_422, %c0_423] : memref<4x64x64xf32, #tpu.memory_space<vmem>>, vector<1x64x64xf32>
    %608 = vector.shape_cast %607 : vector<1x64x64xf32> to vector<64x64xf32>
    %cst_424 = arith.constant dense<0.000000e+00> : vector<4x64xf32>
    %609 = tpu.matmul %606, %608, %cst_424 {dimension_numbers = #tpu.dot_dimension_numbers<[1], [0], [0], [1], [0, 0, 1, 1], [], []>} : vector<4x64xf32>, vector<64x64xf32>, vector<4x64xf32> -> vector<4x64xf32>
    %610 = arith.addf %604, %609 : vector<4x64xf32>
    %c2_425 = arith.constant 2 : index
    %c0_426 = arith.constant 0 : index
    %c0_427 = arith.constant 0 : index
    %c0_428 = arith.constant 0 : index
    %611 = vector.load %arg4[%c2_425, %c0_426, %c0_427, %c0_428] : memref<4x4x4x64xf32, #tpu.memory_space<vmem>>, vector<1x1x4x64xf32>
    %612 = vector.shape_cast %611 : vector<1x1x4x64xf32> to vector<4x64xf32>
    %c1_429 = arith.constant 1 : index
    %c0_430 = arith.constant 0 : index
    %c0_431 = arith.constant 0 : index
    %613 = vector.load %arg8[%c1_429, %c0_430, %c0_431] : memref<4x64x64xf32, #tpu.memory_space<vmem>>, vector<1x64x64xf32>
    %614 = vector.shape_cast %613 : vector<1x64x64xf32> to vector<64x64xf32>
    %cst_432 = arith.constant dense<0.000000e+00> : vector<4x64xf32>
    %615 = tpu.matmul %612, %614, %cst_432 {dimension_numbers = #tpu.dot_dimension_numbers<[1], [0], [0], [1], [0, 0, 1, 1], [], []>} : vector<4x64xf32>, vector<64x64xf32>, vector<4x64xf32> -> vector<4x64xf32>
    %616 = arith.addf %610, %615 : vector<4x64xf32>
    %c2_433 = arith.constant 2 : index
    %c2_434 = arith.constant 2 : index
    %c0_435 = arith.constant 0 : index
    %c0_436 = arith.constant 0 : index
    %617 = vector.load %arg4[%c2_433, %c2_434, %c0_435, %c0_436] : memref<4x4x4x64xf32, #tpu.memory_space<vmem>>, vector<1x1x4x64xf32>
    %618 = vector.shape_cast %617 : vector<1x1x4x64xf32> to vector<4x64xf32>
    %c0_437 = arith.constant 0 : index
    %c0_438 = arith.constant 0 : index
    %c0_439 = arith.constant 0 : index
    %619 = vector.load %arg8[%c0_437, %c0_438, %c0_439] : memref<4x64x64xf32, #tpu.memory_space<vmem>>, vector<1x64x64xf32>
    %620 = vector.shape_cast %619 : vector<1x64x64xf32> to vector<64x64xf32>
    %cst_440 = arith.constant dense<0.000000e+00> : vector<4x64xf32>
    %621 = tpu.matmul %618, %620, %cst_440 {dimension_numbers = #tpu.dot_dimension_numbers<[1], [0], [0], [1], [0, 0, 1, 1], [], []>} : vector<4x64xf32>, vector<64x64xf32>, vector<4x64xf32> -> vector<4x64xf32>
    %622 = arith.addf %616, %621 : vector<4x64xf32>
    %623 = vector.broadcast %423 : vector<4x1xf32> to vector<4x64xf32>
    %624 = arith.addf %622, %623 : vector<4x64xf32>
    %c0_441 = arith.constant 0 : index
    %c0_442 = arith.constant 0 : index
    %c320 = arith.constant 320 : index
    %625 = vector.load %arg7[%c0_441, %c0_442, %c320] : memref<1x4x1024xf32, #tpu.memory_space<vmem>>, vector<1x4x64xf32>
    %626 = vector.shape_cast %625 : vector<1x4x64xf32> to vector<4x64xf32>
    %627 = vector.shape_cast %624 : vector<4x64xf32> to vector<1x4x64xf32>
    tpu.vector_store %arg7[%c0_441, %c0_442, %c320], %627 {strides = array<i32>} : memref<1x4x1024xf32, #tpu.memory_space<vmem>>, vector<1x4x64xf32>,
    %c0_443 = arith.constant 0 : index
    %c1_444 = arith.constant 1 : index
    %c0_445 = arith.constant 0 : index
    %c0_446 = arith.constant 0 : index
    %628 = vector.load %arg4[%c0_443, %c1_444, %c0_445, %c0_446] : memref<4x4x4x64xf32, #tpu.memory_space<vmem>>, vector<1x1x4x64xf32>
    %629 = vector.shape_cast %628 : vector<1x1x4x64xf32> to vector<4x64xf32>
    %c3_447 = arith.constant 3 : index
    %c0_448 = arith.constant 0 : index
    %c0_449 = arith.constant 0 : index
    %630 = vector.load %arg8[%c3_447, %c0_448, %c0_449] : memref<4x64x64xf32, #tpu.memory_space<vmem>>, vector<1x64x64xf32>
    %631 = vector.shape_cast %630 : vector<1x64x64xf32> to vector<64x64xf32>
    %cst_450 = arith.constant dense<0.000000e+00> : vector<4x64xf32>
    %632 = tpu.matmul %629, %631, %cst_450 {dimension_numbers = #tpu.dot_dimension_numbers<[1], [0], [0], [1], [0, 0, 1, 1], [], []>} : vector<4x64xf32>, vector<64x64xf32>, vector<4x64xf32> -> vector<4x64xf32>
    %c0_451 = arith.constant 0 : index
    %c3_452 = arith.constant 3 : index
    %c0_453 = arith.constant 0 : index
    %c0_454 = arith.constant 0 : index
    %633 = vector.load %arg4[%c0_451, %c3_452, %c0_453, %c0_454] : memref<4x4x4x64xf32, #tpu.memory_space<vmem>>, vector<1x1x4x64xf32>
    %634 = vector.shape_cast %633 : vector<1x1x4x64xf32> to vector<4x64xf32>
    %c2_455 = arith.constant 2 : index
    %c0_456 = arith.constant 0 : index
    %c0_457 = arith.constant 0 : index
    %635 = vector.load %arg8[%c2_455, %c0_456, %c0_457] : memref<4x64x64xf32, #tpu.memory_space<vmem>>, vector<1x64x64xf32>
    %636 = vector.shape_cast %635 : vector<1x64x64xf32> to vector<64x64xf32>
    %cst_458 = arith.constant dense<0.000000e+00> : vector<4x64xf32>
    %637 = tpu.matmul %634, %636, %cst_458 {dimension_numbers = #tpu.dot_dimension_numbers<[1], [0], [0], [1], [0, 0, 1, 1], [], []>} : vector<4x64xf32>, vector<64x64xf32>, vector<4x64xf32> -> vector<4x64xf32>
    %638 = arith.addf %632, %637 : vector<4x64xf32>
    %c2_459 = arith.constant 2 : index
    %c1_460 = arith.constant 1 : index
    %c0_461 = arith.constant 0 : index
    %c0_462 = arith.constant 0 : index
    %639 = vector.load %arg4[%c2_459, %c1_460, %c0_461, %c0_462] : memref<4x4x4x64xf32, #tpu.memory_space<vmem>>, vector<1x1x4x64xf32>
    %640 = vector.shape_cast %639 : vector<1x1x4x64xf32> to vector<4x64xf32>
    %c1_463 = arith.constant 1 : index
    %c0_464 = arith.constant 0 : index
    %c0_465 = arith.constant 0 : index
    %641 = vector.load %arg8[%c1_463, %c0_464, %c0_465] : memref<4x64x64xf32, #tpu.memory_space<vmem>>, vector<1x64x64xf32>
    %642 = vector.shape_cast %641 : vector<1x64x64xf32> to vector<64x64xf32>
    %cst_466 = arith.constant dense<0.000000e+00> : vector<4x64xf32>
    %643 = tpu.matmul %640, %642, %cst_466 {dimension_numbers = #tpu.dot_dimension_numbers<[1], [0], [0], [1], [0, 0, 1, 1], [], []>} : vector<4x64xf32>, vector<64x64xf32>, vector<4x64xf32> -> vector<4x64xf32>
    %644 = arith.addf %638, %643 : vector<4x64xf32>
    %c2_467 = arith.constant 2 : index
    %c3_468 = arith.constant 3 : index
    %c0_469 = arith.constant 0 : index
    %c0_470 = arith.constant 0 : index
    %645 = vector.load %arg4[%c2_467, %c3_468, %c0_469, %c0_470] : memref<4x4x4x64xf32, #tpu.memory_space<vmem>>, vector<1x1x4x64xf32>
    %646 = vector.shape_cast %645 : vector<1x1x4x64xf32> to vector<4x64xf32>
    %c0_471 = arith.constant 0 : index
    %c0_472 = arith.constant 0 : index
    %c0_473 = arith.constant 0 : index
    %647 = vector.load %arg8[%c0_471, %c0_472, %c0_473] : memref<4x64x64xf32, #tpu.memory_space<vmem>>, vector<1x64x64xf32>
    %648 = vector.shape_cast %647 : vector<1x64x64xf32> to vector<64x64xf32>
    %cst_474 = arith.constant dense<0.000000e+00> : vector<4x64xf32>
    %649 = tpu.matmul %646, %648, %cst_474 {dimension_numbers = #tpu.dot_dimension_numbers<[1], [0], [0], [1], [0, 0, 1, 1], [], []>} : vector<4x64xf32>, vector<64x64xf32>, vector<4x64xf32> -> vector<4x64xf32>
    %650 = arith.addf %644, %649 : vector<4x64xf32>
    %651 = vector.broadcast %423 : vector<4x1xf32> to vector<4x64xf32>
    %652 = arith.addf %650, %651 : vector<4x64xf32>
    %c0_475 = arith.constant 0 : index
    %c0_476 = arith.constant 0 : index
    %c384 = arith.constant 384 : index
    %653 = vector.load %arg7[%c0_475, %c0_476, %c384] : memref<1x4x1024xf32, #tpu.memory_space<vmem>>, vector<1x4x64xf32>
    %654 = vector.shape_cast %653 : vector<1x4x64xf32> to vector<4x64xf32>
    %655 = vector.shape_cast %652 : vector<4x64xf32> to vector<1x4x64xf32>
    tpu.vector_store %arg7[%c0_475, %c0_476, %c384], %655 {strides = array<i32>} : memref<1x4x1024xf32, #tpu.memory_space<vmem>>, vector<1x4x64xf32>,
    %c0_477 = arith.constant 0 : index
    %c0_478 = arith.constant 0 : index
    %c0_479 = arith.constant 0 : index
    %c0_480 = arith.constant 0 : index
    %656 = vector.load %arg4[%c0_477, %c0_478, %c0_479, %c0_480] : memref<4x4x4x64xf32, #tpu.memory_space<vmem>>, vector<1x1x4x64xf32>
    %657 = vector.shape_cast %656 : vector<1x1x4x64xf32> to vector<4x64xf32>
    %c2_481 = arith.constant 2 : index
    %c0_482 = arith.constant 0 : index
    %c0_483 = arith.constant 0 : index
    %658 = vector.load %arg8[%c2_481, %c0_482, %c0_483] : memref<4x64x64xf32, #tpu.memory_space<vmem>>, vector<1x64x64xf32>
    %659 = vector.shape_cast %658 : vector<1x64x64xf32> to vector<64x64xf32>
    %cst_484 = arith.constant dense<0.000000e+00> : vector<4x64xf32>
    %660 = tpu.matmul %657, %659, %cst_484 {dimension_numbers = #tpu.dot_dimension_numbers<[1], [0], [0], [1], [0, 0, 1, 1], [], []>} : vector<4x64xf32>, vector<64x64xf32>, vector<4x64xf32> -> vector<4x64xf32>
    %c5_485 = arith.constant 5 : index
    %c0_486 = arith.constant 0 : index
    %c0_487 = arith.constant 0 : index
    %661 = vector.load %arg2[%c5_485, %c0_486, %c0_487] : memref<9x64x64xf32, #tpu.memory_space<vmem>>, vector<1x64x64xf32>
    %662 = vector.shape_cast %661 : vector<1x64x64xf32> to vector<64x64xf32>
    %cst_488 = arith.constant dense<0.000000e+00> : vector<4x64xf32>
    %663 = tpu.matmul %660, %662, %cst_488 {dimension_numbers = #tpu.dot_dimension_numbers<[1], [0], [0], [1], [0, 0, 1, 1], [], []>} : vector<4x64xf32>, vector<64x64xf32>, vector<4x64xf32> -> vector<4x64xf32>
    %c0_489 = arith.constant 0 : index
    %c2_490 = arith.constant 2 : index
    %c0_491 = arith.constant 0 : index
    %c0_492 = arith.constant 0 : index
    %664 = vector.load %arg4[%c0_489, %c2_490, %c0_491, %c0_492] : memref<4x4x4x64xf32, #tpu.memory_space<vmem>>, vector<1x1x4x64xf32>
    %665 = vector.shape_cast %664 : vector<1x1x4x64xf32> to vector<4x64xf32>
    %c3_493 = arith.constant 3 : index
    %c0_494 = arith.constant 0 : index
    %c0_495 = arith.constant 0 : index
    %666 = vector.load %arg8[%c3_493, %c0_494, %c0_495] : memref<4x64x64xf32, #tpu.memory_space<vmem>>, vector<1x64x64xf32>
    %667 = vector.shape_cast %666 : vector<1x64x64xf32> to vector<64x64xf32>
    %cst_496 = arith.constant dense<0.000000e+00> : vector<4x64xf32>
    %668 = tpu.matmul %665, %667, %cst_496 {dimension_numbers = #tpu.dot_dimension_numbers<[1], [0], [0], [1], [0, 0, 1, 1], [], []>} : vector<4x64xf32>, vector<64x64xf32>, vector<4x64xf32> -> vector<4x64xf32>
    %669 = arith.addf %663, %668 : vector<4x64xf32>
    %c2_497 = arith.constant 2 : index
    %c0_498 = arith.constant 0 : index
    %c0_499 = arith.constant 0 : index
    %c0_500 = arith.constant 0 : index
    %670 = vector.load %arg4[%c2_497, %c0_498, %c0_499, %c0_500] : memref<4x4x4x64xf32, #tpu.memory_space<vmem>>, vector<1x1x4x64xf32>
    %671 = vector.shape_cast %670 : vector<1x1x4x64xf32> to vector<4x64xf32>
    %c0_501 = arith.constant 0 : index
    %c0_502 = arith.constant 0 : index
    %c0_503 = arith.constant 0 : index
    %672 = vector.load %arg8[%c0_501, %c0_502, %c0_503] : memref<4x64x64xf32, #tpu.memory_space<vmem>>, vector<1x64x64xf32>
    %673 = vector.shape_cast %672 : vector<1x64x64xf32> to vector<64x64xf32>
    %cst_504 = arith.constant dense<0.000000e+00> : vector<4x64xf32>
    %674 = tpu.matmul %671, %673, %cst_504 {dimension_numbers = #tpu.dot_dimension_numbers<[1], [0], [0], [1], [0, 0, 1, 1], [], []>} : vector<4x64xf32>, vector<64x64xf32>, vector<4x64xf32> -> vector<4x64xf32>
    %c5_505 = arith.constant 5 : index
    %c0_506 = arith.constant 0 : index
    %c0_507 = arith.constant 0 : index
    %675 = vector.load %arg2[%c5_505, %c0_506, %c0_507] : memref<9x64x64xf32, #tpu.memory_space<vmem>>, vector<1x64x64xf32>
    %676 = vector.shape_cast %675 : vector<1x64x64xf32> to vector<64x64xf32>
    %cst_508 = arith.constant dense<0.000000e+00> : vector<4x64xf32>
    %677 = tpu.matmul %674, %676, %cst_508 {dimension_numbers = #tpu.dot_dimension_numbers<[1], [0], [0], [1], [0, 0, 1, 1], [], []>} : vector<4x64xf32>, vector<64x64xf32>, vector<4x64xf32> -> vector<4x64xf32>
    %678 = arith.addf %669, %677 : vector<4x64xf32>
    %c2_509 = arith.constant 2 : index
    %c2_510 = arith.constant 2 : index
    %c0_511 = arith.constant 0 : index
    %c0_512 = arith.constant 0 : index
    %679 = vector.load %arg4[%c2_509, %c2_510, %c0_511, %c0_512] : memref<4x4x4x64xf32, #tpu.memory_space<vmem>>, vector<1x1x4x64xf32>
    %680 = vector.shape_cast %679 : vector<1x1x4x64xf32> to vector<4x64xf32>
    %c1_513 = arith.constant 1 : index
    %c0_514 = arith.constant 0 : index
    %c0_515 = arith.constant 0 : index
    %681 = vector.load %arg8[%c1_513, %c0_514, %c0_515] : memref<4x64x64xf32, #tpu.memory_space<vmem>>, vector<1x64x64xf32>
    %682 = vector.shape_cast %681 : vector<1x64x64xf32> to vector<64x64xf32>
    %cst_516 = arith.constant dense<0.000000e+00> : vector<4x64xf32>
    %683 = tpu.matmul %680, %682, %cst_516 {dimension_numbers = #tpu.dot_dimension_numbers<[1], [0], [0], [1], [0, 0, 1, 1], [], []>} : vector<4x64xf32>, vector<64x64xf32>, vector<4x64xf32> -> vector<4x64xf32>
    %684 = arith.addf %678, %683 : vector<4x64xf32>
    %685 = vector.broadcast %423 : vector<4x1xf32> to vector<4x64xf32>
    %686 = arith.addf %684, %685 : vector<4x64xf32>
    %c0_517 = arith.constant 0 : index
    %c0_518 = arith.constant 0 : index
    %c448 = arith.constant 448 : index
    %687 = vector.load %arg7[%c0_517, %c0_518, %c448] : memref<1x4x1024xf32, #tpu.memory_space<vmem>>, vector<1x4x64xf32>
    %688 = vector.shape_cast %687 : vector<1x4x64xf32> to vector<4x64xf32>
    %689 = vector.shape_cast %686 : vector<4x64xf32> to vector<1x4x64xf32>
    tpu.vector_store %arg7[%c0_517, %c0_518, %c448], %689 {strides = array<i32>} : memref<1x4x1024xf32, #tpu.memory_space<vmem>>, vector<1x4x64xf32>,
    %c1_519 = arith.constant 1 : index
    %c1_520 = arith.constant 1 : index
    %c0_521 = arith.constant 0 : index
    %c0_522 = arith.constant 0 : index
    %690 = vector.load %arg4[%c1_519, %c1_520, %c0_521, %c0_522] : memref<4x4x4x64xf32, #tpu.memory_space<vmem>>, vector<1x1x4x64xf32>
    %691 = vector.shape_cast %690 : vector<1x1x4x64xf32> to vector<4x64xf32>
    %c2_523 = arith.constant 2 : index
    %c0_524 = arith.constant 0 : index
    %c0_525 = arith.constant 0 : index
    %692 = vector.load %arg8[%c2_523, %c0_524, %c0_525] : memref<4x64x64xf32, #tpu.memory_space<vmem>>, vector<1x64x64xf32>
    %693 = vector.shape_cast %692 : vector<1x64x64xf32> to vector<64x64xf32>
    %cst_526 = arith.constant dense<0.000000e+00> : vector<4x64xf32>
    %694 = tpu.matmul %691, %693, %cst_526 {dimension_numbers = #tpu.dot_dimension_numbers<[1], [0], [0], [1], [0, 0, 1, 1], [], []>} : vector<4x64xf32>, vector<64x64xf32>, vector<4x64xf32> -> vector<4x64xf32>
    %c1_527 = arith.constant 1 : index
    %c3_528 = arith.constant 3 : index
    %c0_529 = arith.constant 0 : index
    %c0_530 = arith.constant 0 : index
    %695 = vector.load %arg4[%c1_527, %c3_528, %c0_529, %c0_530] : memref<4x4x4x64xf32, #tpu.memory_space<vmem>>, vector<1x1x4x64xf32>
    %696 = vector.shape_cast %695 : vector<1x1x4x64xf32> to vector<4x64xf32>
    %c3_531 = arith.constant 3 : index
    %c0_532 = arith.constant 0 : index
    %c0_533 = arith.constant 0 : index
    %697 = vector.load %arg8[%c3_531, %c0_532, %c0_533] : memref<4x64x64xf32, #tpu.memory_space<vmem>>, vector<1x64x64xf32>
    %698 = vector.shape_cast %697 : vector<1x64x64xf32> to vector<64x64xf32>
    %cst_534 = arith.constant dense<0.000000e+00> : vector<4x64xf32>
    %699 = tpu.matmul %696, %698, %cst_534 {dimension_numbers = #tpu.dot_dimension_numbers<[1], [0], [0], [1], [0, 0, 1, 1], [], []>} : vector<4x64xf32>, vector<64x64xf32>, vector<4x64xf32> -> vector<4x64xf32>
    %c3_535 = arith.constant 3 : index
    %c0_536 = arith.constant 0 : index
    %c0_537 = arith.constant 0 : index
    %700 = vector.load %arg2[%c3_535, %c0_536, %c0_537] : memref<9x64x64xf32, #tpu.memory_space<vmem>>, vector<1x64x64xf32>
    %701 = vector.shape_cast %700 : vector<1x64x64xf32> to vector<64x64xf32>
    %cst_538 = arith.constant dense<0.000000e+00> : vector<4x64xf32>
    %702 = tpu.matmul %699, %701, %cst_538 {dimension_numbers = #tpu.dot_dimension_numbers<[1], [0], [0], [1], [0, 0, 1, 1], [], []>} : vector<4x64xf32>, vector<64x64xf32>, vector<4x64xf32> -> vector<4x64xf32>
    %703 = arith.addf %694, %702 : vector<4x64xf32>
    %c3_539 = arith.constant 3 : index
    %c1_540 = arith.constant 1 : index
    %c0_541 = arith.constant 0 : index
    %c0_542 = arith.constant 0 : index
    %704 = vector.load %arg4[%c3_539, %c1_540, %c0_541, %c0_542] : memref<4x4x4x64xf32, #tpu.memory_space<vmem>>, vector<1x1x4x64xf32>
    %705 = vector.shape_cast %704 : vector<1x1x4x64xf32> to vector<4x64xf32>
    %c0_543 = arith.constant 0 : index
    %c0_544 = arith.constant 0 : index
    %c0_545 = arith.constant 0 : index
    %706 = vector.load %arg8[%c0_543, %c0_544, %c0_545] : memref<4x64x64xf32, #tpu.memory_space<vmem>>, vector<1x64x64xf32>
    %707 = vector.shape_cast %706 : vector<1x64x64xf32> to vector<64x64xf32>
    %cst_546 = arith.constant dense<0.000000e+00> : vector<4x64xf32>
    %708 = tpu.matmul %705, %707, %cst_546 {dimension_numbers = #tpu.dot_dimension_numbers<[1], [0], [0], [1], [0, 0, 1, 1], [], []>} : vector<4x64xf32>, vector<64x64xf32>, vector<4x64xf32> -> vector<4x64xf32>
    %709 = arith.addf %703, %708 : vector<4x64xf32>
    %c3_547 = arith.constant 3 : index
    %c3_548 = arith.constant 3 : index
    %c0_549 = arith.constant 0 : index
    %c0_550 = arith.constant 0 : index
    %710 = vector.load %arg4[%c3_547, %c3_548, %c0_549, %c0_550] : memref<4x4x4x64xf32, #tpu.memory_space<vmem>>, vector<1x1x4x64xf32>
    %711 = vector.shape_cast %710 : vector<1x1x4x64xf32> to vector<4x64xf32>
    %c1_551 = arith.constant 1 : index
    %c0_552 = arith.constant 0 : index
    %c0_553 = arith.constant 0 : index
    %712 = vector.load %arg8[%c1_551, %c0_552, %c0_553] : memref<4x64x64xf32, #tpu.memory_space<vmem>>, vector<1x64x64xf32>
    %713 = vector.shape_cast %712 : vector<1x64x64xf32> to vector<64x64xf32>
    %cst_554 = arith.constant dense<0.000000e+00> : vector<4x64xf32>
    %714 = tpu.matmul %711, %713, %cst_554 {dimension_numbers = #tpu.dot_dimension_numbers<[1], [0], [0], [1], [0, 0, 1, 1], [], []>} : vector<4x64xf32>, vector<64x64xf32>, vector<4x64xf32> -> vector<4x64xf32>
    %c3_555 = arith.constant 3 : index
    %c0_556 = arith.constant 0 : index
    %c0_557 = arith.constant 0 : index
    %715 = vector.load %arg2[%c3_555, %c0_556, %c0_557] : memref<9x64x64xf32, #tpu.memory_space<vmem>>, vector<1x64x64xf32>
    %716 = vector.shape_cast %715 : vector<1x64x64xf32> to vector<64x64xf32>
    %cst_558 = arith.constant dense<0.000000e+00> : vector<4x64xf32>
    %717 = tpu.matmul %714, %716, %cst_558 {dimension_numbers = #tpu.dot_dimension_numbers<[1], [0], [0], [1], [0, 0, 1, 1], [], []>} : vector<4x64xf32>, vector<64x64xf32>, vector<4x64xf32> -> vector<4x64xf32>
    %718 = arith.addf %709, %717 : vector<4x64xf32>
    %719 = vector.broadcast %423 : vector<4x1xf32> to vector<4x64xf32>
    %720 = arith.addf %718, %719 : vector<4x64xf32>
    %c0_559 = arith.constant 0 : index
    %c0_560 = arith.constant 0 : index
    %c512 = arith.constant 512 : index
    %721 = vector.load %arg7[%c0_559, %c0_560, %c512] : memref<1x4x1024xf32, #tpu.memory_space<vmem>>, vector<1x4x64xf32>
    %722 = vector.shape_cast %721 : vector<1x4x64xf32> to vector<4x64xf32>
    %723 = vector.shape_cast %720 : vector<4x64xf32> to vector<1x4x64xf32>
    tpu.vector_store %arg7[%c0_559, %c0_560, %c512], %723 {strides = array<i32>} : memref<1x4x1024xf32, #tpu.memory_space<vmem>>, vector<1x4x64xf32>,
    %c1_561 = arith.constant 1 : index
    %c0_562 = arith.constant 0 : index
    %c0_563 = arith.constant 0 : index
    %c0_564 = arith.constant 0 : index
    %724 = vector.load %arg4[%c1_561, %c0_562, %c0_563, %c0_564] : memref<4x4x4x64xf32, #tpu.memory_space<vmem>>, vector<1x1x4x64xf32>
    %725 = vector.shape_cast %724 : vector<1x1x4x64xf32> to vector<4x64xf32>
    %c3_565 = arith.constant 3 : index
    %c0_566 = arith.constant 0 : index
    %c0_567 = arith.constant 0 : index
    %726 = vector.load %arg8[%c3_565, %c0_566, %c0_567] : memref<4x64x64xf32, #tpu.memory_space<vmem>>, vector<1x64x64xf32>
    %727 = vector.shape_cast %726 : vector<1x64x64xf32> to vector<64x64xf32>
    %cst_568 = arith.constant dense<0.000000e+00> : vector<4x64xf32>
    %728 = tpu.matmul %725, %727, %cst_568 {dimension_numbers = #tpu.dot_dimension_numbers<[1], [0], [0], [1], [0, 0, 1, 1], [], []>} : vector<4x64xf32>, vector<64x64xf32>, vector<4x64xf32> -> vector<4x64xf32>
    %c1_569 = arith.constant 1 : index
    %c2_570 = arith.constant 2 : index
    %c0_571 = arith.constant 0 : index
    %c0_572 = arith.constant 0 : index
    %729 = vector.load %arg4[%c1_569, %c2_570, %c0_571, %c0_572] : memref<4x4x4x64xf32, #tpu.memory_space<vmem>>, vector<1x1x4x64xf32>
    %730 = vector.shape_cast %729 : vector<1x1x4x64xf32> to vector<4x64xf32>
    %c2_573 = arith.constant 2 : index
    %c0_574 = arith.constant 0 : index
    %c0_575 = arith.constant 0 : index
    %731 = vector.load %arg8[%c2_573, %c0_574, %c0_575] : memref<4x64x64xf32, #tpu.memory_space<vmem>>, vector<1x64x64xf32>
    %732 = vector.shape_cast %731 : vector<1x64x64xf32> to vector<64x64xf32>
    %cst_576 = arith.constant dense<0.000000e+00> : vector<4x64xf32>
    %733 = tpu.matmul %730, %732, %cst_576 {dimension_numbers = #tpu.dot_dimension_numbers<[1], [0], [0], [1], [0, 0, 1, 1], [], []>} : vector<4x64xf32>, vector<64x64xf32>, vector<4x64xf32> -> vector<4x64xf32>
    %734 = arith.addf %728, %733 : vector<4x64xf32>
    %c3_577 = arith.constant 3 : index
    %c0_578 = arith.constant 0 : index
    %c0_579 = arith.constant 0 : index
    %c0_580 = arith.constant 0 : index
    %735 = vector.load %arg4[%c3_577, %c0_578, %c0_579, %c0_580] : memref<4x4x4x64xf32, #tpu.memory_space<vmem>>, vector<1x1x4x64xf32>
    %736 = vector.shape_cast %735 : vector<1x1x4x64xf32> to vector<4x64xf32>
    %c1_581 = arith.constant 1 : index
    %c0_582 = arith.constant 0 : index
    %c0_583 = arith.constant 0 : index
    %737 = vector.load %arg8[%c1_581, %c0_582, %c0_583] : memref<4x64x64xf32, #tpu.memory_space<vmem>>, vector<1x64x64xf32>
    %738 = vector.shape_cast %737 : vector<1x64x64xf32> to vector<64x64xf32>
    %cst_584 = arith.constant dense<0.000000e+00> : vector<4x64xf32>
    %739 = tpu.matmul %736, %738, %cst_584 {dimension_numbers = #tpu.dot_dimension_numbers<[1], [0], [0], [1], [0, 0, 1, 1], [], []>} : vector<4x64xf32>, vector<64x64xf32>, vector<4x64xf32> -> vector<4x64xf32>
    %740 = arith.addf %734, %739 : vector<4x64xf32>
    %c3_585 = arith.constant 3 : index
    %c2_586 = arith.constant 2 : index
    %c0_587 = arith.constant 0 : index
    %c0_588 = arith.constant 0 : index
    %741 = vector.load %arg4[%c3_585, %c2_586, %c0_587, %c0_588] : memref<4x4x4x64xf32, #tpu.memory_space<vmem>>, vector<1x1x4x64xf32>
    %742 = vector.shape_cast %741 : vector<1x1x4x64xf32> to vector<4x64xf32>
    %c0_589 = arith.constant 0 : index
    %c0_590 = arith.constant 0 : index
    %c0_591 = arith.constant 0 : index
    %743 = vector.load %arg8[%c0_589, %c0_590, %c0_591] : memref<4x64x64xf32, #tpu.memory_space<vmem>>, vector<1x64x64xf32>
    %744 = vector.shape_cast %743 : vector<1x64x64xf32> to vector<64x64xf32>
    %cst_592 = arith.constant dense<0.000000e+00> : vector<4x64xf32>
    %745 = tpu.matmul %742, %744, %cst_592 {dimension_numbers = #tpu.dot_dimension_numbers<[1], [0], [0], [1], [0, 0, 1, 1], [], []>} : vector<4x64xf32>, vector<64x64xf32>, vector<4x64xf32> -> vector<4x64xf32>
    %746 = arith.addf %740, %745 : vector<4x64xf32>
    %747 = vector.broadcast %423 : vector<4x1xf32> to vector<4x64xf32>
    %748 = arith.addf %746, %747 : vector<4x64xf32>
    %c0_593 = arith.constant 0 : index
    %c0_594 = arith.constant 0 : index
    %c576 = arith.constant 576 : index
    %749 = vector.load %arg7[%c0_593, %c0_594, %c576] : memref<1x4x1024xf32, #tpu.memory_space<vmem>>, vector<1x4x64xf32>
    %750 = vector.shape_cast %749 : vector<1x4x64xf32> to vector<4x64xf32>
    %751 = vector.shape_cast %748 : vector<4x64xf32> to vector<1x4x64xf32>
    tpu.vector_store %arg7[%c0_593, %c0_594, %c576], %751 {strides = array<i32>} : memref<1x4x1024xf32, #tpu.memory_space<vmem>>, vector<1x4x64xf32>,
    %c1_595 = arith.constant 1 : index
    %c1_596 = arith.constant 1 : index
    %c0_597 = arith.constant 0 : index
    %c0_598 = arith.constant 0 : index
    %752 = vector.load %arg4[%c1_595, %c1_596, %c0_597, %c0_598] : memref<4x4x4x64xf32, #tpu.memory_space<vmem>>, vector<1x1x4x64xf32>
    %753 = vector.shape_cast %752 : vector<1x1x4x64xf32> to vector<4x64xf32>
    %c3_599 = arith.constant 3 : index
    %c0_600 = arith.constant 0 : index
    %c0_601 = arith.constant 0 : index
    %754 = vector.load %arg8[%c3_599, %c0_600, %c0_601] : memref<4x64x64xf32, #tpu.memory_space<vmem>>, vector<1x64x64xf32>
    %755 = vector.shape_cast %754 : vector<1x64x64xf32> to vector<64x64xf32>
    %cst_602 = arith.constant dense<0.000000e+00> : vector<4x64xf32>
    %756 = tpu.matmul %753, %755, %cst_602 {dimension_numbers = #tpu.dot_dimension_numbers<[1], [0], [0], [1], [0, 0, 1, 1], [], []>} : vector<4x64xf32>, vector<64x64xf32>, vector<4x64xf32> -> vector<4x64xf32>
    %c1_603 = arith.constant 1 : index
    %c3_604 = arith.constant 3 : index
    %c0_605 = arith.constant 0 : index
    %c0_606 = arith.constant 0 : index
    %757 = vector.load %arg4[%c1_603, %c3_604, %c0_605, %c0_606] : memref<4x4x4x64xf32, #tpu.memory_space<vmem>>, vector<1x1x4x64xf32>
    %758 = vector.shape_cast %757 : vector<1x1x4x64xf32> to vector<4x64xf32>
    %c2_607 = arith.constant 2 : index
    %c0_608 = arith.constant 0 : index
    %c0_609 = arith.constant 0 : index
    %759 = vector.load %arg8[%c2_607, %c0_608, %c0_609] : memref<4x64x64xf32, #tpu.memory_space<vmem>>, vector<1x64x64xf32>
    %760 = vector.shape_cast %759 : vector<1x64x64xf32> to vector<64x64xf32>
    %cst_610 = arith.constant dense<0.000000e+00> : vector<4x64xf32>
    %761 = tpu.matmul %758, %760, %cst_610 {dimension_numbers = #tpu.dot_dimension_numbers<[1], [0], [0], [1], [0, 0, 1, 1], [], []>} : vector<4x64xf32>, vector<64x64xf32>, vector<4x64xf32> -> vector<4x64xf32>
    %762 = arith.addf %756, %761 : vector<4x64xf32>
    %c3_611 = arith.constant 3 : index
    %c1_612 = arith.constant 1 : index
    %c0_613 = arith.constant 0 : index
    %c0_614 = arith.constant 0 : index
    %763 = vector.load %arg4[%c3_611, %c1_612, %c0_613, %c0_614] : memref<4x4x4x64xf32, #tpu.memory_space<vmem>>, vector<1x1x4x64xf32>
    %764 = vector.shape_cast %763 : vector<1x1x4x64xf32> to vector<4x64xf32>
    %c1_615 = arith.constant 1 : index
    %c0_616 = arith.constant 0 : index
    %c0_617 = arith.constant 0 : index
    %765 = vector.load %arg8[%c1_615, %c0_616, %c0_617] : memref<4x64x64xf32, #tpu.memory_space<vmem>>, vector<1x64x64xf32>
    %766 = vector.shape_cast %765 : vector<1x64x64xf32> to vector<64x64xf32>
    %cst_618 = arith.constant dense<0.000000e+00> : vector<4x64xf32>
    %767 = tpu.matmul %764, %766, %cst_618 {dimension_numbers = #tpu.dot_dimension_numbers<[1], [0], [0], [1], [0, 0, 1, 1], [], []>} : vector<4x64xf32>, vector<64x64xf32>, vector<4x64xf32> -> vector<4x64xf32>
    %768 = arith.addf %762, %767 : vector<4x64xf32>
    %c3_619 = arith.constant 3 : index
    %c3_620 = arith.constant 3 : index
    %c0_621 = arith.constant 0 : index
    %c0_622 = arith.constant 0 : index
    %769 = vector.load %arg4[%c3_619, %c3_620, %c0_621, %c0_622] : memref<4x4x4x64xf32, #tpu.memory_space<vmem>>, vector<1x1x4x64xf32>
    %770 = vector.shape_cast %769 : vector<1x1x4x64xf32> to vector<4x64xf32>
    %c0_623 = arith.constant 0 : index
    %c0_624 = arith.constant 0 : index
    %c0_625 = arith.constant 0 : index
    %771 = vector.load %arg8[%c0_623, %c0_624, %c0_625] : memref<4x64x64xf32, #tpu.memory_space<vmem>>, vector<1x64x64xf32>
    %772 = vector.shape_cast %771 : vector<1x64x64xf32> to vector<64x64xf32>
    %cst_626 = arith.constant dense<0.000000e+00> : vector<4x64xf32>
    %773 = tpu.matmul %770, %772, %cst_626 {dimension_numbers = #tpu.dot_dimension_numbers<[1], [0], [0], [1], [0, 0, 1, 1], [], []>} : vector<4x64xf32>, vector<64x64xf32>, vector<4x64xf32> -> vector<4x64xf32>
    %774 = arith.addf %768, %773 : vector<4x64xf32>
    %775 = vector.broadcast %423 : vector<4x1xf32> to vector<4x64xf32>
    %776 = arith.addf %774, %775 : vector<4x64xf32>
    %c0_627 = arith.constant 0 : index
    %c0_628 = arith.constant 0 : index
    %c640 = arith.constant 640 : index
    %777 = vector.load %arg7[%c0_627, %c0_628, %c640] : memref<1x4x1024xf32, #tpu.memory_space<vmem>>, vector<1x4x64xf32>
    %778 = vector.shape_cast %777 : vector<1x4x64xf32> to vector<4x64xf32>
    %779 = vector.shape_cast %776 : vector<4x64xf32> to vector<1x4x64xf32>
    tpu.vector_store %arg7[%c0_627, %c0_628, %c640], %779 {strides = array<i32>} : memref<1x4x1024xf32, #tpu.memory_space<vmem>>, vector<1x4x64xf32>,
    %c1_629 = arith.constant 1 : index
    %c0_630 = arith.constant 0 : index
    %c0_631 = arith.constant 0 : index
    %c0_632 = arith.constant 0 : index
    %780 = vector.load %arg4[%c1_629, %c0_630, %c0_631, %c0_632] : memref<4x4x4x64xf32, #tpu.memory_space<vmem>>, vector<1x1x4x64xf32>
    %781 = vector.shape_cast %780 : vector<1x1x4x64xf32> to vector<4x64xf32>
    %c2_633 = arith.constant 2 : index
    %c0_634 = arith.constant 0 : index
    %c0_635 = arith.constant 0 : index
    %782 = vector.load %arg8[%c2_633, %c0_634, %c0_635] : memref<4x64x64xf32, #tpu.memory_space<vmem>>, vector<1x64x64xf32>
    %783 = vector.shape_cast %782 : vector<1x64x64xf32> to vector<64x64xf32>
    %cst_636 = arith.constant dense<0.000000e+00> : vector<4x64xf32>
    %784 = tpu.matmul %781, %783, %cst_636 {dimension_numbers = #tpu.dot_dimension_numbers<[1], [0], [0], [1], [0, 0, 1, 1], [], []>} : vector<4x64xf32>, vector<64x64xf32>, vector<4x64xf32> -> vector<4x64xf32>
    %c5_637 = arith.constant 5 : index
    %c0_638 = arith.constant 0 : index
    %c0_639 = arith.constant 0 : index
    %785 = vector.load %arg2[%c5_637, %c0_638, %c0_639] : memref<9x64x64xf32, #tpu.memory_space<vmem>>, vector<1x64x64xf32>
    %786 = vector.shape_cast %785 : vector<1x64x64xf32> to vector<64x64xf32>
    %cst_640 = arith.constant dense<0.000000e+00> : vector<4x64xf32>
    %787 = tpu.matmul %784, %786, %cst_640 {dimension_numbers = #tpu.dot_dimension_numbers<[1], [0], [0], [1], [0, 0, 1, 1], [], []>} : vector<4x64xf32>, vector<64x64xf32>, vector<4x64xf32> -> vector<4x64xf32>
    %c1_641 = arith.constant 1 : index
    %c2_642 = arith.constant 2 : index
    %c0_643 = arith.constant 0 : index
    %c0_644 = arith.constant 0 : index
    %788 = vector.load %arg4[%c1_641, %c2_642, %c0_643, %c0_644] : memref<4x4x4x64xf32, #tpu.memory_space<vmem>>, vector<1x1x4x64xf32>
    %789 = vector.shape_cast %788 : vector<1x1x4x64xf32> to vector<4x64xf32>
    %c3_645 = arith.constant 3 : index
    %c0_646 = arith.constant 0 : index
    %c0_647 = arith.constant 0 : index
    %790 = vector.load %arg8[%c3_645, %c0_646, %c0_647] : memref<4x64x64xf32, #tpu.memory_space<vmem>>, vector<1x64x64xf32>
    %791 = vector.shape_cast %790 : vector<1x64x64xf32> to vector<64x64xf32>
    %cst_648 = arith.constant dense<0.000000e+00> : vector<4x64xf32>
    %792 = tpu.matmul %789, %791, %cst_648 {dimension_numbers = #tpu.dot_dimension_numbers<[1], [0], [0], [1], [0, 0, 1, 1], [], []>} : vector<4x64xf32>, vector<64x64xf32>, vector<4x64xf32> -> vector<4x64xf32>
    %793 = arith.addf %787, %792 : vector<4x64xf32>
    %c3_649 = arith.constant 3 : index
    %c0_650 = arith.constant 0 : index
    %c0_651 = arith.constant 0 : index
    %c0_652 = arith.constant 0 : index
    %794 = vector.load %arg4[%c3_649, %c0_650, %c0_651, %c0_652] : memref<4x4x4x64xf32, #tpu.memory_space<vmem>>, vector<1x1x4x64xf32>
    %795 = vector.shape_cast %794 : vector<1x1x4x64xf32> to vector<4x64xf32>
    %c0_653 = arith.constant 0 : index
    %c0_654 = arith.constant 0 : index
    %c0_655 = arith.constant 0 : index
    %796 = vector.load %arg8[%c0_653, %c0_654, %c0_655] : memref<4x64x64xf32, #tpu.memory_space<vmem>>, vector<1x64x64xf32>
    %797 = vector.shape_cast %796 : vector<1x64x64xf32> to vector<64x64xf32>
    %cst_656 = arith.constant dense<0.000000e+00> : vector<4x64xf32>
    %798 = tpu.matmul %795, %797, %cst_656 {dimension_numbers = #tpu.dot_dimension_numbers<[1], [0], [0], [1], [0, 0, 1, 1], [], []>} : vector<4x64xf32>, vector<64x64xf32>, vector<4x64xf32> -> vector<4x64xf32>
    %c5_657 = arith.constant 5 : index
    %c0_658 = arith.constant 0 : index
    %c0_659 = arith.constant 0 : index
    %799 = vector.load %arg2[%c5_657, %c0_658, %c0_659] : memref<9x64x64xf32, #tpu.memory_space<vmem>>, vector<1x64x64xf32>
    %800 = vector.shape_cast %799 : vector<1x64x64xf32> to vector<64x64xf32>
    %cst_660 = arith.constant dense<0.000000e+00> : vector<4x64xf32>
    %801 = tpu.matmul %798, %800, %cst_660 {dimension_numbers = #tpu.dot_dimension_numbers<[1], [0], [0], [1], [0, 0, 1, 1], [], []>} : vector<4x64xf32>, vector<64x64xf32>, vector<4x64xf32> -> vector<4x64xf32>
    %802 = arith.addf %793, %801 : vector<4x64xf32>
    %c3_661 = arith.constant 3 : index
    %c2_662 = arith.constant 2 : index
    %c0_663 = arith.constant 0 : index
    %c0_664 = arith.constant 0 : index
    %803 = vector.load %arg4[%c3_661, %c2_662, %c0_663, %c0_664] : memref<4x4x4x64xf32, #tpu.memory_space<vmem>>, vector<1x1x4x64xf32>
    %804 = vector.shape_cast %803 : vector<1x1x4x64xf32> to vector<4x64xf32>
    %c1_665 = arith.constant 1 : index
    %c0_666 = arith.constant 0 : index
    %c0_667 = arith.constant 0 : index
    %805 = vector.load %arg8[%c1_665, %c0_666, %c0_667] : memref<4x64x64xf32, #tpu.memory_space<vmem>>, vector<1x64x64xf32>
    %806 = vector.shape_cast %805 : vector<1x64x64xf32> to vector<64x64xf32>
    %cst_668 = arith.constant dense<0.000000e+00> : vector<4x64xf32>
    %807 = tpu.matmul %804, %806, %cst_668 {dimension_numbers = #tpu.dot_dimension_numbers<[1], [0], [0], [1], [0, 0, 1, 1], [], []>} : vector<4x64xf32>, vector<64x64xf32>, vector<4x64xf32> -> vector<4x64xf32>
    %808 = arith.addf %802, %807 : vector<4x64xf32>
    %809 = vector.broadcast %423 : vector<4x1xf32> to vector<4x64xf32>
    %810 = arith.addf %808, %809 : vector<4x64xf32>
    %c0_669 = arith.constant 0 : index
    %c0_670 = arith.constant 0 : index
    %c704 = arith.constant 704 : index
    %811 = vector.load %arg7[%c0_669, %c0_670, %c704] : memref<1x4x1024xf32, #tpu.memory_space<vmem>>, vector<1x4x64xf32>
    %812 = vector.shape_cast %811 : vector<1x4x64xf32> to vector<4x64xf32>
    %813 = vector.shape_cast %810 : vector<4x64xf32> to vector<1x4x64xf32>
    tpu.vector_store %arg7[%c0_669, %c0_670, %c704], %813 {strides = array<i32>} : memref<1x4x1024xf32, #tpu.memory_space<vmem>>, vector<1x4x64xf32>,
    %c0_671 = arith.constant 0 : index
    %c1_672 = arith.constant 1 : index
    %c0_673 = arith.constant 0 : index
    %c0_674 = arith.constant 0 : index
    %814 = vector.load %arg4[%c0_671, %c1_672, %c0_673, %c0_674] : memref<4x4x4x64xf32, #tpu.memory_space<vmem>>, vector<1x1x4x64xf32>
    %815 = vector.shape_cast %814 : vector<1x1x4x64xf32> to vector<4x64xf32>
    %c0_675 = arith.constant 0 : index
    %c0_676 = arith.constant 0 : index
    %c0_677 = arith.constant 0 : index
    %816 = vector.load %arg8[%c0_675, %c0_676, %c0_677] : memref<4x64x64xf32, #tpu.memory_space<vmem>>, vector<1x64x64xf32>
    %817 = vector.shape_cast %816 : vector<1x64x64xf32> to vector<64x64xf32>
    %cst_678 = arith.constant dense<0.000000e+00> : vector<4x64xf32>
    %818 = tpu.matmul %815, %817, %cst_678 {dimension_numbers = #tpu.dot_dimension_numbers<[1], [0], [0], [1], [0, 0, 1, 1], [], []>} : vector<4x64xf32>, vector<64x64xf32>, vector<4x64xf32> -> vector<4x64xf32>
    %c7_679 = arith.constant 7 : index
    %c0_680 = arith.constant 0 : index
    %c0_681 = arith.constant 0 : index
    %819 = vector.load %arg2[%c7_679, %c0_680, %c0_681] : memref<9x64x64xf32, #tpu.memory_space<vmem>>, vector<1x64x64xf32>
    %820 = vector.shape_cast %819 : vector<1x64x64xf32> to vector<64x64xf32>
    %cst_682 = arith.constant dense<0.000000e+00> : vector<4x64xf32>
    %821 = tpu.matmul %818, %820, %cst_682 {dimension_numbers = #tpu.dot_dimension_numbers<[1], [0], [0], [1], [0, 0, 1, 1], [], []>} : vector<4x64xf32>, vector<64x64xf32>, vector<4x64xf32> -> vector<4x64xf32>
    %c0_683 = arith.constant 0 : index
    %c3_684 = arith.constant 3 : index
    %c0_685 = arith.constant 0 : index
    %c0_686 = arith.constant 0 : index
    %822 = vector.load %arg4[%c0_683, %c3_684, %c0_685, %c0_686] : memref<4x4x4x64xf32, #tpu.memory_space<vmem>>, vector<1x1x4x64xf32>
    %823 = vector.shape_cast %822 : vector<1x1x4x64xf32> to vector<4x64xf32>
    %c1_687 = arith.constant 1 : index
    %c0_688 = arith.constant 0 : index
    %c0_689 = arith.constant 0 : index
    %824 = vector.load %arg8[%c1_687, %c0_688, %c0_689] : memref<4x64x64xf32, #tpu.memory_space<vmem>>, vector<1x64x64xf32>
    %825 = vector.shape_cast %824 : vector<1x64x64xf32> to vector<64x64xf32>
    %cst_690 = arith.constant dense<0.000000e+00> : vector<4x64xf32>
    %826 = tpu.matmul %823, %825, %cst_690 {dimension_numbers = #tpu.dot_dimension_numbers<[1], [0], [0], [1], [0, 0, 1, 1], [], []>} : vector<4x64xf32>, vector<64x64xf32>, vector<4x64xf32> -> vector<4x64xf32>
    %c6_691 = arith.constant 6 : index
    %c0_692 = arith.constant 0 : index
    %c0_693 = arith.constant 0 : index
    %827 = vector.load %arg2[%c6_691, %c0_692, %c0_693] : memref<9x64x64xf32, #tpu.memory_space<vmem>>, vector<1x64x64xf32>
    %828 = vector.shape_cast %827 : vector<1x64x64xf32> to vector<64x64xf32>
    %cst_694 = arith.constant dense<0.000000e+00> : vector<4x64xf32>
    %829 = tpu.matmul %826, %828, %cst_694 {dimension_numbers = #tpu.dot_dimension_numbers<[1], [0], [0], [1], [0, 0, 1, 1], [], []>} : vector<4x64xf32>, vector<64x64xf32>, vector<4x64xf32> -> vector<4x64xf32>
    %830 = arith.addf %821, %829 : vector<4x64xf32>
    %c2_695 = arith.constant 2 : index
    %c1_696 = arith.constant 1 : index
    %c0_697 = arith.constant 0 : index
    %c0_698 = arith.constant 0 : index
    %831 = vector.load %arg4[%c2_695, %c1_696, %c0_697, %c0_698] : memref<4x4x4x64xf32, #tpu.memory_space<vmem>>, vector<1x1x4x64xf32>
    %832 = vector.shape_cast %831 : vector<1x1x4x64xf32> to vector<4x64xf32>
    %c2_699 = arith.constant 2 : index
    %c0_700 = arith.constant 0 : index
    %c0_701 = arith.constant 0 : index
    %833 = vector.load %arg8[%c2_699, %c0_700, %c0_701] : memref<4x64x64xf32, #tpu.memory_space<vmem>>, vector<1x64x64xf32>
    %834 = vector.shape_cast %833 : vector<1x64x64xf32> to vector<64x64xf32>
    %cst_702 = arith.constant dense<0.000000e+00> : vector<4x64xf32>
    %835 = tpu.matmul %832, %834, %cst_702 {dimension_numbers = #tpu.dot_dimension_numbers<[1], [0], [0], [1], [0, 0, 1, 1], [], []>} : vector<4x64xf32>, vector<64x64xf32>, vector<4x64xf32> -> vector<4x64xf32>
    %836 = arith.addf %830, %835 : vector<4x64xf32>
    %c2_703 = arith.constant 2 : index
    %c3_704 = arith.constant 3 : index
    %c0_705 = arith.constant 0 : index
    %c0_706 = arith.constant 0 : index
    %837 = vector.load %arg4[%c2_703, %c3_704, %c0_705, %c0_706] : memref<4x4x4x64xf32, #tpu.memory_space<vmem>>, vector<1x1x4x64xf32>
    %838 = vector.shape_cast %837 : vector<1x1x4x64xf32> to vector<4x64xf32>
    %c3_707 = arith.constant 3 : index
    %c0_708 = arith.constant 0 : index
    %c0_709 = arith.constant 0 : index
    %839 = vector.load %arg8[%c3_707, %c0_708, %c0_709] : memref<4x64x64xf32, #tpu.memory_space<vmem>>, vector<1x64x64xf32>
    %840 = vector.shape_cast %839 : vector<1x64x64xf32> to vector<64x64xf32>
    %cst_710 = arith.constant dense<0.000000e+00> : vector<4x64xf32>
    %841 = tpu.matmul %838, %840, %cst_710 {dimension_numbers = #tpu.dot_dimension_numbers<[1], [0], [0], [1], [0, 0, 1, 1], [], []>} : vector<4x64xf32>, vector<64x64xf32>, vector<4x64xf32> -> vector<4x64xf32>
    %c3_711 = arith.constant 3 : index
    %c0_712 = arith.constant 0 : index
    %c0_713 = arith.constant 0 : index
    %842 = vector.load %arg2[%c3_711, %c0_712, %c0_713] : memref<9x64x64xf32, #tpu.memory_space<vmem>>, vector<1x64x64xf32>
    %843 = vector.shape_cast %842 : vector<1x64x64xf32> to vector<64x64xf32>
    %cst_714 = arith.constant dense<0.000000e+00> : vector<4x64xf32>
    %844 = tpu.matmul %841, %843, %cst_714 {dimension_numbers = #tpu.dot_dimension_numbers<[1], [0], [0], [1], [0, 0, 1, 1], [], []>} : vector<4x64xf32>, vector<64x64xf32>, vector<4x64xf32> -> vector<4x64xf32>
    %845 = arith.addf %836, %844 : vector<4x64xf32>
    %846 = vector.broadcast %423 : vector<4x1xf32> to vector<4x64xf32>
    %847 = arith.addf %845, %846 : vector<4x64xf32>
    %c0_715 = arith.constant 0 : index
    %c0_716 = arith.constant 0 : index
    %c768 = arith.constant 768 : index
    %848 = vector.load %arg7[%c0_715, %c0_716, %c768] : memref<1x4x1024xf32, #tpu.memory_space<vmem>>, vector<1x4x64xf32>
    %849 = vector.shape_cast %848 : vector<1x4x64xf32> to vector<4x64xf32>
    %850 = vector.shape_cast %847 : vector<4x64xf32> to vector<1x4x64xf32>
    tpu.vector_store %arg7[%c0_715, %c0_716, %c768], %850 {strides = array<i32>} : memref<1x4x1024xf32, #tpu.memory_space<vmem>>, vector<1x4x64xf32>,
    %c0_717 = arith.constant 0 : index
    %c0_718 = arith.constant 0 : index
    %c0_719 = arith.constant 0 : index
    %c0_720 = arith.constant 0 : index
    %851 = vector.load %arg4[%c0_717, %c0_718, %c0_719, %c0_720] : memref<4x4x4x64xf32, #tpu.memory_space<vmem>>, vector<1x1x4x64xf32>
    %852 = vector.shape_cast %851 : vector<1x1x4x64xf32> to vector<4x64xf32>
    %c1_721 = arith.constant 1 : index
    %c0_722 = arith.constant 0 : index
    %c0_723 = arith.constant 0 : index
    %853 = vector.load %arg8[%c1_721, %c0_722, %c0_723] : memref<4x64x64xf32, #tpu.memory_space<vmem>>, vector<1x64x64xf32>
    %854 = vector.shape_cast %853 : vector<1x64x64xf32> to vector<64x64xf32>
    %cst_724 = arith.constant dense<0.000000e+00> : vector<4x64xf32>
    %855 = tpu.matmul %852, %854, %cst_724 {dimension_numbers = #tpu.dot_dimension_numbers<[1], [0], [0], [1], [0, 0, 1, 1], [], []>} : vector<4x64xf32>, vector<64x64xf32>, vector<4x64xf32> -> vector<4x64xf32>
    %c7_725 = arith.constant 7 : index
    %c0_726 = arith.constant 0 : index
    %c0_727 = arith.constant 0 : index
    %856 = vector.load %arg2[%c7_725, %c0_726, %c0_727] : memref<9x64x64xf32, #tpu.memory_space<vmem>>, vector<1x64x64xf32>
    %857 = vector.shape_cast %856 : vector<1x64x64xf32> to vector<64x64xf32>
    %cst_728 = arith.constant dense<0.000000e+00> : vector<4x64xf32>
    %858 = tpu.matmul %855, %857, %cst_728 {dimension_numbers = #tpu.dot_dimension_numbers<[1], [0], [0], [1], [0, 0, 1, 1], [], []>} : vector<4x64xf32>, vector<64x64xf32>, vector<4x64xf32> -> vector<4x64xf32>
    %c0_729 = arith.constant 0 : index
    %c2_730 = arith.constant 2 : index
    %c0_731 = arith.constant 0 : index
    %c0_732 = arith.constant 0 : index
    %859 = vector.load %arg4[%c0_729, %c2_730, %c0_731, %c0_732] : memref<4x4x4x64xf32, #tpu.memory_space<vmem>>, vector<1x1x4x64xf32>
    %860 = vector.shape_cast %859 : vector<1x1x4x64xf32> to vector<4x64xf32>
    %c0_733 = arith.constant 0 : index
    %c0_734 = arith.constant 0 : index
    %c0_735 = arith.constant 0 : index
    %861 = vector.load %arg8[%c0_733, %c0_734, %c0_735] : memref<4x64x64xf32, #tpu.memory_space<vmem>>, vector<1x64x64xf32>
    %862 = vector.shape_cast %861 : vector<1x64x64xf32> to vector<64x64xf32>
    %cst_736 = arith.constant dense<0.000000e+00> : vector<4x64xf32>
    %863 = tpu.matmul %860, %862, %cst_736 {dimension_numbers = #tpu.dot_dimension_numbers<[1], [0], [0], [1], [0, 0, 1, 1], [], []>} : vector<4x64xf32>, vector<64x64xf32>, vector<4x64xf32> -> vector<4x64xf32>
    %c7_737 = arith.constant 7 : index
    %c0_738 = arith.constant 0 : index
    %c0_739 = arith.constant 0 : index
    %864 = vector.load %arg2[%c7_737, %c0_738, %c0_739] : memref<9x64x64xf32, #tpu.memory_space<vmem>>, vector<1x64x64xf32>
    %865 = vector.shape_cast %864 : vector<1x64x64xf32> to vector<64x64xf32>
    %cst_740 = arith.constant dense<0.000000e+00> : vector<4x64xf32>
    %866 = tpu.matmul %863, %865, %cst_740 {dimension_numbers = #tpu.dot_dimension_numbers<[1], [0], [0], [1], [0, 0, 1, 1], [], []>} : vector<4x64xf32>, vector<64x64xf32>, vector<4x64xf32> -> vector<4x64xf32>
    %867 = arith.addf %858, %866 : vector<4x64xf32>
    %c2_741 = arith.constant 2 : index
    %c0_742 = arith.constant 0 : index
    %c0_743 = arith.constant 0 : index
    %c0_744 = arith.constant 0 : index
    %868 = vector.load %arg4[%c2_741, %c0_742, %c0_743, %c0_744] : memref<4x4x4x64xf32, #tpu.memory_space<vmem>>, vector<1x1x4x64xf32>
    %869 = vector.shape_cast %868 : vector<1x1x4x64xf32> to vector<4x64xf32>
    %c3_745 = arith.constant 3 : index
    %c0_746 = arith.constant 0 : index
    %c0_747 = arith.constant 0 : index
    %870 = vector.load %arg8[%c3_745, %c0_746, %c0_747] : memref<4x64x64xf32, #tpu.memory_space<vmem>>, vector<1x64x64xf32>
    %871 = vector.shape_cast %870 : vector<1x64x64xf32> to vector<64x64xf32>
    %cst_748 = arith.constant dense<0.000000e+00> : vector<4x64xf32>
    %872 = tpu.matmul %869, %871, %cst_748 {dimension_numbers = #tpu.dot_dimension_numbers<[1], [0], [0], [1], [0, 0, 1, 1], [], []>} : vector<4x64xf32>, vector<64x64xf32>, vector<4x64xf32> -> vector<4x64xf32>
    %873 = arith.addf %867, %872 : vector<4x64xf32>
    %c2_749 = arith.constant 2 : index
    %c2_750 = arith.constant 2 : index
    %c0_751 = arith.constant 0 : index
    %c0_752 = arith.constant 0 : index
    %874 = vector.load %arg4[%c2_749, %c2_750, %c0_751, %c0_752] : memref<4x4x4x64xf32, #tpu.memory_space<vmem>>, vector<1x1x4x64xf32>
    %875 = vector.shape_cast %874 : vector<1x1x4x64xf32> to vector<4x64xf32>
    %c2_753 = arith.constant 2 : index
    %c0_754 = arith.constant 0 : index
    %c0_755 = arith.constant 0 : index
    %876 = vector.load %arg8[%c2_753, %c0_754, %c0_755] : memref<4x64x64xf32, #tpu.memory_space<vmem>>, vector<1x64x64xf32>
    %877 = vector.shape_cast %876 : vector<1x64x64xf32> to vector<64x64xf32>
    %cst_756 = arith.constant dense<0.000000e+00> : vector<4x64xf32>
    %878 = tpu.matmul %875, %877, %cst_756 {dimension_numbers = #tpu.dot_dimension_numbers<[1], [0], [0], [1], [0, 0, 1, 1], [], []>} : vector<4x64xf32>, vector<64x64xf32>, vector<4x64xf32> -> vector<4x64xf32>
    %879 = arith.addf %873, %878 : vector<4x64xf32>
    %880 = vector.broadcast %423 : vector<4x1xf32> to vector<4x64xf32>
    %881 = arith.addf %879, %880 : vector<4x64xf32>
    %c0_757 = arith.constant 0 : index
    %c0_758 = arith.constant 0 : index
    %c832 = arith.constant 832 : index
    %882 = vector.load %arg7[%c0_757, %c0_758, %c832] : memref<1x4x1024xf32, #tpu.memory_space<vmem>>, vector<1x4x64xf32>
    %883 = vector.shape_cast %882 : vector<1x4x64xf32> to vector<4x64xf32>
    %884 = vector.shape_cast %881 : vector<4x64xf32> to vector<1x4x64xf32>
    tpu.vector_store %arg7[%c0_757, %c0_758, %c832], %884 {strides = array<i32>} : memref<1x4x1024xf32, #tpu.memory_space<vmem>>, vector<1x4x64xf32>,
    %c0_759 = arith.constant 0 : index
    %c1_760 = arith.constant 1 : index
    %c0_761 = arith.constant 0 : index
    %c0_762 = arith.constant 0 : index
    %885 = vector.load %arg4[%c0_759, %c1_760, %c0_761, %c0_762] : memref<4x4x4x64xf32, #tpu.memory_space<vmem>>, vector<1x1x4x64xf32>
    %886 = vector.shape_cast %885 : vector<1x1x4x64xf32> to vector<4x64xf32>
    %c1_763 = arith.constant 1 : index
    %c0_764 = arith.constant 0 : index
    %c0_765 = arith.constant 0 : index
    %887 = vector.load %arg8[%c1_763, %c0_764, %c0_765] : memref<4x64x64xf32, #tpu.memory_space<vmem>>, vector<1x64x64xf32>
    %888 = vector.shape_cast %887 : vector<1x64x64xf32> to vector<64x64xf32>
    %cst_766 = arith.constant dense<0.000000e+00> : vector<4x64xf32>
    %889 = tpu.matmul %886, %888, %cst_766 {dimension_numbers = #tpu.dot_dimension_numbers<[1], [0], [0], [1], [0, 0, 1, 1], [], []>} : vector<4x64xf32>, vector<64x64xf32>, vector<4x64xf32> -> vector<4x64xf32>
    %c7_767 = arith.constant 7 : index
    %c0_768 = arith.constant 0 : index
    %c0_769 = arith.constant 0 : index
    %890 = vector.load %arg2[%c7_767, %c0_768, %c0_769] : memref<9x64x64xf32, #tpu.memory_space<vmem>>, vector<1x64x64xf32>
    %891 = vector.shape_cast %890 : vector<1x64x64xf32> to vector<64x64xf32>
    %cst_770 = arith.constant dense<0.000000e+00> : vector<4x64xf32>
    %892 = tpu.matmul %889, %891, %cst_770 {dimension_numbers = #tpu.dot_dimension_numbers<[1], [0], [0], [1], [0, 0, 1, 1], [], []>} : vector<4x64xf32>, vector<64x64xf32>, vector<4x64xf32> -> vector<4x64xf32>
    %c0_771 = arith.constant 0 : index
    %c3_772 = arith.constant 3 : index
    %c0_773 = arith.constant 0 : index
    %c0_774 = arith.constant 0 : index
    %893 = vector.load %arg4[%c0_771, %c3_772, %c0_773, %c0_774] : memref<4x4x4x64xf32, #tpu.memory_space<vmem>>, vector<1x1x4x64xf32>
    %894 = vector.shape_cast %893 : vector<1x1x4x64xf32> to vector<4x64xf32>
    %c0_775 = arith.constant 0 : index
    %c0_776 = arith.constant 0 : index
    %c0_777 = arith.constant 0 : index
    %895 = vector.load %arg8[%c0_775, %c0_776, %c0_777] : memref<4x64x64xf32, #tpu.memory_space<vmem>>, vector<1x64x64xf32>
    %896 = vector.shape_cast %895 : vector<1x64x64xf32> to vector<64x64xf32>
    %cst_778 = arith.constant dense<0.000000e+00> : vector<4x64xf32>
    %897 = tpu.matmul %894, %896, %cst_778 {dimension_numbers = #tpu.dot_dimension_numbers<[1], [0], [0], [1], [0, 0, 1, 1], [], []>} : vector<4x64xf32>, vector<64x64xf32>, vector<4x64xf32> -> vector<4x64xf32>
    %c7_779 = arith.constant 7 : index
    %c0_780 = arith.constant 0 : index
    %c0_781 = arith.constant 0 : index
    %898 = vector.load %arg2[%c7_779, %c0_780, %c0_781] : memref<9x64x64xf32, #tpu.memory_space<vmem>>, vector<1x64x64xf32>
    %899 = vector.shape_cast %898 : vector<1x64x64xf32> to vector<64x64xf32>
    %cst_782 = arith.constant dense<0.000000e+00> : vector<4x64xf32>
    %900 = tpu.matmul %897, %899, %cst_782 {dimension_numbers = #tpu.dot_dimension_numbers<[1], [0], [0], [1], [0, 0, 1, 1], [], []>} : vector<4x64xf32>, vector<64x64xf32>, vector<4x64xf32> -> vector<4x64xf32>
    %901 = arith.addf %892, %900 : vector<4x64xf32>
    %c2_783 = arith.constant 2 : index
    %c1_784 = arith.constant 1 : index
    %c0_785 = arith.constant 0 : index
    %c0_786 = arith.constant 0 : index
    %902 = vector.load %arg4[%c2_783, %c1_784, %c0_785, %c0_786] : memref<4x4x4x64xf32, #tpu.memory_space<vmem>>, vector<1x1x4x64xf32>
    %903 = vector.shape_cast %902 : vector<1x1x4x64xf32> to vector<4x64xf32>
    %c3_787 = arith.constant 3 : index
    %c0_788 = arith.constant 0 : index
    %c0_789 = arith.constant 0 : index
    %904 = vector.load %arg8[%c3_787, %c0_788, %c0_789] : memref<4x64x64xf32, #tpu.memory_space<vmem>>, vector<1x64x64xf32>
    %905 = vector.shape_cast %904 : vector<1x64x64xf32> to vector<64x64xf32>
    %cst_790 = arith.constant dense<0.000000e+00> : vector<4x64xf32>
    %906 = tpu.matmul %903, %905, %cst_790 {dimension_numbers = #tpu.dot_dimension_numbers<[1], [0], [0], [1], [0, 0, 1, 1], [], []>} : vector<4x64xf32>, vector<64x64xf32>, vector<4x64xf32> -> vector<4x64xf32>
    %907 = arith.addf %901, %906 : vector<4x64xf32>
    %c2_791 = arith.constant 2 : index
    %c3_792 = arith.constant 3 : index
    %c0_793 = arith.constant 0 : index
    %c0_794 = arith.constant 0 : index
    %908 = vector.load %arg4[%c2_791, %c3_792, %c0_793, %c0_794] : memref<4x4x4x64xf32, #tpu.memory_space<vmem>>, vector<1x1x4x64xf32>
    %909 = vector.shape_cast %908 : vector<1x1x4x64xf32> to vector<4x64xf32>
    %c2_795 = arith.constant 2 : index
    %c0_796 = arith.constant 0 : index
    %c0_797 = arith.constant 0 : index
    %910 = vector.load %arg8[%c2_795, %c0_796, %c0_797] : memref<4x64x64xf32, #tpu.memory_space<vmem>>, vector<1x64x64xf32>
    %911 = vector.shape_cast %910 : vector<1x64x64xf32> to vector<64x64xf32>
    %cst_798 = arith.constant dense<0.000000e+00> : vector<4x64xf32>
    %912 = tpu.matmul %909, %911, %cst_798 {dimension_numbers = #tpu.dot_dimension_numbers<[1], [0], [0], [1], [0, 0, 1, 1], [], []>} : vector<4x64xf32>, vector<64x64xf32>, vector<4x64xf32> -> vector<4x64xf32>
    %913 = arith.addf %907, %912 : vector<4x64xf32>
    %914 = vector.broadcast %423 : vector<4x1xf32> to vector<4x64xf32>
    %915 = arith.addf %913, %914 : vector<4x64xf32>
    %c0_799 = arith.constant 0 : index
    %c0_800 = arith.constant 0 : index
    %c896 = arith.constant 896 : index
    %916 = vector.load %arg7[%c0_799, %c0_800, %c896] : memref<1x4x1024xf32, #tpu.memory_space<vmem>>, vector<1x4x64xf32>
    %917 = vector.shape_cast %916 : vector<1x4x64xf32> to vector<4x64xf32>
    %918 = vector.shape_cast %915 : vector<4x64xf32> to vector<1x4x64xf32>
    tpu.vector_store %arg7[%c0_799, %c0_800, %c896], %918 {strides = array<i32>} : memref<1x4x1024xf32, #tpu.memory_space<vmem>>, vector<1x4x64xf32>,
    %c0_801 = arith.constant 0 : index
    %c0_802 = arith.constant 0 : index
    %c0_803 = arith.constant 0 : index
    %c0_804 = arith.constant 0 : index
    %919 = vector.load %arg4[%c0_801, %c0_802, %c0_803, %c0_804] : memref<4x4x4x64xf32, #tpu.memory_space<vmem>>, vector<1x1x4x64xf32>
    %920 = vector.shape_cast %919 : vector<1x1x4x64xf32> to vector<4x64xf32>
    %c0_805 = arith.constant 0 : index
    %c0_806 = arith.constant 0 : index
    %c0_807 = arith.constant 0 : index
    %921 = vector.load %arg8[%c0_805, %c0_806, %c0_807] : memref<4x64x64xf32, #tpu.memory_space<vmem>>, vector<1x64x64xf32>
    %922 = vector.shape_cast %921 : vector<1x64x64xf32> to vector<64x64xf32>
    %cst_808 = arith.constant dense<0.000000e+00> : vector<4x64xf32>
    %923 = tpu.matmul %920, %922, %cst_808 {dimension_numbers = #tpu.dot_dimension_numbers<[1], [0], [0], [1], [0, 0, 1, 1], [], []>} : vector<4x64xf32>, vector<64x64xf32>, vector<4x64xf32> -> vector<4x64xf32>
    %c8_809 = arith.constant 8 : index
    %c0_810 = arith.constant 0 : index
    %c0_811 = arith.constant 0 : index
    %924 = vector.load %arg2[%c8_809, %c0_810, %c0_811] : memref<9x64x64xf32, #tpu.memory_space<vmem>>, vector<1x64x64xf32>
    %925 = vector.shape_cast %924 : vector<1x64x64xf32> to vector<64x64xf32>
    %cst_812 = arith.constant dense<0.000000e+00> : vector<4x64xf32>
    %926 = tpu.matmul %923, %925, %cst_812 {dimension_numbers = #tpu.dot_dimension_numbers<[1], [0], [0], [1], [0, 0, 1, 1], [], []>} : vector<4x64xf32>, vector<64x64xf32>, vector<4x64xf32> -> vector<4x64xf32>
    %c0_813 = arith.constant 0 : index
    %c2_814 = arith.constant 2 : index
    %c0_815 = arith.constant 0 : index
    %c0_816 = arith.constant 0 : index
    %927 = vector.load %arg4[%c0_813, %c2_814, %c0_815, %c0_816] : memref<4x4x4x64xf32, #tpu.memory_space<vmem>>, vector<1x1x4x64xf32>
    %928 = vector.shape_cast %927 : vector<1x1x4x64xf32> to vector<4x64xf32>
    %c1_817 = arith.constant 1 : index
    %c0_818 = arith.constant 0 : index
    %c0_819 = arith.constant 0 : index
    %929 = vector.load %arg8[%c1_817, %c0_818, %c0_819] : memref<4x64x64xf32, #tpu.memory_space<vmem>>, vector<1x64x64xf32>
    %930 = vector.shape_cast %929 : vector<1x64x64xf32> to vector<64x64xf32>
    %cst_820 = arith.constant dense<0.000000e+00> : vector<4x64xf32>
    %931 = tpu.matmul %928, %930, %cst_820 {dimension_numbers = #tpu.dot_dimension_numbers<[1], [0], [0], [1], [0, 0, 1, 1], [], []>} : vector<4x64xf32>, vector<64x64xf32>, vector<4x64xf32> -> vector<4x64xf32>
    %c7_821 = arith.constant 7 : index
    %c0_822 = arith.constant 0 : index
    %c0_823 = arith.constant 0 : index
    %932 = vector.load %arg2[%c7_821, %c0_822, %c0_823] : memref<9x64x64xf32, #tpu.memory_space<vmem>>, vector<1x64x64xf32>
    %933 = vector.shape_cast %932 : vector<1x64x64xf32> to vector<64x64xf32>
    %cst_824 = arith.constant dense<0.000000e+00> : vector<4x64xf32>
    %934 = tpu.matmul %931, %933, %cst_824 {dimension_numbers = #tpu.dot_dimension_numbers<[1], [0], [0], [1], [0, 0, 1, 1], [], []>} : vector<4x64xf32>, vector<64x64xf32>, vector<4x64xf32> -> vector<4x64xf32>
    %935 = arith.addf %926, %934 : vector<4x64xf32>
    %c2_825 = arith.constant 2 : index
    %c0_826 = arith.constant 0 : index
    %c0_827 = arith.constant 0 : index
    %c0_828 = arith.constant 0 : index
    %936 = vector.load %arg4[%c2_825, %c0_826, %c0_827, %c0_828] : memref<4x4x4x64xf32, #tpu.memory_space<vmem>>, vector<1x1x4x64xf32>
    %937 = vector.shape_cast %936 : vector<1x1x4x64xf32> to vector<4x64xf32>
    %c2_829 = arith.constant 2 : index
    %c0_830 = arith.constant 0 : index
    %c0_831 = arith.constant 0 : index
    %938 = vector.load %arg8[%c2_829, %c0_830, %c0_831] : memref<4x64x64xf32, #tpu.memory_space<vmem>>, vector<1x64x64xf32>
    %939 = vector.shape_cast %938 : vector<1x64x64xf32> to vector<64x64xf32>
    %cst_832 = arith.constant dense<0.000000e+00> : vector<4x64xf32>
    %940 = tpu.matmul %937, %939, %cst_832 {dimension_numbers = #tpu.dot_dimension_numbers<[1], [0], [0], [1], [0, 0, 1, 1], [], []>} : vector<4x64xf32>, vector<64x64xf32>, vector<4x64xf32> -> vector<4x64xf32>
    %c5_833 = arith.constant 5 : index
    %c0_834 = arith.constant 0 : index
    %c0_835 = arith.constant 0 : index
    %941 = vector.load %arg2[%c5_833, %c0_834, %c0_835] : memref<9x64x64xf32, #tpu.memory_space<vmem>>, vector<1x64x64xf32>
    %942 = vector.shape_cast %941 : vector<1x64x64xf32> to vector<64x64xf32>
    %cst_836 = arith.constant dense<0.000000e+00> : vector<4x64xf32>
    %943 = tpu.matmul %940, %942, %cst_836 {dimension_numbers = #tpu.dot_dimension_numbers<[1], [0], [0], [1], [0, 0, 1, 1], [], []>} : vector<4x64xf32>, vector<64x64xf32>, vector<4x64xf32> -> vector<4x64xf32>
    %944 = arith.addf %935, %943 : vector<4x64xf32>
    %c2_837 = arith.constant 2 : index
    %c2_838 = arith.constant 2 : index
    %c0_839 = arith.constant 0 : index
    %c0_840 = arith.constant 0 : index
    %945 = vector.load %arg4[%c2_837, %c2_838, %c0_839, %c0_840] : memref<4x4x4x64xf32, #tpu.memory_space<vmem>>, vector<1x1x4x64xf32>
    %946 = vector.shape_cast %945 : vector<1x1x4x64xf32> to vector<4x64xf32>
    %c3_841 = arith.constant 3 : index
    %c0_842 = arith.constant 0 : index
    %c0_843 = arith.constant 0 : index
    %947 = vector.load %arg8[%c3_841, %c0_842, %c0_843] : memref<4x64x64xf32, #tpu.memory_space<vmem>>, vector<1x64x64xf32>
    %948 = vector.shape_cast %947 : vector<1x64x64xf32> to vector<64x64xf32>
    %cst_844 = arith.constant dense<0.000000e+00> : vector<4x64xf32>
    %949 = tpu.matmul %946, %948, %cst_844 {dimension_numbers = #tpu.dot_dimension_numbers<[1], [0], [0], [1], [0, 0, 1, 1], [], []>} : vector<4x64xf32>, vector<64x64xf32>, vector<4x64xf32> -> vector<4x64xf32>
    %950 = arith.addf %944, %949 : vector<4x64xf32>
    %951 = vector.broadcast %423 : vector<4x1xf32> to vector<4x64xf32>
    %952 = arith.addf %950, %951 : vector<4x64xf32>
    %c0_845 = arith.constant 0 : index
    %c0_846 = arith.constant 0 : index
    %c960 = arith.constant 960 : index
    %953 = vector.load %arg7[%c0_845, %c0_846, %c960] : memref<1x4x1024xf32, #tpu.memory_space<vmem>>, vector<1x4x64xf32>
    %954 = vector.shape_cast %953 : vector<1x4x64xf32> to vector<4x64xf32>
    %955 = vector.shape_cast %952 : vector<4x64xf32> to vector<1x4x64xf32>
    tpu.vector_store %arg7[%c0_845, %c0_846, %c960], %955 {strides = array<i32>} : memref<1x4x1024xf32, #tpu.memory_space<vmem>>, vector<1x4x64xf32>,
    return
  }
  func.func @transform_0(%arg0: i32) -> (i32, i32, i32) {
    %c0_i32 = arith.constant 0 : i32
    %c0_i32_0 = arith.constant 0 : i32
    %c0_i32_1 = arith.constant 0 : i32
    return %arg0, %c0_i32, %c0_i32_0 : i32, i32, i32
  }
  func.func @transform_1(%arg0: i32) -> (i32, i32, i32) {
    %c0_i32 = arith.constant 0 : i32
    %c0_i32_0 = arith.constant 0 : i32
    %c0_i32_1 = arith.constant 0 : i32
    %c0_i32_2 = arith.constant 0 : i32
    return %c0_i32, %c0_i32_0, %c0_i32_1 : i32, i32, i32
  }
  func.func @transform_2(%arg0: i32) -> (i32, i32, i32, i32) {
    %c0_i32 = arith.constant 0 : i32
    %c0_i32_0 = arith.constant 0 : i32
    %c0_i32_1 = arith.constant 0 : i32
    %c0_i32_2 = arith.constant 0 : i32
    %c0_i32_3 = arith.constant 0 : i32
    return %c0_i32, %c0_i32_0, %c0_i32_1, %c0_i32_2 : i32, i32, i32, i32
  }
  func.func @transform_3(%arg0: i32) -> (i32, i32, i32, i32) {
    %c0_i32 = arith.constant 0 : i32
    %c0_i32_0 = arith.constant 0 : i32
    %c0_i32_1 = arith.constant 0 : i32
    %c0_i32_2 = arith.constant 0 : i32
    %c0_i32_3 = arith.constant 0 : i32
    return %c0_i32, %c0_i32_0, %c0_i32_1, %c0_i32_2 : i32, i32, i32, i32
  }
  func.func @transform_4(%arg0: i32) -> (i32, i32) {
    %c0_i32 = arith.constant 0 : i32
    %c0_i32_0 = arith.constant 0 : i32
    %c0_i32_1 = arith.constant 0 : i32
    return %c0_i32, %c0_i32_0 : i32, i32
  }
  func.func @transform_5(%arg0: i32) -> (i32, i32) {
    %c0_i32 = arith.constant 0 : i32
    %c0_i32_0 = arith.constant 0 : i32
    %c0_i32_1 = arith.constant 0 : i32
    return %c0_i32, %c0_i32_0 : i32, i32
  }
  func.func @transform_6(%arg0: i32) -> (i32, i32, i32) {
    %c0_i32 = arith.constant 0 : i32
    %c0_i32_0 = arith.constant 0 : i32
    %c0_i32_1 = arith.constant 0 : i32
    return %arg0, %c0_i32, %c0_i32_0 : i32, i32, i32
  }
}

</mosaic_0001>

<bundles_post_ra>
// kernel: grid_output_forward.1
= control target key start
LH: loop header
LB: loop body
LE: loop exit
PB: predicated region body
PF: predicated region fallthrough
CT: control target
= control target key end

     0   :  { %s6765_s21 = smov 0   ;;  %s10103_s0 = inlined_call_operand.vmem [shape: f32[4,64,64], index: 0, kind: input, shape index: {}]   ;;  %s10104_s1 = inlined_call_operand.vmem [shape: f32[9,64,64], index: 1, kind: input, shape index: {}]   ;;  %s10105_s2 = inlined_call_operand.vmem [shape: f32[4,4,64,64], index: 2, kind: input, shape index: {}]   ;;  %s10106_s3 = inlined_call_operand.vmem [shape: f32[4,4,4,64], index: 3, kind: input, shape index: {}]   ;;  %s10107_s4 = inlined_call_operand.vmem [shape: f32[64,3], index: 4, kind: input, shape index: {}]   ;;  %s10108_s5 = inlined_call_operand.vmem [shape: f32[4,1], index: 5, kind: input, shape index: {}]   ;;  %s10109_s6 = inlined_call_operand.vmem [shape: f32[4,4,1024], index: 6, kind: output, shape index: {}]  }
   0x1 LB: > { %s5908_s22 = sadd.s32 4294967295, %s6722_s21   ;;  %p5912_p0 = scmp.ge.s32.totalorder %s6722_s21, 1  ;;  %s6722_s21 = sphi %s6765_s21, %s16_s21  }
   0x2   : > { %p212_p1 = scmp.lt.s32.totalorder %s6722_s21, 5 }
   0x4   : > { %p213_p2 = pnand %p5912_p0, %p212_p1 }
   0x6   : > { %216 = sbr.rel (%p213_p2) target bundleno = 4654 (0x122e), region = 44 }
   0xb   : > { %v5940_v0 = vld [vmem:[%s10104_s1 + $0xf8] sm:$0xff]  ;;  %v5939_v2 = vld [vmem:[%s10104_s1 + $0xf0] sm:$0xff]  ;;  %p242_p3 = scmp.lt.s32.totalorder %s5908_s22, 3  ;;  %v5938_v4 = vld [vmem:[%s10104_s1 + $0xe8] sm:$0xff]  ;;  %vm295_vm0 = vcmask 523264   ;;  %vm3116_vm14 = vcmask 519168  }
   0xc   : > { %v5980_v1 = vld [vmem:[%s10104_s1 + $0x78] sm:$0xff]  ;;  %328 = vmatpush.msra.mxu0 %v5940_v0  ;;  %v5979_v3 = vld [vmem:[%s10104_s1 + $0x70] sm:$0xff]  ;;  %v5978_v5 = vld [vmem:[%s10104_s1 + $0x68] sm:$0xff]  ;;  %vm3311_vm15 = vcmask 1043968  }
   0xd   : > { %517 = vmatpush.msra.mxu3 %v5980_v1  ;;  %s10213_s22 = smov (!%p242_p3, %s5908_s22), 3  ;;  %v5937_v6 = vld [vmem:[%s10104_s1 + $0xe0] sm:$0xff]  ;;  %v5936_v8 = vld [vmem:[%s10104_s1 + $0xd8] sm:$0xff]  ;;  %v5935_v10 = vld [vmem:[%s10104_s1 + $0xd0] sm:$0xff] }
   0xe   : > { %329 = vmatpush.msra.mxu0 %v5939_v2  ;;  %v5977_v7 = vld [vmem:[%s10104_s1 + $0x60] sm:$0xff]  ;;  %v5976_v9 = vld [vmem:[%s10104_s1 + $0x58] sm:$0xff]  ;;  %s6591_s19 = sshll.u32 %s10213_s22, 6  ;;  %v5975_v11 = vld [vmem:[%s10104_s1 + $0x50] sm:$0xff] }
   0xf   : > { %518 = vmatpush.msra.mxu3 %v5979_v3  ;;  %v5934_v12 = vld [vmem:[%s10104_s1 + $0xc8] sm:$0xff]  ;;  %s6821_s8 = scalar_lea.vmem %s10103_s0, %s6591_s19  ;;  %v5933_v14 = vld [vmem:[%s10104_s1 + $0xc0] sm:$0xff]  ;;  %v5919_v39 = vld [vmem:[%s10105_s2 + $0x150] sm:$0xff] }
  0x10   : > { %330 = vmatpush.msra.mxu0 %v5938_v4  ;;  %v5974_v13 = vld [vmem:[%s10104_s1 + $0x48] sm:$0xff]  ;;  %v5973_v15 = vld [vmem:[%s10104_s1 + $0x40] sm:$0xff]  ;;  %v6844_v18 = vld [vmem:[%s6821_s8 + $0x10] sm:$0xff] }
  0x11   : > { %519 = vmatpush.msra.mxu3 %v5978_v5  ;;  %v6830_v16 = vld [vmem:[%s6821_s8] sm:$0xff]  ;;  %v6837_v17 = vld [vmem:[%s6821_s8 + $0x8] sm:$0xff]  ;;  %v6851_v19 = vld [vmem:[%s6821_s8 + $0x38] sm:$0xff] }
  0x12   : > { %331 = vmatpush.msra.mxu0 %v5937_v6  ;;  %458 = vmatpush.msra.mxu2 %v6851_v19  ;;  %v6855_v20 = vld [vmem:[%s6821_s8 + $0x30] sm:$0xff]  ;;  %v6859_v21 = vld [vmem:[%s6821_s8 + $0x28] sm:$0xff]  ;;  %v6862_v22 = vld [vmem:[%s6821_s8 + $0x18] sm:$0xff] }
  0x13   : > { %520 = vmatpush.msra.mxu3 %v5977_v7  ;;  %v6866_v23 = vld [vmem:[%s6821_s8 + $0x20] sm:$0xff]  ;;  %v5918_v36 = vld [vmem:[%s10105_s2 + $0x148] sm:$0xff]  ;;  %v5920_v42 = vld [vmem:[%s10105_s2 + $0x158] sm:$0xff] }
  0x14   : > { %332 = vmatpush.msra.mxu0 %v5936_v8  ;;  %459 = vmatpush.msra.mxu2 %v6855_v20  ;;  %v5917_v33 = vld [vmem:[%s10105_s2 + $0x140] sm:$0xff]  ;;  %v5922_v46 = vld [vmem:[%s10105_s2 + $0x168] sm:$0xff]  ;;  %v5923_v49 = vld [vmem:[%s10105_s2 + $0x170] sm:$0xff] }
  0x15   : > { %521 = vmatpush.msra.mxu3 %v5976_v9  ;;  %v5921_v44 = vld [vmem:[%s10105_s2 + $0x160] sm:$0xff]  ;;  %v5926_v48 = vld [vmem:[%s10105_s2 + $0x1c8] sm:$0xff]  ;;  %v5927_v51 = vld [vmem:[%s10105_s2 + $0x1d0] sm:$0xff] }
  0x16   : > { %333 = vmatpush.msra.mxu0 %v5935_v10  ;;  %460 = vmatpush.msra.mxu2 %v6859_v21  ;;  %v5925_v45 = vld [vmem:[%s10105_s2 + $0x1c0] sm:$0xff]  ;;  %v5966_v50 = vld [vmem:[%s10105_s2 + $0x348] sm:$0xff]  ;;  %v639_v52 = vld [vmem:[%s10104_s1 + $0x38] sm:$0xff] }
  0x17   : > { %522 = vmatpush.msra.mxu3 %v5975_v11  ;;  %v5965_v47 = vld [vmem:[%s10105_s2 + $0x340] sm:$0xff]  ;;  %v5924_v53 = vld [vmem:[%s10105_s2 + $0x178] sm:$0xff]  ;;  %v638_v54 = vld [vmem:[%s10104_s1 + $0x30] sm:$0xff] }
  0x18   : > { %334 = vmatpush.msra.mxu0 %v5934_v12  ;;  %461 = vmatpush.msra.mxu2 %v6866_v23  ;;  %v637_v55 = vld [vmem:[%s10104_s1 + $0x28] sm:$0xff]  ;;  %v5967_v56 = vld [vmem:[%s10105_s2 + $0x350] sm:$0xff]  ;;  %v5928_v57 = vld [vmem:[%s10105_s2 + $0x1d8] sm:$0xff] }
  0x19   : > { %523 = vmatpush.msra.mxu3 %v5974_v13  ;;  %v636_v58 = vld [vmem:[%s10104_s1 + $0x20] sm:$0xff]  ;;  %v635_v59 = vld [vmem:[%s10104_s1 + $0x18] sm:$0xff]  ;;  %v634_v60 = vld [vmem:[%s10104_s1 + $0x10] sm:$0xff] }
  0x1a   : > { %335 = vmatpush.msra.mxu0 %v5933_v14  ;;  %462 = vmatpush.msra.mxu2 %v6862_v22  ;;  %v633_v61 = vld [vmem:[%s10104_s1 + $0x8] sm:$0xff]  ;;  %v5968_v62 = vld [vmem:[%s10105_s2 + $0x358] sm:$0xff]  ;;  %v5929_v63 = vld [vmem:[%s10105_s2 + $0x1e0] sm:$0xff] }
  0x1b   : > { %524 = vmatpush.msra.mxu3 %v5973_v15  ;;  %5941 = vmatmul.msk.f32.vlgmr.msra.gmra.mxu0 %vm295_vm0, %v6830_v16  ;;  %v632_v0 = vld [vmem:[%s10104_s1] sm:$0xff]  ;;  %v5930_v2 = vld [vmem:[%s10105_s2 + $0x1e8] sm:$0xff]  ;;  %v5931_v4 = vld [vmem:[%s10105_s2 + $0x1f0] sm:$0xff] }
  0x1c   : > { %5981 = vmatmul.msk.f32.vlgmr.msra.gmra.mxu3 %vm295_vm0, %v6830_v16  ;;  %463 = vmatpush.msra.mxu2 %v6844_v18  ;;  %v5969_v1 = vld [vmem:[%s10105_s2 + $0x360] sm:$0xff]  ;;  %v5970_v3 = vld [vmem:[%s10105_s2 + $0x368] sm:$0xff]  ;;  %v5971_v5 = vld [vmem:[%s10105_s2 + $0x370] sm:$0xff] }
  0x1d   : > { %v5932_v6 = vld [vmem:[%s10105_s2 + $0x1f8] sm:$0xff]  ;;  %v6035_v9 = vld [vmem:[%s10104_s1 + $0x170] sm:$0xff]  ;;  %v6034_v10 = vld [vmem:[%s10104_s1 + $0x168] sm:$0xff] }
  0x1e   : > { %464 = vmatpush.msra.mxu2 %v6837_v17  ;;  %v5972_v7 = vld [vmem:[%s10105_s2 + $0x378] sm:$0xff]  ;;  %v6033_v11 = vld [vmem:[%s10104_s1 + $0x160] sm:$0xff]  ;;  %v6031_v13 = vld [vmem:[%s10104_s1 + $0x150] sm:$0xff] }
  0x1f   : > { %v6036_v8 = vld [vmem:[%s10104_s1 + $0x178] sm:$0xff]  ;;  %v6030_v14 = vld [vmem:[%s10104_s1 + $0x148] sm:$0xff]  ;;  %v6029_v15 = vld [vmem:[%s10104_s1 + $0x140] sm:$0xff] }
  0x20   : > { %465 = vmatpush.msra.mxu2 %v6830_v16  ;;  %828 = vmatpush.msrb.mxu3 %v6036_v8  ;;  %v6032_v12 = vld [vmem:[%s10104_s1 + $0x158] sm:$0xff] }
  0x21   : > { %5957 = vmatmul.msk.f32.vlgmr.msra.gmra.mxu2 %vm295_vm0, %v5917_v33  ;;  %v6000_v8 = vld [vmem:[%s10105_s2 + $0x3d8] sm:$0xff] }
  0x22   : > { %829 = vmatpush.msrb.mxu3 %v6035_v9  ;;  %v6153_v9 = vld [vmem:[%s10104_s1 + $0x1a0] sm:$0xff] }
  0x23   : > { %5942 = vmatmul.msk.f32.gmra.mxu0 %vm295_vm0, %v6837_v17 }
  0x24   : > { %5982 = vmatmul.msk.f32.gmra.mxu3 %vm295_vm0, %v6837_v17 }
  0x25   : > { %830 = vmatpush.msrb.mxu3 %v6034_v10  ;;  %v6152_v10 = vld [vmem:[%s10104_s1 + $0x198] sm:$0xff] }
  0x27   : > { %831 = vmatpush.msrb.mxu3 %v6033_v11  ;;  %v6151_v11 = vld [vmem:[%s10104_s1 + $0x190] sm:$0xff] }
  0x29   : > { %5958 = vmatmul.msk.f32.gmra.mxu2 %vm295_vm0, %v5918_v36  ;;  %832 = vmatpush.msrb.mxu3 %v6032_v12 }
  0x2b   : > { %5943 = vmatmul.msk.f32.gmra.mxu0 %vm295_vm0, %v6844_v18  ;;  %833 = vmatpush.msrb.mxu3 %v6031_v13  ;;  %v6150_v13 = vld [vmem:[%s10104_s1 + $0x188] sm:$0xff] }
  0x2c   : > { %5983 = vmatmul.msk.f32.gmra.mxu3 %vm295_vm0, %v6844_v18 }
  0x2d   : > { %834 = vmatpush.msrb.mxu3 %v6030_v14  ;;  %v6001_v14 = vld [vmem:[%s10105_s2 + $0x3e0] sm:$0xff] }
  0x2f   : > { %835 = vmatpush.msrb.mxu3 %v6029_v15  ;;  %v6149_v15 = vld [vmem:[%s10104_s1 + $0x180] sm:$0xff] }
  0x31   : > { %5959 = vmatmul.msk.f32.gmra.mxu2 %vm295_vm0, %v5919_v39 }
  0x33   : > { %5944 = vmatmul.msk.f32.gmra.mxu0 %vm295_vm0, %v6862_v22 }
  0x34   : > { %5984 = vmatmul.msk.f32.gmra.mxu3 %vm295_vm0, %v6862_v22 }
  0x39   : > { %5960 = vmatmul.msk.f32.gmra.mxu2 %vm295_vm0, %v5920_v42 }
  0x3b   : > { %5945 = vmatmul.msk.f32.gmra.mxu0 %vm295_vm0, %v6866_v23 }
  0x3c   : > { %5985 = vmatmul.msk.f32.gmra.mxu3 %vm295_vm0, %v6866_v23 }
  0x41   : > { %5961 = vmatmul.msk.f32.gmra.mxu2 %vm295_vm0, %v5921_v44 }
  0x43   : > { %5946 = vmatmul.msk.f32.gmra.mxu0 %vm295_vm0, %v6859_v21 }
  0x44   : > { %5986 = vmatmul.msk.f32.gmra.mxu3 %vm295_vm0, %v6859_v21 }
  0x49   : > { %5962 = vmatmul.msk.f32.gmra.mxu2 %vm295_vm0, %v5922_v46 }
  0x4b   : > { %5947 = vmatmul.msk.f32.gmra.mxu0 %vm295_vm0, %v6855_v20 }
  0x4c   : > { %5987 = vmatmul.msk.f32.gmra.mxu3 %vm295_vm0, %v6855_v20 }
  0x51   : > { %5963 = vmatmul.msk.f32.gmra.mxu2 %vm295_vm0, %v5923_v49 }
  0x53   : > { %5948 = vmatmul.msk.f32.gmra.mxu0 %vm295_vm0, %v6851_v19 }
  0x54   : > { %5988 = vmatmul.msk.f32.gmra.mxu3 %vm295_vm0, %v6851_v19 }
  0x59   : > { %5964 = vmatmul.msk.f32.gmra.mxu2 %vm295_vm0, %v5924_v53  ;;  %v261_v53 = vld [vmem:[%s10107_s4 + $0x8] sm:$0xff] }
  0x5c   : > { %6037 = vmatmul.msk.f32.vlgmr.msrb.gmra.mxu3 %vm295_vm0, %v6830_v16 }
  0x64   : > { %6038 = vmatmul.msk.f32.gmra.mxu3 %vm295_vm0, %v6837_v17 }
  0x6c   : > { %6039 = vmatmul.msk.f32.gmra.mxu3 %vm295_vm0, %v6844_v18 }
  0x74   : > { %6040 = vmatmul.msk.f32.gmra.mxu3 %vm295_vm0, %v6862_v22 }
  0x7c   : > { %6041 = vmatmul.msk.f32.gmra.mxu3 %vm295_vm0, %v6866_v23 }
  0x84   : > { %6042 = vmatmul.msk.f32.gmra.mxu3 %vm295_vm0, %v6859_v21 }
  0x8c   : > { %6043 = vmatmul.msk.f32.gmra.mxu3 %vm295_vm0, %v6855_v20 }
  0x94   : > { %6044 = vmatmul.msk.f32.gmra.mxu3 %vm295_vm0, %v6851_v19 }
  0x98   : > { %v6893_v24 = vpop.f32.mrf.mxu0 }
  0x9f   : > { %v6895_v25 = vpop.f32.mrf.mxu3 }
  0xa0   : > { %v6897_v26 = vpop.f32.mrf.mxu0 }
  0xa7   : > { %v6899_v27 = vpop.f32.mrf.mxu3 }
  0xa8   : > { %v6901_v28 = vpop.f32.mrf.mxu0 }
  0xaf   : > { %v6903_v29 = vpop.f32.mrf.mxu3 }
  0xb0   : > { %v6905_v30 = vpop.f32.mrf.mxu0 }
  0xb7   : > { %v6907_v31 = vpop.f32.mrf.mxu3 }
  0xb8   : > { %v6909_v32 = vpop.f32.mrf.mxu0 }
  0xbf   : > { %v6915_v34 = vpop.f32.mrf.mxu3 }
  0xc0   : > { %v6917_v35 = vpop.f32.mrf.mxu0 }
  0xc7   : > { %v6923_v37 = vpop.f32.mrf.mxu3 }
  0xc8   : > { %v6925_v38 = vpop.f32.mrf.mxu0 }
  0xcf   : > { %v544_v40 = vpop.f32.mrf.mxu3 }
  0xd0   : > { %v6931_v41 = vpop.f32.mrf.mxu0 }
  0xd1   : > { %393 = vmatpush.msra.mxu1 %v6931_v41 }
  0xd3   : > { %394 = vmatpush.msra.mxu1 %v6925_v38 }
  0xd5   : > { %395 = vmatpush.msra.mxu1 %v6917_v35 }
  0xd7   : > { %v547_v43 = vpop.f32.mrf.mxu3  ;;  %396 = vmatpush.msra.mxu1 %v6909_v32 }
  0xd8   : > { %582 = vmatpush.msrb.mxu0 %v547_v43 }
  0xd9   : > { %397 = vmatpush.msra.mxu1 %v6905_v30 }
  0xda   : > { %583 = vmatpush.msrb.mxu0 %v544_v40 }
  0xdb   : > { %398 = vmatpush.msra.mxu1 %v6901_v28 }
  0xdc   : > { %584 = vmatpush.msrb.mxu0 %v6923_v37 }
  0xdd   : > { %399 = vmatpush.msra.mxu1 %v6897_v26 }
  0xde   : > { %585 = vmatpush.msrb.mxu0 %v6915_v34 }
  0xdf   : > { %400 = vmatpush.msra.mxu1 %v6893_v24  ;;  %v7141_v46 = vpop.f32.mrf.mxu3 }
  0xe0   : > { %586 = vmatpush.msrb.mxu0 %v6907_v31  ;;  %5949 = vmatmul.msk.f32.vlgmr.msra.gmra.mxu1 %vm295_vm0, %v5925_v45 }
  0xe1   : > { %648 = vmatpush.msrb.mxu1 %v639_v52 }
  0xe2   : > { %587 = vmatpush.msrb.mxu0 %v6903_v29 }
  0xe3   : > { %649 = vmatpush.msrb.mxu1 %v638_v54 }
  0xe4   : > { %588 = vmatpush.msrb.mxu0 %v6899_v27 }
  0xe5   : > { %650 = vmatpush.msrb.mxu1 %v637_v55  ;;  %v5997_v55 = vld [vmem:[%s10105_s2 + $0x3c0] sm:$0xff] }
  0xe6   : > { %589 = vmatpush.msrb.mxu0 %v6895_v25 }
  0xe7   : > { %5989 = vmatmul.msk.f32.vlgmr.msrb.gmra.mxu0 %vm295_vm0, %v5965_v47  ;;  %651 = vmatpush.msrb.mxu1 %v636_v58  ;;  %v6082_v58 = vld [vmem:[%s10104_s1 + $0xa8] sm:$0xff] }
  0xe8   : > { %902 = vmatpush.msra.mxu0 %v6851_v19  ;;  %5950 = vmatmul.msk.f32.gmra.mxu1 %vm295_vm0, %v5926_v48  ;;  %v7143_v48 = vpop.f32.mrf.mxu3 }
  0xe9   : > { %652 = vmatpush.msrb.mxu1 %v635_v59 }
  0xea   : > { %903 = vmatpush.msra.mxu0 %v6855_v20 }
  0xeb   : > { %653 = vmatpush.msrb.mxu1 %v634_v60  ;;  %v5998_v60 = vld [vmem:[%s10105_s2 + $0x3c8] sm:$0xff] }
  0xec   : > { %904 = vmatpush.msra.mxu0 %v6859_v21 }
  0xed   : > { %654 = vmatpush.msrb.mxu1 %v633_v61  ;;  %v6081_v61 = vld [vmem:[%s10104_s1 + $0xa0] sm:$0xff] }
  0xee   : > { %905 = vmatpush.msra.mxu0 %v6866_v23 }
  0xef   : > { %5990 = vmatmul.msk.f32.gmra.mxu0 %vm295_vm0, %v5966_v50  ;;  %655 = vmatpush.msrb.mxu1 %v632_v0  ;;  %v260_v50 = vld [vmem:[%s10107_s4] sm:$0xff] }
  0xf0   : > { %906 = vmatpush.msra.mxu0 %v6862_v22  ;;  %5951 = vmatmul.msk.f32.gmra.mxu1 %vm295_vm0, %v5927_v51  ;;  %v10110_v51 = vmov 0   ;;  %v7151_v52 = vpop.f32.mrf.mxu3 }
  0xf1   : > { %6681 = vset.pattern.permute.xlu0 %v10110_v51  ;;  %6683 = vset.pattern.permute.xlu1 %v10110_v51 }
  0xf2   : > { %907 = vmatpush.msra.mxu0 %v6844_v18  ;;  %756 = vperm.xlu0 %6681, %v260_v50   ;;  %v6024_v50 = vld [vmem:[%s10105_s2 + $0x118] sm:$0xff] }
  0xf3   : > { %6682 = vset.pattern.permute.xlu2 %v10110_v51 }
  0xf4   : > { %908 = vmatpush.msra.mxu0 %v6837_v17 }
  0xf6   : > { %909 = vmatpush.msra.mxu0 %v6830_v16 }
  0xf7   : > { %5991 = vmatmul.msk.f32.gmra.mxu0 %vm295_vm0, %v5967_v56  ;;  %v6084_v56 = vld [vmem:[%s10104_s1 + $0xb8] sm:$0xff] }
  0xf8   : > { %1173 = vmatpush.msrb.mxu0 %v547_v43  ;;  %5952 = vmatmul.msk.f32.gmra.mxu1 %vm295_vm0, %v5928_v57  ;;  %v7156_v54 = vpop.f32.mrf.mxu3  ;;  %v6083_v57 = vld [vmem:[%s10104_s1 + $0xb0] sm:$0xff] }
  0xfa   : > { %1174 = vmatpush.msrb.mxu0 %v544_v40  ;;  %761 = vperm.xlu0 %6681, %v261_v53  }
  0xfc   : > { %1175 = vmatpush.msrb.mxu0 %v6923_v37 }
  0xfe   : > { %1176 = vmatpush.msrb.mxu0 %v6915_v34 }
  0xff   : > { %5992 = vmatmul.msk.f32.gmra.mxu0 %vm295_vm0, %v5968_v62  ;;  %v6080_v62 = vld [vmem:[%s10104_s1 + $0x98] sm:$0xff] }
 0x100   : > { %1177 = vmatpush.msrb.mxu0 %v6907_v31  ;;  %5953 = vmatmul.msk.f32.gmra.mxu1 %vm295_vm0, %v5929_v63  ;;  %v7171_v59 = vpop.f32.mrf.mxu3  ;;  %v6079_v63 = vld [vmem:[%s10104_s1 + $0x90] sm:$0xff] }
 0x102   : > { %1178 = vmatpush.msrb.mxu0 %v6903_v29 }
 0x104   : > { %1179 = vmatpush.msrb.mxu0 %v6899_v27 }
 0x106   : > { %1180 = vmatpush.msrb.mxu0 %v6895_v25 }
 0x107   : > { %5993 = vmatmul.msk.f32.gmra.mxu0 %vm295_vm0, %v5969_v1  ;;  %v6078_v1 = vld [vmem:[%s10104_s1 + $0x88] sm:$0xff] }
 0x108   : > { %5954 = vmatmul.msk.f32.gmra.mxu1 %vm295_vm0, %v5930_v2  ;;  %v7186_v0 = vpop.f32.mrf.mxu3  ;;  %v5999_v2 = vld [vmem:[%s10105_s2 + $0x3d0] sm:$0xff] }
 0x10f   : > { %5994 = vmatmul.msk.f32.gmra.mxu0 %vm295_vm0, %v5970_v3  ;;  %v6077_v3 = vld [vmem:[%s10104_s1 + $0x80] sm:$0xff] }
 0x110   : > { %5955 = vmatmul.msk.f32.gmra.mxu1 %vm295_vm0, %v5931_v4  ;;  %v6156_v4 = vld [vmem:[%s10104_s1 + $0x1b8] sm:$0xff] }
 0x117   : > { %5995 = vmatmul.msk.f32.gmra.mxu0 %vm295_vm0, %v5971_v5  ;;  %v6155_v5 = vld [vmem:[%s10104_s1 + $0x1b0] sm:$0xff] }
 0x118   : > { %5956 = vmatmul.msk.f32.gmra.mxu1 %vm295_vm0, %v5932_v6  ;;  %v6154_v6 = vld [vmem:[%s10104_s1 + $0x1a8] sm:$0xff] }
 0x11f   : > { %5996 = vmatmul.msk.f32.gmra.mxu0 %vm295_vm0, %v5972_v7  ;;  %v7207_v7 = vpop.f32.mrf.mxu3 }
 0x120   : > { %6005 = vmatmul.msk.f32.vlgmr.msrb.gmra.mxu1 %vm295_vm0, %v6830_v16 }
 0x127   : > { %v7222_v12 = vpop.f32.mrf.mxu3 }
 0x128   : > { %6006 = vmatmul.msk.f32.gmra.mxu1 %vm295_vm0, %v6837_v17 }
 0x129   : > { %967 = vmatpush.msra.mxu1 %v7222_v12 }
 0x12b   : > { %968 = vmatpush.msra.mxu1 %v7207_v7 }
 0x12d   : > { %969 = vmatpush.msra.mxu1 %v7186_v0 }
 0x12f   : > { %970 = vmatpush.msra.mxu1 %v7171_v59 }
 0x130   : > { %6007 = vmatmul.msk.f32.gmra.mxu1 %vm295_vm0, %v6844_v18 }
 0x131   : > { %971 = vmatpush.msra.mxu1 %v7156_v54 }
 0x133   : > { %972 = vmatpush.msra.mxu1 %v7151_v52 }
 0x135   : > { %973 = vmatpush.msra.mxu1 %v7143_v48 }
 0x137   : > { %974 = vmatpush.msra.mxu1 %v7141_v46 }
 0x138   : > { %6008 = vmatmul.msk.f32.gmra.mxu1 %vm295_vm0, %v6862_v22 }
 0x140   : > { %6009 = vmatmul.msk.f32.gmra.mxu1 %vm295_vm0, %v6866_v23 }
 0x148   : > { %6010 = vmatmul.msk.f32.gmra.mxu1 %vm295_vm0, %v6859_v21 }
 0x150   : > { %6011 = vmatmul.msk.f32.gmra.mxu1 %vm295_vm0, %v6855_v20 }
 0x158   : > { %6012 = vmatmul.msk.f32.gmra.mxu1 %vm295_vm0, %v6851_v19 }
 0x15d   : > { %v7115_v25 = vpop.f32.mrf.mxu1 }
 0x165   : > { %v7119_v27 = vpop.f32.mrf.mxu1 }
 0x16d   : > { %v7123_v29 = vpop.f32.mrf.mxu1 }
 0x175   : > { %v7127_v31 = vpop.f32.mrf.mxu1 }
 0x17d   : > { %v7131_v33 = vpop.f32.mrf.mxu1 }
 0x185   : > { %v7135_v34 = vpop.f32.mrf.mxu1 }
 0x18d   : > { %v7137_v36 = vpop.f32.mrf.mxu1 }
 0x18e   : > { %10123 = vst [vmem:[#allocation3_spill] sm:$0xff] %v7137_v36  ;;  %v6269_v36 = vld [vmem:[%s10105_s2 + $0x280] sm:$0xff] }
 0x195   : > { %v7139_v37 = vpop.f32.mrf.mxu1 }
 0x196   : > { %10124 = vst [vmem:[#allocation4_spill] sm:$0xff] %v7139_v37 }
 0x19d   : > { %v657_v39 = vpop.f32.mrf.mxu1 }
 0x1a5   : > { %v660_v40 = vpop.f32.mrf.mxu1 }
 0x1ad   : > { %v663_v42 = vpop.f32.mrf.mxu1 }
 0x1b5   : > { %v666_v43 = vpop.f32.mrf.mxu1 }
 0x1bd   : > { %v669_v44 = vpop.f32.mrf.mxu1 }
 0x1c5   : > { %v672_v45 = vpop.f32.mrf.mxu1 }
 0x1cd   : > { %v675_v47 = vpop.f32.mrf.mxu1 }
 0x1d5   : > { %v678_v49 = vpop.f32.mrf.mxu1 }
 0x1d6   : > { %713 = vmatpush.msrb.mxu2 %v678_v49 }
 0x1d8   : > { %714 = vmatpush.msrb.mxu2 %v675_v47  ;;  %v6023_v47 = vld [vmem:[%s10105_s2 + $0x110] sm:$0xff] }
 0x1da   : > { %715 = vmatpush.msrb.mxu2 %v672_v45  ;;  %v6004_v45 = vld [vmem:[%s10105_s2 + $0x3f8] sm:$0xff] }
 0x1dc   : > { %716 = vmatpush.msrb.mxu2 %v669_v44  ;;  %v7258_v44 = vpop.f32.mrf.mxu2 }
 0x1de   : > { %717 = vmatpush.msrb.mxu2 %v666_v43  ;;  %v6022_v43 = vld [vmem:[%s10105_s2 + $0x108] sm:$0xff] }
 0x1e0   : > { %718 = vmatpush.msrb.mxu2 %v663_v42  ;;  %v6003_v42 = vld [vmem:[%s10105_s2 + $0x3f0] sm:$0xff] }
 0x1e2   : > { %719 = vmatpush.msrb.mxu2 %v660_v40  ;;  %v6021_v40 = vld [vmem:[%s10105_s2 + $0x100] sm:$0xff] }
 0x1e3   : > { %6061 = vmatmul.msk.f32.vlgmr.msra.gmra.mxu1 %vm295_vm0, %v6021_v40 }
 0x1e4   : > { %720 = vmatpush.msrb.mxu2 %v657_v39  ;;  %v6002_v39 = vld [vmem:[%s10105_s2 + $0x3e8] sm:$0xff]  ;;  %v7268_v49 = vpop.f32.mrf.mxu2 }
 0x1e5   : > { %6013 = vmatmul.msk.f32.vlgmr.msrb.gmra.mxu2 %vm295_vm0, %v5997_v55  ;;  %v6129_v55 = vld [vmem:[%s10104_s1 + $0x1e0] sm:$0xff] }
 0x1e6   : > { %1026 = vmatpush.msra.mxu2 %v6084_v56  ;;  %v6028_v56 = vld [vmem:[%s10105_s2 + $0x138] sm:$0xff] }
 0x1e8   : > { %1027 = vmatpush.msra.mxu2 %v6083_v57  ;;  %v6128_v57 = vld [vmem:[%s10104_s1 + $0x1d8] sm:$0xff] }
 0x1ea   : > { %1028 = vmatpush.msra.mxu2 %v6082_v58  ;;  %v6127_v58 = vld [vmem:[%s10104_s1 + $0x1d0] sm:$0xff] }
 0x1eb   : > { %6062 = vmatmul.msk.f32.gmra.mxu1 %vm295_vm0, %v6022_v43 }
 0x1ec   : > { %1029 = vmatpush.msra.mxu2 %v6081_v61  ;;  %v7282_v53 = vpop.f32.mrf.mxu2  ;;  %v6126_v61 = vld [vmem:[%s10104_s1 + $0x1c8] sm:$0xff] }
 0x1ed   : > { %6014 = vmatmul.msk.f32.gmra.mxu2 %vm295_vm0, %v5998_v60 }
 0x1ee   : > { %1030 = vmatpush.msra.mxu2 %v6080_v62  ;;  %v6125_v62 = vld [vmem:[%s10104_s1 + $0x1c0] sm:$0xff] }
 0x1f0   : > { %1031 = vmatpush.msra.mxu2 %v6079_v63 }
 0x1f2   : > { %1032 = vmatpush.msra.mxu2 %v6078_v1 }
 0x1f3   : > { %6063 = vmatmul.msk.f32.gmra.mxu1 %vm295_vm0, %v6023_v47 }
 0x1f4   : > { %1033 = vmatpush.msra.mxu2 %v6077_v3  ;;  %v7366_v3 = vpop.permute.xlu0 %756 }
 0x1f5   : > { %6015 = vmatmul.msk.f32.gmra.mxu2 %vm295_vm0, %v5999_v2  ;;  %v591_v2 = vpop.f32.mrf.mxu0 }
 0x1f6   : > { %1307 = vmatpush.msrb.mxu2 %v6156_v4 }
 0x1f8   : > { %1308 = vmatpush.msrb.mxu2 %v6155_v5  ;;  %v468_v5 = vadd.f32 %v7258_v44, %v7115_v25  ;;  %v6049_v44 = vld [vmem:[%s10105_s2 + $0x1a0] sm:$0xff] }
 0x1fa   : > { %1309 = vmatpush.msrb.mxu2 %v6154_v6  ;;  %v615_v6 = vadd.f32 %v591_v2, %v468_v5 }
 0x1fb   : > { %6064 = vmatmul.msk.f32.gmra.mxu1 %vm295_vm0, %v6024_v50 }
 0x1fc   : > { %1310 = vmatpush.msrb.mxu2 %v6153_v9 }
 0x1fd   : > { %6016 = vmatmul.msk.f32.gmra.mxu2 %vm295_vm0, %v6000_v8  ;;  %v594_v8 = vpop.f32.mrf.mxu0 }
 0x1fe   : > { %1311 = vmatpush.msrb.mxu2 %v6152_v10  ;;  %v7381_v10 = vpop.permute.xlu0 %761 }
 0x200   : > { %1312 = vmatpush.msrb.mxu2 %v6151_v11 }
 0x202   : > { %1313 = vmatpush.msrb.mxu2 %v6150_v13 }
 0x204   : > { %1314 = vmatpush.msrb.mxu2 %v6149_v15 }
 0x205   : > { %6017 = vmatmul.msk.f32.gmra.mxu2 %vm295_vm0, %v6001_v14 }
 0x20d   : > { %6018 = vmatmul.msk.f32.gmra.mxu2 %vm295_vm0, %v6002_v39 }
 0x215   : > { %6019 = vmatmul.msk.f32.gmra.mxu2 %vm295_vm0, %v6003_v42  ;;  %v6048_v42 = vld [vmem:[%s10105_s2 + $0x198] sm:$0xff] }
 0x21d   : > { %6020 = vmatmul.msk.f32.gmra.mxu2 %vm295_vm0, %v6004_v45 }
 0x225   : > { %6085 = vmatmul.msk.f32.vlgmr.msra.gmra.mxu2 %vm295_vm0, %v6830_v16 }
 0x226   : > { %1593 = vmatpush.msra.mxu2 %v6931_v41  ;;  %v6025_v41 = vld [vmem:[%s10105_s2 + $0x120] sm:$0xff] }
 0x227   : > { %6065 = vmatmul.msk.f32.gmra.mxu1 %vm295_vm0, %v6025_v41 }
 0x228   : > { %1594 = vmatpush.msra.mxu2 %v6925_v38  ;;  %v6130_v38 = vld [vmem:[%s10104_s1 + $0x1e8] sm:$0xff] }
 0x22a   : > { %1595 = vmatpush.msra.mxu2 %v6917_v35 }
 0x22c   : > { %1596 = vmatpush.msra.mxu2 %v6909_v32  ;;  %v6026_v32 = vld [vmem:[%s10105_s2 + $0x128] sm:$0xff] }
 0x22d   : > { %6086 = vmatmul.msk.f32.gmra.mxu2 %vm295_vm0, %v6837_v17 }
 0x22e   : > { %1597 = vmatpush.msra.mxu2 %v6905_v30  ;;  %v7297_v30 = vpop.f32.mrf.mxu2 }
 0x22f   : > { %6066 = vmatmul.msk.f32.gmra.mxu1 %vm295_vm0, %v6026_v32  ;;  %v6051_v32 = vld [vmem:[%s10105_s2 + $0x1b0] sm:$0xff] }
 0x230   : > { %1598 = vmatpush.msra.mxu2 %v6901_v28  ;;  %v6027_v28 = vld [vmem:[%s10105_s2 + $0x130] sm:$0xff] }
 0x232   : > { %1599 = vmatpush.msra.mxu2 %v6897_v26  ;;  %v6132_v26 = vld [vmem:[%s10104_s1 + $0x1f8] sm:$0xff] }
 0x233   : > { %1248 = vmatpush.msrb.mxu1 %v6132_v26 }
 0x234   : > { %1600 = vmatpush.msra.mxu2 %v6893_v24  ;;  %v6131_v24 = vld [vmem:[%s10104_s1 + $0x1f0] sm:$0xff] }
 0x235   : > { %6087 = vmatmul.msk.f32.gmra.mxu2 %vm295_vm0, %v6844_v18  ;;  %1249 = vmatpush.msrb.mxu1 %v6131_v24 }
 0x236   : > { %v7312_v35 = vpop.f32.mrf.mxu2 }
 0x237   : > { %6067 = vmatmul.msk.f32.gmra.mxu1 %vm295_vm0, %v6027_v28  ;;  %v6052_v28 = vld [vmem:[%s10105_s2 + $0x1b8] sm:$0xff] }
 0x238   : > { %1250 = vmatpush.msrb.mxu1 %v6130_v38 }
 0x23a   : > { %1251 = vmatpush.msrb.mxu1 %v6129_v55 }
 0x23c   : > { %1252 = vmatpush.msrb.mxu1 %v6128_v57  ;;  %v7481_v57 = vpop.f32.mrf.mxu0 }
 0x23d   : > { %6088 = vmatmul.msk.f32.gmra.mxu2 %vm295_vm0, %v6862_v22 }
 0x23e   : > { %v7332_v60 = vpop.f32.mrf.mxu2  ;;  %1253 = vmatpush.msrb.mxu1 %v6127_v58 }
 0x23f   : > { %6068 = vmatmul.msk.f32.gmra.mxu1 %vm295_vm0, %v6028_v56  ;;  %v6101_v56 = vld [vmem:[%s10105_s2 + $0x380] sm:$0xff] }
 0x240   : > { %1254 = vmatpush.msrb.mxu1 %v6126_v61 }
 0x242   : > { %1255 = vmatpush.msrb.mxu1 %v6125_v62  ;;  %v6102_v62 = vld [vmem:[%s10105_s2 + $0x388] sm:$0xff] }
 0x244   : > { %1511 = vmatpush.msra.mxu1 %v6851_v19 }
 0x245   : > { %6089 = vmatmul.msk.f32.gmra.mxu2 %vm295_vm0, %v6866_v23 }
 0x246   : > { %1512 = vmatpush.msra.mxu1 %v6855_v20  ;;  %v7348_v63 = vpop.f32.mrf.mxu2 }
 0x247   : > { %6133 = vmatmul.msk.f32.vlgmr.msrb.gmra.mxu1 %vm295_vm0, %v6830_v16  ;;  %10125 = vst [vmem:[#allocation5_spill] sm:$0xff] %v7348_v63  ;;  %v6253_v63 = vld [vmem:[%s10105_s2 + $0x200] sm:$0xff] }
 0x248   : > { %1513 = vmatpush.msra.mxu1 %v6859_v21 }
 0x24a   : > { %1514 = vmatpush.msra.mxu1 %v6866_v23 }
 0x24c   : > { %1515 = vmatpush.msra.mxu1 %v6862_v22 }
 0x24d   : > { %6090 = vmatmul.msk.f32.gmra.mxu2 %vm295_vm0, %v6859_v21 }
 0x24e   : > { %1516 = vmatpush.msra.mxu1 %v6844_v18  ;;  %v7359_v1 = vpop.f32.mrf.mxu2 }
 0x24f   : > { %6134 = vmatmul.msk.f32.gmra.mxu1 %vm295_vm0, %v6837_v17  ;;  %10126 = vst [vmem:[#allocation6_spill] sm:$0xff] %v7359_v1 }
 0x250   : > { %1517 = vmatpush.msra.mxu1 %v6837_v17 }
 0x252   : > { %1518 = vmatpush.msra.mxu1 %v6830_v16 }
 0x255   : > { %6091 = vmatmul.msk.f32.gmra.mxu2 %vm295_vm0, %v6855_v20 }
 0x257   : > { %6135 = vmatmul.msk.f32.gmra.mxu1 %vm295_vm0, %v6844_v18 }
 0x25d   : > { %6092 = vmatmul.msk.f32.gmra.mxu2 %vm295_vm0, %v6851_v19 }
 0x25f   : > { %6136 = vmatmul.msk.f32.gmra.mxu1 %vm295_vm0, %v6862_v22 }
 0x265   : > { %6157 = vmatmul.msk.f32.vlgmr.msrb.gmra.mxu2 %vm295_vm0, %v6830_v16  ;;  %v471_v16 = vadd.f32 %v7268_v49, %v7119_v27  ;;  %v6050_v49 = vld [vmem:[%s10105_s2 + $0x1a8] sm:$0xff] }
 0x266   : > { %1880 = vmatpush.msrb.mxu2 %v7222_v12 }
 0x267   : > { %6137 = vmatmul.msk.f32.gmra.mxu1 %vm295_vm0, %v6866_v23 }
 0x268   : > { %v722_v4 = vpop.f32.mrf.mxu2  ;;  %1881 = vmatpush.msrb.mxu2 %v7207_v7  ;;  %v616_v7 = vadd.f32 %v594_v8, %v471_v16 }
 0x269   : > { %v746_v9 = vadd.f32 %v722_v4, %v615_v6  ;;  %v7492_v4 = vpop.f32.mrf.mxu0  ;;  %v6103_v6 = vld [vmem:[%s10105_s2 + $0x390] sm:$0xff] }
 0x26a   : > { %1882 = vmatpush.msrb.mxu2 %v7186_v0 }
 0x26b   : > { %v7385_v11 = vadd.f32 %v7366_v3, %v746_v9 }
 0x26c   : > { %1883 = vmatpush.msrb.mxu2 %v7171_v59 }
 0x26d   : > { %6158 = vmatmul.msk.f32.gmra.mxu2 %vm295_vm0, %v6837_v17  ;;  %10127 = vst [vmem:[#allocation7_spill] sm:$0xff] %v7385_v11  ;;  %v2011_v17 = vsel %vm295_vm0, %v7385_v11, 0.0 }
 0x26e   : > { %1884 = vmatpush.msrb.mxu2 %v7156_v54 }
 0x26f   : > { %6138 = vmatmul.msk.f32.gmra.mxu1 %vm295_vm0, %v6859_v21 }
 0x270   : > { %v725_v25 = vpop.f32.mrf.mxu2  ;;  %1885 = vmatpush.msrb.mxu2 %v7151_v52 }
 0x271   : > { %v747_v0 = vadd.f32 %v725_v25, %v616_v7  ;;  %v7502_v9 = vpop.f32.mrf.mxu0 }
 0x272   : > { %1886 = vmatpush.msrb.mxu2 %v7143_v48  ;;  %v7418_v48 = vpop.f32.mrf.mxu1 }
 0x273   : > { %v7391_v27 = vadd.f32 %v7381_v10, %v747_v0  ;;  %v6104_v0 = vld [vmem:[%s10105_s2 + $0x398] sm:$0xff] }
 0x274   : > { %1887 = vmatpush.msrb.mxu2 %v7141_v46 }
 0x275   : > { %10128 = vst [vmem:[#allocation8_spill] sm:$0xff] %v7391_v27  ;;  %6159 = vmatmul.msk.f32.gmra.mxu2 %vm295_vm0, %v6844_v18  ;;  %v2012_v52 = vsel %vm295_vm0, %v7391_v27, 0.0 }
 0x276   : > { %v2013_v54 = vadd.f32 %v2012_v52, %v2011_v17  ;;  %v6069_v17 = vld [vmem:[%s10105_s2 + $0x300] sm:$0xff] }
 0x277   : > { %6139 = vmatmul.msk.f32.gmra.mxu1 %vm295_vm0, %v6855_v20 }
 0x278   : > { %2014 = vadd.xlane.f32.xlu1 %v2013_v54  ;;  %v7400_v59 = vpop.f32.mrf.mxu2 }
 0x27d   : > { %6160 = vmatmul.msk.f32.gmra.mxu2 %vm295_vm0, %v6862_v22  ;;  %v6045_v22 = vld [vmem:[%s10105_s2 + $0x180] sm:$0xff] }
 0x27e   : > { %6053 = vmatmul.msk.f32.vlgmr.msra.gmra.mxu0 %vm295_vm0, %v6045_v22 }
 0x27f   : > { %6140 = vmatmul.msk.f32.gmra.mxu1 %vm295_vm0, %v6851_v19 }
 0x280   : > { %v7406_v46 = vpop.f32.mrf.mxu2 }
 0x285   : > { %6161 = vmatmul.msk.f32.gmra.mxu2 %vm295_vm0, %v6866_v23  ;;  %v7428_v23 = vpop.f32.mrf.mxu1 }
 0x288   : > { %v7412_v18 = vpop.f32.mrf.mxu2 }
 0x28d   : > { %6162 = vmatmul.msk.f32.gmra.mxu2 %vm295_vm0, %v6859_v21  ;;  %v6046_v21 = vld [vmem:[%s10105_s2 + $0x188] sm:$0xff]  ;;  %v7438_v14 = vpop.f32.mrf.mxu1 }
 0x28e   : > { %6054 = vmatmul.msk.f32.gmra.mxu0 %vm295_vm0, %v6046_v21 }
 0x290   : > { %v7420_v12 = vpop.f32.mrf.mxu2 }
 0x295   : > { %6163 = vmatmul.msk.f32.gmra.mxu2 %vm295_vm0, %v6855_v20  ;;  %v6047_v20 = vld [vmem:[%s10105_s2 + $0x190] sm:$0xff]  ;;  %v7446_v39 = vpop.f32.mrf.mxu1 }
 0x296   : > { %6055 = vmatmul.msk.f32.gmra.mxu0 %vm295_vm0, %v6047_v20 }
 0x298   : > { %v7430_v13 = vpop.f32.mrf.mxu2 }
 0x299   : > { %10129 = vst [vmem:[#allocation9_spill] sm:$0xff] %v7430_v13 }
 0x29d   : > { %6164 = vmatmul.msk.f32.gmra.mxu2 %vm295_vm0, %v6851_v19 }
 0x29e   : > { %6056 = vmatmul.msk.f32.gmra.mxu0 %vm295_vm0, %v6048_v42  ;;  %v7514_v42 = vpop.f32.mrf.mxu0 }
 0x2a0   : > { %v7440_v15 = vpop.f32.mrf.mxu2 }
 0x2a1   : > { %10130 = vst [vmem:[#allocation10_spill] sm:$0xff] %v7440_v15 }
 0x2a4   : > { %v7452_v19 = vpop.f32.mrf.mxu1 }
 0x2a6   : > { %6057 = vmatmul.msk.f32.gmra.mxu0 %vm295_vm0, %v6049_v44 }
 0x2a8   : > { %v1035_v40 = vpop.f32.mrf.mxu2 }
 0x2ac   : > { %v7458_v45 = vpop.f32.mrf.mxu1 }
 0x2ae   : > { %6058 = vmatmul.msk.f32.gmra.mxu0 %vm295_vm0, %v6050_v49 }
 0x2b0   : > { %v1038_v43 = vpop.f32.mrf.mxu2 }
 0x2b4   : > { %v7464_v50 = vpop.f32.mrf.mxu1 }
 0x2b5   : > { %10131 = vst [vmem:[#allocation11_spill] sm:$0xff] %v7464_v50 }
 0x2b6   : > { %6059 = vmatmul.msk.f32.gmra.mxu0 %vm295_vm0, %v6051_v32  ;;  %v6106_v32 = vld [vmem:[%s10105_s2 + $0x3a8] sm:$0xff] }
 0x2b8   : > { %v1041_v47 = vpop.f32.mrf.mxu2 }
 0x2bc   : > { %v7470_v26 = vpop.f32.mrf.mxu1 }
 0x2bd   : > { %10132 = vst [vmem:[#allocation12_spill] sm:$0xff] %v7470_v26 }
 0x2be   : > { %6060 = vmatmul.msk.f32.gmra.mxu0 %vm295_vm0, %v6052_v28  ;;  %v7532_v28 = vpop.f32.mrf.mxu0 }
 0x2bf   : > { %10133 = vst [vmem:[#allocation13_spill] sm:$0xff] %v7532_v28 }
 0x2c0   : > { %v1044_v41 = vpop.f32.mrf.mxu2 }
 0x2c4   : > { %v7476_v38 = vpop.f32.mrf.mxu1 }
 0x2c6   : > { %6109 = vmatmul.msk.f32.vlgmr.msrb.gmra.mxu0 %vm295_vm0, %v6101_v56 }
 0x2c8   : > { %v1047_v24 = vpop.f32.mrf.mxu2 }
 0x2cc   : > { %v7484_v58 = vpop.f32.mrf.mxu1 }
 0x2ce   : > { %6110 = vmatmul.msk.f32.gmra.mxu0 %vm295_vm0, %v6102_v62  ;;  %v6107_v62 = vld [vmem:[%s10105_s2 + $0x3b0] sm:$0xff] }
 0x2d0   : > { %v1050_v55 = vpop.f32.mrf.mxu2 }
 0x2d4   : > { %v7490_v2 = vpop.f32.mrf.mxu1 }
 0x2d6   : > { %6111 = vmatmul.msk.f32.gmra.mxu0 %vm295_vm0, %v6103_v6  ;;  %v7543_v6 = vpop.f32.mrf.mxu0 }
 0x2d7   : > { %10134 = vst [vmem:[#allocation14_spill] sm:$0xff] %v7543_v6 }
 0x2d8   : > { %v1053_v61 = vpop.f32.mrf.mxu2 }
 0x2dc   : > { %v7498_v8 = vpop.f32.mrf.mxu1 }
 0x2de   : > { %6112 = vmatmul.msk.f32.gmra.mxu0 %vm295_vm0, %v6104_v0  ;;  %v6108_v0 = vld [vmem:[%s10105_s2 + $0x3b8] sm:$0xff] }
 0x2e0   : > { %v1056_v5 = vpop.f32.mrf.mxu2 }
 0x2e1   : > { %1091 = vmatpush.msra.mxu3 %v1056_v5 }
 0x2e3   : > { %1092 = vmatpush.msra.mxu3 %v1053_v61  ;;  %v6072_v61 = vld [vmem:[%s10105_s2 + $0x318] sm:$0xff] }
 0x2e4   : > { %v1269_v54 = vpop.f32.mrf.mxu1 }
 0x2e5   : > { %1093 = vmatpush.msra.mxu3 %v1050_v55 }
 0x2e7   : > { %1094 = vmatpush.msra.mxu3 %v1047_v24  ;;  %v6071_v24 = vld [vmem:[%s10105_s2 + $0x310] sm:$0xff] }
 0x2e8   : > { %v7500_v16 = vpop.f32.mrf.mxu2 }
 0x2e9   : > { %1095 = vmatpush.msra.mxu3 %v1044_v41 }
 0x2eb   : > { %v2015_v7 = vpop.xlane.xlu1 %2014  ;;  %1096 = vmatpush.msra.mxu3 %v1041_v47 }
 0x2ec   : > { %v2016_v25 = vrot.slane %v2015_v7, 4  ;;  %v1272_v49 = vpop.f32.mrf.mxu1 }
 0x2ed   : > { %1097 = vmatpush.msra.mxu3 %v1038_v43  ;;  %v6105_v43 = vld [vmem:[%s10105_s2 + $0x3a0] sm:$0xff] }
 0x2ee   : > { %v2017_v52 = vadd.f32 %v2016_v25, %v2015_v7  ;;  %6113 = vmatmul.msk.f32.gmra.mxu0 %vm295_vm0, %v6105_v43  ;;  %v6073_v25 = vld [vmem:[%s10105_s2 + $0x320] sm:$0xff] }
 0x2ef   : > { %1098 = vmatpush.msra.mxu3 %v1035_v40  ;;  %v6070_v40 = vld [vmem:[%s10105_s2 + $0x308] sm:$0xff] }
 0x2f0   : > { %v2018_v22 = vrot.slane %v2017_v52, 2  ;;  %6093 = vmatmul.msk.f32.vlgmr.msra.gmra.mxu3 %vm295_vm0, %v6069_v17  ;;  %v7512_v21 = vpop.f32.mrf.mxu2 }
 0x2f2   : > { %v2019_v20 = vadd.f32 %v2018_v22, %v2017_v52  ;;  %v6197_v22 = vld [vmem:[%s10105_s2 + $0x2c0] sm:$0xff] }
 0x2f3   : > { %6205 = vmatmul.msk.f32.vlgmr.msra.gmra.mxu2 %vm295_vm0, %v6197_v22  ;;  %v6202_v22 = vld [vmem:[%s10105_s2 + $0x2e8] sm:$0xff] }
 0x2f4   : > { %v2020_v44 = vrot.slane %v2019_v20, 1  ;;  %v1275_v55 = vpop.f32.mrf.mxu1 }
 0x2f6   : > { %v2021_v47 = vadd.f32 %v2020_v44, %v2019_v20  ;;  %6114 = vmatmul.msk.f32.gmra.mxu0 %vm295_vm0, %v6106_v32  ;;  %v6117_v20 = vld [vmem:[%s10105_s2 + $0x40] sm:$0xff]  ;;  %v6074_v44 = vld [vmem:[%s10105_s2 + $0x328] sm:$0xff] }
 0x2f8   : > { %6094 = vmatmul.msk.f32.gmra.mxu3 %vm295_vm0, %v6070_v40  ;;  %v7524_v41 = vpop.f32.mrf.mxu2  ;;  %6593 = vpush %v2021_v47  ;;  %v6181_v40 = vld [vmem:[%s10105_s2 + $0x240] sm:$0xff]  ;;  %v6198_v47 = vld [vmem:[%s10105_s2 + $0x2c8] sm:$0xff] }
 0x2f9   : > { %6189 = vmatmul.msk.f32.vlgmr.msra.gmra.mxu1 %vm295_vm0, %v6181_v40  ;;  %v6220_v40 = vld [vmem:[%s10104_s1 + $0x238] sm:$0xff] }
 0x2fb   : > { %v7555_v52 = vpop.f32.mrf.mxu0  ;;  %6206 = vmatmul.msk.f32.gmra.mxu2 %vm295_vm0, %v6198_v47  ;;  %v6219_v47 = vld [vmem:[%s10104_s1 + $0x230] sm:$0xff] }
 0x2fc   : > { %v1278_v5 = vpop.f32.mrf.mxu1 }
 0x2fd   : > { %1437 = vmatpush.msra.mxu0 %v1278_v5 }
 0x2fe   : > { %6115 = vmatmul.msk.f32.gmra.mxu0 %vm295_vm0, %v6107_v62 }
 0x2ff   : > { %1438 = vmatpush.msra.mxu0 %v1275_v55 }
 0x300   : > { %6095 = vmatmul.msk.f32.gmra.mxu3 %vm295_vm0, %v6071_v24  ;;  %v1325_v56 = vpop.f32.mrf.mxu2  ;;  %v6118_v24 = vld [vmem:[%s10105_s2 + $0x48] sm:$0xff] }
 0x301   : > { %1439 = vmatpush.msra.mxu0 %v1272_v49 }
 0x303   : > { %1440 = vmatpush.msra.mxu0 %v1269_v54 }
 0x305   : > { %1441 = vmatpush.msra.mxu0 %v7498_v8 }
 0x306   : > { %6116 = vmatmul.msk.f32.gmra.mxu0 %vm295_vm0, %v6108_v0 }
 0x307   : > { %1442 = vmatpush.msra.mxu0 %v7490_v2 }
 0x308   : > { %6096 = vmatmul.msk.f32.gmra.mxu3 %vm295_vm0, %v6072_v61  ;;  %v1328_v7 = vpop.f32.mrf.mxu2  ;;  %v6075_v61 = vld [vmem:[%s10105_s2 + $0x330] sm:$0xff] }
 0x309   : > { %1443 = vmatpush.msra.mxu0 %v7484_v58 }
 0x30b   : > { %1444 = vmatpush.msra.mxu0 %v7476_v38  ;;  %v7579_v32 = vpop.f32.mrf.mxu0 }
 0x30d   : > { %1741 = vmatpush.msrb.mxu0 %v1278_v5  ;;  %v6182_v5 = vld [vmem:[%s10105_s2 + $0x248] sm:$0xff] }
 0x30e   : > { %6173 = vmatmul.msk.f32.vlgmr.msra.gmra.mxu0 %vm295_vm0, %v6117_v20  ;;  %6190 = vmatmul.msk.f32.gmra.mxu1 %vm295_vm0, %v6182_v5  ;;  %v6122_v20 = vld [vmem:[%s10105_s2 + $0x68] sm:$0xff]  ;;  %v6123_v5 = vld [vmem:[%s10105_s2 + $0x70] sm:$0xff] }
 0x30f   : > { %1742 = vmatpush.msrb.mxu0 %v1275_v55  ;;  %v6199_v55 = vld [vmem:[%s10105_s2 + $0x2d0] sm:$0xff] }
 0x310   : > { %6097 = vmatmul.msk.f32.gmra.mxu3 %vm295_vm0, %v6073_v25  ;;  %v1331_v17 = vpop.f32.mrf.mxu2  ;;  %6207 = vmatmul.msk.f32.gmra.mxu2 %vm295_vm0, %v6199_v55  ;;  %v6217_v55 = vld [vmem:[%s10104_s1 + $0x220] sm:$0xff] }
 0x311   : > { %1743 = vmatpush.msrb.mxu0 %v1272_v49  ;;  %v6119_v49 = vld [vmem:[%s10105_s2 + $0x50] sm:$0xff] }
 0x313   : > { %1744 = vmatpush.msrb.mxu0 %v1269_v54  ;;  %v7600_v54 = vpop.f32.mrf.mxu0 }
 0x315   : > { %1745 = vmatpush.msrb.mxu0 %v7498_v8  ;;  %v6076_v8 = vld [vmem:[%s10105_s2 + $0x338] sm:$0xff] }
 0x316   : > { %6174 = vmatmul.msk.f32.gmra.mxu0 %vm295_vm0, %v6118_v24 }
 0x317   : > { %1746 = vmatpush.msrb.mxu0 %v7490_v2  ;;  %v6183_v2 = vld [vmem:[%s10105_s2 + $0x250] sm:$0xff] }
 0x318   : > { %6098 = vmatmul.msk.f32.gmra.mxu3 %vm295_vm0, %v6074_v44  ;;  %v1334_v43 = vpop.f32.mrf.mxu2  ;;  %6191 = vmatmul.msk.f32.gmra.mxu1 %vm295_vm0, %v6183_v2  ;;  %v6143_v44 = vld [vmem:[%s10105_s2 + $0xd0] sm:$0xff]  ;;  %v6216_v2 = vld [vmem:[%s10104_s1 + $0x218] sm:$0xff] }
 0x319   : > { %1747 = vmatpush.msrb.mxu0 %v7484_v58  ;;  %v6200_v58 = vld [vmem:[%s10105_s2 + $0x2d8] sm:$0xff] }
 0x31a   : > { %6208 = vmatmul.msk.f32.gmra.mxu2 %vm295_vm0, %v6200_v58  ;;  %v6215_v58 = vld [vmem:[%s10104_s1 + $0x210] sm:$0xff] }
 0x31b   : > { %1748 = vmatpush.msrb.mxu0 %v7476_v38  ;;  %v6120_v38 = vld [vmem:[%s10105_s2 + $0x58] sm:$0xff]  ;;  %v7628_v25 = vpop.f32.mrf.mxu0 }
 0x31e   : > { %6175 = vmatmul.msk.f32.gmra.mxu0 %vm295_vm0, %v6119_v49  ;;  %v6144_v49 = vld [vmem:[%s10105_s2 + $0xd8] sm:$0xff] }
 0x320   : > { %6099 = vmatmul.msk.f32.gmra.mxu3 %vm295_vm0, %v6075_v61  ;;  %v1337_v62 = vpop.f32.mrf.mxu2  ;;  %v6203_v61 = vld [vmem:[%s10105_s2 + $0x2f0] sm:$0xff] }
 0x321   : > { %1372 = vmatpush.msrb.mxu3 %v1337_v62  ;;  %v6218_v62 = vld [vmem:[%s10104_s1 + $0x228] sm:$0xff] }
 0x323   : > { %1373 = vmatpush.msrb.mxu3 %v1334_v43  ;;  %v7647_v0 = vpop.f32.mrf.mxu0  ;;  %v6186_v43 = vld [vmem:[%s10105_s2 + $0x268] sm:$0xff] }
 0x325   : > { %1374 = vmatpush.msrb.mxu3 %v1331_v17  ;;  %v6185_v17 = vld [vmem:[%s10105_s2 + $0x260] sm:$0xff] }
 0x326   : > { %6176 = vmatmul.msk.f32.gmra.mxu0 %vm295_vm0, %v6120_v38  ;;  %v6204_v38 = vld [vmem:[%s10105_s2 + $0x2f8] sm:$0xff] }
 0x327   : > { %1375 = vmatpush.msrb.mxu3 %v1328_v7  ;;  %v6141_v7 = vld [vmem:[%s10105_s2 + $0xc0] sm:$0xff] }
 0x328   : > { %6100 = vmatmul.msk.f32.gmra.mxu3 %vm295_vm0, %v6076_v8  ;;  %v6187_v8 = vld [vmem:[%s10105_s2 + $0x270] sm:$0xff] }
 0x329   : > { %1376 = vmatpush.msrb.mxu3 %v1325_v56  ;;  %v6142_v56 = vld [vmem:[%s10105_s2 + $0xc8] sm:$0xff]  ;;  %s6594_s14 = spop %6593 }
 0x32b   : > { %1377 = vmatpush.msrb.mxu3 %v7524_v41  ;;  %v6184_v41 = vld [vmem:[%s10105_s2 + $0x258] sm:$0xff]  ;;  %v7676_v24 = vpop.f32.mrf.mxu0 }
 0x32c   : > { %6192 = vmatmul.msk.f32.gmra.mxu1 %vm295_vm0, %v6184_v41 }
 0x32d   : > { %1378 = vmatpush.msrb.mxu3 %v7512_v21  ;;  %v6201_v21 = vld [vmem:[%s10105_s2 + $0x2e0] sm:$0xff] }
 0x32e   : > { %6209 = vmatmul.msk.f32.gmra.mxu2 %vm295_vm0, %v6201_v21  ;;  %v6124_v21 = vld [vmem:[%s10105_s2 + $0x78] sm:$0xff] }
 0x32f   : > { %1379 = vmatpush.msrb.mxu3 %v7500_v16  ;;  %v6121_v16 = vld [vmem:[%s10105_s2 + $0x60] sm:$0xff] }
 0x330   : > { %6165 = vmatmul.msk.f32.vlgmr.msrb.gmra.mxu3 %vm295_vm0, %v6141_v7  ;;  %6177 = vmatmul.msk.f32.gmra.mxu0 %vm295_vm0, %v6121_v16  ;;  %v6214_v7 = vld [vmem:[%s10104_s1 + $0x208] sm:$0xff]  ;;  %v6213_v16 = vld [vmem:[%s10104_s1 + $0x200] sm:$0xff] }
 0x331   : > { %1667 = vmatpush.msra.mxu3 %v6220_v40  ;;  %v6706_v40 = vld [vmem:[%s6821_s8 + $0x28] sm:$0xff] }
 0x333   : > { %1668 = vmatpush.msra.mxu3 %v6219_v47  ;;  %v7714_v41 = vpop.f32.mrf.mxu0  ;;  %v6707_v47 = vld [vmem:[%s6821_s8 + $0x20] sm:$0xff] }
 0x334   : > { %6193 = vmatmul.msk.f32.gmra.mxu1 %vm295_vm0, %v6185_v17  ;;  %10135 = vst [vmem:[#allocation15_spill] sm:$0xff] %v7714_v41  ;;  %v6188_v17 = vld [vmem:[%s10105_s2 + $0x278] sm:$0xff] }
 0x335   : > { %1669 = vmatpush.msra.mxu3 %v6218_v62  ;;  %v6709_v62 = vld [vmem:[%s6821_s8 + $0x10] sm:$0xff] }
 0x336   : > { %6210 = vmatmul.msk.f32.gmra.mxu2 %vm295_vm0, %v6202_v22  ;;  %v6704_v22 = vld [vmem:[%s6821_s8 + $0x38] sm:$0xff] }
 0x337   : > { %1670 = vmatpush.msra.mxu3 %v6217_v55  ;;  %v6710_v55 = vld [vmem:[%s6821_s8 + $0x8] sm:$0xff] }
 0x338   : > { %6166 = vmatmul.msk.f32.gmra.mxu3 %vm295_vm0, %v6142_v56  ;;  %6178 = vmatmul.msk.f32.gmra.mxu0 %vm295_vm0, %v6122_v20  ;;  %v6145_v56 = vld [vmem:[%s10105_s2 + $0xe0] sm:$0xff]  ;;  %v6705_v20 = vld [vmem:[%s6821_s8 + $0x30] sm:$0xff] }
 0x339   : > { %1671 = vmatpush.msra.mxu3 %v6216_v2  ;;  %v6148_v2 = vld [vmem:[%s10105_s2 + $0xf8] sm:$0xff] }
 0x33b   : > { %1672 = vmatpush.msra.mxu3 %v6215_v58 }
 0x33c   : > { %6194 = vmatmul.msk.f32.gmra.mxu1 %vm295_vm0, %v6186_v43  ;;  %v7736_v43 = vpop.f32.mrf.mxu0 }
 0x33d   : > { %1673 = vmatpush.msra.mxu3 %v6214_v7  ;;  %10136 = vst [vmem:[#allocation16_spill] sm:$0xff] %v7736_v43 }
 0x33e   : > { %6211 = vmatmul.msk.f32.gmra.mxu2 %vm295_vm0, %v6203_v61  ;;  %v6708_v61 = vld [vmem:[%s6821_s8 + $0x18] sm:$0xff] }
 0x33f   : > { %1674 = vmatpush.msra.mxu3 %v6213_v16 }
 0x340   : > { %6167 = vmatmul.msk.f32.gmra.mxu3 %vm295_vm0, %v6143_v44  ;;  %6179 = vmatmul.msk.f32.gmra.mxu0 %vm295_vm0, %v6123_v5  ;;  %v6146_v44 = vld [vmem:[%s10105_s2 + $0xe8] sm:$0xff]  ;;  %v6147_v5 = vld [vmem:[%s10105_s2 + $0xf0] sm:$0xff] }
 0x341   : > { %1962 = vmatpush.msrb.mxu3 %v6704_v22 }
 0x343   : > { %1963 = vmatpush.msrb.mxu3 %v6705_v20 }
 0x344   : > { %6195 = vmatmul.msk.f32.gmra.mxu1 %vm295_vm0, %v6187_v8  ;;  %v6711_v8 = vld [vmem:[%s6821_s8] sm:$0xff] }
 0x345   : > { %1964 = vmatpush.msrb.mxu3 %v6706_v40 }
 0x346   : > { %6212 = vmatmul.msk.f32.gmra.mxu2 %vm295_vm0, %v6204_v38  ;;  %v977_v38 = vadd.f32 %v7418_v48, %v7555_v52 }
 0x347   : > { %1965 = vmatpush.msrb.mxu3 %v6707_v47 }
 0x348   : > { %6168 = vmatmul.msk.f32.gmra.mxu3 %vm295_vm0, %v6144_v49  ;;  %6180 = vmatmul.msk.f32.gmra.mxu0 %vm295_vm0, %v6124_v21  ;;  %v1182_v49 = vpop.f32.mrf.mxu0 }
 0x349   : > { %1966 = vmatpush.msrb.mxu3 %v6708_v61 }
 0x34b   : > { %1967 = vmatpush.msrb.mxu3 %v6709_v62 }
 0x34c   : > { %6196 = vmatmul.msk.f32.gmra.mxu1 %vm295_vm0, %v6188_v17 }
 0x34d   : > { %1968 = vmatpush.msrb.mxu3 %v6710_v55 }
 0x34e   : > { %6261 = vmatmul.msk.f32.vlgmr.msrb.gmra.mxu2 %vm295_vm0, %v6253_v63  ;;  %v6270_v63 = vld [vmem:[%s10105_s2 + $0x288] sm:$0xff] }
 0x34f   : > { %1969 = vmatpush.msrb.mxu3 %v6711_v8 }
 0x350   : > { %6169 = vmatmul.msk.f32.gmra.mxu3 %vm295_vm0, %v6145_v56  ;;  %v1185_v58 = vpop.f32.mrf.mxu0  ;;  %v980_v56 = vadd.f32 %v7428_v23, %v7579_v32 }
 0x358   : > { %6170 = vmatmul.msk.f32.gmra.mxu3 %vm295_vm0, %v6146_v44  ;;  %v7756_v21 = vpop.f32.mrf.mxu0 }
 0x360   : > { %6171 = vmatmul.msk.f32.gmra.mxu3 %vm295_vm0, %v6147_v5  ;;  %v7761_v51 = vpop.f32.mrf.mxu0 }
 0x368   : > { %6172 = vmatmul.msk.f32.gmra.mxu3 %vm295_vm0, %v6148_v2 }
 0x370   : > { %6221 = vmatmul.msk.f32.vlgmr.msra.gmra.mxu3 %vm295_vm0, %v6711_v8 }
 0x373   : > { %v1100_v7 = vpop.f32.mrf.mxu3 }
 0x374   : > { %v1124_v16 = vadd.f32 %v1100_v7, %v977_v38 }
 0x376   : > { %v1206_v17 = vadd.f32 %v1182_v49, %v1124_v16  ;;  %v7776_v49 = vpop.f32.mrf.mxu0 }
 0x377   : > { %10139 = vst [vmem:[#allocation19_spill] sm:$0xff] %v7776_v49 }
 0x378   : > { %6222 = vmatmul.msk.f32.gmra.mxu3 %vm295_vm0, %v6710_v55  ;;  %v7764_v2 = vadd.f32 %v1206_v17, %v7366_v3 }
 0x37a   : > { %10137 = vst [vmem:[#allocation17_spill] sm:$0xff] %v7764_v2  ;;  %v2023_v52 = vsel %vm295_vm0, %v7764_v2, 0.0 }
 0x37b   : > { %v1103_v44 = vpop.f32.mrf.mxu3 }
 0x37c   : > { %v1125_v5 = vadd.f32 %v1103_v44, %v980_v56  ;;  %v1520_v44 = vpop.f32.mrf.mxu1 }
 0x37e   : > { %v1207_v8 = vadd.f32 %v1185_v58, %v1125_v5  ;;  %v7782_v38 = vpop.f32.mrf.mxu0 }
 0x37f   : > { %10140 = vst [vmem:[#allocation20_spill] sm:$0xff] %v7782_v38 }
 0x380   : > { %v7767_v48 = vadd.f32 %v1207_v8, %v7381_v10  ;;  %6223 = vmatmul.msk.f32.gmra.mxu3 %vm295_vm0, %v6709_v62  ;;  %v1602_v8 = vpop.f32.mrf.mxu2 }
 0x382   : > { %10138 = vst [vmem:[#allocation18_spill] sm:$0xff] %v7767_v48  ;;  %v2024_v23 = vsel %vm295_vm0, %v7767_v48, 0.0 }
 0x383   : > { %v7774_v32 = vpop.f32.mrf.mxu3  ;;  %v2025_v55 = vadd.f32 %v2024_v23, %v2023_v52 }
 0x385   : > { %2026 = vadd.xlane.f32.xlu1 %v2025_v55 }
 0x386   : > { %v7789_v16 = vpop.f32.mrf.mxu0 }
 0x387   : > { %10141 = vst [vmem:[#allocation21_spill] sm:$0xff] %v7789_v16 }
 0x388   : > { %6224 = vmatmul.msk.f32.gmra.mxu3 %vm295_vm0, %v6708_v61 }
 0x38b   : > { %v7779_v58 = vpop.f32.mrf.mxu3  ;;  %v1523_v13 = vpop.f32.mrf.mxu1 }
 0x38e   : > { %v7794_v17 = vpop.f32.mrf.mxu0 }
 0x38f   : > { %10143 = vst [vmem:[#allocation23_spill] sm:$0xff] %v7794_v17 }
 0x390   : > { %6225 = vmatmul.msk.f32.gmra.mxu3 %vm295_vm0, %v6707_v47 }
 0x393   : > { %v7784_v62 = vpop.f32.mrf.mxu3 }
 0x396   : > { %v1446_v47 = vpop.f32.mrf.mxu0 }
 0x398   : > { %6226 = vmatmul.msk.f32.gmra.mxu3 %vm295_vm0, %v6706_v40 }
 0x39b   : > { %v7787_v7 = vpop.f32.mrf.mxu3 }
 0x39e   : > { %v1449_v23 = vpop.f32.mrf.mxu0 }
 0x3a0   : > { %6227 = vmatmul.msk.f32.gmra.mxu3 %vm295_vm0, %v6705_v20  ;;  %v1605_v20 = vpop.f32.mrf.mxu2 }
 0x3a3   : > { %v7792_v56 = vpop.f32.mrf.mxu3 }
 0x3a4   : > { %10142 = vst [vmem:[#allocation22_spill] sm:$0xff] %v7792_v56 }
 0x3a8   : > { %6228 = vmatmul.msk.f32.gmra.mxu3 %vm295_vm0, %v6704_v22 }
 0x3ab   : > { %v7797_v61 = vpop.f32.mrf.mxu3 }
 0x3ac   : > { %10144 = vst [vmem:[#allocation24_spill] sm:$0xff] %v7797_v61 }
 0x3b0   : > { %6277 = vmatmul.msk.f32.vlgmr.msrb.gmra.mxu3 %vm295_vm0, %v6269_v36  ;;  %v6230_v36 = vld [vmem:[%s10105_s2 + $0x88] sm:$0xff] }
 0x3b3   : > { %v1381_v5 = vpop.f32.mrf.mxu3 }
 0x3b4   : > { %v1447_v52 = vadd.f32 %v1446_v47, %v1381_v5 }
 0x3b6   : > { %v1544_v40 = vadd.f32 %v1520_v44, %v1447_v52 }
 0x3b8   : > { %v1626_v16 = vadd.f32 %v1602_v8, %v1544_v40  ;;  %6278 = vmatmul.msk.f32.gmra.mxu3 %vm295_vm0, %v6270_v63 }
 0x3ba   : > { %v7800_v56 = vadd.f32 %v1626_v16, %v7366_v3 }
 0x3bb   : > { %v1384_v55 = vpop.f32.mrf.mxu3 }
 0x3bc   : > { %v1450_v26 = vadd.f32 %v1449_v23, %v1384_v55  ;;  %10145 = vst [vmem:[#allocation25_spill] sm:$0xff] %v7800_v56  ;;  %v2036_v47 = vsel %vm295_vm0, %v7800_v56, 0.0 }
 0x3be   : > { %v1545_v43 = vadd.f32 %v1523_v13, %v1450_v26 }
 0x3c0   : > { %v1627_v17 = vadd.f32 %v1605_v20, %v1545_v43 }
 0x3c2   : > { %v7803_v22 = vadd.f32 %v1627_v17, %v7381_v10 }
 0x3c3   : > { %v7805_v61 = vpop.f32.mrf.mxu3 }
 0x3c4   : > { %10146 = vst [vmem:[#allocation26_spill] sm:$0xff] %v7803_v22  ;;  %v2037_v44 = vsel %vm295_vm0, %v7803_v22, 0.0 }
 0x3c5   : > { %v2038_v5 = vadd.f32 %v2037_v44, %v2036_v47 }
 0x3c7   : > { %2039 = vadd.xlane.f32.xlu2 %v2038_v5 }
 0x3cb   : > { %v7811_v8 = vpop.f32.mrf.mxu3 }
 0x3d3   : > { %v7813_v13 = vpop.f32.mrf.mxu3 }
 0x3d4   : > { %10147 = vst [vmem:[#allocation27_spill] sm:$0xff] %v7813_v13 }
 0x3db   : > { %v7815_v26 = vpop.f32.mrf.mxu3 }
 0x3dc   : > { %10148 = vst [vmem:[#allocation28_spill] sm:$0xff] %v7815_v26 }
 0x3e3   : > { %v7817_v43 = vpop.f32.mrf.mxu3 }
 0x3e4   : > { %10149 = vst [vmem:[#allocation29_spill] sm:$0xff] %v7817_v43 }
 0x3eb   : > { %v7819_v16 = vpop.f32.mrf.mxu3 }
 0x3ec   : > { %10150 = vst [vmem:[#allocation30_spill] sm:$0xff] %v7819_v16 }
 0x3f3   : > { %v1676_v17 = vpop.f32.mrf.mxu3 }
 0x3f8   : > { %v2027_v52 = vpop.xlane.xlu1 %2026 }
 0x3f9   : > { %v2028_v40 = vrot.slane %v2027_v52, 4 }
 0x3fb   : > { %v2029_v23 = vadd.f32 %v2028_v40, %v2027_v52  ;;  %v1679_v55 = vpop.f32.mrf.mxu3 }
 0x3fd   : > { %v2030_v20 = vrot.slane %v2029_v23, 2 }
 0x3ff   : > { %v2031_v15 = vadd.f32 %v2030_v20, %v2029_v23  ;;  %v1642_v20 = vld [vmem:[%s10105_s2] sm:$0xff] }
 0x401   : > { %v2032_v28 = vrot.slane %v2031_v15, 1 }
 0x403   : > { %v1682_v47 = vpop.f32.mrf.mxu3  ;;  %v2033_v44 = vadd.f32 %v2032_v28, %v2031_v15  ;;  %v6229_v15 = vld [vmem:[%s10105_s2 + $0x80] sm:$0xff]  ;;  %v6254_v28 = vld [vmem:[%s10105_s2 + $0x208] sm:$0xff] }
 0x404   : > { %6237 = vmatmul.msk.f32.vlgmr.msrb.gmra.mxu0 %vm295_vm0, %v6229_v15  ;;  %6262 = vmatmul.msk.f32.gmra.mxu2 %vm295_vm0, %v6254_v28 }
 0x405   : > { %6595 = vpush %v2033_v44 }
 0x40b   : > { %v1685_v5 = vpop.f32.mrf.mxu3 }
 0x40c   : > { %6238 = vmatmul.msk.f32.gmra.mxu0 %vm295_vm0, %v6230_v36  ;;  %v1643_v36 = vld [vmem:[%s10105_s2 + $0x8] sm:$0xff] }
 0x413   : > { %v1688_v6 = vpop.f32.mrf.mxu3 }
 0x41b   : > { %v1691_v52 = vpop.f32.mrf.mxu3 }
 0x423   : > { %v1694_v40 = vpop.f32.mrf.mxu3 }
 0x42b   : > { %v1697_v23 = vpop.f32.mrf.mxu3 }
 0x42c   : > { %1806 = vmatpush.msrb.mxu1 %v1697_v23 }
 0x42e   : > { %1807 = vmatpush.msrb.mxu1 %v1694_v40 }
 0x430   : > { %1808 = vmatpush.msrb.mxu1 %v1691_v52 }
 0x432   : > { %1809 = vmatpush.msrb.mxu1 %v1688_v6 }
 0x434   : > { %1810 = vmatpush.msrb.mxu1 %v1685_v5  ;;  %v7855_v5 = vpop.f32.mrf.mxu2 }
 0x436   : > { %1811 = vmatpush.msrb.mxu1 %v1682_v47  ;;  %v7853_v47 = vpop.f32.mrf.mxu0  ;;  %s6596_s15 = spop %6595 }
 0x437   : > { %s2035_s25 = sadd.f32 %s6596_s15, %s6594_s14 }
 0x438   : > { %1812 = vmatpush.msrb.mxu1 %v1679_v55 }
 0x43a   : > { %v2040_v44 = vpop.xlane.xlu2 %2039  ;;  %1813 = vmatpush.msrb.mxu1 %v1676_v17  ;;  %v7857_v17 = vpop.f32.mrf.mxu1 }
 0x43b   : > { %v2041_v15 = vrot.slane %v2040_v44, 4  ;;  %6245 = vmatmul.msk.f32.vlgmr.msrb.gmra.mxu1 %vm295_vm0, %v1642_v20 }
 0x43c   : > { %v7861_v23 = vpop.f32.mrf.mxu2 }
 0x43d   : > { %v2042_v28 = vadd.f32 %v2041_v15, %v2040_v44 }
 0x43e   : > { %v7859_v40 = vpop.f32.mrf.mxu0 }
 0x43f   : > { %v2043_v63 = vrot.slane %v2042_v28, 2 }
 0x441   : > { %v2044_v52 = vadd.f32 %v2043_v63, %v2042_v28 }
 0x442   : > { %v7863_v20 = vpop.f32.mrf.mxu1 }
 0x443   : > { %6246 = vmatmul.msk.f32.gmra.mxu1 %vm295_vm0, %v1643_v36  ;;  %v2045_v6 = vrot.slane %v2044_v52, 1 }
 0x444   : > { %v7867_v15 = vpop.f32.mrf.mxu2 }
 0x445   : > { %v2046_v55 = vadd.f32 %v2045_v6, %v2044_v52  ;;  %10152 = vst [vmem:[#allocation32_spill] sm:$0xff] %v7867_v15 }
 0x446   : > { %v7865_v44 = vpop.f32.mrf.mxu0 }
 0x447   : > { %6597 = vpush %v2046_v55 }
 0x448   : > { %10151 = vst [vmem:[#allocation31_spill] sm:$0xff] %v7865_v44 }
 0x44a   : > { %v7869_v28 = vpop.f32.mrf.mxu1 }
 0x44b   : > { %10153 = vst [vmem:[#allocation33_spill] sm:$0xff] %v7869_v28  ;;  %v1971_v28 = vpop.f32.mrf.mxu3 }
 0x44c   : > { %v7873_v36 = vpop.f32.mrf.mxu2 }
 0x44d   : > { %10155 = vst [vmem:[#allocation35_spill] sm:$0xff] %v7873_v36 }
 0x44e   : > { %v7871_v63 = vpop.f32.mrf.mxu0 }
 0x44f   : > { %10154 = vst [vmem:[#allocation34_spill] sm:$0xff] %v7871_v63 }
 0x452   : > { %v7875_v52 = vpop.f32.mrf.mxu1 }
 0x453   : > { %10156 = vst [vmem:[#allocation36_spill] sm:$0xff] %v7875_v52 }
 0x454   : > { %v7879_v55 = vpop.f32.mrf.mxu2 }
 0x455   : > { %10158 = vst [vmem:[#allocation38_spill] sm:$0xff] %v7879_v55  ;;  %v1974_v55 = vpop.f32.mrf.mxu3 }
 0x456   : > { %v7877_v6 = vpop.f32.mrf.mxu0 }
 0x457   : > { %10157 = vst [vmem:[#allocation37_spill] sm:$0xff] %v7877_v6 }
 0x45a   : > { %v7881_v50 = vpop.f32.mrf.mxu1 }
 0x45b   : > { %10159 = vst [vmem:[#allocation39_spill] sm:$0xff] %v7881_v50 }
 0x45c   : > { %v7885_v1 = vpop.f32.mrf.mxu2 }
 0x45d   : > { %10161 = vst [vmem:[#allocation41_spill] sm:$0xff] %v7885_v1 }
 0x45e   : > { %v7883_v41 = vpop.f32.mrf.mxu0 }
 0x45f   : > { %10160 = vst [vmem:[#allocation40_spill] sm:$0xff] %v7883_v41 }
 0x462   : > { %v7887_v37 = vpop.f32.mrf.mxu1 }
 0x463   : > { %10162 = vst [vmem:[#allocation42_spill] sm:$0xff] %v7887_v37 }
 0x464   : > { %v1889_v16 = vpop.f32.mrf.mxu2 }
 0x478   : > { %s6598_s24 = spop %6597 }
 0x479   : > { %s2048_s26 = sadd.f32 %s6598_s24, %s2035_s25 }
 0x481   : > { %v1750_v43 = vpop.f32.mrf.mxu0 }
 0x487   : > { %v1892_v49 = vpop.f32.mrf.mxu2 }
 0x489   : > { %v1753_v13 = vpop.f32.mrf.mxu0 }
 0x4b8   : > { %v1815_v15 = vpop.f32.mrf.mxu1 }
 0x4b9   : > { %v1816_v44 = vadd.f32 %v1815_v15, %v1750_v43 }
 0x4bb   : > { %v1913_v36 = vadd.f32 %v1889_v16, %v1816_v44  ;;  %v6725_v44 = vmov 4096.0  }
 0x4bc   : > { %6694 = vrcp.f32 %v6725_v44  ;;  %v1644_v44 = vld [vmem:[%s10105_s2 + $0x10] sm:$0xff] }
 0x4bd   : > { %v1995_v6 = vadd.f32 %v1971_v28, %v1913_v36  ;;  %6247 = vmatmul.msk.f32.gmra.mxu1 %vm295_vm0, %v1644_v44 }
 0x4bf   : > { %v7890_v50 = vadd.f32 %v1995_v6, %v7366_v3 }
 0x4c0   : > { %v1818_v52 = vpop.f32.mrf.mxu1 }
 0x4c1   : > { %v1819_v63 = vadd.f32 %v1818_v52, %v1753_v13  ;;  %10163 = vst [vmem:[#allocation43_spill] sm:$0xff] %v7890_v50  ;;  %v2049_v37 = vsel %vm295_vm0, %v7890_v50, 0.0 }
 0x4c2   : > { %v6695_v13 = vpop.eup %6694 }
 0x4c3   : > { %v1914_v26 = vadd.f32 %v1892_v49, %v1819_v63  ;;  %v2063_v15 = vmul.f32 4096.0, %v6695_v13  ;;  %vm2067_vm1 = vweird.f32 %v6695_v13 }
 0x4c5   : > { %v1996_v41 = vadd.f32 %v1974_v55, %v1914_v26  ;;  %v2064_v49 = vsub.f32 1.0, %v2063_v15  ;;  %v6272_v15 = vld [vmem:[%s10105_s2 + $0x298] sm:$0xff] }
 0x4c7   : > { %v7893_v1 = vadd.f32 %v1996_v41, %v7381_v10  ;;  %v2065_v26 = vmul.f32 %v6695_v13, %v2064_v49  ;;  %v6232_v49 = vld [vmem:[%s10105_s2 + $0x98] sm:$0xff] }
 0x4c9   : > { %10164 = vst [vmem:[#allocation44_spill] sm:$0xff] %v7893_v1  ;;  %v2050_v43 = vsel %vm295_vm0, %v7893_v1, 0.0  ;;  %v2066_v41 = vadd.f32 %v6695_v13, %v2065_v26 }
 0x4ca   : > { %v2051_v16 = vadd.f32 %v2050_v43, %v2049_v37  ;;  %v6255_v37 = vld [vmem:[%s10105_s2 + $0x210] sm:$0xff] }
 0x4cb   : > { %v2068_v55 = vsel %vm2067_vm1, %v6695_v13, %v2066_v41  ;;  %6263 = vmatmul.msk.f32.gmra.mxu2 %vm295_vm0, %v6255_v37  ;;  %v6271_v43 = vld [vmem:[%s10105_s2 + $0x290] sm:$0xff]  ;;  %v6256_v13 = vld [vmem:[%s10105_s2 + $0x218] sm:$0xff] }
 0x4cc   : > { %2052 = vadd.xlane.f32.xlu2 %v2051_v16  ;;  %6279 = vmatmul.msk.f32.gmra.mxu3 %vm295_vm0, %v6271_v43  ;;  %v6231_v16 = vld [vmem:[%s10105_s2 + $0x90] sm:$0xff] }
 0x4cd   : > { %6239 = vmatmul.msk.f32.gmra.mxu0 %vm295_vm0, %v6231_v16 }
 0x4d3   : > { %6264 = vmatmul.msk.f32.gmra.mxu2 %vm295_vm0, %v6256_v13 }
 0x4d4   : > { %6280 = vmatmul.msk.f32.gmra.mxu3 %vm295_vm0, %v6272_v15 }
 0x4d5   : > { %6240 = vmatmul.msk.f32.gmra.mxu0 %vm295_vm0, %v6232_v49 }
 0x53f   : > { %v2053_v28 = vpop.xlane.xlu2 %2052 }
 0x540   : > { %v2054_v3 = vrot.slane %v2053_v28, 4 }
 0x542   : > { %v2055_v63 = vadd.f32 %v2054_v3, %v2053_v28  ;;  %v1645_v28 = vld [vmem:[%s10105_s2 + $0x18] sm:$0xff] }
 0x543   : > { %6248 = vmatmul.msk.f32.gmra.mxu1 %vm295_vm0, %v1645_v28 }
 0x544   : > { %v2056_v36 = vrot.slane %v2055_v63, 2 }
 0x546   : > { %v2057_v10 = vadd.f32 %v2056_v36, %v2055_v63 }
 0x548   : > { %v2058_v52 = vrot.slane %v2057_v10, 1 }
 0x54a   : > { %v2059_v6 = vadd.f32 %v2058_v52, %v2057_v10  ;;  %v1756_v38 = vpop.f32.mrf.mxu0 }
 0x54c   : > { %6599 = vpush %v2059_v6 }
 0x54d   : > { %6601 = vpush %v2068_v55 }
 0x57d   : > { %s6600_s27 = spop %6599 }
 0x57e   : > { %s2061_s28 = sadd.f32 %s6600_s27, %s2048_s26  ;;  %s7931_s29 = spop %6601 }
 0x580   : > { %s2070_s30 = smul.f32 %s7931_s29, %s2061_s28 }
 0x582   : > { %v7934_v3 = vstv %s2070_s30 }
 0x583   : > { %10165 = vst [vmem:[#allocation45_spill] sm:$0xff] %v7934_v3  ;;  %v2105_v63 = vsub.f32 %v7800_v56, %v7934_v3  ;;  %v2106_v26 = vsub.f32 %v7803_v22, %v7934_v3  ;;  %v2088_v36 = vsub.f32 %v7764_v2, %v7934_v3  ;;  %v2089_v10 = vsub.f32 %v7767_v48, %v7934_v3 }
 0x584   : > { %v2072_v41 = vsub.f32 %v7385_v11, %v7934_v3  ;;  %v2073_v52 = vsub.f32 %v7391_v27, %v7934_v3  ;;  %v2122_v6 = vsub.f32 %v7890_v50, %v7934_v3  ;;  %v2123_v55 = vsub.f32 %v7893_v1, %v7934_v3 }
 0x585   : > { %v2107_v37 = vmul.f32 %v2105_v63, %v2105_v63  ;;  %v2108_v43 = vmul.f32 %v2106_v26, %v2106_v26  ;;  %v2090_v16 = vmul.f32 %v2088_v36, %v2088_v36  ;;  %v2091_v44 = vmul.f32 %v2089_v10, %v2089_v10 }
 0x586   : > { %v2074_v13 = vmul.f32 %v2072_v41, %v2072_v41  ;;  %v2075_v15 = vmul.f32 %v2073_v52, %v2073_v52  ;;  %v2124_v26 = vmul.f32 %v2122_v6, %v2122_v6  ;;  %v2125_v36 = vmul.f32 %v2123_v55, %v2123_v55 }
 0x587   : > { %v2109_v49 = vsel %vm295_vm0, %v2107_v37, 0.0  ;;  %v2110_v28 = vsel %vm295_vm0, %v2108_v43, 0.0  ;;  %v2092_v56 = vsel %vm295_vm0, %v2090_v16, 0.0  ;;  %v2093_v2 = vsel %vm295_vm0, %v2091_v44, 0.0 }
 0x588   : > { %v2111_v11 = vadd.f32 %v2110_v28, %v2109_v49  ;;  %v2094_v22 = vadd.f32 %v2093_v2, %v2092_v56  ;;  %v2076_v50 = vsel %vm295_vm0, %v2074_v13, 0.0  ;;  %v2077_v1 = vsel %vm295_vm0, %v2075_v15, 0.0  ;;  %v262_v2 = vld [vmem:[%s10107_s4 + $0x10] sm:$0xff] }
 0x589   : > { %v2078_v63 = vadd.f32 %v2077_v1, %v2076_v50  ;;  %v2126_v10 = vsel %vm295_vm0, %v2124_v26, 0.0  ;;  %v2127_v41 = vsel %vm295_vm0, %v2125_v36, 0.0  ;;  %v7966_v1 = vld [vmem:[%s10107_s4 + $0x18] sm:$0xff] }
 0x58a   : > { %2112 = vadd.xlane.f32.xlu2 %v2111_v11  ;;  %2095 = vadd.xlane.f32.xlu1 %v2094_v22  ;;  %v2128_v52 = vadd.f32 %v2127_v41, %v2126_v10  ;;  %10166 = vst [vmem:[#allocation46_spill] sm:$0xff] %v7966_v1 }
 0x58b   : > { %2079 = vadd.xlane.f32.xlu0 %v2078_v63 }
 0x592   : > { %2129 = vadd.xlane.f32.xlu1 %v2128_v52 }
 0x5a2   : > { %766 = vperm.xlu2 %6682, %v262_v2  }
 0x5ab   : > { %771 = vperm.xlu1 %6683, %v7966_v1  }
 0x5fd   : > { %v2113_v11 = vpop.xlane.xlu2 %2112  ;;  %v2096_v50 = vpop.xlane.xlu1 %2095 }
 0x5fe   : > { %v2114_v56 = vrot.slane %v2113_v11, 4  ;;  %v2097_v22 = vrot.slane %v2096_v50, 4  ;;  %v2080_v6 = vpop.xlane.xlu0 %2079 }
 0x5ff   : > { %v2081_v55 = vrot.slane %v2080_v6, 4 }
 0x600   : > { %v2115_v37 = vadd.f32 %v2114_v56, %v2113_v11  ;;  %v2098_v43 = vadd.f32 %v2097_v22, %v2096_v50  ;;  %v1821_v11 = vpop.f32.mrf.mxu1  ;;  %v1895_v22 = vpop.f32.mrf.mxu2 }
 0x601   : > { %v2082_v16 = vadd.f32 %v2081_v55, %v2080_v6  ;;  %v983_v55 = vadd.f32 %v7438_v14, %v7600_v54 }
 0x602   : > { %v2116_v44 = vrot.slane %v2115_v37, 2  ;;  %v2099_v13 = vrot.slane %v2098_v43, 2 }
 0x603   : > { %v2083_v15 = vrot.slane %v2082_v16, 2 }
 0x604   : > { %v2100_v49 = vadd.f32 %v2099_v13, %v2098_v43  ;;  %v2117_v28 = vadd.f32 %v2116_v44, %v2115_v37  ;;  %v1453_v37 = vadd.f32 %v7853_v47, %v7805_v61  ;;  %v1977_v43 = vpop.f32.mrf.mxu3  ;;  %v1126_v44 = vadd.f32 %v7774_v32, %v983_v55 }
 0x605   : > { %v2130_v63 = vpop.xlane.xlu1 %2129  ;;  %v2084_v26 = vadd.f32 %v2083_v15, %v2082_v16  ;;  %v986_v16 = vadd.f32 %v7446_v39, %v7628_v25  ;;  %v1822_v61 = vadd.f32 %v1821_v11, %v1756_v38  ;;  %v477_v13 = vadd.f32 %v7297_v30, %v7127_v31 }
 0x606   : > { %v2131_v36 = vrot.slane %v2130_v63, 4  ;;  %v2101_v41 = vrot.slane %v2100_v49, 1  ;;  %v2118_v52 = vrot.slane %v2117_v28, 1  ;;  %v1546_v14 = vadd.f32 %v7857_v17, %v1453_v37 }
 0x607   : > { %v2085_v10 = vrot.slane %v2084_v26, 1  ;;  %v1127_v39 = vadd.f32 %v7779_v58, %v986_v16  ;;  %v1915_v17 = vadd.f32 %v1895_v22, %v1822_v61 }
 0x608   : > { %v2132_v2 = vadd.f32 %v2131_v36, %v2130_v63  ;;  %v2102_v27 = vadd.f32 %v2101_v41, %v2100_v49  ;;  %v2119_v3 = vadd.f32 %v2118_v52, %v2117_v28  ;;  %v1628_v32 = vadd.f32 %v7855_v5, %v1546_v14 }
 0x609   : > { %v2086_v48 = vadd.f32 %v2085_v10, %v2084_v26  ;;  %v1209_v58 = vadd.f32 %v7761_v51, %v1127_v39  ;;  %v1997_v63 = vadd.f32 %v1977_v43, %v1915_v17 }
 0x60a   : > { %v2133_v1 = vrot.slane %v2132_v2, 2 }
 0x60b   : > { %6603 = vpush %v2086_v48  ;;  %v1456_v48 = vadd.f32 %v7859_v40, %v7811_v8  ;;  %v767_v8 = vpop.permute.xlu2 %766  ;;  %v1898_v40 = vpop.f32.mrf.mxu2 }
 0x60c   : > { %6605 = vpush %v2102_v27  ;;  %v2134_v50 = vadd.f32 %v2133_v1, %v2132_v2  ;;  %v1759_v27 = vpop.f32.mrf.mxu0  ;;  %v1824_v1 = vpop.f32.mrf.mxu1  ;;  %v7997_v49 = vadd.f32 %v1628_v32, %v767_v8 }
 0x60d   : > { %6607 = vpush %v2119_v3  ;;  %v474_v3 = vadd.f32 %v7282_v53, %v7123_v29  ;;  %v1825_v47 = vadd.f32 %v1824_v1, %v1759_v27  ;;  %v1547_v25 = vadd.f32 %v7863_v20, %v1456_v48  ;;  %v1208_v29 = vadd.f32 %v7756_v21, %v1126_v44 }
 0x60e   : > { %v2135_v56 = vrot.slane %v2134_v50, 1  ;;  %v618_v53 = vadd.f32 %v7492_v4, %v477_v13  ;;  %v2201_v10 = vsel %vm295_vm0, %v7997_v49, 0.0 }
 0x60f   : > { %v617_v54 = vadd.f32 %v7481_v57, %v474_v3  ;;  %v7992_v38 = vadd.f32 %v1208_v29, %v767_v8  ;;  %v1916_v31 = vadd.f32 %v1898_v40, %v1825_v47  ;;  %v1629_v20 = vadd.f32 %v7861_v23, %v1547_v25 }
 0x610   : > { %v2136_v6 = vadd.f32 %v2135_v56, %v2134_v50  ;;  %v749_v30 = vadd.f32 %v7406_v46, %v618_v53  ;;  %v8017_v50 = vadd.f32 %v1997_v63, %v767_v8 }
 0x611   : > { %v748_v15 = vadd.f32 %v7400_v59, %v617_v54  ;;  %v1980_v59 = vpop.f32.mrf.mxu3  ;;  %v2188_v51 = vsel %vm295_vm0, %v7992_v38, 0.0 }
 0x612   : > { %6609 = vpush %v2136_v6  ;;  %v1998_v26 = vadd.f32 %v1980_v59, %v1916_v31  ;;  %v2214_v22 = vsel %vm295_vm0, %v8017_v50, 0.0 }
 0x613   : > { %v7990_v57 = vadd.f32 %v767_v8, %v748_v15 }
 0x615   : > { %v2176_v36 = vsel %vm295_vm0, %v7990_v57, 0.0 }
 0x61d   : > { %v772_v21 = vpop.permute.xlu1 %771 }
 0x61e   : > { %v7999_v28 = vadd.f32 %v772_v21, %v749_v30  ;;  %v8001_v4 = vadd.f32 %v1209_v58, %v772_v21  ;;  %v8003_v5 = vadd.f32 %v1629_v20, %v772_v21  ;;  %v8019_v56 = vadd.f32 %v1998_v26, %v772_v21 }
 0x620   : > { %v2177_v46 = vsel %vm295_vm0, %v7999_v28, 0.0  ;;  %v2189_v23 = vsel %vm295_vm0, %v8001_v4, 0.0  ;;  %v2202_v41 = vsel %vm295_vm0, %v8003_v5, 0.0  ;;  %v2215_v6 = vsel %vm295_vm0, %v8019_v56, 0.0 }
 0x621   : > { %v2178_v52 = vadd.f32 %v2177_v46, %v2176_v36  ;;  %v2190_v2 = vadd.f32 %v2189_v23, %v2188_v51  ;;  %v2203_v11 = vadd.f32 %v2202_v41, %v2201_v10  ;;  %v2216_v55 = vadd.f32 %v2215_v6, %v2214_v22  ;;  %v1646_v22 = vld [vmem:[%s10105_s2 + $0x20] sm:$0xff]  ;;  %v6258_v6 = vld [vmem:[%s10105_s2 + $0x228] sm:$0xff] }
 0x622   : > { %6249 = vmatmul.msk.f32.gmra.mxu1 %vm295_vm0, %v1646_v22 }
 0x623   : > { %2179 = vadd.xlane.f32.xlu2 %v2178_v52  ;;  %2191 = vadd.xlane.f32.xlu1 %v2190_v2  ;;  %v6257_v52 = vld [vmem:[%s10105_s2 + $0x220] sm:$0xff] }
 0x624   : > { %2204 = vadd.xlane.f32.xlu0 %v2203_v11  ;;  %6265 = vmatmul.msk.f32.gmra.mxu2 %vm295_vm0, %v6257_v52  ;;  %v6273_v2 = vld [vmem:[%s10105_s2 + $0x2a0] sm:$0xff] }
 0x625   : > { %6281 = vmatmul.msk.f32.gmra.mxu3 %vm295_vm0, %v6273_v2  ;;  %v6233_v11 = vld [vmem:[%s10105_s2 + $0xa0] sm:$0xff] }
 0x626   : > { %6241 = vmatmul.msk.f32.gmra.mxu0 %vm295_vm0, %v6233_v11 }
 0x62c   : > { %2217 = vadd.xlane.f32.xlu0 %v2216_v55  ;;  %6266 = vmatmul.msk.f32.gmra.mxu2 %vm295_vm0, %v6258_v6  ;;  %v6274_v55 = vld [vmem:[%s10105_s2 + $0x2a8] sm:$0xff]  ;;  %v6235_v6 = vld [vmem:[%s10105_s2 + $0xb0] sm:$0xff] }
 0x62d   : > { %6282 = vmatmul.msk.f32.gmra.mxu3 %vm295_vm0, %v6274_v55  ;;  %v1648_v55 = vld [vmem:[%s10105_s2 + $0x30] sm:$0xff] }
 0x63c   : > { %s6604_s11 = spop %6603 }
 0x63d   : > { %s6606_s12 = spop %6605 }
 0x63e   : > { %s2104_s13 = sadd.f32 %s6606_s12, %s6604_s11  ;;  %s6608_s14 = spop %6607 }
 0x640   : > { %s2121_s15 = sadd.f32 %s6608_s14, %s2104_s13 }
 0x643   : > { %s6610_s16 = spop %6609 }
 0x644   : > { %s2138_s17 = sadd.f32 %s6610_s16, %s2121_s15 }
 0x646   : > { %s2147_s18 = smul.f32 %s7931_s29, %s2138_s17 }
 0x648   : > { %s2148_s19 = sadd.f32 1e-05, %s2147_s18 }
 0x64a   : > { %v2149_v37 = vstv %s2148_s19 }
 0x64b   : > { %6696 = vrsqrt.f32 %v2149_v37  ;;  %vm2156_vm3 = vweird.f32 %v2149_v37 }
 0x651   : > { %v6697_v43 = vpop.eup %6696 }
 0x652   : > { %v2151_v16 = vmul.f32 %v6697_v43, %v2149_v37  ;;  %vm2157_vm2 = vweird.f32 %v6697_v43  ;;  %v6234_v37 = vld [vmem:[%s10105_s2 + $0xa8] sm:$0xff] }
 0x653   : > { %vm2158_vm4 = vmor %vm2156_vm3, %vm2157_vm2  ;;  %6242 = vmatmul.msk.f32.gmra.mxu0 %vm295_vm0, %v6234_v37  ;;  %v6260_v37 = vld [vmem:[%s10105_s2 + $0x238] sm:$0xff] }
 0x654   : > { %v2152_v48 = vmul.f32 %v6697_v43, %v2151_v16 }
 0x656   : > { %v2153_v27 = vmul.f32 0.5, %v2152_v48 }
 0x658   : > { %v2154_v1 = vsub.f32 1.5, %v2153_v27 }
 0x65a   : > { %v2155_v3 = vmul.f32 %v6697_v43, %v2154_v1 }
 0x65b   : > { %6243 = vmatmul.msk.f32.gmra.mxu0 %vm295_vm0, %v6235_v6  ;;  %v480_v6 = vadd.f32 %v7312_v35, %v7131_v33  ;;  %v989_v33 = vadd.f32 %v7452_v19, %v7647_v0  ;;  %v10169_v19 = vld [vmem:[#allocation34_spill] sm:$0xff] }
 0x65c   : > { %v2159_v44 = vsel %vm2158_vm4, %v6697_v43, %v2155_v3  ;;  %v1647_v43 = vld [vmem:[%s10105_s2 + $0x28] sm:$0xff] }
 0x65d   : > { %6611 = vpush %v2159_v44  ;;  %6250 = vmatmul.msk.f32.gmra.mxu1 %vm295_vm0, %v1647_v43 }
 0x665   : > { %6251 = vmatmul.msk.f32.gmra.mxu1 %vm295_vm0, %v1648_v55 }
 0x68e   : > { %s8045_s10 = spop %6611 }
 0x696   : > { %v2180_v14 = vpop.xlane.xlu2 %2179  ;;  %v2192_v54 = vpop.xlane.xlu1 %2191 }
 0x697   : > { %v2181_v61 = vrot.slane %v2180_v14, 4  ;;  %v2193_v47 = vrot.slane %v2192_v54, 4  ;;  %v2205_v13 = vpop.xlane.xlu0 %2204 }
 0x698   : > { %v2206_v39 = vrot.slane %v2205_v13, 4 }
 0x699   : > { %v2182_v25 = vadd.f32 %v2181_v61, %v2180_v14  ;;  %v2194_v8 = vadd.f32 %v2193_v47, %v2192_v54 }
 0x69a   : > { %v2207_v40 = vadd.f32 %v2206_v39, %v2205_v13 }
 0x69b   : > { %v2183_v15 = vrot.slane %v2182_v25, 2  ;;  %v2195_v29 = vrot.slane %v2194_v8, 2 }
 0x69c   : > { %v2208_v53 = vrot.slane %v2207_v40, 2 }
 0x69d   : > { %v2184_v32 = vadd.f32 %v2183_v15, %v2182_v25  ;;  %v2196_v17 = vadd.f32 %v2195_v29, %v2194_v8 }
 0x69e   : > { %v2209_v31 = vadd.f32 %v2208_v53, %v2207_v40 }
 0x69f   : > { %v2218_v30 = vpop.xlane.xlu0 %2217  ;;  %v2185_v58 = vrot.slane %v2184_v32, 1  ;;  %v2197_v20 = vrot.slane %v2196_v17, 1 }
 0x6a0   : > { %v2219_v59 = vrot.slane %v2218_v30, 4  ;;  %v2210_v21 = vrot.slane %v2209_v31, 1 }
 0x6a1   : > { %v2186_v63 = vadd.f32 %v2185_v58, %v2184_v32  ;;  %v2198_v26 = vadd.f32 %v2197_v20, %v2196_v17 }
 0x6a2   : > { %v2220_v36 = vadd.f32 %v2219_v59, %v2218_v30  ;;  %v2211_v51 = vadd.f32 %v2210_v21, %v2209_v31 }
 0x6a3   : > { %6613 = vpush %v2186_v63 }
 0x6a4   : > { %v2221_v46 = vrot.slane %v2220_v36, 2  ;;  %6615 = vpush %v2198_v26 }
 0x6a5   : > { %6617 = vpush %v2211_v51  ;;  %v8090_v51 = vld [vmem:[%s10107_s4 + $0x20] sm:$0xff] }
 0x6a6   : > { %v2222_v23 = vadd.f32 %v2221_v46, %v2220_v36  ;;  %v8096_v46 = vld [vmem:[%s10107_s4 + $0x28] sm:$0xff] }
 0x6a8   : > { %v2223_v10 = vrot.slane %v2222_v23, 1 }
 0x6aa   : > { %v2224_v41 = vadd.f32 %v2223_v10, %v2222_v23  ;;  %v6259_v23 = vld [vmem:[%s10105_s2 + $0x230] sm:$0xff] }
 0x6ab   : > { %v6275_v10 = vld [vmem:[%s10105_s2 + $0x2b0] sm:$0xff]  ;;  %6267 = vmatmul.msk.f32.gmra.mxu2 %vm295_vm0, %v6259_v23 }
 0x6ac   : > { %6619 = vpush %v2224_v41  ;;  %6283 = vmatmul.msk.f32.gmra.mxu3 %vm295_vm0, %v6275_v10 }
 0x6b3   : > { %6268 = vmatmul.msk.f32.gmra.mxu2 %vm295_vm0, %v6260_v37  ;;  %v992_v37 = vadd.f32 %v7458_v45, %v7676_v24 }
 0x6d4   : > { %s6614_s8 = spop %6613 }
 0x6d5   : > { %s6616_s11 = spop %6615 }
 0x6d6   : > { %s2200_s12 = sadd.f32 %s6616_s11, %s6614_s8  ;;  %s6618_s19 = spop %6617 }
 0x6d8   : > { %s2213_s20 = sadd.f32 %s6618_s19, %s2200_s12 }
 0x6dd   : > { %s6620_s23 = spop %6619 }
 0x6de   : > { %s2226_s24 = sadd.f32 %s6620_s23, %s2213_s20 }
 0x6e0   : > { %s2235_s25 = smul.f32 %s7931_s29, %s2226_s24 }
 0x6e2   : > { %v8061_v16 = vstv %s2235_s25 }
 0x6e3   : > { %v2270_v48 = vsub.f32 %v7997_v49, %v8061_v16  ;;  %v2271_v27 = vsub.f32 %v8003_v5, %v8061_v16  ;;  %v2237_v1 = vsub.f32 %v7990_v57, %v8061_v16  ;;  %v2238_v3 = vsub.f32 %v7999_v28, %v8061_v16 }
 0x6e4   : > { %v2253_v44 = vsub.f32 %v7992_v38, %v8061_v16  ;;  %v2254_v14 = vsub.f32 %v8001_v4, %v8061_v16  ;;  %v2287_v30 = vsub.f32 %v8017_v50, %v8061_v16  ;;  %v2288_v58 = vsub.f32 %v8019_v56, %v8061_v16 }
 0x6e5   : > { %v2272_v54 = vmul.f32 %v2270_v48, %v2270_v48  ;;  %v2273_v61 = vmul.f32 %v2271_v27, %v2271_v27  ;;  %v2239_v47 = vmul.f32 %v2237_v1, %v2237_v1  ;;  %v2240_v13 = vmul.f32 %v2238_v3, %v2238_v3 }
 0x6e6   : > { %v2255_v53 = vmul.f32 %v2253_v44, %v2253_v44  ;;  %v2256_v32 = vmul.f32 %v2254_v14, %v2254_v14  ;;  %v2289_v59 = vmul.f32 %v2287_v30, %v2287_v30  ;;  %v2290_v21 = vmul.f32 %v2288_v58, %v2288_v58  ;;  %v6276_v44 = vld [vmem:[%s10105_s2 + $0x2b8] sm:$0xff] }
 0x6e7   : > { %v2274_v39 = vsel %vm295_vm0, %v2272_v54, 0.0  ;;  %v2275_v25 = vsel %vm295_vm0, %v2273_v61, 0.0  ;;  %v2241_v8 = vsel %vm295_vm0, %v2239_v47, 0.0  ;;  %v2242_v40 = vsel %vm295_vm0, %v2240_v13, 0.0  ;;  %6284 = vmatmul.msk.f32.gmra.mxu3 %vm295_vm0, %v6276_v44  ;;  %v6236_v61 = vld [vmem:[%s10105_s2 + $0xb8] sm:$0xff] }
 0x6e8   : > { %v2276_v15 = vadd.f32 %v2275_v25, %v2274_v39  ;;  %v2243_v29 = vadd.f32 %v2242_v40, %v2241_v8  ;;  %v2257_v17 = vsel %vm295_vm0, %v2255_v53, 0.0  ;;  %v2258_v31 = vsel %vm295_vm0, %v2256_v32, 0.0  ;;  %v1649_v47 = vld [vmem:[%s10105_s2 + $0x38] sm:$0xff]  ;;  %v1762_v25 = vpop.f32.mrf.mxu0  ;;  %v1827_v8 = vpop.f32.mrf.mxu1  ;;  %6244 = vmatmul.msk.f32.gmra.mxu0 %vm295_vm0, %v6236_v61 }
 0x6e9   : > { %v2259_v20 = vadd.f32 %v2258_v31, %v2257_v17  ;;  %v2291_v63 = vsel %vm295_vm0, %v2289_v59, 0.0  ;;  %v2292_v26 = vsel %vm295_vm0, %v2290_v21, 0.0  ;;  %6252 = vmatmul.msk.f32.gmra.mxu1 %vm295_vm0, %v1649_v47  ;;  %v1901_v32 = vpop.f32.mrf.mxu2  ;;  %v1828_v23 = vadd.f32 %v1827_v8, %v1762_v25 }
 0x6ea   : > { %2277 = vadd.xlane.f32.xlu2 %v2276_v15  ;;  %2244 = vadd.xlane.f32.xlu0 %v2243_v29  ;;  %v2293_v36 = vadd.f32 %v2292_v26, %v2291_v63 }
 0x6f0   : > { %v1765_v26 = vpop.f32.mrf.mxu0 }
 0x6f2   : > { %2260 = vadd.xlane.f32.xlu0 %v2259_v20  ;;  %v1983_v20 = vpop.f32.mrf.mxu3 }
 0x6fa   : > { %2294 = vadd.xlane.f32.xlu0 %v2293_v36  ;;  %v1830_v36 = vpop.f32.mrf.mxu1 }
 0x702   : > { %776 = vperm.xlu2 %6682, %v8090_v51  }
 0x70e   : > { %781 = vperm.xlu0 %6681, %v8096_v46  }
 0x75d   : > { %v2278_v41 = vpop.xlane.xlu2 %2277  ;;  %v2245_v52 = vpop.xlane.xlu0 %2244 }
 0x75e   : > { %v2279_v2 = vrot.slane %v2278_v41, 4  ;;  %v2246_v11 = vrot.slane %v2245_v52, 4 }
 0x760   : > { %v2247_v22 = vadd.f32 %v2246_v11, %v2245_v52  ;;  %v2280_v43 = vadd.f32 %v2279_v2, %v2278_v41  ;;  %v1831_v41 = vadd.f32 %v1830_v36, %v1765_v26  ;;  %v1904_v2 = vpop.f32.mrf.mxu2  ;;  %v1917_v11 = vadd.f32 %v1901_v32, %v1828_v23 }
 0x762   : > { %v2248_v48 = vrot.slane %v2247_v22, 2  ;;  %v2281_v3 = vrot.slane %v2280_v43, 2  ;;  %v1918_v55 = vadd.f32 %v1904_v2, %v1831_v41 }
 0x764   : > { %v2249_v27 = vadd.f32 %v2248_v48, %v2247_v22  ;;  %v2282_v40 = vadd.f32 %v2281_v3, %v2280_v43  ;;  %v1986_v43 = vpop.f32.mrf.mxu3  ;;  %v619_v48 = vadd.f32 %v7502_v9, %v480_v6 }
 0x765   : > { %v2261_v1 = vpop.xlane.xlu0 %2260  ;;  %v777_v3 = vpop.permute.xlu2 %776  ;;  %v2000_v35 = vadd.f32 %v1986_v43, %v1918_v55  ;;  %v8190_v55 = vld [vmem:[%s10107_s4 + $0x38] sm:$0xff] }
 0x766   : > { %v2262_v14 = vrot.slane %v2261_v1, 4  ;;  %v2250_v54 = vrot.slane %v2249_v27, 1  ;;  %v2283_v31 = vrot.slane %v2282_v40, 1 }
 0x768   : > { %v2263_v13 = vadd.f32 %v2262_v14, %v2261_v1  ;;  %v2251_v39 = vadd.f32 %v2250_v54, %v2249_v27  ;;  %v2284_v63 = vadd.f32 %v2283_v31, %v2282_v40  ;;  %v483_v27 = vadd.f32 %v7332_v60, %v7135_v34  ;;  %v10170_v40 = vld [vmem:[#allocation19_spill] sm:$0xff]  ;;  %v10173_v31 = vld [vmem:[#allocation36_spill] sm:$0xff] }
 0x769   : > { %v1999_v1 = vadd.f32 %v1983_v20, %v1917_v11  ;;  %v750_v14 = vadd.f32 %v7412_v18, %v619_v48  ;;  %v1129_v54 = vadd.f32 %v7787_v7, %v992_v37  ;;  %v1128_v34 = vadd.f32 %v7784_v62, %v989_v33  ;;  %v10167_v18 = vld [vmem:[#allocation20_spill] sm:$0xff]  ;;  %v10174_v20 = vld [vmem:[#allocation33_spill] sm:$0xff] }
 0x76a   : > { %v2264_v15 = vrot.slane %v2263_v13, 2  ;;  %6621 = vpush %v2251_v39  ;;  %v620_v44 = vadd.f32 %v7514_v42, %v483_v27 }
 0x76b   : > { %v8144_v24 = vadd.f32 %v777_v3, %v750_v14  ;;  %v8146_v9 = vadd.f32 %v1999_v1, %v777_v3  ;;  %v1211_v47 = vadd.f32 %v10167_v18, %v1129_v54 }
 0x76c   : > { %v2265_v53 = vadd.f32 %v2264_v15, %v2263_v13  ;;  %v751_v45 = vadd.f32 %v7420_v12, %v620_v44  ;;  %v10168_v13 = vld [vmem:[#allocation28_spill] sm:$0xff]  ;;  %v1210_v15 = vadd.f32 %v10170_v40, %v1128_v34 }
 0x76d   : > { %v2295_v29 = vpop.xlane.xlu0 %2294  ;;  %v1462_v0 = vadd.f32 %v10169_v19, %v10168_v13  ;;  %v2341_v7 = vsel %vm295_vm0, %v8144_v24, 0.0  ;;  %v2379_v39 = vsel %vm295_vm0, %v8146_v9, 0.0 }
 0x76e   : > { %v2296_v17 = vrot.slane %v2295_v29, 4  ;;  %v2266_v30 = vrot.slane %v2265_v53, 1 }
 0x770   : > { %v2297_v58 = vadd.f32 %v2296_v17, %v2295_v29  ;;  %v2267_v59 = vadd.f32 %v2266_v30, %v2265_v53  ;;  %v10171_v29 = vld [vmem:[#allocation27_spill] sm:$0xff]  ;;  %v1549_v30 = vadd.f32 %v10173_v31, %v1462_v0 }
 0x771   : > { %v10172_v53 = vld [vmem:[#allocation31_spill] sm:$0xff] }
 0x772   : > { %v2298_v21 = vrot.slane %v2297_v58, 2  ;;  %6623 = vpush %v2267_v59  ;;  %v1459_v32 = vadd.f32 %v10172_v53, %v10171_v29 }
 0x773   : > { %6625 = vpush %v2284_v63  ;;  %v10175_v63 = vld [vmem:[#allocation35_spill] sm:$0xff] }
 0x774   : > { %v2299_v10 = vadd.f32 %v2298_v21, %v2297_v58  ;;  %v8170_v58 = vadd.f32 %v1210_v15, %v777_v3  ;;  %v1548_v59 = vadd.f32 %v10174_v20, %v1459_v32  ;;  %v1631_v26 = vadd.f32 %v10175_v63, %v1549_v30 }
 0x776   : > { %v2300_v52 = vrot.slane %v2299_v10, 1  ;;  %v2353_v36 = vsel %vm295_vm0, %v8170_v58, 0.0 }
 0x778   : > { %v2301_v22 = vadd.f32 %v2300_v52, %v2299_v10  ;;  %v10176_v10 = vld [vmem:[#allocation32_spill] sm:$0xff] }
 0x779   : > { %v1630_v41 = vadd.f32 %v10176_v10, %v1548_v59 }
 0x77a   : > { %6627 = vpush %v2301_v22 }
 0x77b   : > { %v8181_v2 = vadd.f32 %v1630_v41, %v777_v3 }
 0x77d   : > { %v2366_v22 = vsel %vm295_vm0, %v8181_v2, 0.0 }
 0x780   : > { %v782_v61 = vpop.permute.xlu0 %781 }
 0x781   : > { %v8149_v60 = vadd.f32 %v782_v61, %v751_v45  ;;  %v8151_v42 = vadd.f32 %v2000_v35, %v782_v61  ;;  %v8167_v17 = vadd.f32 %v1211_v47, %v782_v61  ;;  %v8179_v52 = vadd.f32 %v1631_v26, %v782_v61 }
 0x783   : > { %v2342_v12 = vsel %vm295_vm0, %v8149_v60, 0.0  ;;  %v2380_v62 = vsel %vm295_vm0, %v8151_v42, 0.0  ;;  %v2354_v21 = vsel %vm295_vm0, %v8167_v17, 0.0  ;;  %v2367_v11 = vsel %vm295_vm0, %v8179_v52, 0.0 }
 0x784   : > { %v2343_v25 = vadd.f32 %v2342_v12, %v2341_v7  ;;  %v2381_v8 = vadd.f32 %v2380_v62, %v2379_v39  ;;  %v2355_v23 = vadd.f32 %v2354_v21, %v2353_v36  ;;  %v2368_v6 = vadd.f32 %v2367_v11, %v2366_v22 }
 0x786   : > { %2344 = vadd.xlane.f32.xlu1 %v2343_v25  ;;  %2382 = vadd.xlane.f32.xlu0 %v2381_v8 }
 0x78e   : > { %2356 = vadd.xlane.f32.xlu1 %v2355_v23 }
 0x796   : > { %2369 = vadd.xlane.f32.xlu1 %v2368_v6 }
 0x79a   : > { %791 = vperm.xlu0 %6681, %v8190_v55  }
 0x79b   : > { %s6622_s28 = spop %6621 }
 0x7a3   : > { %s6624_s30 = spop %6623 }
 0x7a4   : > { %s2269_s7 = sadd.f32 %s6624_s30, %s6622_s28  ;;  %s6626_s9 = spop %6625 }
 0x7a5   : > { %s6726_s30 = smov 1  }
 0x7a6   : > { %s2286_s8 = sadd.f32 %s6626_s9, %s2269_s7 }
 0x7ab   : > { %s6628_s11 = spop %6627 }
 0x7ac   : > { %s2303_s12 = sadd.f32 %s6628_s11, %s2286_s8 }
 0x7ae   : > { %s2312_s13 = smul.f32 %s7931_s29, %s2303_s12 }
 0x7b0   : > { %s2313_s14 = sadd.f32 1e-05, %s2312_s13 }
 0x7b2   : > { %v2314_v37 = vstv %s2313_s14 }
 0x7b3   : > { %6698 = vrsqrt.f32 %v2314_v37  ;;  %vm2321_vm6 = vweird.f32 %v2314_v37 }
 0x7b9   : > { %v6699_v43 = vpop.eup %6698 }
 0x7ba   : > { %v2316_v48 = vmul.f32 %v6699_v43, %v2314_v37  ;;  %vm2322_vm5 = vweird.f32 %v6699_v43 }
 0x7bb   : > { %vm2323_vm7 = vmor %vm2321_vm6, %vm2322_vm5 }
 0x7bc   : > { %v2317_v27 = vmul.f32 %v6699_v43, %v2316_v48 }
 0x7be   : > { %v2318_v1 = vmul.f32 0.5, %v2317_v27 }
 0x7c0   : > { %v2319_v3 = vsub.f32 1.5, %v2318_v1 }
 0x7c2   : > { %v2320_v44 = vmul.f32 %v6699_v43, %v2319_v3 }
 0x7c4   : > { %v2324_v14 = vsel %vm2323_vm7, %v6699_v43, %v2320_v44 }
 0x7c5   : > { %6629 = vpush %v2324_v14 }
 0x7f6   : > { %s8194_s15 = spop %6629 }
 0x7f9   : > { %v2345_v33 = vpop.xlane.xlu1 %2344  ;;  %v2383_v61 = vpop.xlane.xlu0 %2382 }
 0x7fa   : > { %v2346_v35 = vrot.slane %v2345_v33, 4  ;;  %v2384_v18 = vrot.slane %v2383_v61, 4 }
 0x7fc   : > { %v2347_v54 = vadd.f32 %v2346_v35, %v2345_v33  ;;  %v2385_v12 = vadd.f32 %v2384_v18, %v2383_v61 }
 0x7fe   : > { %v2348_v45 = vrot.slane %v2347_v54, 2  ;;  %v2386_v25 = vrot.slane %v2385_v12, 2 }
 0x800   : > { %v2349_v34 = vadd.f32 %v2348_v45, %v2347_v54  ;;  %v2387_v32 = vadd.f32 %v2386_v25, %v2385_v12 }
 0x801   : > { %v2357_v47 = vpop.xlane.xlu1 %2356 }
 0x802   : > { %v2358_v13 = vrot.slane %v2357_v47, 4  ;;  %v2350_v19 = vrot.slane %v2349_v34, 1  ;;  %v2388_v20 = vrot.slane %v2387_v32, 1 }
 0x804   : > { %v2359_v0 = vadd.f32 %v2358_v13, %v2357_v47  ;;  %v2351_v7 = vadd.f32 %v2350_v19, %v2349_v34  ;;  %v2389_v63 = vadd.f32 %v2388_v20, %v2387_v32 }
 0x806   : > { %v2360_v39 = vrot.slane %v2359_v0, 2  ;;  %6631 = vpush %v2351_v7 }
 0x808   : > { %v2361_v62 = vadd.f32 %v2360_v39, %v2359_v0  ;;  %v8226_v39 = vld [vmem:[%s10107_s4 + $0x30] sm:$0xff] }
 0x809   : > { %v2370_v8 = vpop.xlane.xlu1 %2369 }
 0x80a   : > { %v2371_v40 = vrot.slane %v2370_v8, 4  ;;  %v2362_v15 = vrot.slane %v2361_v62, 1 }
 0x80c   : > { %v2372_v29 = vadd.f32 %v2371_v40, %v2370_v8  ;;  %v2363_v53 = vadd.f32 %v2362_v15, %v2361_v62 }
 0x80e   : > { %v2373_v31 = vrot.slane %v2372_v29, 2  ;;  %6633 = vpush %v2363_v53 }
 0x810   : > { %v2374_v30 = vadd.f32 %v2373_v31, %v2372_v29 }
 0x812   : > { %v2375_v59 = vrot.slane %v2374_v30, 1 }
 0x814   : > { %v2376_v21 = vadd.f32 %v2375_v59, %v2374_v30 }
 0x816   : > { %6635 = vpush %v2376_v21 }
 0x817   : > { %6637 = vpush %v2389_v63 }
 0x837   : > { %s6632_s16 = spop %6631 }
 0x83f   : > { %s6634_s17 = spop %6633 }
 0x840   : > { %s2365_s18 = sadd.f32 %s6634_s17, %s6632_s16 }
 0x847   : > { %s6636_s19 = spop %6635 }
 0x848   : > { %s2378_s20 = sadd.f32 %s6636_s19, %s2365_s18  ;;  %s6638_s23 = spop %6637 }
 0x84a   : > { %s2391_s24 = sadd.f32 %s6638_s23, %s2378_s20 }
 0x84c   : > { %s2400_s25 = smul.f32 %s7931_s29, %s2391_s24 }
 0x84e   : > { %v8197_v26 = vstv %s2400_s25 }
 0x84f   : > { %v2418_v36 = vsub.f32 %v8170_v58, %v8197_v26  ;;  %v2419_v23 = vsub.f32 %v8167_v17, %v8197_v26  ;;  %v2402_v10 = vsub.f32 %v8144_v24, %v8197_v26  ;;  %v2403_v41 = vsub.f32 %v8149_v60, %v8197_v26 }
 0x850   : > { %v2435_v11 = vsub.f32 %v8181_v2, %v8197_v26  ;;  %v2436_v22 = vsub.f32 %v8179_v52, %v8197_v26  ;;  %v2452_v34 = vsub.f32 %v8146_v9, %v8197_v26  ;;  %v2453_v18 = vsub.f32 %v8151_v42, %v8197_v26 }
 0x851   : > { %v2420_v6 = vmul.f32 %v2418_v36, %v2418_v36  ;;  %v2421_v37 = vmul.f32 %v2419_v23, %v2419_v23  ;;  %v2404_v43 = vmul.f32 %v2402_v10, %v2402_v10  ;;  %v2405_v48 = vmul.f32 %v2403_v41, %v2403_v41 }
 0x852   : > { %v2437_v35 = vmul.f32 %v2435_v11, %v2435_v11  ;;  %v2438_v54 = vmul.f32 %v2436_v22, %v2436_v22  ;;  %v2454_v13 = vmul.f32 %v2452_v34, %v2452_v34  ;;  %v2455_v19 = vmul.f32 %v2453_v18, %v2453_v18  ;;  %v10180_v34 = vld [vmem:[#allocation37_spill] sm:$0xff] }
 0x853   : > { %v2422_v27 = vsel %vm295_vm0, %v2420_v6, 0.0  ;;  %v2423_v1 = vsel %vm295_vm0, %v2421_v37, 0.0  ;;  %v2406_v3 = vsel %vm295_vm0, %v2404_v43, 0.0  ;;  %v2407_v44 = vsel %vm295_vm0, %v2405_v48, 0.0 }
 0x854   : > { %v2424_v14 = vadd.f32 %v2423_v1, %v2422_v27  ;;  %v2408_v33 = vadd.f32 %v2407_v44, %v2406_v3  ;;  %v2439_v45 = vsel %vm295_vm0, %v2437_v35, 0.0  ;;  %v2440_v61 = vsel %vm295_vm0, %v2438_v54, 0.0  ;;  %v1768_v54 = vpop.f32.mrf.mxu0 }
 0x855   : > { %v2441_v47 = vadd.f32 %v2440_v61, %v2439_v45  ;;  %v2456_v0 = vsel %vm295_vm0, %v2454_v13, 0.0  ;;  %v2457_v7 = vsel %vm295_vm0, %v2455_v19, 0.0  ;;  %v1833_v45 = vpop.f32.mrf.mxu1  ;;  %v10179_v61 = vld [vmem:[#allocation29_spill] sm:$0xff]  ;;  %v10182_v13 = vld [vmem:[#allocation6_spill] sm:$0xff] }
 0x856   : > { %2425 = vadd.xlane.f32.xlu1 %v2424_v14  ;;  %2409 = vadd.xlane.f32.xlu2 %v2408_v33  ;;  %v2458_v12 = vadd.f32 %v2457_v7, %v2456_v0  ;;  %v10177_v14 = vld [vmem:[#allocation30_spill] sm:$0xff]  ;;  %v10178_v33 = vld [vmem:[#allocation40_spill] sm:$0xff]  ;;  %v1465_v18 = vadd.f32 %v10180_v34, %v10179_v61 }
 0x857   : > { %v1468_v35 = vadd.f32 %v10178_v33, %v10177_v14  ;;  %v10183_v0 = vld [vmem:[#allocation42_spill] sm:$0xff]  ;;  %v10198_v34 = vld [vmem:[#allocation24_spill] sm:$0xff] }
 0x859   : > { %v1551_v7 = vadd.f32 %v10183_v0, %v1468_v35  ;;  %v10199_v0 = vld [vmem:[#allocation21_spill] sm:$0xff] }
 0x85d   : > { %v1836_v14 = vpop.f32.mrf.mxu1 }
 0x85e   : > { %2442 = vadd.xlane.f32.xlu1 %v2441_v47  ;;  %v10181_v47 = vld [vmem:[#allocation4_spill] sm:$0xff] }
 0x85f   : > { %v489_v19 = vadd.f32 %v10182_v13, %v10181_v47  ;;  %v1834_v47 = vadd.f32 %v1833_v45, %v1768_v54 }
 0x866   : > { %2459 = vadd.xlane.f32.xlu1 %v2458_v12  ;;  %v10184_v12 = vld [vmem:[#allocation15_spill] sm:$0xff] }
 0x87f   : > { %786 = vperm.xlu1 %6683, %v8226_v39  }
 0x8c9   : > { %v2426_v62 = vpop.xlane.xlu1 %2425  ;;  %v2410_v25 = vpop.xlane.xlu2 %2409 }
 0x8ca   : > { %v2427_v8 = vrot.slane %v2426_v62, 4  ;;  %v2411_v40 = vrot.slane %v2410_v25, 4 }
 0x8cc   : > { %v2428_v15 = vadd.f32 %v2427_v8, %v2426_v62  ;;  %v2412_v29 = vadd.f32 %v2411_v40, %v2410_v25  ;;  %v10185_v62 = vld [vmem:[#allocation11_spill] sm:$0xff]  ;;  %v1907_v8 = vpop.f32.mrf.mxu2 }
 0x8cd   : > { %v995_v25 = vadd.f32 %v10185_v62, %v10184_v12  ;;  %v10186_v40 = vld [vmem:[#allocation3_spill] sm:$0xff] }
 0x8ce   : > { %v2429_v53 = vrot.slane %v2428_v15, 2  ;;  %v2413_v32 = vrot.slane %v2412_v29, 2 }
 0x8d0   : > { %v2414_v31 = vadd.f32 %v2413_v32, %v2412_v29  ;;  %v2430_v30 = vadd.f32 %v2429_v53, %v2428_v15  ;;  %v10187_v15 = vld [vmem:[#allocation5_spill] sm:$0xff]  ;;  %v10188_v53 = vld [vmem:[#allocation14_spill] sm:$0xff] }
 0x8d1   : > { %v2443_v20 = vpop.xlane.xlu1 %2442  ;;  %v486_v29 = vadd.f32 %v10187_v15, %v10186_v40  ;;  %v622_v32 = vadd.f32 %v10188_v53, %v489_v19  ;;  %v10200_v53 = vld [vmem:[#allocation23_spill] sm:$0xff] }
 0x8d2   : > { %v2444_v59 = vrot.slane %v2443_v20, 4  ;;  %v2415_v21 = vrot.slane %v2414_v31, 1  ;;  %v2431_v63 = vrot.slane %v2430_v30, 1 }
 0x8d4   : > { %v2445_v36 = vadd.f32 %v2444_v59, %v2443_v20  ;;  %v2416_v23 = vadd.f32 %v2415_v21, %v2414_v31  ;;  %v2432_v10 = vadd.f32 %v2431_v63, %v2430_v30  ;;  %v10189_v31 = vld [vmem:[#allocation39_spill] sm:$0xff]  ;;  %v792_v20 = vpop.permute.xlu0 %791  ;;  %v10190_v59 = vld [vmem:[#allocation13_spill] sm:$0xff]  ;;  %v10191_v63 = vld [vmem:[#allocation10_spill] sm:$0xff]  ;;  %v1910_v54 = vpop.f32.mrf.mxu2 }
 0x8d5   : > { %v1550_v30 = vadd.f32 %v10189_v31, %v1465_v18  ;;  %v621_v21 = vadd.f32 %v10190_v59, %v486_v29  ;;  %v1919_v31 = vadd.f32 %v1907_v8, %v1834_v47 }
 0x8d6   : > { %v2446_v41 = vrot.slane %v2445_v36, 2  ;;  %6639 = vpush %v2416_v23  ;;  %v10192_v23 = vld [vmem:[#allocation16_spill] sm:$0xff] }
 0x8d7   : > { %6641 = vpush %v2432_v10  ;;  %v10193_v10 = vld [vmem:[#allocation12_spill] sm:$0xff] }
 0x8d8   : > { %v2447_v11 = vadd.f32 %v2446_v41, %v2445_v36  ;;  %v753_v36 = vadd.f32 %v10191_v63, %v622_v32  ;;  %v998_v41 = vadd.f32 %v10193_v10, %v10192_v23 }
 0x8d9   : > { %v2460_v22 = vpop.xlane.xlu1 %2459 }
 0x8da   : > { %v2461_v6 = vrot.slane %v2460_v22, 4  ;;  %v2448_v37 = vrot.slane %v2447_v11, 1  ;;  %v8250_v33 = vadd.f32 %v792_v20, %v753_v36  ;;  %v1131_v18 = vadd.f32 %v10198_v34, %v998_v41 }
 0x8dc   : > { %v2462_v43 = vadd.f32 %v2461_v6, %v2460_v22  ;;  %v2449_v48 = vadd.f32 %v2448_v37, %v2447_v11  ;;  %v10194_v11 = vld [vmem:[#allocation41_spill] sm:$0xff]  ;;  %v10195_v6 = vld [vmem:[#allocation22_spill] sm:$0xff]  ;;  %v2507_v15 = vsel %vm295_vm0, %v8250_v33, 0.0  ;;  %v1213_v32 = vadd.f32 %v10200_v53, %v1131_v18 }
 0x8dd   : > { %v1633_v22 = vadd.f32 %v10194_v11, %v1551_v7  ;;  %v1130_v37 = vadd.f32 %v10195_v6, %v995_v25 }
 0x8de   : > { %v2463_v27 = vrot.slane %v2462_v43, 2  ;;  %6643 = vpush %v2449_v48  ;;  %v10196_v48 = vld [vmem:[#allocation9_spill] sm:$0xff] }
 0x8df   : > { %v8252_v35 = vadd.f32 %v1633_v22, %v792_v20  ;;  %v1212_v7 = vadd.f32 %v10199_v0, %v1130_v37 }
 0x8e0   : > { %v2464_v1 = vadd.f32 %v2463_v27, %v2462_v43  ;;  %v1989_v43 = vpop.f32.mrf.mxu3  ;;  %v752_v27 = vadd.f32 %v10196_v48, %v621_v21  ;;  %v8271_v21 = vadd.f32 %v1213_v32, %v792_v20  ;;  %v2326_v48 = vstv %s8194_s15 }
 0x8e1   : > { %v2532_v25 = vsel %vm295_vm0, %v8252_v35, 0.0  ;;  %v2001_v36 = vadd.f32 %v1989_v43, %v1919_v31 }
 0x8e2   : > { %v2465_v3 = vrot.slane %v2464_v1, 1  ;;  %v2519_v41 = vsel %vm295_vm0, %v8271_v21, 0.0 }
 0x8e4   : > { %v2466_v44 = vadd.f32 %v2465_v3, %v2464_v1  ;;  %v10197_v1 = vld [vmem:[#allocation38_spill] sm:$0xff] }
 0x8e5   : > { %v1632_v3 = vadd.f32 %v10197_v1, %v1550_v30 }
 0x8e6   : > { %6645 = vpush %v2466_v44  ;;  %v1771_v44 = vpop.f32.mrf.mxu0 }
 0x8e7   : > { %v1837_v12 = vadd.f32 %v1836_v14, %v1771_v44 }
 0x8e8   : > { %v1992_v63 = vpop.f32.mrf.mxu3 }
 0x8e9   : > { %v1920_v59 = vadd.f32 %v1910_v54, %v1837_v12 }
 0x8eb   : > { %v2002_v10 = vadd.f32 %v1992_v63, %v1920_v59 }
 0x8ed   : > { %v8279_v22 = vadd.f32 %v2002_v10, %v792_v20 }
 0x8ef   : > { %v2545_v37 = vsel %vm295_vm0, %v8279_v22, 0.0 }
 0x8f1   : > { %v787_v61 = vpop.permute.xlu1 %786 }
 0x8f2   : > { %v8255_v13 = vadd.f32 %v787_v61, %v752_v27  ;;  %v8257_v19 = vadd.f32 %v1632_v3, %v787_v61  ;;  %v8269_v30 = vadd.f32 %v1212_v7, %v787_v61  ;;  %v8277_v8 = vadd.f32 %v2001_v36, %v787_v61  ;;  %v10201_v27 = vld [vmem:[#allocation46_spill] sm:$0xff] }
 0x8f3   : > { %v8289_v1 = vmul.f32 %v2326_v48, %v10201_v27 }
 0x8f4   : > { %v2531_v62 = vsel %vm295_vm0, %v8257_v19, 0.0  ;;  %v2506_v40 = vsel %vm295_vm0, %v8255_v13, 0.0  ;;  %v2518_v23 = vsel %vm295_vm0, %v8269_v30, 0.0  ;;  %v2544_v6 = vsel %vm295_vm0, %v8277_v8, 0.0 }
 0x8f5   : > { %v2533_v45 = vadd.f32 %v2532_v25, %v2531_v62  ;;  %v2508_v29 = vadd.f32 %v2507_v15, %v2506_v40  ;;  %v2520_v11 = vadd.f32 %v2519_v41, %v2518_v23  ;;  %v2546_v43 = vadd.f32 %v2545_v37, %v2544_v6 }
 0x8f6   : > { %v2330_v3 = vmul.f32 %v8289_v1, %v8061_v16 }
 0x8f7   : > { %2534 = vadd.xlane.f32.xlu1 %v2533_v45  ;;  %2509 = vadd.xlane.f32.xlu2 %v2508_v29 }
 0x8ff   : > { %2521 = vadd.xlane.f32.xlu2 %v2520_v11 }
 0x907   : > { %2547 = vadd.xlane.f32.xlu2 %v2546_v43  ;;  %s6640_s28 = spop %6639 }
 0x908   : > { %s6642_s7 = spop %6641 }
 0x909   : > { %s2434_s8 = sadd.f32 %s6642_s7, %s6640_s28  ;;  %s6729_s7 = smov 64  }
 0x90f   : > { %s6644_s9 = spop %6643 }
 0x910   : > { %2335 = vrot.lane.b32.xlu1 %v2330_v3, %s6726_s30  ;;  %s2451_s11 = sadd.f32 %s6644_s9, %s2434_s8 }
 0x917   : > { %s6646_s12 = spop %6645 }
 0x918   : > { %s2468_s13 = sadd.f32 %s6646_s12, %s2451_s11 }
 0x91a   : > { %s2477_s14 = smul.f32 %s7931_s29, %s2468_s13 }
 0x91c   : > { %s2478_s16 = sadd.f32 1e-05, %s2477_s14 }
 0x91e   : > { %v2479_v20 = vstv %s2478_s16 }
 0x91f   : > { %6700 = vrsqrt.f32 %v2479_v20  ;;  %vm2486_vm9 = vweird.f32 %v2479_v20 }
 0x925   : > { %v6701_v44 = vpop.eup %6700 }
 0x926   : > { %v2481_v14 = vmul.f32 %v6701_v44, %v2479_v20  ;;  %vm2487_vm8 = vweird.f32 %v6701_v44 }
 0x927   : > { %vm2488_vm10 = vmor %vm2486_vm9, %vm2487_vm8 }
 0x928   : > { %v2482_v61 = vmul.f32 %v6701_v44, %v2481_v14 }
 0x92a   : > { %v2483_v34 = vmul.f32 0.5, %v2482_v61 }
 0x92c   : > { %v2484_v18 = vsub.f32 1.5, %v2483_v34 }
 0x92e   : > { %v2485_v47 = vmul.f32 %v6701_v44, %v2484_v18 }
 0x930   : > { %v2489_v0 = vsel %vm2488_vm10, %v6701_v44, %v2485_v47 }
 0x931   : > { %6647 = vpush %v2489_v0 }
 0x962   : > { %s8295_s17 = spop %6647 }
 0x96a   : > { %v2535_v7 = vpop.xlane.xlu1 %2534  ;;  %v2510_v12 = vpop.xlane.xlu2 %2509 }
 0x96b   : > { %v2536_v62 = vrot.slane %v2535_v7, 4  ;;  %v2511_v25 = vrot.slane %v2510_v12, 4 }
 0x96d   : > { %v2512_v40 = vadd.f32 %v2511_v25, %v2510_v12  ;;  %v2537_v15 = vadd.f32 %v2536_v62, %v2535_v7 }
 0x96f   : > { %v2513_v54 = vrot.slane %v2512_v40, 2  ;;  %v2538_v29 = vrot.slane %v2537_v15, 2 }
 0x971   : > { %v2514_v45 = vadd.f32 %v2513_v54, %v2512_v40  ;;  %v2539_v36 = vadd.f32 %v2538_v29, %v2537_v15 }
 0x972   : > { %v2522_v53 = vpop.xlane.xlu2 %2521 }
 0x973   : > { %v2523_v32 = vrot.slane %v2522_v53, 4  ;;  %v2515_v31 = vrot.slane %v2514_v45, 1  ;;  %v2540_v11 = vrot.slane %v2539_v36, 1 }
 0x975   : > { %v2524_v59 = vadd.f32 %v2523_v32, %v2522_v53  ;;  %v2516_v63 = vadd.f32 %v2515_v31, %v2514_v45  ;;  %v2541_v3 = vadd.f32 %v2540_v11, %v2539_v36 }
 0x977   : > { %v2525_v23 = vrot.slane %v2524_v59, 2  ;;  %6649 = vpush %v2516_v63 }
 0x979   : > { %v2526_v10 = vadd.f32 %v2525_v23, %v2524_v59 }
 0x97a   : > { %v2548_v41 = vpop.xlane.xlu2 %2547 }
 0x97b   : > { %v2549_v6 = vrot.slane %v2548_v41, 4  ;;  %v2527_v37 = vrot.slane %v2526_v10, 1 }
 0x97d   : > { %v2550_v43 = vadd.f32 %v2549_v6, %v2548_v41  ;;  %v2528_v27 = vadd.f32 %v2527_v37, %v2526_v10 }
 0x97f   : > { %v2551_v20 = vrot.slane %v2550_v43, 2  ;;  %6651 = vpush %v2528_v27  ;;  %v2491_v27 = vstv %s8295_s17 }
 0x980   : > { %6653 = vpush %v2541_v3 }
 0x981   : > { %v2552_v44 = vadd.f32 %v2551_v20, %v2550_v43 }
 0x983   : > { %v2553_v14 = vrot.slane %v2552_v44, 1 }
 0x985   : > { %v2554_v61 = vadd.f32 %v2553_v14, %v2552_v44  ;;  %v8326_v44 = vmul.f32 %v2491_v27, %v8096_v46 }
 0x987   : > { %6655 = vpush %v2554_v61  ;;  %v2495_v61 = vmul.f32 %v8326_v44, %v8197_v26 }
 0x9a8   : > { %s6650_s18 = spop %6649 }
 0x9b0   : > { %s6652_s19 = spop %6651 }
 0x9b1   : > { %s2530_s20 = sadd.f32 %s6652_s19, %s6650_s18  ;;  %s6654_s23 = spop %6653 }
 0x9b3   : > { %s2543_s24 = sadd.f32 %s6654_s23, %s2530_s20 }
 0x9b8   : > { %s6656_s25 = spop %6655 }
 0x9b9   : > { %s2556_s26 = sadd.f32 %s6656_s25, %s2543_s24 }
 0x9bb   : > { %s2565_s27 = smul.f32 %s7931_s29, %s2556_s26  ;;  %s6592_s26 = sshll.u32 %s10213_s22, 5 }
 0x9bd   : > { %v8298_v34 = vstv %s2565_s27 }
 0x9be   : > { %v2583_v18 = vsub.f32 %v8269_v30, %v8298_v34  ;;  %v2584_v47 = vsub.f32 %v8271_v21, %v8298_v34  ;;  %v2567_v0 = vsub.f32 %v8255_v13, %v8298_v34  ;;  %v2568_v7 = vsub.f32 %v8250_v33, %v8298_v34 }
 0x9bf   : > { %v2600_v12 = vsub.f32 %v8257_v19, %v8298_v34  ;;  %v2601_v62 = vsub.f32 %v8252_v35, %v8298_v34  ;;  %v2617_v41 = vsub.f32 %v8277_v8, %v8298_v34  ;;  %v2618_v11 = vsub.f32 %v8279_v22, %v8298_v34 }
 0x9c0   : > { %v2585_v25 = vmul.f32 %v2583_v18, %v2583_v18  ;;  %v2586_v40 = vmul.f32 %v2584_v47, %v2584_v47  ;;  %v2569_v15 = vmul.f32 %v2567_v0, %v2567_v0  ;;  %v2570_v54 = vmul.f32 %v2568_v7, %v2568_v7  ;;  %v8334_v18 = vld [vmem:[%s10107_s4 + $0x10] sm:$0xff] }
 0x9c1   : > { %v2602_v63 = vmul.f32 %v2600_v12, %v2600_v12  ;;  %v2603_v36 = vmul.f32 %v2601_v62, %v2601_v62  ;;  %v2619_v37 = vmul.f32 %v2617_v41, %v2617_v41  ;;  %v2620_v43 = vmul.f32 %v2618_v11, %v2618_v11 }
 0x9c2   : > { %v2587_v45 = vsel %vm295_vm0, %v2585_v25, 0.0  ;;  %v2588_v29 = vsel %vm295_vm0, %v2586_v40, 0.0  ;;  %v2571_v53 = vsel %vm295_vm0, %v2569_v15, 0.0  ;;  %v2572_v32 = vsel %vm295_vm0, %v2570_v54, 0.0 }
 0x9c3   : > { %v2589_v31 = vadd.f32 %v2588_v29, %v2587_v45  ;;  %v2573_v59 = vadd.f32 %v2572_v32, %v2571_v53  ;;  %v2604_v23 = vsel %vm295_vm0, %v2602_v63, 0.0  ;;  %v2605_v10 = vsel %vm295_vm0, %v2603_v36, 0.0 }
 0x9c4   : > { %v2606_v6 = vadd.f32 %v2605_v10, %v2604_v23  ;;  %v2621_v3 = vsel %vm295_vm0, %v2619_v37, 0.0  ;;  %v2622_v20 = vsel %vm295_vm0, %v2620_v43, 0.0  ;;  %v8339_v47 = vmul.f32 %v8334_v18, %v2326_v48 }
 0x9c5   : > { %2590 = vadd.xlane.f32.xlu2 %v2589_v31  ;;  %2574 = vadd.xlane.f32.xlu0 %v2573_v59  ;;  %v2623_v14 = vadd.f32 %v2622_v20, %v2621_v3  ;;  %v8345_v7 = vmul.f32 %v2491_v27, %v8090_v51  ;;  %v6727_v62 = vmov 2  }
 0x9c6   : > { %v2329_v0 = vmul.f32 %v8339_v47, %v8061_v16  ;;  %6687 = vset.pattern.permute.xlu0 %v6727_v62 }
 0x9c7   : > { %v2494_v12 = vmul.f32 %v8345_v7, %v8197_v26 }
 0x9cd   : > { %2607 = vadd.xlane.f32.xlu2 %v2606_v6 }
 0x9d5   : > { %2624 = vadd.xlane.f32.xlu2 %v2623_v14 }
 0x9d9   : > { %2500 = vrot.lane.b32.xlu0 %v2495_v61, %s6726_s30 }
 0x9e1   : > { %2333 = vrot.lane.b32.xlu0 %v2329_v0, %s6726_s30 }
 0x9ed   : > { %2498 = vrot.lane.b32.xlu2 %v2494_v12, %s6726_s30 }
 0xa38   : > { %v2591_v25 = vpop.xlane.xlu2 %2590  ;;  %v2575_v40 = vpop.xlane.xlu0 %2574 }
 0xa39   : > { %v2592_v48 = vrot.slane %v2591_v25, 4  ;;  %v2576_v15 = vrot.slane %v2575_v40, 4 }
 0xa3b   : > { %v2593_v54 = vadd.f32 %v2592_v48, %v2591_v25  ;;  %v2577_v45 = vadd.f32 %v2576_v15, %v2575_v40 }
 0xa3d   : > { %v2594_v16 = vrot.slane %v2593_v54, 2  ;;  %v2578_v29 = vrot.slane %v2577_v45, 2 }
 0xa3f   : > { %v2579_v53 = vadd.f32 %v2578_v29, %v2577_v45  ;;  %v2595_v32 = vadd.f32 %v2594_v16, %v2593_v54 }
 0xa40   : > { %v2608_v31 = vpop.xlane.xlu2 %2607 }
 0xa41   : > { %v2609_v59 = vrot.slane %v2608_v31, 4  ;;  %v2580_v63 = vrot.slane %v2579_v53, 1  ;;  %v2596_v36 = vrot.slane %v2595_v32, 1 }
 0xa43   : > { %v2610_v26 = vadd.f32 %v2609_v59, %v2608_v31  ;;  %v2581_v23 = vadd.f32 %v2580_v63, %v2579_v53  ;;  %v2597_v10 = vadd.f32 %v2596_v36, %v2595_v32  ;;  %v6728_v53 = vmov 1  }
 0xa44   : > { %6684 = vset.pattern.permute.xlu2 %v6728_v53  ;;  %6686 = vset.pattern.permute.xlu1 %v6728_v53 }
 0xa45   : > { %v2611_v41 = vrot.slane %v2610_v26, 2  ;;  %6657 = vpush %v2581_v23  ;;  %v8363_v23 = vld [vmem:[%s10107_s4] sm:$0xff] }
 0xa46   : > { %6659 = vpush %v2597_v10 }
 0xa47   : > { %v2612_v11 = vadd.f32 %v2611_v41, %v2610_v26  ;;  %v2161_v26 = vstv %s8045_s10  ;;  %v6714_v41 = vld [vmem:[%s10107_s4 + $0x8] sm:$0xff] }
 0xa48   : > { %v2625_v6 = vpop.xlane.xlu2 %2624  ;;  %v2162_v10 = vmul.f32 %v8363_v23, %v2161_v26 }
 0xa49   : > { %v2626_v37 = vrot.slane %v2625_v6, 4  ;;  %v2613_v43 = vrot.slane %v2612_v11, 1 }
 0xa4b   : > { %v2627_v27 = vadd.f32 %v2626_v37, %v2625_v6  ;;  %v2614_v3 = vadd.f32 %v2613_v43, %v2612_v11  ;;  %v2163_v11 = vmul.f32 %v6714_v41, %v2161_v26  ;;  %v10202_v6 = vld [vmem:[#allocation45_spill] sm:$0xff]  ;;  %v2336_v43 = vpop.permute.xlu1 %2335 }
 0xa4d   : > { %v2628_v20 = vrot.slane %v2627_v27, 2  ;;  %6661 = vpush %v2614_v3  ;;  %v2165_v37 = vmul.f32 %v2163_v11, %v10202_v6  ;;  %v6715_v3 = vld [vmem:[%s10107_s4 + $0x18] sm:$0xff] }
 0xa4f   : > { %v2629_v14 = vadd.f32 %v2628_v20, %v2627_v27  ;;  %v10203_v27 = vmov 0   ;;  %v2340_v20 = vsub.f32 %v6715_v3, %v2336_v43 }
 0xa50   : > { %v2499_v61 = vpop.permute.xlu2 %2498 }
 0xa51   : > { %v2504_v0 = vsub.f32 %v8090_v51, %v2499_v61  ;;  %v2630_v12 = vrot.slane %v2629_v14, 1 }
 0xa53   : > { %2741 = vperm.xlu0 %6687, %v2504_v0   ;;  %v2631_v25 = vadd.f32 %v2630_v12, %v2629_v14 }
 0xa55   : > { %6663 = vpush %v2631_v25 }
 0xa5b   : > { %6688 = vset.pattern.permute.xlu0 %v6728_v53 }
 0xa76   : > { %s6658_s15 = spop %6657 }
 0xa77   : > { %s6660_s9 = spop %6659 }
 0xa78   : > { %s2599_s11 = sadd.f32 %s6660_s9, %s6658_s15  ;;  %s9197_s15 = scalar_lea.vmem %s10109_s6, %s6592_s26 }
 0xa7e   : > { %s6662_s8 = spop %6661 }
 0xa7f   : > { %s2616_s12 = sadd.f32 %s6662_s8, %s2599_s11 }
 0xa86   : > { %s6664_s13 = spop %6663 }
 0xa87   : > { %s2633_s14 = sadd.f32 %s6664_s13, %s2616_s12 }
 0xa89   : > { %s2642_s16 = smul.f32 %s7931_s29, %s2633_s14 }
 0xa8b   : > { %s2643_s17 = sadd.f32 1e-05, %s2642_s16 }
 0xa8d   : > { %v2644_v40 = vstv %s2643_s17 }
 0xa8e   : > { %6702 = vrsqrt.f32 %v2644_v40  ;;  %vm2651_vm12 = vweird.f32 %v2644_v40 }
 0xa94   : > { %v6703_v48 = vpop.eup %6702 }
 0xa95   : > { %v2646_v15 = vmul.f32 %v6703_v48, %v2644_v40  ;;  %vm2652_vm11 = vweird.f32 %v6703_v48 }
 0xa96   : > { %vm2653_vm13 = vmor %vm2651_vm12, %vm2652_vm11 }
 0xa97   : > { %v2647_v54 = vmul.f32 %v6703_v48, %v2646_v15 }
 0xa99   : > { %v2648_v45 = vmul.f32 0.5, %v2647_v54 }
 0xa9b   : > { %v2649_v51 = vsub.f32 1.5, %v2648_v45 }
 0xa9d   : > { %v2650_v16 = vmul.f32 %v6703_v48, %v2649_v51 }
 0xa9f   : > { %v2654_v29 = vsel %vm2653_vm13, %v6703_v48, %v2650_v16 }
 0xaa0   : > { %6665 = vpush %v2654_v29 }
 0xad1   : > { %s6666_s29 = spop %6665 }
 0xad2   : > { %v2656_v32 = vstv %s6666_s29 }
 0xad3   : > { %v2657_v31 = vmul.f32 %v2656_v32, %v8226_v39  ;;  %v2658_v59 = vmul.f32 %v2656_v32, %v8190_v55 }
 0xad5   : > { %v2659_v63 = vmul.f32 %v2657_v31, %v8298_v34  ;;  %v2660_v36 = vmul.f32 %v2658_v59, %v8298_v34  ;;  %2708 = vperm.xlu0 %6688, %v2658_v59   ;;  %v2164_v34 = vmul.f32 %v2162_v10, %v10202_v6 }
 0xad7   : > { %2665 = vrot.lane.b32.xlu2 %v2660_v36, %s6726_s30  ;;  %2663 = vrot.lane.b32.xlu1 %v2659_v63, %s6726_s30 }
 0xadd   : > { %2693 = vperm.xlu0 %6688, %v8345_v7   ;;  %v2501_v7 = vpop.permute.xlu0 %2500 }
 0xade   : > { %v2505_v14 = vsub.f32 %v8096_v46, %v2501_v7 }
 0xadf   : > { %2170 = vrot.lane.b32.xlu2 %v2165_v37, %s6726_s30  ;;  %2168 = vrot.lane.b32.xlu1 %v2164_v34, %s6726_s30 }
 0xae5   : > { %2673 = vperm.xlu0 %6688, %v2162_v10  }
 0xae7   : > { %2703 = vperm.xlu2 %6684, %v2657_v31   ;;  %2688 = vperm.xlu1 %6686, %v8289_v1  }
 0xaed   : > { %6693 = vset.pattern.permute.xlu0 %v10203_v27 }
 0xaef   : > { %2698 = vperm.xlu2 %6684, %v8326_v44   ;;  %6690 = vset.pattern.permute.xlu1 %v6727_v62  ;;  %v2334_v44 = vpop.permute.xlu0 %2333 }
 0xaf0   : > { %2736 = vperm.xlu1 %6690, %v2340_v20  }
 0xaf7   : > { %6685 = vset.pattern.permute.xlu2 %v6727_v62  ;;  %v2742_v25 = vpop.permute.xlu0 %2741 }
 0xaf8   : > { %2746 = vperm.xlu2 %6685, %v2505_v14  }
 0xb00   : > { %6689 = vset.pattern.permute.xlu2 %v6728_v53 }
 0xb01   : > { %2683 = vperm.xlu2 %6689, %v8339_v47  }
 0xb09   : > { %2678 = vperm.xlu2 %6689, %v2163_v11  }
 0xb11   : > { %6691 = vset.pattern.permute.xlu2 %v6727_v62 }
 0xb31   : > { %v2666_v1 = vpop.permute.xlu2 %2665 }
 0xb32   : > { %v2670_v61 = vsub.f32 %v8190_v55, %v2666_v1 }
 0xb34   : > { %2756 = vperm.xlu1 %6690, %v2670_v61  }
 0xb39   : > { %v2171_v0 = vpop.permute.xlu2 %2170 }
 0xb3a   : > { %v2175_v12 = vsub.f32 %v6714_v41, %v2171_v0 }
 0xb3c   : > { %2726 = vperm.xlu2 %6691, %v2175_v12  }
 0xb41   : > { %v8386_v40 = vpop.permute.xlu2 %2703 }
 0xb44   : > { %6692 = vset.pattern.permute.xlu2 %v10203_v27 }
 0xb47   : > { %v8389_v46 = vpop.permute.xlu0 %2708 }
 0xb49   : > { %v2699_v48 = vpop.permute.xlu2 %2698  ;;  %v2664_v47 = vpop.permute.xlu1 %2663 }
 0xb4a   : > { %v2669_v15 = vsub.f32 %v8226_v39, %v2664_v47  ;;  %v2716_v16 = vmul.f32 %v2699_v48, %v8149_v60  ;;  %v2788_v29 = vmul.f32 %v2699_v48, %v8167_v17  ;;  %v2821_v53 = vmul.f32 %v2699_v48, %v8179_v52  ;;  %v6292_v47 = vld [vmem:[%s10104_s1 + $0xe0] sm:$0xff] }
 0xb4c   : > { %2751 = vperm.xlu1 %6690, %v2669_v15   ;;  %v6291_v15 = vld [vmem:[%s10104_s1 + $0xd8] sm:$0xff] }
 0xb4f   : > { %v2694_v62 = vpop.permute.xlu0 %2693 }
 0xb50   : > { %v2715_v55 = vmul.f32 %v2694_v62, %v8144_v24  ;;  %v2787_v54 = vmul.f32 %v2694_v62, %v8170_v58  ;;  %v2820_v45 = vmul.f32 %v2694_v62, %v8181_v2  ;;  %v2853_v51 = vmul.f32 %v2694_v62, %v8146_v9  ;;  %v6290_v62 = vld [vmem:[%s10104_s1 + $0xd0] sm:$0xff] }
 0xb51   : > { %v2169_v32 = vpop.permute.xlu1 %2168  ;;  %v2339_v24 = vsub.f32 %v8334_v18, %v2334_v44  ;;  %v2854_v58 = vmul.f32 %v2699_v48, %v8151_v42 }
 0xb52   : > { %v2763_v31 = vadd.f32 %v2742_v25, %v2715_v55  ;;  %v2795_v59 = vadd.f32 %v2787_v54, %v2742_v25  ;;  %v2828_v39 = vadd.f32 %v2820_v45, %v2742_v25  ;;  %v2861_v63 = vadd.f32 %v2853_v51, %v2742_v25  ;;  %v2747_v36 = vpop.permute.xlu2 %2746  ;;  %v6289_v55 = vld [vmem:[%s10104_s1 + $0xc8] sm:$0xff]  ;;  %v10205_v51 = vld [vmem:[#allocation18_spill] sm:$0xff] }
 0xb53   : > { %v2764_v26 = vadd.f32 %v2747_v36, %v2716_v16  ;;  %v2796_v2 = vadd.f32 %v2788_v29, %v2747_v36  ;;  %v2829_v60 = vadd.f32 %v2821_v53, %v2747_v36  ;;  %v2862_v17 = vadd.f32 %v2854_v58, %v2747_v36  ;;  %v10204_v54 = vld [vmem:[#allocation8_spill] sm:$0xff]  ;;  %v10206_v29 = vld [vmem:[#allocation26_spill] sm:$0xff] }
 0xb54   : > { %v2771_v10 = vmax.f32 %v2763_v31, 0.0  ;;  %v2803_v9 = vmax.f32 %v2795_v59, 0.0  ;;  %v2836_v41 = vmax.f32 %v2828_v39, 0.0  ;;  %v2869_v11 = vmax.f32 %v2861_v63, 0.0  ;;  %2731 = vperm.xlu1 %6690, %v2339_v24   ;;  %v6288_v59 = vld [vmem:[%s10104_s1 + $0xc0] sm:$0xff] }
 0xb55   : > { %v2772_v52 = vmax.f32 %v2764_v26, 0.0  ;;  %v2804_v6 = vmax.f32 %v2796_v2, 0.0  ;;  %v2837_v18 = vmax.f32 %v2829_v60, 0.0  ;;  %v2870_v42 = vmax.f32 %v2862_v17, 0.0 }
 0xb56   : > { %2779 = vst.msk [vmem:[#allocation2 + $0x20] sm:$0xff] %vm295_vm0, %v2771_v10  ;;  %v2174_v37 = vsub.f32 %v8363_v23, %v2169_v32  ;;  %v10207_v32 = vld [vmem:[#allocation44_spill] sm:$0xff]  ;;  %v2790_v60 = vmul.f32 %v8389_v46, %v8271_v21  ;;  %v2856_v17 = vmul.f32 %v8389_v46, %v8279_v22 }
 0xb57   : > { %2812 = vst.msk [vmem:[#allocation2 + $0x60] sm:$0xff] %vm295_vm0, %v2803_v9 }
 0xb58   : > { %2845 = vst.msk [vmem:[#allocation2 + $0xa0] sm:$0xff] %vm295_vm0, %v2836_v41  ;;  %v2718_v41 = vmul.f32 %v8389_v46, %v8250_v33 }
 0xb59   : > { %2878 = vst.msk [vmem:[#allocation2 + $0xe0] sm:$0xff] %vm295_vm0, %v2869_v11  ;;  %v2689_v34 = vpop.permute.xlu1 %2688  ;;  %v2823_v11 = vmul.f32 %v8389_v46, %v8252_v35  ;;  %v2717_v46 = vmul.f32 %v8386_v40, %v8255_v13 }
 0xb5a   : > { %2780 = vst.msk [vmem:[#allocation2 + $0x28] sm:$0xff] %vm295_vm0, %v2772_v52  ;;  %v2714_v43 = vmul.f32 %v2689_v34, %v7999_v28  ;;  %v2786_v27 = vmul.f32 %v2689_v34, %v8001_v4  ;;  %v2819_v3 = vmul.f32 %v2689_v34, %v8003_v5  ;;  %v2852_v20 = vmul.f32 %v2689_v34, %v8019_v56  ;;  %v6295_v28 = vld [vmem:[%s10104_s1 + $0xf8] sm:$0xff]  ;;  %v6294_v4 = vld [vmem:[%s10104_s1 + $0xf0] sm:$0xff]  ;;  %v6293_v56 = vld [vmem:[%s10104_s1 + $0xe8] sm:$0xff] }
 0xb5b   : > { %2813 = vst.msk [vmem:[#allocation2 + $0x68] sm:$0xff] %vm295_vm0, %v2804_v6  ;;  %2945 = vmatpush.msra.mxu1 %v6295_v28  ;;  %v8424_v5 = vpop.permute.xlu2 %2683 }
 0xb5c   : > { %2846 = vst.msk [vmem:[#allocation2 + $0xa8] sm:$0xff] %vm295_vm0, %v2837_v18  ;;  %2721 = vperm.xlu1 %6690, %v2174_v37   ;;  %v2713_v13 = vmul.f32 %v8424_v5, %v7990_v57 }
 0xb5d   : > { %2879 = vst.msk [vmem:[#allocation2 + $0xe8] sm:$0xff] %vm295_vm0, %v2870_v42  ;;  %2946 = vmatpush.msra.mxu1 %v6294_v4 }
 0xb5f   : > { %2947 = vmatpush.msra.mxu1 %v6293_v56 }
 0xb61   : > { %2948 = vmatpush.msra.mxu1 %v6292_v47 }
 0xb62   : > { %v2737_v7 = vpop.permute.xlu1 %2736 }
 0xb63   : > { %v2762_v14 = vadd.f32 %v2737_v7, %v2714_v43  ;;  %v2794_v1 = vadd.f32 %v2786_v27, %v2737_v7  ;;  %v2827_v61 = vadd.f32 %v2819_v3, %v2737_v7  ;;  %v2860_v23 = vadd.f32 %v2852_v20, %v2737_v7  ;;  %v2679_v48 = vpop.permute.xlu2 %2678  ;;  %2949 = vmatpush.msra.mxu1 %v6291_v15 }
 0xb64   : > { %v2712_v45 = vmul.f32 %v2679_v48, %v10204_v54  ;;  %v2784_v16 = vmul.f32 %v2679_v48, %v10205_v51  ;;  %v2817_v53 = vmul.f32 %v2679_v48, %v10206_v29  ;;  %v2850_v31 = vmul.f32 %v2679_v48, %v10207_v32  ;;  %v10209_v29 = vld [vmem:[#allocation17_spill] sm:$0xff] }
 0xb65   : > { %v2770_v44 = vmax.f32 %v2762_v14, 0.0  ;;  %v2802_v0 = vmax.f32 %v2794_v1, 0.0  ;;  %v2835_v12 = vmax.f32 %v2827_v61, 0.0  ;;  %v2868_v25 = vmax.f32 %v2860_v23, 0.0  ;;  %2950 = vmatpush.msra.mxu1 %v6290_v62  ;;  %v2674_v62 = vpop.permute.xlu0 %2673  ;;  %v10210_v32 = vld [vmem:[#allocation25_spill] sm:$0xff] }
 0xb66   : > { %v2789_v20 = vmul.f32 %v8386_v40, %v8269_v30  ;;  %v2822_v7 = vmul.f32 %v8386_v40, %v8257_v19  ;;  %v2855_v14 = vmul.f32 %v8386_v40, %v8277_v8  ;;  %v2785_v19 = vmul.f32 %v8424_v5, %v7992_v38 }
 0xb67   : > { %2778 = vst.msk [vmem:[#allocation2 + $0x18] sm:$0xff] %vm295_vm0, %v2770_v44  ;;  %2951 = vmatpush.msra.mxu1 %v6289_v55  ;;  %v2818_v30 = vmul.f32 %v8424_v5, %v7997_v49  ;;  %v2851_v8 = vmul.f32 %v8424_v5, %v8017_v50  ;;  %v10208_v50 = vld [vmem:[#allocation7_spill] sm:$0xff] }
 0xb68   : > { %2811 = vst.msk [vmem:[#allocation2 + $0x58] sm:$0xff] %vm295_vm0, %v2802_v0  ;;  %v2711_v5 = vmul.f32 %v2674_v62, %v10208_v50 }
 0xb69   : > { %2844 = vst.msk [vmem:[#allocation2 + $0x98] sm:$0xff] %vm295_vm0, %v2835_v12  ;;  %2952 = vmatpush.msra.mxu1 %v6288_v59  ;;  %v10211_v59 = vld [vmem:[#allocation43_spill] sm:$0xff] }
 0xb6a   : > { %2877 = vst.msk [vmem:[#allocation2 + $0xd8] sm:$0xff] %vm295_vm0, %v2868_v25 }
 0xb96   : > { %v2727_v39 = vpop.permute.xlu2 %2726 }
 0xb97   : > { %v2760_v63 = vadd.f32 %v2727_v39, %v2712_v45  ;;  %v2792_v36 = vadd.f32 %v2784_v16, %v2727_v39  ;;  %v2825_v24 = vadd.f32 %v2817_v53, %v2727_v39  ;;  %v2858_v58 = vadd.f32 %v2850_v31, %v2727_v39  ;;  %v8507_v16 = vld [vmem:[#allocation2 + $0x28] sm:$0xff] }
 0xb98   : > { %v2783_v53 = vmul.f32 %v2674_v62, %v10209_v29  ;;  %v2816_v31 = vmul.f32 %v2674_v62, %v10210_v32  ;;  %v2849_v39 = vmul.f32 %v2674_v62, %v10211_v59  ;;  %v6313_v62 = vld [vmem:[%s10106_s3 + $0x18] sm:$0xf]  ;;  %v6316_v32 = vld [vmem:[%s10106_s3 + $0x30] sm:$0xf]  ;;  %v6331_v59 = vld [vmem:[%s10106_s3 + $0x1c] sm:$0xf] }
 0xb99   : > { %v2768_v26 = vmax.f32 %v2760_v63, 0.0  ;;  %v2800_v2 = vmax.f32 %v2792_v36, 0.0  ;;  %v2833_v10 = vmax.f32 %v2825_v24, 0.0  ;;  %v2866_v9 = vmax.f32 %v2858_v58, 0.0  ;;  %v8516_v36 = vld [vmem:[#allocation2 + $0x68] sm:$0xff] }
 0xb9a   : > { %v8522_v24 = vld [vmem:[#allocation2 + $0xa8] sm:$0xff] }
 0xb9b   : > { %2776 = vst.msk [vmem:[#allocation2 + $0x8] sm:$0xff] %vm295_vm0, %v2768_v26  ;;  %v8525_v26 = vld [vmem:[#allocation2 + $0xe8] sm:$0xff] }
 0xb9c   : > { %2809 = vst.msk [vmem:[#allocation2 + $0x48] sm:$0xff] %vm295_vm0, %v2800_v2 }
 0xb9d   : > { %2842 = vst.msk [vmem:[#allocation2 + $0x88] sm:$0xff] %vm295_vm0, %v2833_v10 }
 0xb9e   : > { %2875 = vst.msk [vmem:[#allocation2 + $0xc8] sm:$0xff] %vm295_vm0, %v2866_v9 }
 0xba6   : > { %v2757_v52 = vpop.permute.xlu1 %2756 }
 0xba7   : > { %v2766_v6 = vadd.f32 %v2757_v52, %v2718_v41  ;;  %v2798_v18 = vadd.f32 %v2790_v60, %v2757_v52  ;;  %v2831_v42 = vadd.f32 %v2823_v11, %v2757_v52  ;;  %v2864_v34 = vadd.f32 %v2856_v17, %v2757_v52  ;;  %v8527_v60 = vld [vmem:[#allocation2 + $0x60] sm:$0xff] }
 0xba8   : > { %v8531_v11 = vld [vmem:[#allocation2 + $0x20] sm:$0xff] }
 0xba9   : > { %v2774_v37 = vmax.f32 %v2766_v6, 0.0  ;;  %v2806_v43 = vmax.f32 %v2798_v18, 0.0  ;;  %v2839_v27 = vmax.f32 %v2831_v42, 0.0  ;;  %v2872_v3 = vmax.f32 %v2864_v34, 0.0  ;;  %v8533_v17 = vld [vmem:[#allocation2 + $0xa0] sm:$0xff]  ;;  %v8539_v34 = vld [vmem:[#allocation2 + $0x58] sm:$0xff] }
 0xbaa   : > { %v8537_v42 = vld [vmem:[#allocation2 + $0xe0] sm:$0xff] }
 0xbab   : > { %2782 = vst.msk [vmem:[#allocation2 + $0x38] sm:$0xff] %vm295_vm0, %v2774_v37 }
 0xbac   : > { %2815 = vst.msk [vmem:[#allocation2 + $0x78] sm:$0xff] %vm295_vm0, %v2806_v43  ;;  %v8543_v43 = vld [vmem:[#allocation2 + $0x18] sm:$0xff] }
 0xbad   : > { %2848 = vst.msk [vmem:[#allocation2 + $0xb8] sm:$0xff] %vm295_vm0, %v2839_v27  ;;  %v8545_v27 = vld [vmem:[#allocation2 + $0x98] sm:$0xff] }
 0xbae   : > { %2881 = vst.msk [vmem:[#allocation2 + $0xf8] sm:$0xff] %vm295_vm0, %v2872_v3 }
 0xbb2   : > { %v8464_v33 = vld [vmem:[#allocation2 + $0x38] sm:$0xff] }
 0xbb3   : > { %v8466_v35 = vld [vmem:[#allocation2 + $0x78] sm:$0xff]  ;;  %2968 = vmatpush.msra.mxu2 %v8464_v33 }
 0xbb4   : > { %2914 = vmatpush.msra.mxu0 %v8466_v35  ;;  %v8470_v21 = vld [vmem:[#allocation2 + $0xb8] sm:$0xff] }
 0xbb5   : > { %3001 = vmatpush.msra.mxu3 %v8470_v21  ;;  %v8473_v22 = vld [vmem:[#allocation2 + $0xf8] sm:$0xff] }
 0xbb6   : > { %3066 = vmatpush.msrb.mxu1 %v8473_v22 }
 0xbbe   : > { %v2752_v1 = vpop.permute.xlu1 %2751 }
 0xbbf   : > { %v2765_v61 = vadd.f32 %v2752_v1, %v2717_v46  ;;  %v2797_v23 = vadd.f32 %v2789_v20, %v2752_v1  ;;  %v2830_v44 = vadd.f32 %v2822_v7, %v2752_v1  ;;  %v2863_v0 = vadd.f32 %v2855_v14, %v2752_v1  ;;  %v8552_v46 = vld [vmem:[#allocation2 + $0xd8] sm:$0xff]  ;;  %v8566_v1 = vld [vmem:[#allocation2 + $0x48] sm:$0xff] }
 0xbc1   : > { %v2773_v12 = vmax.f32 %v2765_v61, 0.0  ;;  %v2805_v25 = vmax.f32 %v2797_v23, 0.0  ;;  %v2838_v28 = vmax.f32 %v2830_v44, 0.0  ;;  %v2871_v4 = vmax.f32 %v2863_v0, 0.0  ;;  %v8571_v61 = vld [vmem:[#allocation2 + $0x8] sm:$0xff] }
 0xbc2   : > { %v8573_v23 = vld [vmem:[#allocation2 + $0x88] sm:$0xff] }
 0xbc3   : > { %2781 = vst.msk [vmem:[#allocation2 + $0x30] sm:$0xff] %vm295_vm0, %v2773_v12  ;;  %v8577_v44 = vld [vmem:[#allocation2 + $0xc8] sm:$0xff]  ;;  %v6286_v12 = vld [vmem:[%s10106_s3 + $0x1c] sm:$0xf] }
 0xbc4   : > { %2814 = vst.msk [vmem:[#allocation2 + $0x70] sm:$0xff] %vm295_vm0, %v2805_v25 }
 0xbc5   : > { %2847 = vst.msk [vmem:[#allocation2 + $0xb0] sm:$0xff] %vm295_vm0, %v2838_v28  ;;  %v6298_v28 = vld [vmem:[%s10106_s3 + $0x34] sm:$0xf] }
 0xbc6   : > { %2880 = vst.msk [vmem:[#allocation2 + $0xf0] sm:$0xff] %vm295_vm0, %v2871_v4  ;;  %v2732_v40 = vpop.permute.xlu1 %2731 }
 0xbc7   : > { %v2761_v56 = vadd.f32 %v2732_v40, %v2713_v13  ;;  %v2793_v48 = vadd.f32 %v2785_v19, %v2732_v40  ;;  %v2826_v47 = vadd.f32 %v2818_v30, %v2732_v40  ;;  %v2859_v15 = vadd.f32 %v2851_v8, %v2732_v40  ;;  %v8597_v13 = vld [vmem:[%s10104_s1 + $0x78] sm:$0xff]  ;;  %v8608_v30 = vld [vmem:[%s10104_s1 + $0x70] sm:$0xff]  ;;  %v8615_v8 = vld [vmem:[%s10104_s1 + $0x68] sm:$0xff] }
 0xbc8   : > { %v8622_v40 = vld [vmem:[%s10104_s1 + $0x60] sm:$0xff] }
 0xbc9   : > { %v2769_v57 = vmax.f32 %v2761_v56, 0.0  ;;  %v2801_v55 = vmax.f32 %v2793_v48, 0.0  ;;  %v2834_v54 = vmax.f32 %v2826_v47, 0.0  ;;  %v2867_v38 = vmax.f32 %v2859_v15, 0.0  ;;  %v8629_v56 = vld [vmem:[%s10104_s1 + $0x58] sm:$0xff]  ;;  %v8636_v48 = vld [vmem:[%s10104_s1 + $0x50] sm:$0xff] }
 0xbca   : > { %v8496_v45 = vld [vmem:[#allocation2 + $0x30] sm:$0xff]  ;;  %v8643_v47 = vld [vmem:[%s10104_s1 + $0x48] sm:$0xff]  ;;  %v8650_v15 = vld [vmem:[%s10104_s1 + $0x40] sm:$0xff] }
 0xbcb   : > { %2777 = vst.msk [vmem:[#allocation2 + $0x10] sm:$0xff] %vm295_vm0, %v2769_v57  ;;  %v8499_v49 = vld [vmem:[#allocation2 + $0x70] sm:$0xff]  ;;  %2969 = vmatpush.msra.mxu2 %v8496_v45  ;;  %v6327_v57 = vld [vmem:[%s10106_s3 + $0x38] sm:$0xf] }
 0xbcc   : > { %2810 = vst.msk [vmem:[#allocation2 + $0x50] sm:$0xff] %vm295_vm0, %v2801_v55  ;;  %2915 = vmatpush.msra.mxu0 %v8499_v49  ;;  %v8505_v51 = vld [vmem:[#allocation2 + $0xb0] sm:$0xff] }
 0xbcd   : > { %2843 = vst.msk [vmem:[#allocation2 + $0x90] sm:$0xff] %vm295_vm0, %v2834_v54  ;;  %3002 = vmatpush.msra.mxu3 %v8505_v51  ;;  %v8514_v63 = vld [vmem:[#allocation2 + $0xf0] sm:$0xff]  ;;  %2970 = vmatpush.msra.mxu2 %v8507_v16 }
 0xbce   : > { %2876 = vst.msk [vmem:[#allocation2 + $0xd0] sm:$0xff] %vm295_vm0, %v2867_v38  ;;  %3067 = vmatpush.msrb.mxu1 %v8514_v63  ;;  %2916 = vmatpush.msra.mxu0 %v8516_v36  ;;  %v2722_v58 = vpop.permute.xlu1 %2721  ;;  %v6285_v55 = vld [vmem:[%s10106_s3 + $0x14] sm:$0xf]  ;;  %v6348_v38 = vld [vmem:[%s10106_s3 + $0x10] sm:$0xf] }
 0xbcf   : > { %3003 = vmatpush.msra.mxu3 %v8522_v24  ;;  %v2759_v2 = vadd.f32 %v2722_v58, %v2711_v5  ;;  %v2791_v10 = vadd.f32 %v2783_v53, %v2722_v58  ;;  %v2824_v9 = vadd.f32 %v2816_v31, %v2722_v58  ;;  %v2857_v41 = vadd.f32 %v2849_v39, %v2722_v58  ;;  %v6334_v54 = vld [vmem:[%s10106_s3 + $0x34] sm:$0xf]  ;;  %v6309_v5 = vld [vmem:[%s10106_s3 + $0x3c] sm:$0xf]  ;;  %v6312_v53 = vld [vmem:[%s10106_s3 + $0x10] sm:$0xf] }
 0xbd0   : > { %3068 = vmatpush.msrb.mxu1 %v8525_v26  ;;  %2917 = vmatpush.msra.mxu0 %v8527_v60  ;;  %v6345_v58 = vld [vmem:[%s10106_s3 + $0x3c] sm:$0xf] }
 0xbd1   : > { %v2767_v52 = vmax.f32 %v2759_v2, 0.0  ;;  %v2799_v6 = vmax.f32 %v2791_v10, 0.0  ;;  %v2832_v18 = vmax.f32 %v2824_v9, 0.0  ;;  %2971 = vmatpush.msra.mxu2 %v8531_v11  ;;  %3004 = vmatpush.msra.mxu3 %v8533_v17  ;;  %v2865_v37 = vmax.f32 %v2857_v41, 0.0  ;;  %v8777_v2 = vld [vmem:[%s10104_s1 + $0x178] sm:$0xff]  ;;  %v8785_v10 = vld [vmem:[%s10104_s1 + $0x170] sm:$0xff] }
 0xbd2   : > { %3069 = vmatpush.msrb.mxu1 %v8537_v42  ;;  %2918 = vmatpush.msra.mxu0 %v8539_v34  ;;  %v8547_v3 = vld [vmem:[#allocation2 + $0x10] sm:$0xff]  ;;  %v8792_v9 = vld [vmem:[%s10104_s1 + $0x168] sm:$0xff]  ;;  %v8799_v41 = vld [vmem:[%s10104_s1 + $0x160] sm:$0xff] }
 0xbd3   : > { %2775 = vst.msk [vmem:[#allocation2] sm:$0xff] %vm295_vm0, %v2767_v52  ;;  %2972 = vmatpush.msra.mxu2 %v8543_v43  ;;  %3005 = vmatpush.msra.mxu3 %v8545_v27  ;;  %v8554_v20 = vld [vmem:[#allocation2 + $0x50] sm:$0xff]  ;;  %v8806_v52 = vld [vmem:[%s10104_s1 + $0x158] sm:$0xff] }
 0xbd4   : > { %2808 = vst.msk [vmem:[#allocation2 + $0x40] sm:$0xff] %vm295_vm0, %v2799_v6  ;;  %3070 = vmatpush.msrb.mxu1 %v8552_v46  ;;  %2919 = vmatpush.msra.mxu0 %v8554_v20  ;;  %v8559_v7 = vld [vmem:[#allocation2 + $0x90] sm:$0xff] }
 0xbd5   : > { %2841 = vst.msk [vmem:[#allocation2 + $0x80] sm:$0xff] %vm295_vm0, %v2832_v18  ;;  %2973 = vmatpush.msra.mxu2 %v8547_v3  ;;  %3006 = vmatpush.msra.mxu3 %v8559_v7  ;;  %v8564_v14 = vld [vmem:[#allocation2 + $0xd0] sm:$0xff] }
 0xbd6   : > { %2874 = vst.msk [vmem:[#allocation2 + $0xc0] sm:$0xff] %vm295_vm0, %v2865_v37  ;;  %3071 = vmatpush.msrb.mxu1 %v8564_v14  ;;  %2920 = vmatpush.msra.mxu0 %v8566_v1  ;;  %v8814_v18 = vld [vmem:[%s10104_s1 + $0x150] sm:$0xff]  ;;  %v8821_v37 = vld [vmem:[%s10104_s1 + $0x148] sm:$0xff] }
 0xbd7   : > { %2974 = vmatpush.msra.mxu2 %v8571_v61  ;;  %3007 = vmatpush.msra.mxu3 %v8573_v23 }
 0xbd8   : > { %3072 = vmatpush.msrb.mxu1 %v8577_v44 }
 0xbda   : > { %v8580_v0 = vld [vmem:[#allocation2] sm:$0xff] }
 0xbdb   : > { %v8585_v25 = vld [vmem:[#allocation2 + $0x40] sm:$0xff]  ;;  %2975 = vmatpush.msra.mxu2 %v8580_v0 }
 0xbdc   : > { %2921 = vmatpush.msra.mxu0 %v8585_v25  ;;  %v8592_v4 = vld [vmem:[#allocation2 + $0x80] sm:$0xff]  ;;  %6297 = vmatmul.msk.f32.vlgmr.msra.gmra.mxu2 %vm295_vm0, %v6285_v55 }
 0xbdd   : > { %3008 = vmatpush.msra.mxu3 %v8592_v4  ;;  %v8600_v19 = vld [vmem:[#allocation2 + $0xc0] sm:$0xff]  ;;  %6287 = vmatmul.msk.f32.vlgmr.msra.gmra.mxu0 %vm295_vm0, %v6286_v12 }
 0xbde   : > { %3073 = vmatpush.msrb.mxu1 %v8600_v19  ;;  %6299 = vmatmul.msk.f32.vlgmr.msra.gmra.mxu3 %vm295_vm0, %v6298_v28  ;;  %v8828_v12 = vld [vmem:[%s10104_s1 + $0x140] sm:$0xff] }
 0xbdf   : > { %3032 = vmatpush.msrb.mxu0 %v8597_v13  ;;  %3149 = vmatpush.msrb.mxu3 %v8464_v33  ;;  %v3082_v28 = vld [vmem:[%s10104_s1 + $0x20] sm:$0xff] }
 0xbe1   : > { %3033 = vmatpush.msrb.mxu0 %v8608_v30  ;;  %3150 = vmatpush.msrb.mxu3 %v8496_v45 }
 0xbe3   : > { %3034 = vmatpush.msrb.mxu0 %v8615_v8  ;;  %3151 = vmatpush.msrb.mxu3 %v8507_v16 }
 0xbe5   : > { %3035 = vmatpush.msrb.mxu0 %v8622_v40  ;;  %3152 = vmatpush.msrb.mxu3 %v8531_v11 }
 0xbe7   : > { %3036 = vmatpush.msrb.mxu0 %v8629_v56  ;;  %3153 = vmatpush.msrb.mxu3 %v8543_v43 }
 0xbe9   : > { %3037 = vmatpush.msrb.mxu0 %v8636_v48  ;;  %3154 = vmatpush.msrb.mxu3 %v8547_v3 }
 0xbeb   : > { %3038 = vmatpush.msrb.mxu0 %v8643_v47  ;;  %3155 = vmatpush.msrb.mxu3 %v8571_v61 }
 0xbed   : > { %3039 = vmatpush.msrb.mxu0 %v8650_v15  ;;  %3156 = vmatpush.msrb.mxu3 %v8580_v0 }
 0xbee   : > { %6314 = vmatmul.msk.f32.vlgmr.msrb.gmra.mxu3 %vm295_vm0, %v6313_v62 }
 0xbef   : > { %3172 = vmatpush.msra.mxu0 %v8466_v35  ;;  %3270 = vmatpush.msra.mxu3 %v8470_v21 }
 0xbf1   : > { %3173 = vmatpush.msra.mxu0 %v8499_v49  ;;  %3271 = vmatpush.msra.mxu3 %v8505_v51 }
 0xbf3   : > { %3174 = vmatpush.msra.mxu0 %v8516_v36  ;;  %3272 = vmatpush.msra.mxu3 %v8522_v24 }
 0xbf5   : > { %3175 = vmatpush.msra.mxu0 %v8527_v60  ;;  %3273 = vmatpush.msra.mxu3 %v8533_v17 }
 0xbf7   : > { %3176 = vmatpush.msra.mxu0 %v8539_v34  ;;  %3274 = vmatpush.msra.mxu3 %v8545_v27 }
 0xbf9   : > { %3177 = vmatpush.msra.mxu0 %v8554_v20  ;;  %3275 = vmatpush.msra.mxu3 %v8559_v7 }
 0xbfb   : > { %3178 = vmatpush.msra.mxu0 %v8566_v1  ;;  %3276 = vmatpush.msra.mxu3 %v8573_v23 }
 0xbfd   : > { %3179 = vmatpush.msra.mxu0 %v8585_v25  ;;  %3277 = vmatpush.msra.mxu3 %v8592_v4 }
 0xbfe   : > { %6328 = vmatmul.msk.f32.vlgmr.msra.gmra.mxu3 %vm295_vm0, %v6327_v57 }
 0xbff   : > { %3397 = vmatpush.msrb.mxu3 %v8473_v22 }
 0xc01   : > { %3398 = vmatpush.msrb.mxu3 %v8514_v63 }
 0xc03   : > { %3399 = vmatpush.msrb.mxu3 %v8525_v26 }
 0xc05   : > { %3400 = vmatpush.msrb.mxu3 %v8537_v42 }
 0xc07   : > { %3401 = vmatpush.msrb.mxu3 %v8552_v46 }
 0xc09   : > { %3402 = vmatpush.msrb.mxu3 %v8564_v14 }
 0xc0b   : > { %3403 = vmatpush.msrb.mxu3 %v8577_v44 }
 0xc0d   : > { %3404 = vmatpush.msrb.mxu3 %v8600_v19 }
 0xc0e   : > { %6335 = vmatmul.msk.f32.vlgmr.msrb.gmra.mxu3 %vm295_vm0, %v6334_v54 }
 0xc0f   : > { %3519 = vmatpush.msra.mxu3 %v8464_v33 }
 0xc11   : > { %3520 = vmatpush.msra.mxu3 %v8496_v45 }
 0xc13   : > { %3521 = vmatpush.msra.mxu3 %v8507_v16 }
 0xc15   : > { %3522 = vmatpush.msra.mxu3 %v8531_v11 }
 0xc17   : > { %3523 = vmatpush.msra.mxu3 %v8543_v43 }
 0xc19   : > { %3524 = vmatpush.msra.mxu3 %v8547_v3 }
 0xc1b   : > { %3525 = vmatpush.msra.mxu3 %v8571_v61 }
 0xc1d   : > { %3526 = vmatpush.msra.mxu3 %v8580_v0 }
 0xc1e   : > { %6349 = vmatmul.msk.f32.vlgmr.msra.gmra.mxu3 %vm295_vm0, %v6348_v38 }
 0xc5a   : > { %v2923_v50 = vpop.f32.mrf.mxu0 }
 0xc5b   : > { %6296 = vmatmul.msk.f32.vlgmr.msra.gmra.mxu1 %vm295_vm0, %v2923_v50 }
 0xc5c   : > { %3205 = vmatpush.msra.mxu1 %v8473_v22 }
 0xc5e   : > { %3206 = vmatpush.msra.mxu1 %v8514_v63 }
 0xc5f   : > { %v2977_v62 = vpop.f32.mrf.mxu2 }
 0xc60   : > { %3207 = vmatpush.msra.mxu1 %v8525_v26 }
 0xc61   : > { %v3010_v29 = vpop.f32.mrf.mxu3 }
 0xc62   : > { %6308 = vmatmul.msk.f32.vlgmr.msrb.gmra.mxu0 %vm295_vm0, %v3010_v29  ;;  %3208 = vmatpush.msra.mxu1 %v8537_v42  ;;  %v9054_v29 = vld [vmem:[#allocation2 + $0x50] sm:$0xff] }
 0xc63   : > { %3293 = vmatpush.msrb.mxu0 %v8597_v13  ;;  %6310 = vmatmul.msk.f32.vlgmr.msrb.gmra.mxu1 %vm295_vm0, %v6309_v5  ;;  %v9049_v5 = vld [vmem:[#allocation2 + $0x58] sm:$0xff] }
 0xc64   : > { %3209 = vmatpush.msra.mxu1 %v8552_v46 }
 0xc65   : > { %3294 = vmatpush.msrb.mxu0 %v8608_v30 }
 0xc66   : > { %3210 = vmatpush.msra.mxu1 %v8564_v14 }
 0xc67   : > { %3295 = vmatpush.msrb.mxu0 %v8615_v8 }
 0xc68   : > { %3211 = vmatpush.msra.mxu1 %v8577_v44 }
 0xc69   : > { %3296 = vmatpush.msrb.mxu0 %v8622_v40 }
 0xc6a   : > { %3212 = vmatpush.msra.mxu1 %v8600_v19  ;;  %6315 = vmatmul.msk.f32.vlgmr.msra.gmra.mxu0 %vm295_vm0, %v6312_v53  ;;  %v9058_v53 = vld [vmem:[#allocation2 + $0xc8] sm:$0xff] }
 0xc6b   : > { %3297 = vmatpush.msrb.mxu0 %v8629_v56  ;;  %6317 = vmatmul.msk.f32.vlgmr.msra.gmra.mxu1 %vm295_vm0, %v6316_v32  ;;  %v9060_v32 = vld [vmem:[#allocation2 + $0x48] sm:$0xff] }
 0xc6c   : > { %3342 = vmatpush.msrb.mxu1 %v8464_v33 }
 0xc6d   : > { %3298 = vmatpush.msrb.mxu0 %v8636_v48 }
 0xc6e   : > { %3343 = vmatpush.msrb.mxu1 %v8496_v45 }
 0xc6f   : > { %3299 = vmatpush.msrb.mxu0 %v8643_v47 }
 0xc70   : > { %3344 = vmatpush.msrb.mxu1 %v8507_v16 }
 0xc71   : > { %3300 = vmatpush.msrb.mxu0 %v8650_v15  ;;  %v8747_v31 = vpop.f32.mrf.mxu3 }
 0xc72   : > { %3345 = vmatpush.msrb.mxu1 %v8531_v11 }
 0xc73   : > { %3428 = vmatpush.msra.mxu0 %v8597_v13 }
 0xc74   : > { %3346 = vmatpush.msrb.mxu1 %v8543_v43 }
 0xc75   : > { %3429 = vmatpush.msra.mxu0 %v8608_v30 }
 0xc76   : > { %3347 = vmatpush.msrb.mxu1 %v8547_v3 }
 0xc77   : > { %3430 = vmatpush.msra.mxu0 %v8615_v8 }
 0xc78   : > { %3348 = vmatpush.msrb.mxu1 %v8571_v61 }
 0xc79   : > { %3431 = vmatpush.msra.mxu0 %v8622_v40 }
 0xc7a   : > { %3349 = vmatpush.msrb.mxu1 %v8580_v0 }
 0xc7b   : > { %3432 = vmatpush.msra.mxu0 %v8629_v56  ;;  %6332 = vmatmul.msk.f32.vlgmr.msrb.gmra.mxu1 %vm295_vm0, %v6331_v59  ;;  %v6398_v59 = vld [vmem:[%s10106_s3 + $0x2c] sm:$0xf] }
 0xc7c   : > { %3461 = vmatpush.msra.mxu1 %v8470_v21 }
 0xc7d   : > { %3433 = vmatpush.msra.mxu0 %v8636_v48 }
 0xc7e   : > { %3462 = vmatpush.msra.mxu1 %v8505_v51 }
 0xc7f   : > { %3434 = vmatpush.msra.mxu0 %v8643_v47 }
 0xc80   : > { %3463 = vmatpush.msra.mxu1 %v8522_v24 }
 0xc81   : > { %v3279_v39 = vpop.f32.mrf.mxu3  ;;  %3435 = vmatpush.msra.mxu0 %v8650_v15 }
 0xc82   : > { %3464 = vmatpush.msra.mxu1 %v8533_v17  ;;  %6329 = vmatmul.msk.f32.vlgmr.msrb.gmra.mxu0 %vm295_vm0, %v3279_v39  ;;  %v9067_v39 = vld [vmem:[#allocation2 + $0xc0] sm:$0xff] }
 0xc83   : > { %3559 = vmatpush.msrb.mxu0 %v8466_v35 }
 0xc84   : > { %3465 = vmatpush.msra.mxu1 %v8545_v27 }
 0xc85   : > { %3560 = vmatpush.msrb.mxu0 %v8499_v49 }
 0xc86   : > { %3466 = vmatpush.msra.mxu1 %v8559_v7 }
 0xc87   : > { %3561 = vmatpush.msrb.mxu0 %v8516_v36 }
 0xc88   : > { %3467 = vmatpush.msra.mxu1 %v8573_v23 }
 0xc89   : > { %3562 = vmatpush.msrb.mxu0 %v8527_v60 }
 0xc8a   : > { %3468 = vmatpush.msra.mxu1 %v8592_v4 }
 0xc8b   : > { %6346 = vmatmul.msk.f32.vlgmr.msra.gmra.mxu1 %vm295_vm0, %v6345_v58  ;;  %3563 = vmatpush.msrb.mxu0 %v8539_v34  ;;  %v9069_v58 = vld [vmem:[#allocation2 + $0x40] sm:$0xff] }
 0xc8c   : > { %3582 = vmatpush.msrb.mxu1 %v8777_v2 }
 0xc8d   : > { %3564 = vmatpush.msrb.mxu0 %v8554_v20 }
 0xc8e   : > { %3583 = vmatpush.msrb.mxu1 %v8785_v10 }
 0xc8f   : > { %3565 = vmatpush.msrb.mxu0 %v8566_v1 }
 0xc90   : > { %3584 = vmatpush.msrb.mxu1 %v8792_v9 }
 0xc91   : > { %v3406_v6 = vpop.f32.mrf.mxu3  ;;  %3566 = vmatpush.msrb.mxu0 %v8585_v25 }
 0xc92   : > { %3585 = vmatpush.msrb.mxu1 %v8799_v41  ;;  %6344 = vmatmul.msk.f32.vlgmr.msra.gmra.mxu0 %vm295_vm0, %v3406_v6  ;;  %v3918_v6 = vld [vmem:[%s10106_s3] sm:$0xf] }
 0xc93   : > { %3678 = vmatpush.msra.mxu0 %v8473_v22  ;;  %v6358_v22 = vld [vmem:[%s10106_s3 + $0x18] sm:$0xf] }
 0xc94   : > { %3586 = vmatpush.msrb.mxu1 %v8806_v52 }
 0xc95   : > { %3679 = vmatpush.msra.mxu0 %v8514_v63  ;;  %v6372_v63 = vld [vmem:[%s10106_s3 + $0x38] sm:$0xf] }
 0xc96   : > { %3587 = vmatpush.msrb.mxu1 %v8814_v18 }
 0xc97   : > { %3680 = vmatpush.msra.mxu0 %v8525_v26 }
 0xc98   : > { %3588 = vmatpush.msrb.mxu1 %v8821_v37 }
 0xc99   : > { %3681 = vmatpush.msra.mxu0 %v8537_v42  ;;  %v3085_v42 = vld [vmem:[%s10104_s1 + $0x38] sm:$0xff] }
 0xc9a   : > { %3589 = vmatpush.msrb.mxu1 %v8828_v12  ;;  %6359 = vmatmul.msk.f32.vlgmr.msrb.gmra.mxu0 %vm295_vm0, %v6358_v22  ;;  %v6408_v22 = vld [vmem:[%s10106_s3 + $0x4] sm:$0xf] }
 0xc9b   : > { %3682 = vmatpush.msra.mxu0 %v8552_v46  ;;  %3097 = vmatpush.msrb.mxu2 %v3085_v42  ;;  %v3084_v46 = vld [vmem:[%s10104_s1 + $0x30] sm:$0xff] }
 0xc9c   : > { %3709 = vmatpush.msra.mxu1 %v8597_v13 }
 0xc9d   : > { %3683 = vmatpush.msra.mxu0 %v8564_v14  ;;  %3098 = vmatpush.msrb.mxu2 %v3084_v46  ;;  %v3083_v14 = vld [vmem:[%s10104_s1 + $0x28] sm:$0xff] }
 0xc9e   : > { %3710 = vmatpush.msra.mxu1 %v8608_v30  ;;  %v6425_v46 = vld [vmem:[%s10106_s3 + $0x8] sm:$0xf] }
 0xc9f   : > { %3684 = vmatpush.msra.mxu0 %v8577_v44  ;;  %3099 = vmatpush.msrb.mxu2 %v3083_v14  ;;  %v6412_v14 = vld [vmem:[%s10106_s3 + $0x24] sm:$0xf] }
 0xca0   : > { %3711 = vmatpush.msra.mxu1 %v8615_v8 }
 0xca1   : > { %3685 = vmatpush.msra.mxu0 %v8600_v19  ;;  %v3528_v26 = vpop.f32.mrf.mxu3  ;;  %3100 = vmatpush.msrb.mxu2 %v3082_v28 }
 0xca2   : > { %3712 = vmatpush.msra.mxu1 %v8622_v40  ;;  %6373 = vmatmul.msk.f32.vlgmr.msra.gmra.mxu0 %vm295_vm0, %v6372_v63 }
 0xca3   : > { %3813 = vmatpush.msrb.mxu0 %v8470_v21  ;;  %6360 = vmatmul.msk.f32.vlgmr.msrb.gmra.mxu1 %vm295_vm0, %v3528_v26  ;;  %v6404_v26 = vld [vmem:[%s10106_s3 + $0x20] sm:$0xf] }
 0xca4   : > { %3713 = vmatpush.msra.mxu1 %v8629_v56 }
 0xca5   : > { %3814 = vmatpush.msrb.mxu0 %v8505_v51 }
 0xca6   : > { %3714 = vmatpush.msra.mxu1 %v8636_v48 }
 0xca7   : > { %3815 = vmatpush.msrb.mxu0 %v8522_v24 }
 0xca8   : > { %3715 = vmatpush.msra.mxu1 %v8643_v47 }
 0xca9   : > { %3816 = vmatpush.msrb.mxu0 %v8533_v17 }
 0xcaa   : > { %3716 = vmatpush.msra.mxu1 %v8650_v15 }
 0xcab   : > { %3817 = vmatpush.msrb.mxu0 %v8545_v27 }
 0xcac   : > { %3846 = vmatpush.msrb.mxu1 %v8464_v33  ;;  %v6383_v33 = vld [vmem:[%s10106_s3 + $0x4] sm:$0xf] }
 0xcad   : > { %3818 = vmatpush.msrb.mxu0 %v8559_v7 }
 0xcae   : > { %3847 = vmatpush.msrb.mxu1 %v8496_v45  ;;  %v3081_v45 = vld [vmem:[%s10104_s1 + $0x18] sm:$0xff] }
 0xcaf   : > { %3819 = vmatpush.msrb.mxu0 %v8573_v23  ;;  %3101 = vmatpush.msrb.mxu2 %v3081_v45  ;;  %v9177_v45 = vld [vmem:[#allocation2 + $0x20] sm:$0xff] }
 0xcb0   : > { %3848 = vmatpush.msrb.mxu1 %v8507_v16  ;;  %v3080_v16 = vld [vmem:[%s10104_s1 + $0x10] sm:$0xff] }
 0xcb1   : > { %3820 = vmatpush.msrb.mxu0 %v8592_v4  ;;  %3102 = vmatpush.msrb.mxu2 %v3080_v16  ;;  %v6366_v16 = vld [vmem:[%s10104_s1 + $0x98] sm:$0xff] }
 0xcb2   : > { %3849 = vmatpush.msrb.mxu1 %v8531_v11  ;;  %6395 = vmatmul.msk.f32.vlgmr.msrb.gmra.mxu0 %vm295_vm0, %v6383_v33  ;;  %v3079_v11 = vld [vmem:[%s10104_s1 + $0x8] sm:$0xff]  ;;  %v6367_v33 = vld [vmem:[%s10104_s1 + $0xa0] sm:$0xff] }
 0xcb3   : > { %3948 = vmatpush.msra.mxu0 %v8470_v21  ;;  %3103 = vmatpush.msrb.mxu2 %v3079_v11  ;;  %v9185_v11 = vld [vmem:[#allocation2 + $0x18] sm:$0xff] }
 0xcb4   : > { %3850 = vmatpush.msrb.mxu1 %v8543_v43  ;;  %v3078_v43 = vld [vmem:[%s10104_s1] sm:$0xff] }
 0xcb5   : > { %3949 = vmatpush.msra.mxu0 %v8505_v51  ;;  %3104 = vmatpush.msrb.mxu2 %v3078_v43 }
 0xcb6   : > { %3851 = vmatpush.msrb.mxu1 %v8547_v3  ;;  %v6401_v3 = vld [vmem:[%s10106_s3 + $0x8] sm:$0xf] }
 0xcb7   : > { %3950 = vmatpush.msra.mxu0 %v8522_v24  ;;  %3236 = vmatpush.msra.mxu2 %v8597_v13 }
 0xcb8   : > { %3852 = vmatpush.msrb.mxu1 %v8571_v61  ;;  %v6409_v61 = vld [vmem:[%s10106_s3 + $0xc] sm:$0xf] }
 0xcb9   : > { %3951 = vmatpush.msra.mxu0 %v8533_v17  ;;  %3237 = vmatpush.msra.mxu2 %v8608_v30 }
 0xcba   : > { %3853 = vmatpush.msrb.mxu1 %v8580_v0 }
 0xcbb   : > { %3952 = vmatpush.msra.mxu0 %v8545_v27  ;;  %3238 = vmatpush.msra.mxu2 %v8615_v8 }
 0xcbd   : > { %3953 = vmatpush.msra.mxu0 %v8559_v7  ;;  %3239 = vmatpush.msra.mxu2 %v8622_v40 }
 0xcbf   : > { %3954 = vmatpush.msra.mxu0 %v8573_v23  ;;  %3240 = vmatpush.msra.mxu2 %v8629_v56 }
 0xcc1   : > { %3955 = vmatpush.msra.mxu0 %v8592_v4  ;;  %3241 = vmatpush.msra.mxu2 %v8636_v48 }
 0xcc2   : > { %6402 = vmatmul.msk.f32.vlgmr.msra.gmra.mxu0 %vm295_vm0, %v6401_v3 }
 0xcc3   : > { %4086 = vmatpush.msrb.mxu0 %v8470_v21  ;;  %3242 = vmatpush.msra.mxu2 %v8643_v47 }
 0xcc5   : > { %4087 = vmatpush.msrb.mxu0 %v8505_v51  ;;  %3243 = vmatpush.msra.mxu2 %v8650_v15 }
 0xcc7   : > { %4088 = vmatpush.msrb.mxu0 %v8522_v24 }
 0xcc9   : > { %4089 = vmatpush.msrb.mxu0 %v8533_v17 }
 0xccb   : > { %4090 = vmatpush.msrb.mxu0 %v8545_v27 }
 0xccd   : > { %4091 = vmatpush.msrb.mxu0 %v8559_v7 }
 0xccf   : > { %4092 = vmatpush.msrb.mxu0 %v8573_v23 }
 0xcd1   : > { %4093 = vmatpush.msrb.mxu0 %v8592_v4 }
 0xcd2   : > { %6410 = vmatmul.msk.f32.vlgmr.msrb.gmra.mxu0 %vm295_vm0, %v6409_v61  ;;  %v6365_v61 = vld [vmem:[%s10104_s1 + $0x90] sm:$0xff] }
 0xcd3   : > { %4209 = vmatpush.msra.mxu0 %v8470_v21  ;;  %v4189_v21 = vld [vmem:[%s10106_s3] sm:$0xf] }
 0xcd5   : > { %4210 = vmatpush.msra.mxu0 %v8505_v51 }
 0xcd7   : > { %4211 = vmatpush.msra.mxu0 %v8522_v24 }
 0xcd8   : > { %v2954_v0 = vpop.f32.mrf.mxu1 }
 0xcd9   : > { %4212 = vmatpush.msra.mxu0 %v8533_v17  ;;  %v2978_v57 = vadd.f32 %v2977_v62, %v2954_v0  ;;  %v9200_v62 = vld [vmem:[#allocation2 + $0x10] sm:$0xff] }
 0xcdb   : > { %4213 = vmatpush.msra.mxu0 %v8545_v27 }
 0xcdd   : > { %4214 = vmatpush.msra.mxu0 %v8559_v7 }
 0xcdf   : > { %4215 = vmatpush.msra.mxu0 %v8573_v23  ;;  %v3041_v55 = vpop.f32.mrf.mxu0 }
 0xce0   : > { %v8945_v54 = vadd.f32 %v3041_v55, %v2978_v57  ;;  %v3075_v38 = vpop.f32.mrf.mxu1  ;;  %v9208_v55 = vld [vmem:[#allocation2 + $0x8] sm:$0xff] }
 0xce1   : > { %4216 = vmatpush.msra.mxu0 %v8592_v4  ;;  %6311 = vmatmul.msk.f32.vlgmr.msrb.gmra.mxu2 %vm295_vm0, %v3075_v38  ;;  %v9216_v38 = vld [vmem:[%s10104_s1 + $0xf8] sm:$0xff] }
 0xce2   : > { %6416 = vmatmul.msk.f32.vlgmr.msra.gmra.mxu0 %vm295_vm0, %v4189_v21  ;;  %3365 = vmatpush.msrb.mxu2 %v8466_v35  ;;  %v4387_v35 = vld [vmem:[#allocation2 + $0xb8] sm:$0xff]  ;;  %v6364_v21 = vld [vmem:[%s10104_s1 + $0x88] sm:$0xff] }
 0xce3   : > { %4327 = vmatpush.msrb.mxu0 %v8777_v2 }
 0xce4   : > { %3366 = vmatpush.msrb.mxu2 %v8499_v49  ;;  %v2882_v49 = vld [vmem:[%s10108_s5] sm:$0xf] }
 0xce5   : > { %4328 = vmatpush.msrb.mxu0 %v8785_v10  ;;  %3112 = vperm.xlu2 %6692, %v2882_v49   ;;  %v6434_v49 = vld [vmem:[%s10106_s3 + $0x1c] sm:$0xf] }
 0xce6   : > { %3367 = vmatpush.msrb.mxu2 %v8516_v36  ;;  %v6330_v36 = vld [vmem:[%s10106_s3 + $0x14] sm:$0xf] }
 0xce7   : > { %4329 = vmatpush.msrb.mxu0 %v8792_v9 }
 0xce8   : > { %3368 = vmatpush.msrb.mxu2 %v8527_v60  ;;  %v3214_v50 = vpop.f32.mrf.mxu1  ;;  %v3601_v60 = vld [vmem:[#allocation2 + $0xb0] sm:$0xff] }
 0xce9   : > { %4330 = vmatpush.msrb.mxu0 %v8799_v41  ;;  %6326 = vmatmul.msk.f32.vlgmr.msra.gmra.mxu2 %vm295_vm0, %v3214_v50 }
 0xcea   : > { %3369 = vmatpush.msrb.mxu2 %v8539_v34 }
 0xceb   : > { %4331 = vmatpush.msrb.mxu0 %v8806_v52 }
 0xcec   : > { %3370 = vmatpush.msrb.mxu2 %v8554_v20  ;;  %v3600_v20 = vld [vmem:[#allocation2 + $0xa8] sm:$0xff] }
 0xced   : > { %4332 = vmatpush.msrb.mxu0 %v8814_v18 }
 0xcee   : > { %3371 = vmatpush.msrb.mxu2 %v8566_v1 }
 0xcef   : > { %4333 = vmatpush.msrb.mxu0 %v8821_v37 }
 0xcf0   : > { %3372 = vmatpush.msrb.mxu2 %v8585_v25  ;;  %v6361_v25 = vld [vmem:[%s10106_s3 + $0x30] sm:$0xf] }
 0xcf1   : > { %4334 = vmatpush.msrb.mxu0 %v8828_v12  ;;  %6333 = vmatmul.msk.f32.vlgmr.msrb.gmra.mxu2 %vm295_vm0, %v6330_v36  ;;  %v6446_v36 = vld [vmem:[%s10106_s3 + $0x34] sm:$0xf] }
 0xcf2   : > { %3484 = vmatpush.msra.mxu2 %v8597_v13 }
 0xcf3   : > { %4462 = vmatpush.msra.mxu0 %v4387_v35 }
 0xcf4   : > { %3485 = vmatpush.msra.mxu2 %v8608_v30  ;;  %v9003_v30 = vld [vmem:[#allocation2 + $0xf8] sm:$0xff] }
 0xcf5   : > { %4463 = vmatpush.msra.mxu0 %v8505_v51  ;;  %v8982_v51 = vpop.f32.mrf.mxu0 }
 0xcf6   : > { %3486 = vmatpush.msra.mxu2 %v8615_v8  ;;  %v9020_v8 = vld [vmem:[#allocation2 + $0xd0] sm:$0xff]  ;;  %v3182_v50 = vadd.f32 %v8982_v51, %v8747_v31 }
 0xcf7   : > { %4464 = vmatpush.msra.mxu0 %v8522_v24  ;;  %v9239_v31 = vld [vmem:[%s10104_s1 + $0xf0] sm:$0xff] }
 0xcf8   : > { %3487 = vmatpush.msra.mxu2 %v8622_v40  ;;  %v8985_v24 = vpop.f32.mrf.mxu1  ;;  %v6384_v40 = vld [vmem:[%s10106_s3 + $0xc] sm:$0xf] }
 0xcf9   : > { %4465 = vmatpush.msra.mxu0 %v8533_v17 }
 0xcfa   : > { %3488 = vmatpush.msra.mxu2 %v8629_v56 }
 0xcfb   : > { %4466 = vmatpush.msra.mxu0 %v8545_v27 }
 0xcfc   : > { %3489 = vmatpush.msra.mxu2 %v8636_v48  ;;  %v9030_v48 = vld [vmem:[#allocation2 + $0x78] sm:$0xff] }
 0xcfd   : > { %4467 = vmatpush.msra.mxu0 %v8559_v7 }
 0xcfe   : > { %3490 = vmatpush.msra.mxu2 %v8643_v47  ;;  %v9034_v47 = vld [vmem:[#allocation2 + $0x70] sm:$0xff] }
 0xcff   : > { %4468 = vmatpush.msra.mxu0 %v8573_v23  ;;  %v8989_v34 = vpop.f32.mrf.mxu0 }
 0xd00   : > { %3491 = vmatpush.msra.mxu2 %v8650_v15  ;;  %v9045_v15 = vld [vmem:[#allocation2 + $0x60] sm:$0xff] }
 0xd01   : > { %4469 = vmatpush.msra.mxu0 %v8592_v4 }
 0xd02   : > { %3614 = vmatpush.msrb.mxu2 %v4387_v35  ;;  %v9224_v35 = vld [vmem:[#allocation2] sm:$0xff] }
 0xd04   : > { %3615 = vmatpush.msrb.mxu2 %v3601_v60 }
 0xd06   : > { %3616 = vmatpush.msrb.mxu2 %v3600_v20  ;;  %v9248_v20 = vld [vmem:[%s10104_s1 + $0xe8] sm:$0xff] }
 0xd08   : > { %v3470_v1 = vpop.f32.mrf.mxu1  ;;  %3617 = vmatpush.msrb.mxu2 %v8533_v17  ;;  %v9006_v17 = vld [vmem:[#allocation2 + $0xf0] sm:$0xff] }
 0xd09   : > { %6347 = vmatmul.msk.f32.vlgmr.msra.gmra.mxu2 %vm295_vm0, %v3470_v1 }
 0xd0a   : > { %3618 = vmatpush.msrb.mxu2 %v8545_v27  ;;  %v9009_v27 = vld [vmem:[#allocation2 + $0xe8] sm:$0xff] }
 0xd0c   : > { %3619 = vmatpush.msrb.mxu2 %v8559_v7 }
 0xd0e   : > { %3620 = vmatpush.msrb.mxu2 %v8573_v23  ;;  %v9014_v23 = vld [vmem:[#allocation2 + $0xe0] sm:$0xff] }
 0xd0f   : > { %v8999_v13 = vpop.f32.mrf.mxu0 }
 0xd10   : > { %3621 = vmatpush.msrb.mxu2 %v8592_v4  ;;  %v9017_v4 = vld [vmem:[#allocation2 + $0xd8] sm:$0xff] }
 0xd11   : > { %6362 = vmatmul.msk.f32.vlgmr.msrb.gmra.mxu2 %vm295_vm0, %v6361_v25  ;;  %v9257_v25 = vld [vmem:[%s10104_s1 + $0xe0] sm:$0xff] }
 0xd12   : > { %3759 = vmatpush.msra.mxu2 %v9003_v30 }
 0xd14   : > { %3760 = vmatpush.msra.mxu2 %v9006_v17 }
 0xd16   : > { %3761 = vmatpush.msra.mxu2 %v9009_v27 }
 0xd17   : > { %v9012_v7 = vpop.f32.mrf.mxu0 }
 0xd18   : > { %3762 = vmatpush.msra.mxu2 %v9014_v23 }
 0xd1a   : > { %3763 = vmatpush.msra.mxu2 %v9017_v4 }
 0xd1c   : > { %3764 = vmatpush.msra.mxu2 %v9020_v8 }
 0xd1e   : > { %3765 = vmatpush.msra.mxu2 %v8577_v44  ;;  %v9038_v44 = vld [vmem:[#allocation2 + $0x68] sm:$0xff] }
 0xd1f   : > { %v3687_v56 = vpop.f32.mrf.mxu0 }
 0xd20   : > { %3766 = vmatpush.msra.mxu2 %v8600_v19  ;;  %6382 = vmatmul.msk.f32.vlgmr.msra.gmra.mxu1 %vm295_vm0, %v3687_v56  ;;  %v6396_v19 = vld [vmem:[%s10106_s3 + $0x24] sm:$0xf]  ;;  %v9266_v56 = vld [vmem:[%s10104_s1 + $0xd8] sm:$0xff] }
 0xd21   : > { %6385 = vmatmul.msk.f32.vlgmr.msra.gmra.mxu2 %vm295_vm0, %v6384_v40  ;;  %3971 = vmatpush.msra.mxu1 %v9003_v30 }
 0xd22   : > { %3880 = vmatpush.msrb.mxu2 %v9030_v48 }
 0xd23   : > { %3972 = vmatpush.msra.mxu1 %v9006_v17 }
 0xd24   : > { %3881 = vmatpush.msrb.mxu2 %v9034_v47 }
 0xd25   : > { %3973 = vmatpush.msra.mxu1 %v9009_v27 }
 0xd26   : > { %3882 = vmatpush.msrb.mxu2 %v9038_v44 }
 0xd27   : > { %3974 = vmatpush.msra.mxu1 %v9014_v23 }
 0xd28   : > { %3883 = vmatpush.msrb.mxu2 %v9045_v15  ;;  %6397 = vmatmul.msk.f32.vlgmr.msrb.gmra.mxu1 %vm295_vm0, %v6396_v19  ;;  %v9283_v19 = vld [vmem:[%s10104_s1 + $0xc8] sm:$0xff] }
 0xd29   : > { %3975 = vmatpush.msra.mxu1 %v9017_v4 }
 0xd2a   : > { %3884 = vmatpush.msrb.mxu2 %v9049_v5 }
 0xd2b   : > { %3976 = vmatpush.msra.mxu1 %v9020_v8 }
 0xd2c   : > { %3885 = vmatpush.msrb.mxu2 %v9054_v29 }
 0xd2d   : > { %3977 = vmatpush.msra.mxu1 %v9058_v53 }
 0xd2e   : > { %3886 = vmatpush.msrb.mxu2 %v9060_v32 }
 0xd2f   : > { %3978 = vmatpush.msra.mxu1 %v9067_v39  ;;  %v9096_v63 = vpop.f32.mrf.mxu0 }
 0xd30   : > { %3887 = vmatpush.msrb.mxu2 %v9069_v58  ;;  %6403 = vmatmul.msk.f32.vlgmr.msra.gmra.mxu1 %vm295_vm0, %v3918_v6  ;;  %v6451_v6 = vld [vmem:[%s10106_s3 + $0x10] sm:$0xf] }
 0xd31   : > { %4109 = vmatpush.msrb.mxu1 %v9003_v30  ;;  %6399 = vmatmul.msk.f32.vlgmr.msrb.gmra.mxu2 %vm295_vm0, %v6398_v59  ;;  %v9291_v59 = vld [vmem:[%s10104_s1 + $0xc0] sm:$0xff] }
 0xd32   : > { %4004 = vmatpush.msra.mxu2 %v9030_v48 }
 0xd33   : > { %4110 = vmatpush.msrb.mxu1 %v9006_v17 }
 0xd34   : > { %4005 = vmatpush.msra.mxu2 %v9034_v47 }
 0xd35   : > { %4111 = vmatpush.msrb.mxu1 %v9009_v27 }
 0xd36   : > { %4006 = vmatpush.msra.mxu2 %v9038_v44 }
 0xd37   : > { %4112 = vmatpush.msrb.mxu1 %v9014_v23 }
 0xd38   : > { %4007 = vmatpush.msra.mxu2 %v9045_v15 }
 0xd39   : > { %4113 = vmatpush.msrb.mxu1 %v9017_v4 }
 0xd3a   : > { %4008 = vmatpush.msra.mxu2 %v9049_v5 }
 0xd3b   : > { %4114 = vmatpush.msrb.mxu1 %v9020_v8 }
 0xd3c   : > { %4009 = vmatpush.msra.mxu2 %v9054_v29 }
 0xd3d   : > { %4115 = vmatpush.msrb.mxu1 %v9058_v53 }
 0xd3e   : > { %4010 = vmatpush.msra.mxu2 %v9060_v32 }
 0xd3f   : > { %4116 = vmatpush.msrb.mxu1 %v9067_v39  ;;  %v9114_v42 = vpop.f32.mrf.mxu0  ;;  %v9187_v3 = vpop.permute.xlu2 %3112 }
 0xd40   : > { %4011 = vmatpush.msra.mxu2 %v9069_v58  ;;  %6411 = vmatmul.msk.f32.vlgmr.msrb.gmra.mxu1 %vm295_vm0, %v6408_v22  ;;  %v6448_v22 = vld [vmem:[%s10106_s3 + $0x3c] sm:$0xf] }
 0xd41   : > { %4249 = vmatpush.msra.mxu1 %v9003_v30  ;;  %6405 = vmatmul.msk.f32.vlgmr.msra.gmra.mxu2 %vm295_vm0, %v6404_v26 }
 0xd42   : > { %4141 = vmatpush.msrb.mxu2 %v9030_v48 }
 0xd43   : > { %4250 = vmatpush.msra.mxu1 %v9006_v17 }
 0xd44   : > { %4142 = vmatpush.msrb.mxu2 %v9034_v47 }
 0xd45   : > { %4251 = vmatpush.msra.mxu1 %v9009_v27 }
 0xd46   : > { %4143 = vmatpush.msrb.mxu2 %v9038_v44 }
 0xd47   : > { %4252 = vmatpush.msra.mxu1 %v9014_v23 }
 0xd48   : > { %4144 = vmatpush.msrb.mxu2 %v9045_v15 }
 0xd49   : > { %4253 = vmatpush.msra.mxu1 %v9017_v4 }
 0xd4a   : > { %4145 = vmatpush.msrb.mxu2 %v9049_v5 }
 0xd4b   : > { %4254 = vmatpush.msra.mxu1 %v9020_v8 }
 0xd4c   : > { %4146 = vmatpush.msrb.mxu2 %v9054_v29 }
 0xd4d   : > { %4255 = vmatpush.msra.mxu1 %v9058_v53 }
 0xd4e   : > { %4147 = vmatpush.msrb.mxu2 %v9060_v32 }
 0xd4f   : > { %4256 = vmatpush.msra.mxu1 %v9067_v39  ;;  %v9135_v28 = vpop.f32.mrf.mxu0 }
 0xd50   : > { %4148 = vmatpush.msrb.mxu2 %v9069_v58  ;;  %6426 = vmatmul.msk.f32.vlgmr.msra.gmra.mxu1 %vm295_vm0, %v6425_v46 }
 0xd51   : > { %4360 = vmatpush.msrb.mxu1 %v9030_v48  ;;  %6413 = vmatmul.msk.f32.vlgmr.msrb.gmra.mxu2 %vm295_vm0, %v6412_v14  ;;  %v6459_v14 = vld [vmem:[%s10106_s3 + $0x14] sm:$0xf] }
 0xd52   : > { %4272 = vmatpush.msra.mxu2 %v8777_v2  ;;  %v6370_v2 = vld [vmem:[%s10104_s1 + $0xb8] sm:$0xff] }
 0xd53   : > { %4361 = vmatpush.msrb.mxu1 %v9034_v47  ;;  %3645 = vmatpush.msrb.mxu3 %v6370_v2 }
 0xd54   : > { %4273 = vmatpush.msra.mxu2 %v8785_v10  ;;  %v6369_v10 = vld [vmem:[%s10104_s1 + $0xb0] sm:$0xff] }
 0xd55   : > { %4362 = vmatpush.msrb.mxu1 %v9038_v44  ;;  %3646 = vmatpush.msrb.mxu3 %v6369_v10  ;;  %v6455_v10 = vld [vmem:[%s10106_s3 + $0x30] sm:$0xf] }
 0xd56   : > { %4274 = vmatpush.msra.mxu2 %v8792_v9  ;;  %v6431_v9 = vld [vmem:[%s10106_s3 + $0x28] sm:$0xf] }
 0xd57   : > { %4363 = vmatpush.msrb.mxu1 %v9045_v15 }
 0xd58   : > { %4275 = vmatpush.msra.mxu2 %v8799_v41  ;;  %v9156_v41 = vld [vmem:[#allocation2 + $0x38] sm:$0xff] }
 0xd59   : > { %4364 = vmatpush.msrb.mxu1 %v9049_v5 }
 0xd5a   : > { %4276 = vmatpush.msra.mxu2 %v8806_v52 }
 0xd5b   : > { %4365 = vmatpush.msrb.mxu1 %v9054_v29 }
 0xd5c   : > { %4277 = vmatpush.msra.mxu2 %v8814_v18  ;;  %v9161_v18 = vld [vmem:[#allocation2 + $0x30] sm:$0xff] }
 0xd5d   : > { %4366 = vmatpush.msrb.mxu1 %v9060_v32 }
 0xd5e   : > { %4278 = vmatpush.msra.mxu2 %v8821_v37  ;;  %v6368_v37 = vld [vmem:[%s10104_s1 + $0xa8] sm:$0xff] }
 0xd5f   : > { %4367 = vmatpush.msrb.mxu1 %v9069_v58  ;;  %v4218_v52 = vpop.f32.mrf.mxu0  ;;  %3647 = vmatpush.msrb.mxu3 %v6368_v37 }
 0xd60   : > { %4279 = vmatpush.msra.mxu2 %v8828_v12  ;;  %6432 = vmatmul.msk.f32.vlgmr.msrb.gmra.mxu1 %vm295_vm0, %v6431_v9  ;;  %v9170_v12 = vld [vmem:[#allocation2 + $0x28] sm:$0xff] }
 0xd61   : > { %4494 = vmatpush.msra.mxu1 %v9156_v41  ;;  %6427 = vmatmul.msk.f32.vlgmr.msra.gmra.mxu2 %vm295_vm0, %v4218_v52 }
 0xd62   : > { %4408 = vmatpush.msrb.mxu2 %v9003_v30  ;;  %3648 = vmatpush.msrb.mxu3 %v6367_v33  ;;  %v9414_v33 = vld [vmem:[%s10104_s1 + $0x148] sm:$0xff] }
 0xd63   : > { %4495 = vmatpush.msra.mxu1 %v9161_v18 }
 0xd64   : > { %4409 = vmatpush.msrb.mxu2 %v9006_v17  ;;  %v3106_v43 = vpop.f32.mrf.mxu2  ;;  %3649 = vmatpush.msrb.mxu3 %v6366_v16  ;;  %v9421_v16 = vld [vmem:[%s10104_s1 + $0x1f8] sm:$0xff] }
 0xd65   : > { %4496 = vmatpush.msra.mxu1 %v9170_v12  ;;  %v3109_v0 = vadd.f32 %v3106_v43, %v8945_v54  ;;  %v6363_v54 = vld [vmem:[%s10104_s1 + $0x80] sm:$0xff] }
 0xd66   : > { %4410 = vmatpush.msrb.mxu2 %v9009_v27  ;;  %3650 = vmatpush.msrb.mxu3 %v6365_v61  ;;  %v9427_v43 = vld [vmem:[%s10104_s1 + $0x140] sm:$0xff]  ;;  %v9434_v61 = vld [vmem:[%s10104_s1 + $0x1f0] sm:$0xff] }
 0xd67   : > { %4497 = vmatpush.msra.mxu1 %v9177_v45  ;;  %v3115_v57 = vadd.f32 %v9187_v3, %v3109_v0  ;;  %v6483_v0 = vld [vmem:[%s10106_s3 + $0x38] sm:$0xf] }
 0xd68   : > { %4411 = vmatpush.msrb.mxu2 %v9014_v23  ;;  %3651 = vmatpush.msrb.mxu3 %v6364_v21  ;;  %v9445_v21 = vld [vmem:[%s10104_s1 + $0x1e8] sm:$0xff] }
 0xd69   : > { %4498 = vmatpush.msra.mxu1 %v9185_v11  ;;  %3117 = vst.msk [vmem:[%s9197_s15] sm:$0xf] %vm3116_vm14, %v3115_v57  ;;  %v9453_v57 = vld [vmem:[%s10104_s1 + $0x1e0] sm:$0xff] }
 0xd6a   : > { %4412 = vmatpush.msrb.mxu2 %v9017_v4  ;;  %3652 = vmatpush.msrb.mxu3 %v6363_v54  ;;  %v9462_v54 = vld [vmem:[%s10104_s1 + $0x1d8] sm:$0xff] }
 0xd6b   : > { %4499 = vmatpush.msra.mxu1 %v9200_v62 }
 0xd6c   : > { %4413 = vmatpush.msrb.mxu2 %v9020_v8  ;;  %3790 = vmatpush.msra.mxu3 %v9216_v38  ;;  %v3245_v51 = vpop.f32.mrf.mxu2 }
 0xd6d   : > { %4500 = vmatpush.msra.mxu1 %v9208_v55  ;;  %v3248_v60 = vadd.f32 %v3245_v51, %v3182_v50  ;;  %v9470_v50 = vld [vmem:[%s10104_s1 + $0x1d0] sm:$0xff]  ;;  %v9488_v51 = vld [vmem:[%s10104_s1 + $0x1c0] sm:$0xff] }
 0xd6e   : > { %4414 = vmatpush.msrb.mxu2 %v9058_v53  ;;  %3791 = vmatpush.msra.mxu3 %v9239_v31 }
 0xd6f   : > { %4501 = vmatpush.msra.mxu1 %v9224_v35  ;;  %v3305_v1 = vadd.f32 %v8989_v34, %v3248_v60  ;;  %v9274_v34 = vld [vmem:[%s10104_s1 + $0xd0] sm:$0xff]  ;;  %v6406_v60 = vld [vmem:[%s10106_s3 + $0x28] sm:$0xf] }
 0xd70   : > { %4415 = vmatpush.msrb.mxu2 %v9067_v39  ;;  %6447 = vmatmul.msk.f32.vlgmr.msra.gmra.mxu1 %vm295_vm0, %v6446_v36 }
 0xd71   : > { %4617 = vmatpush.msrb.mxu1 %v9003_v30  ;;  %6435 = vmatmul.msk.f32.vlgmr.msrb.gmra.mxu2 %vm295_vm0, %v6434_v49  ;;  %v3306_v40 = vadd.f32 %v3305_v1, %v9187_v3  ;;  %v9478_v49 = vld [vmem:[%s10104_s1 + $0x1c8] sm:$0xff]  ;;  %v6457_v1 = vld [vmem:[%s10106_s3 + $0x38] sm:$0xf] }
 0xd72   : > { %4527 = vmatpush.msra.mxu2 %v9030_v48  ;;  %3792 = vmatpush.msra.mxu3 %v9248_v20 }
 0xd73   : > { %4618 = vmatpush.msrb.mxu1 %v9006_v17  ;;  %3308 = vrot.lane.b32.xlu1 %v3306_v40, %s6729_s7  ;;  %v3591_v40 = vpop.f32.mrf.mxu1 }
 0xd74   : > { %4528 = vmatpush.msra.mxu2 %v9034_v47  ;;  %3793 = vmatpush.msra.mxu3 %v9257_v25  ;;  %v3374_v26 = vpop.f32.mrf.mxu2 }
 0xd75   : > { %4619 = vmatpush.msrb.mxu1 %v9009_v27  ;;  %v3375_v46 = vadd.f32 %v3374_v26, %v8985_v24 }
 0xd76   : > { %4529 = vmatpush.msra.mxu2 %v9038_v44  ;;  %3794 = vmatpush.msra.mxu3 %v9266_v56 }
 0xd77   : > { %4620 = vmatpush.msrb.mxu1 %v9014_v23  ;;  %v3440_v2 = vadd.f32 %v8999_v13, %v3375_v46 }
 0xd78   : > { %4530 = vmatpush.msra.mxu2 %v9045_v15  ;;  %3795 = vmatpush.msra.mxu3 %v9274_v34 }
 0xd79   : > { %4621 = vmatpush.msrb.mxu1 %v9017_v4 }
 0xd7a   : > { %4531 = vmatpush.msra.mxu2 %v9049_v5  ;;  %3796 = vmatpush.msra.mxu3 %v9283_v19 }
 0xd7b   : > { %4622 = vmatpush.msrb.mxu1 %v9020_v8 }
 0xd7c   : > { %4532 = vmatpush.msra.mxu2 %v9054_v29  ;;  %3797 = vmatpush.msra.mxu3 %v9291_v59 }
 0xd7d   : > { %4623 = vmatpush.msrb.mxu1 %v9058_v53 }
 0xd7e   : > { %4533 = vmatpush.msra.mxu2 %v9060_v32 }
 0xd7f   : > { %4624 = vmatpush.msrb.mxu1 %v9067_v39 }
 0xd80   : > { %4534 = vmatpush.msra.mxu2 %v9069_v58  ;;  %6454 = vmatmul.msk.f32.vlgmr.msrb.gmra.mxu1 %vm295_vm0, %v6451_v6  ;;  %v6465_v6 = vld [vmem:[%s10106_s3 + $0x3c] sm:$0xf] }
 0xd81   : > { %4753 = vmatpush.msra.mxu1 %v9003_v30  ;;  %6449 = vmatmul.msk.f32.vlgmr.msra.gmra.mxu2 %vm295_vm0, %v6448_v22  ;;  %v3592_v22 = vadd.f32 %v3591_v40, %v9012_v7  ;;  %v6480_v7 = vld [vmem:[%s10106_s3 + $0x30] sm:$0xf]  ;;  %v6509_v40 = vld [vmem:[%s10106_s3 + $0x2c] sm:$0xf] }
 0xd82   : > { %4649 = vmatpush.msrb.mxu2 %v9030_v48 }
 0xd83   : > { %4754 = vmatpush.msra.mxu1 %v9006_v17 }
 0xd84   : > { %4650 = vmatpush.msrb.mxu2 %v9034_v47 }
 0xd85   : > { %4755 = vmatpush.msra.mxu1 %v9009_v27 }
 0xd86   : > { %4651 = vmatpush.msrb.mxu2 %v9038_v44 }
 0xd87   : > { %4756 = vmatpush.msra.mxu1 %v9014_v23 }
 0xd88   : > { %4652 = vmatpush.msrb.mxu2 %v9045_v15 }
 0xd89   : > { %4757 = vmatpush.msra.mxu1 %v9017_v4 }
 0xd8a   : > { %4653 = vmatpush.msrb.mxu2 %v9049_v5 }
 0xd8b   : > { %4758 = vmatpush.msra.mxu1 %v9020_v8 }
 0xd8c   : > { %4654 = vmatpush.msrb.mxu2 %v9054_v29  ;;  %v3493_v24 = vpop.f32.mrf.mxu2 }
 0xd8d   : > { %4759 = vmatpush.msra.mxu1 %v9058_v53  ;;  %v3496_v9 = vadd.f32 %v3493_v24, %v3440_v2  ;;  %v6495_v24 = vld [vmem:[%s10106_s3 + $0xc] sm:$0xf] }
 0xd8e   : > { %4655 = vmatpush.msrb.mxu2 %v9060_v32 }
 0xd8f   : > { %4760 = vmatpush.msra.mxu1 %v9067_v39  ;;  %v3497_v52 = vadd.f32 %v3496_v9, %v9187_v3  ;;  %v9619_v9 = vld [vmem:[#allocation2 + $0x40] sm:$0xff] }
 0xd90   : > { %6462 = vmatmul.msk.f32.vlgmr.msra.gmra.mxu1 %vm295_vm0, %v6459_v14  ;;  %4656 = vmatpush.msrb.mxu2 %v9069_v58 }
 0xd91   : > { %4893 = vmatpush.msrb.mxu1 %v9003_v30  ;;  %6456 = vmatmul.msk.f32.vlgmr.msrb.gmra.mxu2 %vm295_vm0, %v6455_v10  ;;  %3498 = vst.msk [vmem:[%s9197_s15 + $0x4] sm:$0xf] %vm3116_vm14, %v3497_v52  ;;  %v6477_v30 = vld [vmem:[%s10106_s3 + $0x18] sm:$0xf] }
 0xd92   : > { %4785 = vmatpush.msra.mxu2 %v9030_v48 }
 0xd93   : > { %4894 = vmatpush.msrb.mxu1 %v9006_v17  ;;  %v9360_v17 = vld [vmem:[%s10104_s1 + $0x178] sm:$0xff] }
 0xd94   : > { %4786 = vmatpush.msra.mxu2 %v9034_v47  ;;  %v3623_v13 = vpop.f32.mrf.mxu2 }
 0xd95   : > { %4895 = vmatpush.msrb.mxu1 %v9009_v27  ;;  %6371 = vmatmul.msk.f32.vlgmr.msrb.gmra.mxu3 %vm295_vm0, %v3623_v13  ;;  %v6463_v27 = vld [vmem:[%s10106_s3 + $0x34] sm:$0xf]  ;;  %v9623_v13 = vld [vmem:[#allocation2 + $0xf8] sm:$0xff] }
 0xd96   : > { %4787 = vmatpush.msra.mxu2 %v9038_v44  ;;  %3903 = vmatpush.msrb.mxu3 %v9216_v38 }
 0xd97   : > { %4896 = vmatpush.msrb.mxu1 %v9014_v23  ;;  %v9372_v23 = vld [vmem:[%s10104_s1 + $0x170] sm:$0xff] }
 0xd98   : > { %4788 = vmatpush.msra.mxu2 %v9045_v15  ;;  %3904 = vmatpush.msrb.mxu3 %v9239_v31 }
 0xd99   : > { %4897 = vmatpush.msrb.mxu1 %v9017_v4  ;;  %v9380_v4 = vld [vmem:[%s10104_s1 + $0x168] sm:$0xff] }
 0xd9a   : > { %4789 = vmatpush.msra.mxu2 %v9049_v5  ;;  %3905 = vmatpush.msrb.mxu3 %v9248_v20 }
 0xd9b   : > { %4898 = vmatpush.msrb.mxu1 %v9020_v8  ;;  %v9389_v8 = vld [vmem:[%s10104_s1 + $0x160] sm:$0xff] }
 0xd9c   : > { %4790 = vmatpush.msra.mxu2 %v9054_v29  ;;  %3906 = vmatpush.msrb.mxu3 %v9257_v25 }
 0xd9d   : > { %4899 = vmatpush.msrb.mxu1 %v9058_v53  ;;  %v9397_v53 = vld [vmem:[%s10104_s1 + $0x158] sm:$0xff]  ;;  %v3718_v46 = vpop.f32.mrf.mxu1 }
 0xd9e   : > { %4791 = vmatpush.msra.mxu2 %v9060_v32  ;;  %3907 = vmatpush.msrb.mxu3 %v9266_v56 }
 0xd9f   : > { %4900 = vmatpush.msrb.mxu1 %v9067_v39  ;;  %v9405_v39 = vld [vmem:[%s10104_s1 + $0x150] sm:$0xff] }
 0xda0   : > { %6478 = vmatmul.msk.f32.vlgmr.msrb.gmra.mxu1 %vm295_vm0, %v6477_v30  ;;  %4792 = vmatpush.msra.mxu2 %v9069_v58  ;;  %v9626_v30 = vld [vmem:[#allocation2 + $0xf0] sm:$0xff] }
 0xda1   : > { %5004 = vmatpush.msra.mxu1 %v9030_v48  ;;  %6464 = vmatmul.msk.f32.vlgmr.msra.gmra.mxu2 %vm295_vm0, %v6463_v27 }
 0xda2   : > { %4916 = vmatpush.msrb.mxu2 %v9360_v17  ;;  %3908 = vmatpush.msrb.mxu3 %v9274_v34 }
 0xda3   : > { %5005 = vmatpush.msra.mxu1 %v9034_v47 }
 0xda4   : > { %4917 = vmatpush.msrb.mxu2 %v9372_v23  ;;  %3909 = vmatpush.msrb.mxu3 %v9283_v19  ;;  %v3768_v37 = vpop.f32.mrf.mxu2 }
 0xda5   : > { %5006 = vmatpush.msra.mxu1 %v9038_v44  ;;  %6394 = vmatmul.msk.f32.vlgmr.msra.gmra.mxu3 %vm295_vm0, %v3768_v37  ;;  %v3855_v10 = vpop.f32.mrf.mxu1  ;;  %v9630_v37 = vld [vmem:[#allocation2 + $0xe8] sm:$0xff] }
 0xda6   : > { %4918 = vmatpush.msrb.mxu2 %v9380_v4  ;;  %3910 = vmatpush.msrb.mxu3 %v9291_v59 }
 0xda7   : > { %5007 = vmatpush.msra.mxu1 %v9045_v15 }
 0xda8   : > { %4919 = vmatpush.msrb.mxu2 %v9389_v8  ;;  %4038 = vmatpush.msra.mxu3 %v9156_v41 }
 0xda9   : > { %5008 = vmatpush.msra.mxu1 %v9049_v5 }
 0xdaa   : > { %4920 = vmatpush.msrb.mxu2 %v9397_v53  ;;  %4039 = vmatpush.msra.mxu3 %v9161_v18 }
 0xdab   : > { %5009 = vmatpush.msra.mxu1 %v9054_v29 }
 0xdac   : > { %4921 = vmatpush.msrb.mxu2 %v9405_v39  ;;  %4040 = vmatpush.msra.mxu3 %v9170_v12 }
 0xdad   : > { %5010 = vmatpush.msra.mxu1 %v9060_v32 }
 0xdae   : > { %4922 = vmatpush.msrb.mxu2 %v9414_v33  ;;  %4041 = vmatpush.msra.mxu3 %v9177_v45 }
 0xdaf   : > { %5011 = vmatpush.msra.mxu1 %v9069_v58 }
 0xdb0   : > { %4923 = vmatpush.msrb.mxu2 %v9427_v43  ;;  %6484 = vmatmul.msk.f32.vlgmr.msra.gmra.mxu1 %vm295_vm0, %v6483_v0  ;;  %v3980_v0 = vpop.f32.mrf.mxu1 }
 0xdb1   : > { %5137 = vmatpush.msrb.mxu1 %v9421_v16  ;;  %4042 = vmatpush.msra.mxu3 %v9185_v11 }
 0xdb2   : > { %5043 = vmatpush.msra.mxu2 %v9156_v41 }
 0xdb3   : > { %5138 = vmatpush.msrb.mxu1 %v9434_v61  ;;  %4043 = vmatpush.msra.mxu3 %v9200_v62 }
 0xdb4   : > { %5044 = vmatpush.msra.mxu2 %v9161_v18  ;;  %v3889_v36 = vpop.f32.mrf.mxu2 }
 0xdb5   : > { %5139 = vmatpush.msrb.mxu1 %v9445_v21  ;;  %4044 = vmatpush.msra.mxu3 %v9208_v55 }
 0xdb6   : > { %5045 = vmatpush.msra.mxu2 %v9170_v12  ;;  %6400 = vmatmul.msk.f32.vlgmr.msrb.gmra.mxu3 %vm295_vm0, %v3889_v36  ;;  %v9633_v36 = vld [vmem:[#allocation2 + $0xe0] sm:$0xff] }
 0xdb7   : > { %5140 = vmatpush.msrb.mxu1 %v9453_v57  ;;  %4045 = vmatpush.msra.mxu3 %v9224_v35 }
 0xdb8   : > { %5046 = vmatpush.msra.mxu2 %v9177_v45 }
 0xdb9   : > { %5141 = vmatpush.msrb.mxu1 %v9462_v54  ;;  %4174 = vmatpush.msrb.mxu3 %v9156_v41 }
 0xdba   : > { %5047 = vmatpush.msra.mxu2 %v9185_v11 }
 0xdbb   : > { %5142 = vmatpush.msrb.mxu1 %v9470_v50  ;;  %4175 = vmatpush.msrb.mxu3 %v9161_v18 }
 0xdbc   : > { %5048 = vmatpush.msra.mxu2 %v9200_v62 }
 0xdbd   : > { %5143 = vmatpush.msrb.mxu1 %v9478_v49  ;;  %4176 = vmatpush.msrb.mxu3 %v9170_v12 }
 0xdbe   : > { %5049 = vmatpush.msra.mxu2 %v9208_v55  ;;  %6407 = vmatmul.msk.f32.vlgmr.msra.gmra.mxu3 %vm295_vm0, %v6406_v60 }
 0xdbf   : > { %5144 = vmatpush.msrb.mxu1 %v9488_v51  ;;  %4177 = vmatpush.msrb.mxu3 %v9177_v45 }
 0xdc0   : > { %5050 = vmatpush.msra.mxu2 %v9224_v35 }
 0xdc1   : > { %5268 = vmatpush.msra.mxu1 %v9030_v48  ;;  %4178 = vmatpush.msrb.mxu3 %v9185_v11  ;;  %v6414_v48 = vld [vmem:[%s10106_s3 + $0x2c] sm:$0xf] }
 0xdc3   : > { %5269 = vmatpush.msra.mxu1 %v9034_v47  ;;  %4179 = vmatpush.msrb.mxu3 %v9200_v62  ;;  %v6428_v47 = vld [vmem:[%s10106_s3 + $0x20] sm:$0xf] }
 0xdc5   : > { %5270 = vmatpush.msra.mxu1 %v9038_v44  ;;  %4180 = vmatpush.msrb.mxu3 %v9208_v55  ;;  %v9528_v44 = vpop.f32.mrf.mxu2 }
 0xdc7   : > { %5271 = vmatpush.msra.mxu1 %v9045_v15  ;;  %4181 = vmatpush.msrb.mxu3 %v9224_v35 }
 0xdc8   : > { %6415 = vmatmul.msk.f32.vlgmr.msrb.gmra.mxu3 %vm295_vm0, %v6414_v48  ;;  %v9636_v48 = vld [vmem:[#allocation2 + $0xd8] sm:$0xff] }
 0xdc9   : > { %5272 = vmatpush.msra.mxu1 %v9049_v5  ;;  %4304 = vmatpush.msra.mxu3 %v9156_v41 }
 0xdcb   : > { %5273 = vmatpush.msra.mxu1 %v9054_v29  ;;  %4305 = vmatpush.msra.mxu3 %v9161_v18 }
 0xdcd   : > { %5274 = vmatpush.msra.mxu1 %v9060_v32  ;;  %4306 = vmatpush.msra.mxu3 %v9170_v12 }
 0xdcf   : > { %5275 = vmatpush.msra.mxu1 %v9069_v58  ;;  %4307 = vmatpush.msra.mxu3 %v9177_v45 }
 0xdd1   : > { %4308 = vmatpush.msra.mxu3 %v9185_v11 }
 0xdd3   : > { %4309 = vmatpush.msra.mxu3 %v9200_v62 }
 0xdd4   : > { %v9536_v15 = vpop.f32.mrf.mxu2 }
 0xdd5   : > { %4310 = vmatpush.msra.mxu3 %v9208_v55 }
 0xdd7   : > { %4311 = vmatpush.msra.mxu3 %v9224_v35 }
 0xdd8   : > { %6429 = vmatmul.msk.f32.vlgmr.msra.gmra.mxu3 %vm295_vm0, %v6428_v47 }
 0xdd9   : > { %4439 = vmatpush.msrb.mxu3 %v9216_v38 }
 0xddb   : > { %4440 = vmatpush.msrb.mxu3 %v9239_v31 }
 0xddd   : > { %4441 = vmatpush.msrb.mxu3 %v9248_v20 }
 0xddf   : > { %4442 = vmatpush.msrb.mxu3 %v9257_v25 }
 0xde1   : > { %4443 = vmatpush.msrb.mxu3 %v9266_v56 }
 0xde3   : > { %4444 = vmatpush.msrb.mxu3 %v9274_v34 }
 0xde4   : > { %v9543_v5 = vpop.f32.mrf.mxu2 }
 0xde5   : > { %4445 = vmatpush.msrb.mxu3 %v9283_v19  ;;  %v3309_v29 = vpop.permute.xlu1 %3308 }
 0xde6   : > { %3312 = vst.msk [vmem:[%s9197_s15] sm:$0xf] %vm3311_vm15, %v3309_v29 }
 0xde7   : > { %4446 = vmatpush.msrb.mxu3 %v9291_v59 }
 0xde9   : > { %4550 = vmatpush.msra.mxu3 %v9216_v38 }
 0xdeb   : > { %4551 = vmatpush.msra.mxu3 %v9239_v31 }
 0xded   : > { %4552 = vmatpush.msra.mxu3 %v9248_v20 }
 0xdef   : > { %4553 = vmatpush.msra.mxu3 %v9257_v25 }
 0xdf1   : > { %4554 = vmatpush.msra.mxu3 %v9266_v56 }
 0xdf3   : > { %4555 = vmatpush.msra.mxu3 %v9274_v34 }
 0xdf4   : > { %v4417_v32 = vpop.f32.mrf.mxu2 }
 0xdf5   : > { %4556 = vmatpush.msra.mxu3 %v9283_v19 }
 0xdf6   : > { %6444 = vmatmul.msk.f32.vlgmr.msrb.gmra.mxu3 %vm295_vm0, %v4417_v32  ;;  %v9640_v32 = vld [vmem:[#allocation2 + $0xd0] sm:$0xff] }
 0xdf7   : > { %4557 = vmatpush.msra.mxu3 %v9291_v59 }
 0xdf9   : > { %4682 = vmatpush.msrb.mxu3 %v9156_v41 }
 0xdfb   : > { %4683 = vmatpush.msrb.mxu3 %v9161_v18 }
 0xdfd   : > { %4684 = vmatpush.msrb.mxu3 %v9170_v12 }
 0xdff   : > { %4685 = vmatpush.msrb.mxu3 %v9177_v45 }
 0xe01   : > { %4686 = vmatpush.msrb.mxu3 %v9185_v11 }
 0xe03   : > { %4687 = vmatpush.msrb.mxu3 %v9200_v62 }
 0xe04   : > { %v4536_v58 = vpop.f32.mrf.mxu2 }
 0xe05   : > { %4688 = vmatpush.msrb.mxu3 %v9208_v55 }
 0xe06   : > { %6450 = vmatmul.msk.f32.vlgmr.msra.gmra.mxu3 %vm295_vm0, %v4536_v58 }
 0xe07   : > { %4689 = vmatpush.msrb.mxu3 %v9224_v35 }
 0xe09   : > { %4818 = vmatpush.msra.mxu3 %v9156_v41 }
 0xe0b   : > { %4819 = vmatpush.msra.mxu3 %v9161_v18 }
 0xe0d   : > { %4820 = vmatpush.msra.mxu3 %v9170_v12 }
 0xe0e   : > { %6458 = vmatmul.msk.f32.vlgmr.msrb.gmra.mxu3 %vm295_vm0, %v6457_v1  ;;  %v9644_v1 = vld [vmem:[#allocation2 + $0xc8] sm:$0xff] }
 0xe0f   : > { %4821 = vmatpush.msra.mxu3 %v9177_v45 }
 0xe11   : > { %4822 = vmatpush.msra.mxu3 %v9185_v11 }
 0xe13   : > { %4823 = vmatpush.msra.mxu3 %v9200_v62 }
 0xe15   : > { %4824 = vmatpush.msra.mxu3 %v9208_v55 }
 0xe17   : > { %4825 = vmatpush.msra.mxu3 %v9224_v35 }
 0xe18   : > { %6466 = vmatmul.msk.f32.vlgmr.msra.gmra.mxu3 %vm295_vm0, %v6465_v6  ;;  %v3654_v26 = vpop.f32.mrf.mxu3 }
 0xe19   : > { %4948 = vmatpush.msrb.mxu3 %v9156_v41  ;;  %v3657_v14 = vadd.f32 %v3654_v26, %v3592_v22  ;;  %v9653_v22 = vld [vmem:[#allocation2 + $0xc0] sm:$0xff] }
 0xe1b   : > { %4949 = vmatpush.msrb.mxu3 %v9161_v18  ;;  %v3721_v2 = vadd.f32 %v3718_v46, %v3657_v14  ;;  %v9595_v18 = vld [vmem:[#allocation2 + $0x78] sm:$0xff] }
 0xe1d   : > { %4950 = vmatpush.msrb.mxu3 %v9170_v12  ;;  %v3722_v41 = vadd.f32 %v3721_v2, %v9187_v3  ;;  %v9598_v12 = vld [vmem:[#allocation2 + $0x70] sm:$0xff] }
 0xe1f   : > { %4951 = vmatpush.msrb.mxu3 %v9177_v45  ;;  %3724 = vrot.lane.b32.xlu0 %v3722_v41, %s6729_s7  ;;  %v9601_v45 = vld [vmem:[#allocation2 + $0x68] sm:$0xff] }
 0xe21   : > { %4952 = vmatpush.msrb.mxu3 %v9185_v11  ;;  %v9604_v11 = vld [vmem:[#allocation2 + $0x60] sm:$0xff] }
 0xe23   : > { %4953 = vmatpush.msrb.mxu3 %v9200_v62  ;;  %v9607_v62 = vld [vmem:[#allocation2 + $0x58] sm:$0xff] }
 0xe25   : > { %4954 = vmatpush.msrb.mxu3 %v9208_v55  ;;  %v9610_v55 = vld [vmem:[#allocation2 + $0x50] sm:$0xff] }
 0xe27   : > { %4955 = vmatpush.msrb.mxu3 %v9224_v35  ;;  %v9613_v35 = vld [vmem:[#allocation2 + $0x48] sm:$0xff] }
 0xe28   : > { %6481 = vmatmul.msk.f32.vlgmr.msrb.gmra.mxu3 %vm295_vm0, %v6480_v7  ;;  %v3799_v52 = vpop.f32.mrf.mxu3 }
 0xe29   : > { %5083 = vmatpush.msra.mxu3 %v9595_v18  ;;  %v3823_v27 = vadd.f32 %v9096_v63, %v3799_v52  ;;  %v3981_v63 = vadd.f32 %v3980_v0, %v9114_v42  ;;  %v4118_v42 = vpop.f32.mrf.mxu1  ;;  %v9686_v52 = vld [vmem:[#allocation2 + $0xa8] sm:$0xff]  ;;  %v9693_v0 = vld [vmem:[#allocation2 + $0xa0] sm:$0xff] }
 0xe2a   : > { %v4119_v14 = vadd.f32 %v4118_v42, %v9135_v28  ;;  %v6467_v42 = vld [vmem:[%s10106_s3 + $0x10] sm:$0xf] }
 0xe2b   : > { %5084 = vmatpush.msra.mxu3 %v9598_v12  ;;  %v3858_v60 = vadd.f32 %v3855_v10, %v3823_v27  ;;  %v4016_v6 = vadd.f32 %v9528_v44, %v3981_v63  ;;  %v9682_v10 = vld [vmem:[#allocation2 + $0xb0] sm:$0xff]  ;;  %v9706_v63 = vld [vmem:[#allocation2 + $0x80] sm:$0xff] }
 0xe2c   : > { %v4153_v44 = vadd.f32 %v9536_v15, %v4119_v14  ;;  %v6433_v27 = vld [vmem:[%s10106_s3 + $0x14] sm:$0xf] }
 0xe2d   : > { %5085 = vmatpush.msra.mxu3 %v9601_v45 }
 0xe2f   : > { %5086 = vmatpush.msra.mxu3 %v9604_v11 }
 0xe31   : > { %5087 = vmatpush.msra.mxu3 %v9607_v62 }
 0xe33   : > { %5088 = vmatpush.msra.mxu3 %v9610_v55 }
 0xe35   : > { %5089 = vmatpush.msra.mxu3 %v9613_v35 }
 0xe37   : > { %5090 = vmatpush.msra.mxu3 %v9619_v9 }
 0xe38   : > { %6496 = vmatmul.msk.f32.vlgmr.msra.gmra.mxu3 %vm295_vm0, %v6495_v24  ;;  %v9678_v24 = vld [vmem:[#allocation2 + $0xb8] sm:$0xff] }
 0xe39   : > { %5202 = vmatpush.msrb.mxu3 %v9623_v13  ;;  %v3912_v47 = vpop.f32.mrf.mxu3 }
 0xe3a   : > { %v3915_v29 = vadd.f32 %v3912_v47, %v3858_v60  ;;  %v9696_v60 = vld [vmem:[#allocation2 + $0x98] sm:$0xff]  ;;  %v9700_v47 = vld [vmem:[#allocation2 + $0x90] sm:$0xff] }
 0xe3b   : > { %5203 = vmatpush.msrb.mxu3 %v9626_v30 }
 0xe3c   : > { %v3916_v58 = vadd.f32 %v3915_v29, %v9187_v3  ;;  %v9703_v29 = vld [vmem:[#allocation2 + $0x88] sm:$0xff] }
 0xe3d   : > { %5204 = vmatpush.msrb.mxu3 %v9630_v37 }
 0xe3e   : > { %3917 = vst.msk [vmem:[%s9197_s15 + $0x8] sm:$0xf] %vm3116_vm14, %v3916_v58  ;;  %v6452_v58 = vld [vmem:[%s10106_s3 + $0x18] sm:$0xf] }
 0xe3f   : > { %5205 = vmatpush.msrb.mxu3 %v9633_v36 }
 0xe41   : > { %5206 = vmatpush.msrb.mxu3 %v9636_v48  ;;  %v4047_v26 = vpop.f32.mrf.mxu3 }
 0xe42   : > { %v4050_v46 = vadd.f32 %v4047_v26, %v4016_v6 }
 0xe43   : > { %5207 = vmatpush.msrb.mxu3 %v9640_v32 }
 0xe44   : > { %v4051_v2 = vadd.f32 %v4050_v46, %v9187_v3 }
 0xe45   : > { %5208 = vmatpush.msrb.mxu3 %v9644_v1 }
 0xe46   : > { %4053 = vrot.lane.b32.xlu2 %v4051_v2, %s6729_s7 }
 0xe47   : > { %5209 = vmatpush.msrb.mxu3 %v9653_v22 }
 0xe48   : > { %6510 = vmatmul.msk.f32.vlgmr.msrb.gmra.mxu3 %vm295_vm0, %v6509_v40  ;;  %v6460_v40 = vld [vmem:[%s10106_s3 + $0x1c] sm:$0xf] }
 0xe49   : > { %5331 = vmatpush.msra.mxu3 %v9421_v16 }
 0xe4b   : > { %5332 = vmatpush.msra.mxu3 %v9434_v61  ;;  %v4183_v41 = vpop.f32.mrf.mxu3 }
 0xe4c   : > { %v4186_v7 = vadd.f32 %v4183_v41, %v4153_v44  ;;  %v6497_v44 = vld [vmem:[%s10104_s1 + $0x180] sm:$0xff] }
 0xe4d   : > { %5333 = vmatpush.msra.mxu3 %v9445_v21 }
 0xe4e   : > { %v4187_v28 = vadd.f32 %v4186_v7, %v9187_v3 }
 0xe4f   : > { %5334 = vmatpush.msra.mxu3 %v9453_v57 }
 0xe50   : > { %4188 = vst.msk [vmem:[%s9197_s15 + $0xc] sm:$0xf] %vm3116_vm14, %v4187_v28 }
 0xe51   : > { %5335 = vmatpush.msra.mxu3 %v9462_v54 }
 0xe53   : > { %5336 = vmatpush.msra.mxu3 %v9470_v50 }
 0xe55   : > { %5337 = vmatpush.msra.mxu3 %v9478_v49 }
 0xe57   : > { %5338 = vmatpush.msra.mxu3 %v9488_v51 }
 0xe59   : > { %5458 = vmatpush.msrb.mxu3 %v9595_v18 }
 0xe5b   : > { %5459 = vmatpush.msrb.mxu3 %v9598_v12  ;;  %v4313_v15 = vpop.f32.mrf.mxu3 }
 0xe5c   : > { %6430 = vmatmul.msk.f32.vlgmr.msrb.gmra.mxu0 %vm295_vm0, %v4313_v15  ;;  %v9822_v15 = vld [vmem:[#allocation2] sm:$0xff] }
 0xe5d   : > { %5460 = vmatpush.msrb.mxu3 %v9601_v45  ;;  %4594 = vmatpush.msrb.mxu0 %v9678_v24 }
 0xe5f   : > { %5461 = vmatpush.msrb.mxu3 %v9604_v11  ;;  %4595 = vmatpush.msrb.mxu0 %v9682_v10 }
 0xe61   : > { %5462 = vmatpush.msrb.mxu3 %v9607_v62  ;;  %4596 = vmatpush.msrb.mxu0 %v9686_v52 }
 0xe63   : > { %5463 = vmatpush.msrb.mxu3 %v9610_v55  ;;  %4597 = vmatpush.msrb.mxu0 %v9693_v0 }
 0xe64   : > { %6445 = vmatmul.msk.f32.vlgmr.msra.gmra.mxu0 %vm295_vm0, %v6433_v27 }
 0xe65   : > { %5464 = vmatpush.msrb.mxu3 %v9613_v35  ;;  %4598 = vmatpush.msrb.mxu0 %v9696_v60 }
 0xe67   : > { %5465 = vmatpush.msrb.mxu3 %v9619_v9  ;;  %4599 = vmatpush.msrb.mxu0 %v9700_v47 }
 0xe69   : > { %4600 = vmatpush.msrb.mxu0 %v9703_v29 }
 0xe6b   : > { %4601 = vmatpush.msrb.mxu0 %v9706_v63 }
 0xe6c   : > { %6453 = vmatmul.msk.f32.vlgmr.msrb.gmra.mxu0 %vm295_vm0, %v6452_v58 }
 0xe6d   : > { %4730 = vmatpush.msra.mxu0 %v9678_v24 }
 0xe6f   : > { %4731 = vmatpush.msra.mxu0 %v9682_v10 }
 0xe71   : > { %4732 = vmatpush.msra.mxu0 %v9686_v52 }
 0xe73   : > { %4733 = vmatpush.msra.mxu0 %v9693_v0 }
 0xe75   : > { %4734 = vmatpush.msra.mxu0 %v9696_v60 }
 0xe77   : > { %4735 = vmatpush.msra.mxu0 %v9700_v47 }
 0xe79   : > { %4736 = vmatpush.msra.mxu0 %v9703_v29  ;;  %v9728_v6 = vpop.f32.mrf.mxu3 }
 0xe7b   : > { %4737 = vmatpush.msra.mxu0 %v9706_v63 }
 0xe7c   : > { %6461 = vmatmul.msk.f32.vlgmr.msra.gmra.mxu0 %vm295_vm0, %v6460_v40 }
 0xe7d   : > { %4853 = vmatpush.msrb.mxu0 %v9678_v24 }
 0xe7f   : > { %4854 = vmatpush.msrb.mxu0 %v9682_v10 }
 0xe81   : > { %4855 = vmatpush.msrb.mxu0 %v9686_v52 }
 0xe83   : > { %4856 = vmatpush.msrb.mxu0 %v9693_v0 }
 0xe85   : > { %4857 = vmatpush.msrb.mxu0 %v9696_v60 }
 0xe87   : > { %4858 = vmatpush.msrb.mxu0 %v9700_v47 }
 0xe89   : > { %4859 = vmatpush.msrb.mxu0 %v9703_v29  ;;  %v9738_v26 = vpop.f32.mrf.mxu3 }
 0xe8b   : > { %4860 = vmatpush.msrb.mxu0 %v9706_v63 }
 0xe8c   : > { %6468 = vmatmul.msk.f32.vlgmr.msrb.gmra.mxu0 %vm295_vm0, %v6467_v42 }
 0xe8d   : > { %4971 = vmatpush.msra.mxu0 %v9360_v17  ;;  %v6504_v17 = vld [vmem:[%s10104_s1 + $0x1b8] sm:$0xff] }
 0xe8f   : > { %4972 = vmatpush.msra.mxu0 %v9372_v23  ;;  %v6503_v23 = vld [vmem:[%s10104_s1 + $0x1b0] sm:$0xff] }
 0xe91   : > { %4973 = vmatpush.msra.mxu0 %v9380_v4  ;;  %v9746_v46 = vpop.f32.mrf.mxu3  ;;  %v3725_v14 = vpop.permute.xlu0 %3724  ;;  %v6502_v4 = vld [vmem:[%s10104_s1 + $0x1a8] sm:$0xff] }
 0xe92   : > { %3727 = vst.msk [vmem:[%s9197_s15 + $0x4] sm:$0xf] %vm3311_vm15, %v3725_v14 }
 0xe93   : > { %4974 = vmatpush.msra.mxu0 %v9389_v8 }
 0xe95   : > { %4975 = vmatpush.msra.mxu0 %v9397_v53  ;;  %v6501_v53 = vld [vmem:[%s10104_s1 + $0x1a0] sm:$0xff] }
 0xe97   : > { %4976 = vmatpush.msra.mxu0 %v9405_v39  ;;  %v6500_v39 = vld [vmem:[%s10104_s1 + $0x198] sm:$0xff] }
 0xe99   : > { %4977 = vmatpush.msra.mxu0 %v9414_v33  ;;  %v6499_v33 = vld [vmem:[%s10104_s1 + $0x190] sm:$0xff] }
 0xe9b   : > { %4978 = vmatpush.msra.mxu0 %v9427_v43  ;;  %v9762_v8 = vpop.f32.mrf.mxu3  ;;  %v6498_v43 = vld [vmem:[%s10104_s1 + $0x188] sm:$0xff] }
 0xe9d   : > { %5114 = vmatpush.msrb.mxu0 %v6504_v17 }
 0xe9f   : > { %5115 = vmatpush.msrb.mxu0 %v6503_v23 }
 0xea0   : > { %v4054_v2 = vpop.permute.xlu2 %4053 }
 0xea1   : > { %5116 = vmatpush.msrb.mxu0 %v6502_v4  ;;  %4056 = vst.msk [vmem:[%s9197_s15 + $0x8] sm:$0xf] %vm3311_vm15, %v4054_v2  ;;  %v4658_v2 = vpop.f32.mrf.mxu2 }
 0xea3   : > { %5117 = vmatpush.msrb.mxu0 %v6501_v53 }
 0xea5   : > { %5118 = vmatpush.msrb.mxu0 %v6500_v39 }
 0xea7   : > { %5119 = vmatpush.msrb.mxu0 %v6499_v33 }
 0xea9   : > { %5120 = vmatpush.msrb.mxu0 %v6498_v43 }
 0xeab   : > { %v4957_v41 = vpop.f32.mrf.mxu3  ;;  %5121 = vmatpush.msrb.mxu0 %v6497_v44 }
 0xeac   : > { %6482 = vmatmul.msk.f32.vlgmr.msra.gmra.mxu0 %vm295_vm0, %v4957_v41 }
 0xead   : > { %5233 = vmatpush.msra.mxu0 %v9216_v38 }
 0xeaf   : > { %5234 = vmatpush.msra.mxu0 %v9239_v31  ;;  %v9800_v31 = vld [vmem:[#allocation2 + $0x38] sm:$0xff] }
 0xeb1   : > { %5235 = vmatpush.msra.mxu0 %v9248_v20  ;;  %v9803_v20 = vld [vmem:[#allocation2 + $0x30] sm:$0xff] }
 0xeb3   : > { %5236 = vmatpush.msra.mxu0 %v9257_v25  ;;  %v9806_v25 = vld [vmem:[#allocation2 + $0x28] sm:$0xff] }
 0xeb5   : > { %5237 = vmatpush.msra.mxu0 %v9266_v56  ;;  %v4258_v56 = vpop.f32.mrf.mxu1 }
 0xeb6   : > { %v4282_v28 = vadd.f32 %v9543_v5, %v4258_v56 }
 0xeb7   : > { %5238 = vmatpush.msra.mxu0 %v9274_v34  ;;  %v9809_v34 = vld [vmem:[#allocation2 + $0x20] sm:$0xff] }
 0xeb9   : > { %5239 = vmatpush.msra.mxu0 %v9283_v19  ;;  %v9812_v19 = vld [vmem:[#allocation2 + $0x18] sm:$0xff] }
 0xebb   : > { %v5092_v7 = vpop.f32.mrf.mxu3  ;;  %5240 = vmatpush.msra.mxu0 %v9291_v59  ;;  %v9815_v59 = vld [vmem:[#allocation2 + $0x10] sm:$0xff] }
 0xebc   : > { %6505 = vmatmul.msk.f32.vlgmr.msrb.gmra.mxu0 %vm295_vm0, %v5092_v7 }
 0xebd   : > { %5354 = vmatpush.msrb.mxu0 %v9421_v16  ;;  %v9818_v16 = vld [vmem:[#allocation2 + $0x8] sm:$0xff]  ;;  %v4369_v27 = vpop.f32.mrf.mxu1 }
 0xebf   : > { %5355 = vmatpush.msrb.mxu0 %v9434_v61 }
 0xec1   : > { %5356 = vmatpush.msrb.mxu0 %v9445_v21 }
 0xec3   : > { %5357 = vmatpush.msrb.mxu0 %v9453_v57 }
 0xec5   : > { %5358 = vmatpush.msrb.mxu0 %v9462_v54  ;;  %v4503_v17 = vpop.f32.mrf.mxu1 }
 0xec7   : > { %5359 = vmatpush.msrb.mxu0 %v9470_v50 }
 0xec9   : > { %5360 = vmatpush.msrb.mxu0 %v9478_v49 }
 0xecb   : > { %v5211_v38 = vpop.f32.mrf.mxu3  ;;  %5361 = vmatpush.msrb.mxu0 %v9488_v51 }
 0xecc   : > { %6519 = vmatmul.msk.f32.vlgmr.msra.gmra.mxu0 %vm295_vm0, %v5211_v38 }
 0xecd   : > { %5498 = vmatpush.msra.mxu0 %v9800_v31  ;;  %v4626_v33 = vpop.f32.mrf.mxu1 }
 0xecf   : > { %5499 = vmatpush.msra.mxu0 %v9803_v20 }
 0xed1   : > { %5500 = vmatpush.msra.mxu0 %v9806_v25 }
 0xed3   : > { %5501 = vmatpush.msra.mxu0 %v9809_v34 }
 0xed5   : > { %5502 = vmatpush.msra.mxu0 %v9812_v19 }
 0xed7   : > { %5503 = vmatpush.msra.mxu0 %v9815_v59 }
 0xed9   : > { %5504 = vmatpush.msra.mxu0 %v9818_v16  ;;  %v4336_v58 = vpop.f32.mrf.mxu0 }
 0xeda   : > { %v4339_v40 = vadd.f32 %v4336_v58, %v4282_v28  ;;  %v4794_v28 = vpop.f32.mrf.mxu2 }
 0xedb   : > { %5505 = vmatpush.msra.mxu0 %v9822_v15 }
 0xedc   : > { %v4372_v42 = vadd.f32 %v4369_v27, %v4339_v40 }
 0xede   : > { %v4373_v14 = vadd.f32 %v4372_v42, %v9187_v3 }
 0xee0   : > { %4375 = vrot.lane.b32.xlu1 %v4373_v14, %s6729_s7  ;;  %v6529_v14 = vld [vmem:[%s10106_s3 + $0x8] sm:$0xf] }
 0xee1   : > { %v4471_v23 = vpop.f32.mrf.mxu0 }
 0xee2   : > { %v4472_v4 = vadd.f32 %v4471_v23, %v9728_v6  ;;  %v4762_v6 = vpop.f32.mrf.mxu1  ;;  %v6535_v23 = vld [vmem:[%s10106_s3 + $0x28] sm:$0xf] }
 0xee4   : > { %v4506_v53 = vadd.f32 %v4503_v17, %v4472_v4  ;;  %v9878_v17 = vld [vmem:[%s10104_s1 + $0x1f8] sm:$0xff] }
 0xee6   : > { %v4562_v5 = vadd.f32 %v9738_v26, %v4506_v53 }
 0xee8   : > { %v4563_v39 = vadd.f32 %v4562_v5, %v9187_v3 }
 0xee9   : > { %v4603_v43 = vpop.f32.mrf.mxu0 }
 0xeea   : > { %4564 = vst.msk [vmem:[%s9197_s15 + $0x10] sm:$0xf] %vm3116_vm14, %v4563_v39  ;;  %v4627_v44 = vadd.f32 %v4626_v33, %v4603_v43  ;;  %v6533_v43 = vld [vmem:[%s10106_s3 + $0x20] sm:$0xf] }
 0xeec   : > { %v4661_v41 = vadd.f32 %v4658_v2, %v4627_v44 }
 0xeee   : > { %v4694_v7 = vadd.f32 %v9746_v46, %v4661_v41  ;;  %v6485_v46 = vld [vmem:[%s10106_s3 + $0x4] sm:$0xf] }
 0xef0   : > { %v4695_v38 = vadd.f32 %v4694_v7, %v9187_v3 }
 0xef2   : > { %4697 = vrot.lane.b32.xlu0 %v4695_v38, %s6729_s7 }
 0xef9   : > { %v4739_v56 = vpop.f32.mrf.mxu0 }
 0xefa   : > { %v4763_v26 = vadd.f32 %v4762_v6, %v4739_v56 }
 0xefc   : > { %v4797_v27 = vadd.f32 %v4794_v28, %v4763_v26 }
 0xefe   : > { %v4830_v58 = vadd.f32 %v9762_v8, %v4797_v27  ;;  %v6507_v8 = vld [vmem:[%s10106_s3 + $0x24] sm:$0xf]  ;;  %v5624_v27 = vld [vmem:[%s10106_s3] sm:$0xf] }
 0xf00   : > { %v4831_v40 = vadd.f32 %v4830_v58, %v9187_v3  ;;  %v6559_v58 = vld [vmem:[%s10104_s1 + $0x218] sm:$0xff] }
 0xf02   : > { %4832 = vst.msk [vmem:[%s9197_s15 + $0x14] sm:$0xf] %vm3116_vm14, %v4831_v40  ;;  %v6583_v40 = vld [vmem:[%s10104_s1 + $0x168] sm:$0xff] }
 0xf09   : > { %v4862_v42 = vpop.f32.mrf.mxu0 }
 0xf0a   : > { %6479 = vmatmul.msk.f32.vlgmr.msrb.gmra.mxu2 %vm295_vm0, %v4862_v42 }
 0xf0b   : > { %5169 = vmatpush.msrb.mxu2 %v9678_v24 }
 0xf0d   : > { %5170 = vmatpush.msrb.mxu2 %v9682_v10 }
 0xf0f   : > { %5171 = vmatpush.msrb.mxu2 %v9686_v52 }
 0xf11   : > { %5172 = vmatpush.msrb.mxu2 %v9693_v0 }
 0xf12   : > { %6486 = vmatmul.msk.f32.vlgmr.msra.gmra.mxu2 %vm295_vm0, %v6485_v46  ;;  %v6558_v46 = vld [vmem:[%s10104_s1 + $0x210] sm:$0xff] }
 0xf13   : > { %5173 = vmatpush.msrb.mxu2 %v9696_v60 }
 0xf15   : > { %5174 = vmatpush.msrb.mxu2 %v9700_v47 }
 0xf17   : > { %5175 = vmatpush.msrb.mxu2 %v9703_v29 }
 0xf19   : > { %5176 = vmatpush.msrb.mxu2 %v9706_v63 }
 0xf1a   : > { %6508 = vmatmul.msk.f32.vlgmr.msrb.gmra.mxu2 %vm295_vm0, %v6507_v8  ;;  %v6582_v8 = vld [vmem:[%s10104_s1 + $0x160] sm:$0xff] }
 0xf1b   : > { %5308 = vmatpush.msra.mxu2 %v9800_v31 }
 0xf1d   : > { %5309 = vmatpush.msra.mxu2 %v9803_v20 }
 0xf1f   : > { %5310 = vmatpush.msra.mxu2 %v9806_v25 }
 0xf21   : > { %5311 = vmatpush.msra.mxu2 %v9809_v34 }
 0xf23   : > { %5312 = vmatpush.msra.mxu2 %v9812_v19 }
 0xf25   : > { %5313 = vmatpush.msra.mxu2 %v9815_v59 }
 0xf27   : > { %5314 = vmatpush.msra.mxu2 %v9818_v16 }
 0xf29   : > { %5315 = vmatpush.msra.mxu2 %v9822_v15  ;;  %v4980_v5 = vpop.f32.mrf.mxu0 }
 0xf2a   : > { %6530 = vmatmul.msk.f32.vlgmr.msra.gmra.mxu2 %vm295_vm0, %v6529_v14  ;;  %v6557_v14 = vld [vmem:[%s10104_s1 + $0x208] sm:$0xff] }
 0xf2b   : > { %5419 = vmatpush.msrb.mxu2 %v9678_v24 }
 0xf2d   : > { %5420 = vmatpush.msrb.mxu2 %v9682_v10 }
 0xf2f   : > { %5421 = vmatpush.msrb.mxu2 %v9686_v52 }
 0xf31   : > { %5422 = vmatpush.msrb.mxu2 %v9693_v0 }
 0xf33   : > { %5423 = vmatpush.msrb.mxu2 %v9696_v60 }
 0xf35   : > { %5424 = vmatpush.msrb.mxu2 %v9700_v47 }
 0xf37   : > { %5425 = vmatpush.msrb.mxu2 %v9703_v29 }
 0xf39   : > { %5426 = vmatpush.msrb.mxu2 %v9706_v63 }
 0xf3a   : > { %6536 = vmatmul.msk.f32.vlgmr.msrb.gmra.mxu2 %vm295_vm0, %v6535_v23  ;;  %v6556_v23 = vld [vmem:[%s10104_s1 + $0x200] sm:$0xff] }
 0xf3b   : > { %5544 = vmatpush.msra.mxu2 %v9878_v17 }
 0xf3d   : > { %5545 = vmatpush.msra.mxu2 %v9434_v61 }
 0xf3f   : > { %5546 = vmatpush.msra.mxu2 %v9445_v21 }
 0xf41   : > { %5547 = vmatpush.msra.mxu2 %v9453_v57 }
 0xf43   : > { %5548 = vmatpush.msra.mxu2 %v9462_v54 }
 0xf45   : > { %5549 = vmatpush.msra.mxu2 %v9470_v50 }
 0xf47   : > { %5550 = vmatpush.msra.mxu2 %v9478_v49 }
 0xf49   : > { %5551 = vmatpush.msra.mxu2 %v9488_v51 }
 0xf4b   : > { %5684 = vmatpush.msrb.mxu2 %v9595_v18  ;;  %v4902_v18 = vpop.f32.mrf.mxu1 }
 0xf4d   : > { %5685 = vmatpush.msrb.mxu2 %v9598_v12 }
 0xf4f   : > { %5686 = vmatpush.msrb.mxu2 %v9601_v45 }
 0xf51   : > { %5687 = vmatpush.msrb.mxu2 %v9604_v11 }
 0xf52   : > { %v4376_v4 = vpop.permute.xlu1 %4375 }
 0xf53   : > { %5688 = vmatpush.msrb.mxu2 %v9607_v62  ;;  %4378 = vst.msk [vmem:[%s9197_s15 + $0xc] sm:$0xf] %vm3311_vm15, %v4376_v4  ;;  %v5013_v39 = vpop.f32.mrf.mxu1  ;;  %v6580_v4 = vld [vmem:[%s10104_s1 + $0x150] sm:$0xff] }
 0xf55   : > { %5689 = vmatpush.msrb.mxu2 %v9610_v55 }
 0xf57   : > { %5690 = vmatpush.msrb.mxu2 %v9613_v35  ;;  %v5248_v35 = vld [vmem:[%s10106_s3] sm:$0xf] }
 0xf59   : > { %5691 = vmatpush.msrb.mxu2 %v9619_v9 }
 0xf64   : > { %v4698_v53 = vpop.permute.xlu0 %4697 }
 0xf65   : > { %4700 = vst.msk [vmem:[%s9197_s15 + $0x10] sm:$0xf] %vm3311_vm15, %v4698_v53  ;;  %v6579_v53 = vld [vmem:[%s10104_s1 + $0x148] sm:$0xff] }
 0xf8d   : > { %v4925_v12 = vpop.f32.mrf.mxu2 }
 0xf8e   : > { %v4926_v45 = vadd.f32 %v4925_v12, %v4902_v18  ;;  %v6578_v18 = vld [vmem:[%s10104_s1 + $0x140] sm:$0xff]  ;;  %v6587_v12 = vld [vmem:[%s10106_s3 + $0x28] sm:$0xf] }
 0xf90   : > { %v4983_v11 = vadd.f32 %v4980_v5, %v4926_v45 }
 0xf92   : > { %v5016_v33 = vadd.f32 %v5013_v39, %v4983_v11 }
 0xf94   : > { %v5017_v62 = vadd.f32 %v5016_v33, %v9187_v3 }
 0xf95   : > { %v5052_v55 = vpop.f32.mrf.mxu2 }
 0xf96   : > { %6506 = vmatmul.msk.f32.vlgmr.msrb.gmra.mxu1 %vm295_vm0, %v5052_v55  ;;  %5019 = vrot.lane.b32.xlu2 %v5017_v62, %s6729_s7 }
 0xf97   : > { %5386 = vmatpush.msrb.mxu1 %v9623_v13 }
 0xf99   : > { %5387 = vmatpush.msrb.mxu1 %v9626_v30 }
 0xf9b   : > { %5388 = vmatpush.msrb.mxu1 %v9630_v37 }
 0xf9d   : > { %5389 = vmatpush.msrb.mxu1 %v9633_v36  ;;  %v9918_v9 = vpop.f32.mrf.mxu2 }
 0xf9e   : > { %6520 = vmatmul.msk.f32.vlgmr.msra.gmra.mxu1 %vm295_vm0, %v5248_v35 }
 0xf9f   : > { %5390 = vmatpush.msrb.mxu1 %v9636_v48 }
 0xfa1   : > { %5391 = vmatpush.msrb.mxu1 %v9640_v32 }
 0xfa3   : > { %5392 = vmatpush.msrb.mxu1 %v9644_v1 }
 0xfa5   : > { %5393 = vmatpush.msrb.mxu1 %v9653_v22 }
 0xfa6   : > { %6534 = vmatmul.msk.f32.vlgmr.msrb.gmra.mxu1 %vm295_vm0, %v6533_v43 }
 0xfa7   : > { %5521 = vmatpush.msra.mxu1 %v9878_v17 }
 0xfa9   : > { %5522 = vmatpush.msra.mxu1 %v9434_v61  ;;  %v6537_v61 = vld [vmem:[%s10106_s3 + $0x4] sm:$0xf] }
 0xfab   : > { %5523 = vmatpush.msra.mxu1 %v9445_v21  ;;  %v6551_v21 = vld [vmem:[%s10106_s3 + $0x24] sm:$0xf] }
 0xfad   : > { %v5317_v2 = vpop.f32.mrf.mxu2  ;;  %5524 = vmatpush.msra.mxu1 %v9453_v57  ;;  %v6572_v57 = vld [vmem:[%s10104_s1 + $0x1f0] sm:$0xff] }
 0xfae   : > { %6531 = vmatmul.msk.f32.vlgmr.msra.gmra.mxu3 %vm295_vm0, %v5317_v2 }
 0xfaf   : > { %5576 = vmatpush.msra.mxu3 %v9623_v13  ;;  %5525 = vmatpush.msra.mxu1 %v9462_v54  ;;  %v6571_v54 = vld [vmem:[%s10104_s1 + $0x1e8] sm:$0xff] }
 0xfb1   : > { %5577 = vmatpush.msra.mxu3 %v9626_v30  ;;  %5526 = vmatpush.msra.mxu1 %v9470_v50  ;;  %v6570_v50 = vld [vmem:[%s10104_s1 + $0x1e0] sm:$0xff] }
 0xfb3   : > { %5578 = vmatpush.msra.mxu3 %v9630_v37  ;;  %5527 = vmatpush.msra.mxu1 %v9478_v49  ;;  %v6569_v49 = vld [vmem:[%s10104_s1 + $0x1d8] sm:$0xff] }
 0xfb5   : > { %5579 = vmatpush.msra.mxu3 %v9633_v36  ;;  %5528 = vmatpush.msra.mxu1 %v9488_v51  ;;  %v6568_v51 = vld [vmem:[%s10104_s1 + $0x1d0] sm:$0xff] }
 0xfb6   : > { %6538 = vmatmul.msk.f32.vlgmr.msrb.gmra.mxu3 %vm295_vm0, %v6537_v61 }
 0xfb7   : > { %5644 = vmatpush.msrb.mxu1 %v9800_v31  ;;  %5580 = vmatpush.msra.mxu3 %v9636_v48  ;;  %v6567_v31 = vld [vmem:[%s10104_s1 + $0x1c8] sm:$0xff] }
 0xfb9   : > { %5645 = vmatpush.msrb.mxu1 %v9803_v20  ;;  %5581 = vmatpush.msra.mxu3 %v9640_v32  ;;  %v6566_v20 = vld [vmem:[%s10104_s1 + $0x1c0] sm:$0xff] }
 0xfbb   : > { %5646 = vmatpush.msrb.mxu1 %v9806_v25  ;;  %5582 = vmatpush.msra.mxu3 %v9644_v1 }
 0xfbd   : > { %5647 = vmatpush.msrb.mxu1 %v9809_v34  ;;  %5583 = vmatpush.msra.mxu3 %v9653_v22  ;;  %v5123_v34 = vpop.f32.mrf.mxu0  ;;  %v5428_v38 = vpop.f32.mrf.mxu2 }
 0xfbe   : > { %6552 = vmatmul.msk.f32.vlgmr.msra.gmra.mxu3 %vm295_vm0, %v6551_v21 }
 0xfbf   : > { %5715 = vmatpush.msrb.mxu3 %v9878_v17  ;;  %5648 = vmatpush.msrb.mxu1 %v9812_v19  ;;  %v6581_v17 = vld [vmem:[%s10104_s1 + $0x158] sm:$0xff] }
 0xfc1   : > { %5716 = vmatpush.msrb.mxu3 %v6572_v57  ;;  %5649 = vmatpush.msrb.mxu1 %v9815_v59 }
 0xfc3   : > { %5717 = vmatpush.msrb.mxu3 %v6571_v54  ;;  %5650 = vmatpush.msrb.mxu1 %v9818_v16 }
 0xfc5   : > { %5718 = vmatpush.msrb.mxu3 %v6570_v50  ;;  %5651 = vmatpush.msrb.mxu1 %v9822_v15  ;;  %v6553_v15 = vld [vmem:[%s10106_s3 + $0x2c] sm:$0xf] }
 0xfc7   : > { %5719 = vmatpush.msrb.mxu3 %v6569_v49 }
 0xfc9   : > { %5720 = vmatpush.msrb.mxu3 %v6568_v51 }
 0xfcb   : > { %5721 = vmatpush.msrb.mxu3 %v6567_v31 }
 0xfcd   : > { %5722 = vmatpush.msrb.mxu3 %v6566_v20 }
 0xfcf   : > { %5834 = vmatpush.msra.mxu3 %v9623_v13 }
 0xfd1   : > { %5835 = vmatpush.msra.mxu3 %v9626_v30  ;;  %v5242_v30 = vpop.f32.mrf.mxu0 }
 0xfd3   : > { %5836 = vmatpush.msra.mxu3 %v9630_v37 }
 0xfd5   : > { %5837 = vmatpush.msra.mxu3 %v9633_v36 }
 0xfd7   : > { %5838 = vmatpush.msra.mxu3 %v9636_v48  ;;  %v6547_v48 = vld [vmem:[%s10106_s3 + $0xc] sm:$0xf] }
 0xfd9   : > { %5839 = vmatpush.msra.mxu3 %v9640_v32 }
 0xfdb   : > { %5840 = vmatpush.msra.mxu3 %v9644_v1 }
 0xfdd   : > { %5841 = vmatpush.msra.mxu3 %v9653_v22  ;;  %v6564_v22 = vld [vmem:[%s10106_s3 + $0x8] sm:$0xf] }
 0xff0   : > { %v5020_v25 = vpop.permute.xlu2 %5019 }
 0xff1   : > { %5022 = vst.msk [vmem:[%s9197_s15 + $0x14] sm:$0xf] %vm3311_vm15, %v5020_v25 }
0x1013   : > { %v5146_v13 = vpop.f32.mrf.mxu1 }
0x1014   : > { %v5147_v19 = vadd.f32 %v5146_v13, %v5123_v34 }
0x1016   : > { %v5181_v37 = vadd.f32 %v9918_v9, %v5147_v19 }
0x1018   : > { %v5245_v59 = vadd.f32 %v5242_v30, %v5181_v37 }
0x101a   : > { %v5246_v36 = vadd.f32 %v5245_v59, %v9187_v3 }
0x101b   : > { %v5277_v16 = vpop.f32.mrf.mxu1 }
0x101c   : > { %5247 = vst.msk [vmem:[%s9197_s15 + $0x18] sm:$0xf] %vm3116_vm14, %v5246_v36  ;;  %6532 = vmatmul.msk.f32.vlgmr.msrb.gmra.mxu0 %vm295_vm0, %v5277_v16 }
0x101d   : > { %5609 = vmatpush.msrb.mxu0 %v9678_v24 }
0x101f   : > { %5610 = vmatpush.msrb.mxu0 %v9682_v10 }
0x1021   : > { %5611 = vmatpush.msrb.mxu0 %v9686_v52 }
0x1023   : > { %5612 = vmatpush.msrb.mxu0 %v9693_v0  ;;  %v5395_v41 = vpop.f32.mrf.mxu1 }
0x1024   : > { %6548 = vmatmul.msk.f32.vlgmr.msra.gmra.mxu0 %vm295_vm0, %v6547_v48 }
0x1025   : > { %5613 = vmatpush.msrb.mxu0 %v9696_v60 }
0x1027   : > { %5614 = vmatpush.msrb.mxu0 %v9700_v47 }
0x1029   : > { %5615 = vmatpush.msrb.mxu0 %v9703_v29 }
0x102b   : > { %5616 = vmatpush.msrb.mxu0 %v9706_v63 }
0x102c   : > { %6554 = vmatmul.msk.f32.vlgmr.msrb.gmra.mxu0 %vm295_vm0, %v6553_v15 }
0x1031   : > { %v5340_v32 = vpop.f32.mrf.mxu3 }
0x1039   : > { %v5467_v1 = vpop.f32.mrf.mxu3 }
0x103a   : > { %6550 = vmatmul.msk.f32.vlgmr.msra.gmra.mxu2 %vm295_vm0, %v5467_v1 }
0x1041   : > { %v5585_v39 = vpop.f32.mrf.mxu3 }
0x1042   : > { %6565 = vmatmul.msk.f32.vlgmr.msrb.gmra.mxu2 %vm295_vm0, %v6564_v22 }
0x1099   : > { %v5363_v44 = vpop.f32.mrf.mxu0 }
0x109a   : > { %v5364_v7 = vadd.f32 %v5363_v44, %v5340_v32 }
0x109c   : > { %v5398_v6 = vadd.f32 %v5395_v41, %v5364_v7 }
0x109e   : > { %v5431_v56 = vadd.f32 %v5428_v38, %v5398_v6 }
0x10a0   : > { %v5432_v28 = vadd.f32 %v5431_v56, %v9187_v3 }
0x10a1   : > { %v5507_v26 = vpop.f32.mrf.mxu0 }
0x10a2   : > { %6549 = vmatmul.msk.f32.vlgmr.msra.gmra.mxu1 %vm295_vm0, %v5507_v26  ;;  %5434 = vrot.lane.b32.xlu1 %v5432_v28, %s6729_s7 }
0x10a3   : > { %5770 = vmatpush.msra.mxu1 %v9678_v24  ;;  %v6576_v24 = vld [vmem:[%s10106_s3 + $0x20] sm:$0xf] }
0x10a5   : > { %5771 = vmatpush.msra.mxu1 %v9682_v10  ;;  %v6563_v10 = vld [vmem:[%s10104_s1 + $0x238] sm:$0xff] }
0x10a6   : > { %5738 = vmatpush.msra.mxu0 %v6563_v10 }
0x10a7   : > { %5772 = vmatpush.msra.mxu1 %v9686_v52  ;;  %v6562_v52 = vld [vmem:[%s10104_s1 + $0x230] sm:$0xff] }
0x10a8   : > { %5739 = vmatpush.msra.mxu0 %v6562_v52 }
0x10a9   : > { %5773 = vmatpush.msra.mxu1 %v9693_v0  ;;  %v5618_v33 = vpop.f32.mrf.mxu0 }
0x10aa   : > { %6555 = vmatmul.msk.f32.vlgmr.msrb.gmra.mxu1 %vm295_vm0, %v5624_v27 }
0x10ab   : > { %5774 = vmatpush.msra.mxu1 %v9696_v60  ;;  %v6561_v60 = vld [vmem:[%s10104_s1 + $0x228] sm:$0xff] }
0x10ac   : > { %5740 = vmatpush.msra.mxu0 %v6561_v60 }
0x10ad   : > { %5775 = vmatpush.msra.mxu1 %v9700_v47  ;;  %v6585_v47 = vld [vmem:[%s10104_s1 + $0x178] sm:$0xff] }
0x10ae   : > { %5801 = vmatpush.msra.mxu2 %v6585_v47 }
0x10af   : > { %5776 = vmatpush.msra.mxu1 %v9703_v29  ;;  %v6560_v29 = vld [vmem:[%s10104_s1 + $0x220] sm:$0xff] }
0x10b0   : > { %5741 = vmatpush.msra.mxu0 %v6560_v29 }
0x10b1   : > { %5777 = vmatpush.msra.mxu1 %v9706_v63  ;;  %v6584_v63 = vld [vmem:[%s10104_s1 + $0x170] sm:$0xff] }
0x10b2   : > { %6577 = vmatmul.msk.f32.vlgmr.msra.gmra.mxu1 %vm295_vm0, %v6576_v24  ;;  %5802 = vmatpush.msra.mxu2 %v6584_v63 }
0x10b3   : > { %5742 = vmatpush.msra.mxu0 %v6559_v58 }
0x10b4   : > { %5803 = vmatpush.msra.mxu2 %v6583_v40 }
0x10b5   : > { %5743 = vmatpush.msra.mxu0 %v6558_v46 }
0x10b6   : > { %5804 = vmatpush.msra.mxu2 %v6582_v8 }
0x10b7   : > { %5744 = vmatpush.msra.mxu0 %v6557_v14 }
0x10b8   : > { %5805 = vmatpush.msra.mxu2 %v6581_v17 }
0x10b9   : > { %5745 = vmatpush.msra.mxu0 %v6556_v23 }
0x10ba   : > { %5806 = vmatpush.msra.mxu2 %v6580_v4 }
0x10bc   : > { %5807 = vmatpush.msra.mxu2 %v6579_v53 }
0x10bd   : > { %v5553_v0 = vpop.f32.mrf.mxu2 }
0x10be   : > { %5808 = vmatpush.msra.mxu2 %v6578_v18 }
0x10c5   : > { %v5693_v42 = vpop.f32.mrf.mxu2 }
0x10c6   : > { %6574 = vmatmul.msk.f32.vlgmr.msrb.gmra.mxu3 %vm295_vm0, %v5693_v42 }
0x10ce   : > { %6588 = vmatmul.msk.f32.vlgmr.msra.gmra.mxu3 %vm295_vm0, %v6587_v12 }
0x1114   : > { %v5435_v5 = vpop.permute.xlu1 %5434 }
0x1115   : > { %5437 = vst.msk [vmem:[%s9197_s15 + $0x18] sm:$0xf] %vm3311_vm15, %v5435_v5 }
0x111f   : > { %v5530_v45 = vpop.f32.mrf.mxu1 }
0x1120   : > { %v5554_v11 = vadd.f32 %v5553_v0, %v5530_v45 }
0x1122   : > { %v5588_v62 = vadd.f32 %v5585_v39, %v5554_v11 }
0x1124   : > { %v5621_v55 = vadd.f32 %v5618_v33, %v5588_v62 }
0x1126   : > { %v5622_v35 = vadd.f32 %v5621_v55, %v9187_v3 }
0x1127   : > { %v5653_v9 = vpop.f32.mrf.mxu1 }
0x1128   : > { %5623 = vst.msk [vmem:[%s9197_s15 + $0x1c] sm:$0xf] %vm3116_vm14, %v5622_v35  ;;  %6575 = vmatmul.msk.f32.vlgmr.msra.gmra.mxu0 %vm295_vm0, %v5653_v9 }
0x112f   : > { %v5779_v43 = vpop.f32.mrf.mxu1 }
0x1130   : > { %6586 = vmatmul.msk.f32.vlgmr.msra.gmra.mxu2 %vm295_vm0, %v5779_v43 }
0x1149   : > { %v5724_v2 = vpop.f32.mrf.mxu3 }
0x1151   : > { %v5843_v54 = vpop.f32.mrf.mxu3 }
0x11a5   : > { %v5747_v61 = vpop.f32.mrf.mxu0 }
0x11a6   : > { %v5748_v21 = vadd.f32 %v5747_v61, %v5724_v2 }
0x11b3   : > { %v5810_v57 = vpop.f32.mrf.mxu2 }
0x11b4   : > { %v5813_v50 = vadd.f32 %v5810_v57, %v5748_v21 }
0x11b6   : > { %v5846_v49 = vadd.f32 %v5843_v54, %v5813_v50 }
0x11b8   : > { %v5847_v51 = vadd.f32 %v5846_v49, %v9187_v3 }
0x11ba   : > { %5849 = vrot.lane.b32.xlu0 %v5847_v51, %s6729_s7 }
0x122c   : > { %v5850_v31 = vpop.permute.xlu0 %5849 }
0x122d   : > { %5852 = vst.msk [vmem:[%s9197_s15 + $0x1c] sm:$0xf] %vm3311_vm15, %v5850_v31 }
0x122e PF: > { %s16_s21 = sadd.s32 1, %s6722_s21  }
0x122f   : > { %p13_p4 = scmp.ge.s32.totalorder %s16_s21, 6  }
0x1231   :  { %15 = sbr.rel (!%p13_p4) target bundleno = 1 (0x1), region = 114 }

</bundles_post_ra>
